<compile_context>
chip_gen: v7x
topology: tpu7x:2x2x1
jax: 0.10.0
libtpu: 0.0.40
codegen_flags: <defaults>
</compile_context>

<pallas_src>
import functools
import math

import jax
import jax.numpy as jnp
from jax.experimental import pallas as pl
from jax.experimental.pallas import tpu as pltpu

BN_EPS = 1e-5
CP = 128        # lane-dense padded channel count (last dim -> 128 lanes)
KSIZE = 3
WPAD_L = 8      # left W halo in the y1 scratch -> centre store is (8,128)-tile aligned


# ----------------------------- Pallas kernel -----------------------------

def _bn_silu(y, gamma, beta, inv_m):
    """Training-mode BatchNorm (batch stats, biased var, single pass) + SiLU, in f32."""
    mean = jnp.sum(y, axis=0, keepdims=True) * inv_m
    mean_sq = jnp.sum(y * y, axis=0, keepdims=True) * inv_m
    var = mean_sq - mean * mean
    yn = (y - mean) * jax.lax.rsqrt(var + BN_EPS) * gamma + beta
    return yn * jax.nn.sigmoid(yn)          # SiLU; sigmoid -> EUP slot


def _bottleneck_kernel(x_ref, w1_ref, g1_ref, b1_ref, w2_ref, g2_ref, b2_ref,
                       out_ref, y1p_ref, *, add):
    # x_ref:   (N, H+2, W+2, CP)  f32, spatially halo-padded, channel-padded NHWC
    # w*_ref:  (9, CP, CP)        bf16, per-tap (kh*3+kw) fused AdaLoRA conv weights
    # g*/b*:   (1, CP)            f32, BN gamma/beta (padding lanes: gamma=1, beta=0)
    # out_ref: (N, H, W, CP)      f32, lane-dense
    # y1p_ref: (N, H+2, W+2*WPAD_L, CP) f32 VMEM scratch for the intermediate activation
    n, hp, wp, cp = x_ref.shape
    h, w = hp - 2, wp - 2
    m = n * h * w
    inv_m = 1.0 / m                          # static Python float (trace-time constant)

    def conv9(load_tap, w_ref):
        # implicit im2col: accumulate the 9 shifted (M, CP) @ (CP, CP) MXU matmuls
        acc = jnp.zeros((m, cp), jnp.float32)
        for t in range(KSIZE * KSIZE):       # static unroll: 9 independent MXU pushes
            kh, kw = t // KSIZE, t % KSIZE
            acc = acc + jnp.dot(load_tap(kh, kw), w_ref[t],
                                preferred_element_type=jnp.float32)
        return acc

    # ---- cv1 ----
    def x_tap(kh, kw):
        blk = x_ref[:, kh:kh + h, kw:kw + w, :]
        # f32 -> bf16 cast is VPU filler under the MXU-bound loop (free slot)
        return blk.reshape(m, cp).astype(jnp.bfloat16)

    y1 = _bn_silu(conv9(x_tap, w1_ref), g1_ref[...], b1_ref[...], inv_m)

    # stash y1 (with a zero spatial halo) in VMEM; never touches HBM.
    # Centre store starts at W offset WPAD_L=8 -> (8,128)-tile aligned, unmasked.
    y1p_ref[...] = jnp.zeros_like(y1p_ref)
    y1p_ref[:, 1:1 + h, WPAD_L:WPAD_L + w, :] = y1.reshape(n, h, w, cp)

    # ---- cv2 ----
    def y_tap(kh, kw):
        w0 = WPAD_L - 1 + kw
        blk = y1p_ref[:, kh:kh + h, w0:w0 + w, :]
        return blk.reshape(m, cp).astype(jnp.bfloat16)

    y2 = _bn_silu(conv9(y_tap, w2_ref), g2_ref[...], b2_ref[...], inv_m)

    if add:  # fused bottleneck shortcut (exact f32 residual, static branch)
        y2 = y2 + x_ref[:, 1:1 + h, 1:1 + w, :].reshape(m, cp)

    out_ref[...] = y2.reshape(n, h, w, cp)   # lane-dense (128) unmasked store


# ----------------------------- host-side glue -----------------------------

def adalora_effective_weight(weight, lora_A, lora_B, lora_E, scaling):
    """weight (OIHW) + scaling * (B @ (A*E)).view(weight.shape)   (groups=1)."""
    delta = (lora_B @ (lora_A * lora_E)).reshape(weight.shape) * scaling
    return weight + delta


def _pack_conv_weight(weight_oihw, cin, cout):
    """OIHW -> (9, CP, CP) bf16 per-tap matrices, tap index = kh*3 + kw."""
    wt = jnp.transpose(weight_oihw, (2, 3, 1, 0)).reshape(KSIZE * KSIZE, cin, cout)
    wt = jnp.pad(wt, ((0, 0), (0, CP - cin), (0, CP - cout)))
    return wt.astype(jnp.bfloat16)


def _pad_bn(v, c, pad_value):
    return jnp.pad(v, ((0, 0), (0, CP - c)), constant_values=pad_value).astype(jnp.float32)


@functools.partial(jax.jit, static_argnames=("k", "shortcut"))
def bottleneck_adalora_forward(x_nchw, p1, p2, k=(3, 3), shortcut=True):
    """x + cv2(cv1(x)) if (shortcut and c1 == c2) else cv2(cv1(x)).  NCHW in/out."""
    assert k == (3, 3), "kernel specialised for k=(3,3)"
    n, c1, h, w = x_nchw.shape

    w1 = adalora_effective_weight(p1["weight"], p1["lora_A"], p1["lora_B"],
                                  p1["lora_E"], p1["scaling"])
    w2 = adalora_effective_weight(p2["weight"], p2["lora_A"], p2["lora_B"],
                                  p2["lora_E"], p2["scaling"])
    c_ = w1.shape[0]
    c2 = w2.shape[0]
    add = bool(shortcut and (c1 == c2))

    # single NCHW->NHWC transpose + halo/channel pad (everything else stays NHWC)
    x_nhwc = jnp.transpose(x_nchw, (0, 2, 3, 1)).astype(jnp.float32)
    x_pad = jnp.pad(x_nhwc, ((0, 0), (1, 1), (1, 1), (0, CP - c1)))

    args = (
        x_pad,
        _pack_conv_weight(w1, c1, c_),
        _pad_bn(p1["bn_gamma"], c_, 1.0), _pad_bn(p1["bn_beta"], c_, 0.0),
        _pack_conv_weight(w2, c_, c2),
        _pad_bn(p2["bn_gamma"], c2, 1.0), _pad_bn(p2["bn_beta"], c2, 0.0),
    )

    vmem = pl.BlockSpec(memory_space=pltpu.MemorySpace.VMEM)
    out_nhwc = pl.pallas_call(
        functools.partial(_bottleneck_kernel, add=add),
        out_shape=jax.ShapeDtypeStruct((n, h, w, CP), jnp.float32),
        in_specs=[vmem] * len(args),
        out_specs=vmem,
        scratch_shapes=[pltpu.VMEM((n, h + 2, w + 2 * WPAD_L, CP), jnp.float32)],
        compiler_params=pltpu.CompilerParams(vmem_limit_bytes=32 * 1024 * 1024),
    )(*args)

    # drop channel padding, single NHWC->NCHW transpose back to the PyTorch layout
    return jnp.transpose(out_nhwc[..., :c2], (0, 3, 1, 2))


# ----------------------------- params & reference -----------------------------

def init_conv_adalora_params(key, c_in, c_out, k, r, lora_alpha):
    """Deterministic synthetic params for one Conv_adalora (+ its BatchNorm2d)."""
    k1, k2, k3, k4, k5, k6 = jax.random.split(key, 6)
    bound = 1.0 / math.sqrt(c_in * k * k)
    return {
        "weight": jax.random.uniform(k1, (c_out, c_in, k, k), jnp.float32, -bound, bound),
        "lora_A": 0.1 * jax.random.normal(k2, (r, c_in * k), jnp.float32),
        "lora_B": 0.1 * jax.random.normal(k3, (c_out * k, r), jnp.float32),
        # PyTorch init zeros lora_E (delta would vanish); use nonzero values so the
        # AdaLoRA path is actually exercised numerically.
        "lora_E": 0.1 * jax.random.normal(k4, (r, 1), jnp.float32),
        "scaling": float(lora_alpha) / float(r),
        "bn_gamma": (1.0 + 0.1 * jax.random.normal(k5, (1, c_out), jnp.float32)),
        "bn_beta": 0.1 * jax.random.normal(k6, (1, c_out), jnp.float32),
    }


def _reference_forward(x, p1, p2, shortcut=True):
    """Pure-JAX (f32, NCHW) reference of the module's forward (training-mode BN)."""
    def conv_bn_silu_ref(xx, p):
        wt = adalora_effective_weight(p["weight"], p["lora_A"], p["lora_B"],
                                      p["lora_E"], p["scaling"])
        y = jax.lax.conv_general_dilated(
            xx, wt, (1, 1), "SAME",
            dimension_numbers=("NCHW", "OIHW", "NCHW"),
            precision=jax.lax.Precision.HIGHEST)
        mean = jnp.mean(y, axis=(0, 2, 3), keepdims=True)
        var = jnp.mean((y - mean) ** 2, axis=(0, 2, 3), keepdims=True)
        g = p["bn_gamma"].reshape(1, -1, 1, 1)
        b = p["bn_beta"].reshape(1, -1, 1, 1)
        yn = (y - mean) * jax.lax.rsqrt(var + BN_EPS) * g + b
        return yn * jax.nn.sigmoid(yn)

    y = conv_bn_silu_ref(conv_bn_silu_ref(x, p1), p2)
    return x + y if (shortcut and x.shape[1] == y.shape[1]) else y


# ---------------------------------- main ----------------------------------

if __name__ == "__main__":
    key = jax.random.PRNGKey(0)
    kx, kp1, kp2 = jax.random.split(key, 3)

    # Bottleneck_adalora(c1=4, c2=4, shortcut=True, g=1, k=(3,3), e=0.5, r=2, lora_alpha=4)
    c1, c2, e, r, lora_alpha = 4, 4, 0.5, 2, 4
    c_ = int(c2 * e)
    N, H, W = 2, 16, 16

    x = jax.random.normal(kx, (N, c1, H, W), jnp.float32)
    p1 = init_conv_adalora_params(kp1, c1, c_, 3, r, lora_alpha)
    p2 = init_conv_adalora_params(kp2, c_, c2, 3, r, lora_alpha)

    out = bottleneck_adalora_forward(x, p1, p2, k=(3, 3), shortcut=True)
    jax.block_until_ready(out)
    assert out.shape == (N, c2, H, W)

    # loose tolerance: kernel uses bf16 MXU inputs (f32 accumulation / BN / SiLU)
    ref = _reference_forward(x, p1, p2, shortcut=True)
    max_err = float(jnp.max(jnp.abs(out - ref)))
    assert max_err < 5e-2, f"mismatch vs f32 reference: max abs err {max_err}"

    print("KERNEL_OK")
</pallas_src>

<mosaic_0001>
module attributes {stable_mosaic.version = 11 : i64} {
  func.func @_bottleneck_kernel(%arg0: memref<2x18x18x128xf32, #tpu.memory_space<vmem>>, %arg1: memref<9x128x128xbf16, #tpu.memory_space<vmem>>, %arg2: memref<1x128xf32, #tpu.memory_space<vmem>>, %arg3: memref<1x128xf32, #tpu.memory_space<vmem>>, %arg4: memref<9x128x128xbf16, #tpu.memory_space<vmem>>, %arg5: memref<1x128xf32, #tpu.memory_space<vmem>>, %arg6: memref<1x128xf32, #tpu.memory_space<vmem>>, %arg7: memref<2x16x16x128xf32, #tpu.memory_space<vmem>>, %arg8: memref<2x18x32x128xf32, #tpu.memory_space<vmem>>) attributes {dimension_semantics = [], scalar_prefetch = 0 : i64, scratch_operands = 1 : i64, tpu.core_type = #tpu.core_type<tc>} {
    %cst = arith.constant 0.000000e+00 : f32
    %0 = vector.broadcast %cst : f32 to vector<512x128xf32>
    %c0 = arith.constant 0 : index
    %c0_0 = arith.constant 0 : index
    %c0_1 = arith.constant 0 : index
    %c0_2 = arith.constant 0 : index
    %1 = vector.load %arg0[%c0, %c0_0, %c0_1, %c0_2] : memref<2x18x18x128xf32, #tpu.memory_space<vmem>>, vector<2x16x16x128xf32>
    %2 = vector.shape_cast %1 : vector<2x16x16x128xf32> to vector<512x128xf32>
    %3 = arith.truncf %2 : vector<512x128xf32> to vector<512x128xbf16>
    %c0_3 = arith.constant 0 : index
    %c0_4 = arith.constant 0 : index
    %c0_5 = arith.constant 0 : index
    %4 = vector.load %arg1[%c0_3, %c0_4, %c0_5] : memref<9x128x128xbf16, #tpu.memory_space<vmem>>, vector<1x128x128xbf16>
    %5 = vector.shape_cast %4 : vector<1x128x128xbf16> to vector<128x128xbf16>
    %cst_6 = arith.constant dense<0.000000e+00> : vector<512x128xf32>
    %6 = tpu.matmul %3, %5, %cst_6 {dimension_numbers = #tpu.dot_dimension_numbers<[1], [0], [0], [1], [0, 0, 1, 1], [], []>} : vector<512x128xbf16>, vector<128x128xbf16>, vector<512x128xf32> -> vector<512x128xf32>
    %7 = arith.addf %0, %6 : vector<512x128xf32>
    %c0_7 = arith.constant 0 : index
    %c0_8 = arith.constant 0 : index
    %c1 = arith.constant 1 : index
    %c0_9 = arith.constant 0 : index
    %8 = vector.load %arg0[%c0_7, %c0_8, %c1, %c0_9] : memref<2x18x18x128xf32, #tpu.memory_space<vmem>>, vector<2x16x16x128xf32>
    %9 = vector.shape_cast %8 : vector<2x16x16x128xf32> to vector<512x128xf32>
    %10 = arith.truncf %9 : vector<512x128xf32> to vector<512x128xbf16>
    %c1_10 = arith.constant 1 : index
    %c0_11 = arith.constant 0 : index
    %c0_12 = arith.constant 0 : index
    %11 = vector.load %arg1[%c1_10, %c0_11, %c0_12] : memref<9x128x128xbf16, #tpu.memory_space<vmem>>, vector<1x128x128xbf16>
    %12 = vector.shape_cast %11 : vector<1x128x128xbf16> to vector<128x128xbf16>
    %cst_13 = arith.constant dense<0.000000e+00> : vector<512x128xf32>
    %13 = tpu.matmul %10, %12, %cst_13 {dimension_numbers = #tpu.dot_dimension_numbers<[1], [0], [0], [1], [0, 0, 1, 1], [], []>} : vector<512x128xbf16>, vector<128x128xbf16>, vector<512x128xf32> -> vector<512x128xf32>
    %14 = arith.addf %7, %13 : vector<512x128xf32>
    %c0_14 = arith.constant 0 : index
    %c0_15 = arith.constant 0 : index
    %c2 = arith.constant 2 : index
    %c0_16 = arith.constant 0 : index
    %15 = vector.load %arg0[%c0_14, %c0_15, %c2, %c0_16] : memref<2x18x18x128xf32, #tpu.memory_space<vmem>>, vector<2x16x16x128xf32>
    %16 = vector.shape_cast %15 : vector<2x16x16x128xf32> to vector<512x128xf32>
    %17 = arith.truncf %16 : vector<512x128xf32> to vector<512x128xbf16>
    %c2_17 = arith.constant 2 : index
    %c0_18 = arith.constant 0 : index
    %c0_19 = arith.constant 0 : index
    %18 = vector.load %arg1[%c2_17, %c0_18, %c0_19] : memref<9x128x128xbf16, #tpu.memory_space<vmem>>, vector<1x128x128xbf16>
    %19 = vector.shape_cast %18 : vector<1x128x128xbf16> to vector<128x128xbf16>
    %cst_20 = arith.constant dense<0.000000e+00> : vector<512x128xf32>
    %20 = tpu.matmul %17, %19, %cst_20 {dimension_numbers = #tpu.dot_dimension_numbers<[1], [0], [0], [1], [0, 0, 1, 1], [], []>} : vector<512x128xbf16>, vector<128x128xbf16>, vector<512x128xf32> -> vector<512x128xf32>
    %21 = arith.addf %14, %20 : vector<512x128xf32>
    %c0_21 = arith.constant 0 : index
    %c1_22 = arith.constant 1 : index
    %c0_23 = arith.constant 0 : index
    %c0_24 = arith.constant 0 : index
    %22 = vector.load %arg0[%c0_21, %c1_22, %c0_23, %c0_24] : memref<2x18x18x128xf32, #tpu.memory_space<vmem>>, vector<2x16x16x128xf32>
    %23 = vector.shape_cast %22 : vector<2x16x16x128xf32> to vector<512x128xf32>
    %24 = arith.truncf %23 : vector<512x128xf32> to vector<512x128xbf16>
    %c3 = arith.constant 3 : index
    %c0_25 = arith.constant 0 : index
    %c0_26 = arith.constant 0 : index
    %25 = vector.load %arg1[%c3, %c0_25, %c0_26] : memref<9x128x128xbf16, #tpu.memory_space<vmem>>, vector<1x128x128xbf16>
    %26 = vector.shape_cast %25 : vector<1x128x128xbf16> to vector<128x128xbf16>
    %cst_27 = arith.constant dense<0.000000e+00> : vector<512x128xf32>
    %27 = tpu.matmul %24, %26, %cst_27 {dimension_numbers = #tpu.dot_dimension_numbers<[1], [0], [0], [1], [0, 0, 1, 1], [], []>} : vector<512x128xbf16>, vector<128x128xbf16>, vector<512x128xf32> -> vector<512x128xf32>
    %28 = arith.addf %21, %27 : vector<512x128xf32>
    %c0_28 = arith.constant 0 : index
    %c1_29 = arith.constant 1 : index
    %c1_30 = arith.constant 1 : index
    %c0_31 = arith.constant 0 : index
    %29 = vector.load %arg0[%c0_28, %c1_29, %c1_30, %c0_31] : memref<2x18x18x128xf32, #tpu.memory_space<vmem>>, vector<2x16x16x128xf32>
    %30 = vector.shape_cast %29 : vector<2x16x16x128xf32> to vector<512x128xf32>
    %31 = arith.truncf %30 : vector<512x128xf32> to vector<512x128xbf16>
    %c4 = arith.constant 4 : index
    %c0_32 = arith.constant 0 : index
    %c0_33 = arith.constant 0 : index
    %32 = vector.load %arg1[%c4, %c0_32, %c0_33] : memref<9x128x128xbf16, #tpu.memory_space<vmem>>, vector<1x128x128xbf16>
    %33 = vector.shape_cast %32 : vector<1x128x128xbf16> to vector<128x128xbf16>
    %cst_34 = arith.constant dense<0.000000e+00> : vector<512x128xf32>
    %34 = tpu.matmul %31, %33, %cst_34 {dimension_numbers = #tpu.dot_dimension_numbers<[1], [0], [0], [1], [0, 0, 1, 1], [], []>} : vector<512x128xbf16>, vector<128x128xbf16>, vector<512x128xf32> -> vector<512x128xf32>
    %35 = arith.addf %28, %34 : vector<512x128xf32>
    %c0_35 = arith.constant 0 : index
    %c1_36 = arith.constant 1 : index
    %c2_37 = arith.constant 2 : index
    %c0_38 = arith.constant 0 : index
    %36 = vector.load %arg0[%c0_35, %c1_36, %c2_37, %c0_38] : memref<2x18x18x128xf32, #tpu.memory_space<vmem>>, vector<2x16x16x128xf32>
    %37 = vector.shape_cast %36 : vector<2x16x16x128xf32> to vector<512x128xf32>
    %38 = arith.truncf %37 : vector<512x128xf32> to vector<512x128xbf16>
    %c5 = arith.constant 5 : index
    %c0_39 = arith.constant 0 : index
    %c0_40 = arith.constant 0 : index
    %39 = vector.load %arg1[%c5, %c0_39, %c0_40] : memref<9x128x128xbf16, #tpu.memory_space<vmem>>, vector<1x128x128xbf16>
    %40 = vector.shape_cast %39 : vector<1x128x128xbf16> to vector<128x128xbf16>
    %cst_41 = arith.constant dense<0.000000e+00> : vector<512x128xf32>
    %41 = tpu.matmul %38, %40, %cst_41 {dimension_numbers = #tpu.dot_dimension_numbers<[1], [0], [0], [1], [0, 0, 1, 1], [], []>} : vector<512x128xbf16>, vector<128x128xbf16>, vector<512x128xf32> -> vector<512x128xf32>
    %42 = arith.addf %35, %41 : vector<512x128xf32>
    %c0_42 = arith.constant 0 : index
    %c2_43 = arith.constant 2 : index
    %c0_44 = arith.constant 0 : index
    %c0_45 = arith.constant 0 : index
    %43 = vector.load %arg0[%c0_42, %c2_43, %c0_44, %c0_45] : memref<2x18x18x128xf32, #tpu.memory_space<vmem>>, vector<2x16x16x128xf32>
    %44 = vector.shape_cast %43 : vector<2x16x16x128xf32> to vector<512x128xf32>
    %45 = arith.truncf %44 : vector<512x128xf32> to vector<512x128xbf16>
    %c6 = arith.constant 6 : index
    %c0_46 = arith.constant 0 : index
    %c0_47 = arith.constant 0 : index
    %46 = vector.load %arg1[%c6, %c0_46, %c0_47] : memref<9x128x128xbf16, #tpu.memory_space<vmem>>, vector<1x128x128xbf16>
    %47 = vector.shape_cast %46 : vector<1x128x128xbf16> to vector<128x128xbf16>
    %cst_48 = arith.constant dense<0.000000e+00> : vector<512x128xf32>
    %48 = tpu.matmul %45, %47, %cst_48 {dimension_numbers = #tpu.dot_dimension_numbers<[1], [0], [0], [1], [0, 0, 1, 1], [], []>} : vector<512x128xbf16>, vector<128x128xbf16>, vector<512x128xf32> -> vector<512x128xf32>
    %49 = arith.addf %42, %48 : vector<512x128xf32>
    %c0_49 = arith.constant 0 : index
    %c2_50 = arith.constant 2 : index
    %c1_51 = arith.constant 1 : index
    %c0_52 = arith.constant 0 : index
    %50 = vector.load %arg0[%c0_49, %c2_50, %c1_51, %c0_52] : memref<2x18x18x128xf32, #tpu.memory_space<vmem>>, vector<2x16x16x128xf32>
    %51 = vector.shape_cast %50 : vector<2x16x16x128xf32> to vector<512x128xf32>
    %52 = arith.truncf %51 : vector<512x128xf32> to vector<512x128xbf16>
    %c7 = arith.constant 7 : index
    %c0_53 = arith.constant 0 : index
    %c0_54 = arith.constant 0 : index
    %53 = vector.load %arg1[%c7, %c0_53, %c0_54] : memref<9x128x128xbf16, #tpu.memory_space<vmem>>, vector<1x128x128xbf16>
    %54 = vector.shape_cast %53 : vector<1x128x128xbf16> to vector<128x128xbf16>
    %cst_55 = arith.constant dense<0.000000e+00> : vector<512x128xf32>
    %55 = tpu.matmul %52, %54, %cst_55 {dimension_numbers = #tpu.dot_dimension_numbers<[1], [0], [0], [1], [0, 0, 1, 1], [], []>} : vector<512x128xbf16>, vector<128x128xbf16>, vector<512x128xf32> -> vector<512x128xf32>
    %56 = arith.addf %49, %55 : vector<512x128xf32>
    %c0_56 = arith.constant 0 : index
    %c2_57 = arith.constant 2 : index
    %c2_58 = arith.constant 2 : index
    %c0_59 = arith.constant 0 : index
    %57 = vector.load %arg0[%c0_56, %c2_57, %c2_58, %c0_59] : memref<2x18x18x128xf32, #tpu.memory_space<vmem>>, vector<2x16x16x128xf32>
    %58 = vector.shape_cast %57 : vector<2x16x16x128xf32> to vector<512x128xf32>
    %59 = arith.truncf %58 : vector<512x128xf32> to vector<512x128xbf16>
    %c8 = arith.constant 8 : index
    %c0_60 = arith.constant 0 : index
    %c0_61 = arith.constant 0 : index
    %60 = vector.load %arg1[%c8, %c0_60, %c0_61] : memref<9x128x128xbf16, #tpu.memory_space<vmem>>, vector<1x128x128xbf16>
    %61 = vector.shape_cast %60 : vector<1x128x128xbf16> to vector<128x128xbf16>
    %cst_62 = arith.constant dense<0.000000e+00> : vector<512x128xf32>
    %62 = tpu.matmul %59, %61, %cst_62 {dimension_numbers = #tpu.dot_dimension_numbers<[1], [0], [0], [1], [0, 0, 1, 1], [], []>} : vector<512x128xbf16>, vector<128x128xbf16>, vector<512x128xf32> -> vector<512x128xf32>
    %63 = arith.addf %56, %62 : vector<512x128xf32>
    %c0_63 = arith.constant 0 : index
    %c0_64 = arith.constant 0 : index
    %64 = vector.load %arg2[%c0_63, %c0_64] : memref<1x128xf32, #tpu.memory_space<vmem>>, vector<1x128xf32>
    %c0_65 = arith.constant 0 : index
    %c0_66 = arith.constant 0 : index
    %65 = vector.load %arg3[%c0_65, %c0_66] : memref<1x128xf32, #tpu.memory_space<vmem>>, vector<1x128xf32>
    %cst_67 = arith.constant dense<0.000000e+00> : vector<128xf32>
    %66 = vector.multi_reduction <add>, %63, %cst_67 [0] : vector<512x128xf32> to vector<128xf32>
    %67 = vector.shape_cast %66 : vector<128xf32> to vector<1x128xf32>
    %cst_68 = arith.constant 0.001953125 : f32
    %68 = vector.broadcast %cst_68 : f32 to vector<1x128xf32>
    %69 = arith.mulf %67, %68 : vector<1x128xf32>
    %70 = arith.mulf %63, %63 : vector<512x128xf32>
    %cst_69 = arith.constant dense<0.000000e+00> : vector<128xf32>
    %71 = vector.multi_reduction <add>, %70, %cst_69 [0] : vector<512x128xf32> to vector<128xf32>
    %72 = vector.shape_cast %71 : vector<128xf32> to vector<1x128xf32>
    %cst_70 = arith.constant 0.001953125 : f32
    %73 = vector.broadcast %cst_70 : f32 to vector<1x128xf32>
    %74 = arith.mulf %72, %73 : vector<1x128xf32>
    %75 = arith.mulf %69, %69 : vector<1x128xf32>
    %76 = arith.subf %74, %75 : vector<1x128xf32>
    %77 = vector.broadcast %69 : vector<1x128xf32> to vector<512x128xf32>
    %78 = arith.subf %63, %77 : vector<512x128xf32>
    %cst_71 = arith.constant 9.99999974E-6 : f32
    %79 = vector.broadcast %cst_71 : f32 to vector<1x128xf32>
    %80 = arith.addf %76, %79 : vector<1x128xf32>
    %81 = math.rsqrt %80 : vector<1x128xf32>
    %82 = vector.broadcast %81 : vector<1x128xf32> to vector<512x128xf32>
    %83 = arith.mulf %78, %82 : vector<512x128xf32>
    %84 = vector.broadcast %64 : vector<1x128xf32> to vector<512x128xf32>
    %85 = arith.mulf %83, %84 : vector<512x128xf32>
    %86 = vector.broadcast %65 : vector<1x128xf32> to vector<512x128xf32>
    %87 = arith.addf %85, %86 : vector<512x128xf32>
    %88 = arith.negf %87 : vector<512x128xf32>
    %89 = math.exp %88 : vector<512x128xf32>
    %cst_72 = arith.constant 1.000000e+00 : f32
    %90 = vector.broadcast %cst_72 : f32 to vector<512x128xf32>
    %91 = arith.addf %90, %89 : vector<512x128xf32>
    %92 = arith.divf %90, %91 : vector<512x128xf32>
    %93 = arith.mulf %87, %92 : vector<512x128xf32>
    %cst_73 = arith.constant 0.000000e+00 : f32
    %94 = vector.broadcast %cst_73 : f32 to vector<2x18x32x128xf32>
    %c0_74 = arith.constant 0 : index
    %c0_75 = arith.constant 0 : index
    %c0_76 = arith.constant 0 : index
    %c0_77 = arith.constant 0 : index
    %95 = vector.load %arg8[%c0_74, %c0_75, %c0_76, %c0_77] : memref<2x18x32x128xf32, #tpu.memory_space<vmem>>, vector<2x18x32x128xf32>
    tpu.vector_store %arg8[%c0_74, %c0_75, %c0_76, %c0_77], %94 {strides = array<i32>} : memref<2x18x32x128xf32, #tpu.memory_space<vmem>>, vector<2x18x32x128xf32>,
    %96 = vector.shape_cast %93 : vector<512x128xf32> to vector<2x16x16x128xf32>
    %c0_78 = arith.constant 0 : index
    %c1_79 = arith.constant 1 : index
    %c8_80 = arith.constant 8 : index
    %c0_81 = arith.constant 0 : index
    %97 = vector.load %arg8[%c0_78, %c1_79, %c8_80, %c0_81] : memref<2x18x32x128xf32, #tpu.memory_space<vmem>>, vector<2x16x16x128xf32>
    tpu.vector_store %arg8[%c0_78, %c1_79, %c8_80, %c0_81], %96 {strides = array<i32>} : memref<2x18x32x128xf32, #tpu.memory_space<vmem>>, vector<2x16x16x128xf32>,
    %cst_82 = arith.constant 0.000000e+00 : f32
    %98 = vector.broadcast %cst_82 : f32 to vector<512x128xf32>
    %c0_83 = arith.constant 0 : index
    %c0_84 = arith.constant 0 : index
    %c7_85 = arith.constant 7 : index
    %c0_86 = arith.constant 0 : index
    %99 = vector.load %arg8[%c0_83, %c0_84, %c7_85, %c0_86] : memref<2x18x32x128xf32, #tpu.memory_space<vmem>>, vector<2x16x16x128xf32>
    %100 = vector.shape_cast %99 : vector<2x16x16x128xf32> to vector<512x128xf32>
    %101 = arith.truncf %100 : vector<512x128xf32> to vector<512x128xbf16>
    %c0_87 = arith.constant 0 : index
    %c0_88 = arith.constant 0 : index
    %c0_89 = arith.constant 0 : index
    %102 = vector.load %arg4[%c0_87, %c0_88, %c0_89] : memref<9x128x128xbf16, #tpu.memory_space<vmem>>, vector<1x128x128xbf16>
    %103 = vector.shape_cast %102 : vector<1x128x128xbf16> to vector<128x128xbf16>
    %cst_90 = arith.constant dense<0.000000e+00> : vector<512x128xf32>
    %104 = tpu.matmul %101, %103, %cst_90 {dimension_numbers = #tpu.dot_dimension_numbers<[1], [0], [0], [1], [0, 0, 1, 1], [], []>} : vector<512x128xbf16>, vector<128x128xbf16>, vector<512x128xf32> -> vector<512x128xf32>
    %105 = arith.addf %98, %104 : vector<512x128xf32>
    %c0_91 = arith.constant 0 : index
    %c0_92 = arith.constant 0 : index
    %c8_93 = arith.constant 8 : index
    %c0_94 = arith.constant 0 : index
    %106 = vector.load %arg8[%c0_91, %c0_92, %c8_93, %c0_94] : memref<2x18x32x128xf32, #tpu.memory_space<vmem>>, vector<2x16x16x128xf32>
    %107 = vector.shape_cast %106 : vector<2x16x16x128xf32> to vector<512x128xf32>
    %108 = arith.truncf %107 : vector<512x128xf32> to vector<512x128xbf16>
    %c1_95 = arith.constant 1 : index
    %c0_96 = arith.constant 0 : index
    %c0_97 = arith.constant 0 : index
    %109 = vector.load %arg4[%c1_95, %c0_96, %c0_97] : memref<9x128x128xbf16, #tpu.memory_space<vmem>>, vector<1x128x128xbf16>
    %110 = vector.shape_cast %109 : vector<1x128x128xbf16> to vector<128x128xbf16>
    %cst_98 = arith.constant dense<0.000000e+00> : vector<512x128xf32>
    %111 = tpu.matmul %108, %110, %cst_98 {dimension_numbers = #tpu.dot_dimension_numbers<[1], [0], [0], [1], [0, 0, 1, 1], [], []>} : vector<512x128xbf16>, vector<128x128xbf16>, vector<512x128xf32> -> vector<512x128xf32>
    %112 = arith.addf %105, %111 : vector<512x128xf32>
    %c0_99 = arith.constant 0 : index
    %c0_100 = arith.constant 0 : index
    %c9 = arith.constant 9 : index
    %c0_101 = arith.constant 0 : index
    %113 = vector.load %arg8[%c0_99, %c0_100, %c9, %c0_101] : memref<2x18x32x128xf32, #tpu.memory_space<vmem>>, vector<2x16x16x128xf32>
    %114 = vector.shape_cast %113 : vector<2x16x16x128xf32> to vector<512x128xf32>
    %115 = arith.truncf %114 : vector<512x128xf32> to vector<512x128xbf16>
    %c2_102 = arith.constant 2 : index
    %c0_103 = arith.constant 0 : index
    %c0_104 = arith.constant 0 : index
    %116 = vector.load %arg4[%c2_102, %c0_103, %c0_104] : memref<9x128x128xbf16, #tpu.memory_space<vmem>>, vector<1x128x128xbf16>
    %117 = vector.shape_cast %116 : vector<1x128x128xbf16> to vector<128x128xbf16>
    %cst_105 = arith.constant dense<0.000000e+00> : vector<512x128xf32>
    %118 = tpu.matmul %115, %117, %cst_105 {dimension_numbers = #tpu.dot_dimension_numbers<[1], [0], [0], [1], [0, 0, 1, 1], [], []>} : vector<512x128xbf16>, vector<128x128xbf16>, vector<512x128xf32> -> vector<512x128xf32>
    %119 = arith.addf %112, %118 : vector<512x128xf32>
    %c0_106 = arith.constant 0 : index
    %c1_107 = arith.constant 1 : index
    %c7_108 = arith.constant 7 : index
    %c0_109 = arith.constant 0 : index
    %120 = vector.load %arg8[%c0_106, %c1_107, %c7_108, %c0_109] : memref<2x18x32x128xf32, #tpu.memory_space<vmem>>, vector<2x16x16x128xf32>
    %121 = vector.shape_cast %120 : vector<2x16x16x128xf32> to vector<512x128xf32>
    %122 = arith.truncf %121 : vector<512x128xf32> to vector<512x128xbf16>
    %c3_110 = arith.constant 3 : index
    %c0_111 = arith.constant 0 : index
    %c0_112 = arith.constant 0 : index
    %123 = vector.load %arg4[%c3_110, %c0_111, %c0_112] : memref<9x128x128xbf16, #tpu.memory_space<vmem>>, vector<1x128x128xbf16>
    %124 = vector.shape_cast %123 : vector<1x128x128xbf16> to vector<128x128xbf16>
    %cst_113 = arith.constant dense<0.000000e+00> : vector<512x128xf32>
    %125 = tpu.matmul %122, %124, %cst_113 {dimension_numbers = #tpu.dot_dimension_numbers<[1], [0], [0], [1], [0, 0, 1, 1], [], []>} : vector<512x128xbf16>, vector<128x128xbf16>, vector<512x128xf32> -> vector<512x128xf32>
    %126 = arith.addf %119, %125 : vector<512x128xf32>
    %c0_114 = arith.constant 0 : index
    %c1_115 = arith.constant 1 : index
    %c8_116 = arith.constant 8 : index
    %c0_117 = arith.constant 0 : index
    %127 = vector.load %arg8[%c0_114, %c1_115, %c8_116, %c0_117] : memref<2x18x32x128xf32, #tpu.memory_space<vmem>>, vector<2x16x16x128xf32>
    %128 = vector.shape_cast %127 : vector<2x16x16x128xf32> to vector<512x128xf32>
    %129 = arith.truncf %128 : vector<512x128xf32> to vector<512x128xbf16>
    %c4_118 = arith.constant 4 : index
    %c0_119 = arith.constant 0 : index
    %c0_120 = arith.constant 0 : index
    %130 = vector.load %arg4[%c4_118, %c0_119, %c0_120] : memref<9x128x128xbf16, #tpu.memory_space<vmem>>, vector<1x128x128xbf16>
    %131 = vector.shape_cast %130 : vector<1x128x128xbf16> to vector<128x128xbf16>
    %cst_121 = arith.constant dense<0.000000e+00> : vector<512x128xf32>
    %132 = tpu.matmul %129, %131, %cst_121 {dimension_numbers = #tpu.dot_dimension_numbers<[1], [0], [0], [1], [0, 0, 1, 1], [], []>} : vector<512x128xbf16>, vector<128x128xbf16>, vector<512x128xf32> -> vector<512x128xf32>
    %133 = arith.addf %126, %132 : vector<512x128xf32>
    %c0_122 = arith.constant 0 : index
    %c1_123 = arith.constant 1 : index
    %c9_124 = arith.constant 9 : index
    %c0_125 = arith.constant 0 : index
    %134 = vector.load %arg8[%c0_122, %c1_123, %c9_124, %c0_125] : memref<2x18x32x128xf32, #tpu.memory_space<vmem>>, vector<2x16x16x128xf32>
    %135 = vector.shape_cast %134 : vector<2x16x16x128xf32> to vector<512x128xf32>
    %136 = arith.truncf %135 : vector<512x128xf32> to vector<512x128xbf16>
    %c5_126 = arith.constant 5 : index
    %c0_127 = arith.constant 0 : index
    %c0_128 = arith.constant 0 : index
    %137 = vector.load %arg4[%c5_126, %c0_127, %c0_128] : memref<9x128x128xbf16, #tpu.memory_space<vmem>>, vector<1x128x128xbf16>
    %138 = vector.shape_cast %137 : vector<1x128x128xbf16> to vector<128x128xbf16>
    %cst_129 = arith.constant dense<0.000000e+00> : vector<512x128xf32>
    %139 = tpu.matmul %136, %138, %cst_129 {dimension_numbers = #tpu.dot_dimension_numbers<[1], [0], [0], [1], [0, 0, 1, 1], [], []>} : vector<512x128xbf16>, vector<128x128xbf16>, vector<512x128xf32> -> vector<512x128xf32>
    %140 = arith.addf %133, %139 : vector<512x128xf32>
    %c0_130 = arith.constant 0 : index
    %c2_131 = arith.constant 2 : index
    %c7_132 = arith.constant 7 : index
    %c0_133 = arith.constant 0 : index
    %141 = vector.load %arg8[%c0_130, %c2_131, %c7_132, %c0_133] : memref<2x18x32x128xf32, #tpu.memory_space<vmem>>, vector<2x16x16x128xf32>
    %142 = vector.shape_cast %141 : vector<2x16x16x128xf32> to vector<512x128xf32>
    %143 = arith.truncf %142 : vector<512x128xf32> to vector<512x128xbf16>
    %c6_134 = arith.constant 6 : index
    %c0_135 = arith.constant 0 : index
    %c0_136 = arith.constant 0 : index
    %144 = vector.load %arg4[%c6_134, %c0_135, %c0_136] : memref<9x128x128xbf16, #tpu.memory_space<vmem>>, vector<1x128x128xbf16>
    %145 = vector.shape_cast %144 : vector<1x128x128xbf16> to vector<128x128xbf16>
    %cst_137 = arith.constant dense<0.000000e+00> : vector<512x128xf32>
    %146 = tpu.matmul %143, %145, %cst_137 {dimension_numbers = #tpu.dot_dimension_numbers<[1], [0], [0], [1], [0, 0, 1, 1], [], []>} : vector<512x128xbf16>, vector<128x128xbf16>, vector<512x128xf32> -> vector<512x128xf32>
    %147 = arith.addf %140, %146 : vector<512x128xf32>
    %c0_138 = arith.constant 0 : index
    %c2_139 = arith.constant 2 : index
    %c8_140 = arith.constant 8 : index
    %c0_141 = arith.constant 0 : index
    %148 = vector.load %arg8[%c0_138, %c2_139, %c8_140, %c0_141] : memref<2x18x32x128xf32, #tpu.memory_space<vmem>>, vector<2x16x16x128xf32>
    %149 = vector.shape_cast %148 : vector<2x16x16x128xf32> to vector<512x128xf32>
    %150 = arith.truncf %149 : vector<512x128xf32> to vector<512x128xbf16>
    %c7_142 = arith.constant 7 : index
    %c0_143 = arith.constant 0 : index
    %c0_144 = arith.constant 0 : index
    %151 = vector.load %arg4[%c7_142, %c0_143, %c0_144] : memref<9x128x128xbf16, #tpu.memory_space<vmem>>, vector<1x128x128xbf16>
    %152 = vector.shape_cast %151 : vector<1x128x128xbf16> to vector<128x128xbf16>
    %cst_145 = arith.constant dense<0.000000e+00> : vector<512x128xf32>
    %153 = tpu.matmul %150, %152, %cst_145 {dimension_numbers = #tpu.dot_dimension_numbers<[1], [0], [0], [1], [0, 0, 1, 1], [], []>} : vector<512x128xbf16>, vector<128x128xbf16>, vector<512x128xf32> -> vector<512x128xf32>
    %154 = arith.addf %147, %153 : vector<512x128xf32>
    %c0_146 = arith.constant 0 : index
    %c2_147 = arith.constant 2 : index
    %c9_148 = arith.constant 9 : index
    %c0_149 = arith.constant 0 : index
    %155 = vector.load %arg8[%c0_146, %c2_147, %c9_148, %c0_149] : memref<2x18x32x128xf32, #tpu.memory_space<vmem>>, vector<2x16x16x128xf32>
    %156 = vector.shape_cast %155 : vector<2x16x16x128xf32> to vector<512x128xf32>
    %157 = arith.truncf %156 : vector<512x128xf32> to vector<512x128xbf16>
    %c8_150 = arith.constant 8 : index
    %c0_151 = arith.constant 0 : index
    %c0_152 = arith.constant 0 : index
    %158 = vector.load %arg4[%c8_150, %c0_151, %c0_152] : memref<9x128x128xbf16, #tpu.memory_space<vmem>>, vector<1x128x128xbf16>
    %159 = vector.shape_cast %158 : vector<1x128x128xbf16> to vector<128x128xbf16>
    %cst_153 = arith.constant dense<0.000000e+00> : vector<512x128xf32>
    %160 = tpu.matmul %157, %159, %cst_153 {dimension_numbers = #tpu.dot_dimension_numbers<[1], [0], [0], [1], [0, 0, 1, 1], [], []>} : vector<512x128xbf16>, vector<128x128xbf16>, vector<512x128xf32> -> vector<512x128xf32>
    %161 = arith.addf %154, %160 : vector<512x128xf32>
    %c0_154 = arith.constant 0 : index
    %c0_155 = arith.constant 0 : index
    %162 = vector.load %arg5[%c0_154, %c0_155] : memref<1x128xf32, #tpu.memory_space<vmem>>, vector<1x128xf32>
    %c0_156 = arith.constant 0 : index
    %c0_157 = arith.constant 0 : index
    %163 = vector.load %arg6[%c0_156, %c0_157] : memref<1x128xf32, #tpu.memory_space<vmem>>, vector<1x128xf32>
    %cst_158 = arith.constant dense<0.000000e+00> : vector<128xf32>
    %164 = vector.multi_reduction <add>, %161, %cst_158 [0] : vector<512x128xf32> to vector<128xf32>
    %165 = vector.shape_cast %164 : vector<128xf32> to vector<1x128xf32>
    %cst_159 = arith.constant 0.001953125 : f32
    %166 = vector.broadcast %cst_159 : f32 to vector<1x128xf32>
    %167 = arith.mulf %165, %166 : vector<1x128xf32>
    %168 = arith.mulf %161, %161 : vector<512x128xf32>
    %cst_160 = arith.constant dense<0.000000e+00> : vector<128xf32>
    %169 = vector.multi_reduction <add>, %168, %cst_160 [0] : vector<512x128xf32> to vector<128xf32>
    %170 = vector.shape_cast %169 : vector<128xf32> to vector<1x128xf32>
    %cst_161 = arith.constant 0.001953125 : f32
    %171 = vector.broadcast %cst_161 : f32 to vector<1x128xf32>
    %172 = arith.mulf %170, %171 : vector<1x128xf32>
    %173 = arith.mulf %167, %167 : vector<1x128xf32>
    %174 = arith.subf %172, %173 : vector<1x128xf32>
    %175 = vector.broadcast %167 : vector<1x128xf32> to vector<512x128xf32>
    %176 = arith.subf %161, %175 : vector<512x128xf32>
    %cst_162 = arith.constant 9.99999974E-6 : f32
    %177 = vector.broadcast %cst_162 : f32 to vector<1x128xf32>
    %178 = arith.addf %174, %177 : vector<1x128xf32>
    %179 = math.rsqrt %178 : vector<1x128xf32>
    %180 = vector.broadcast %179 : vector<1x128xf32> to vector<512x128xf32>
    %181 = arith.mulf %176, %180 : vector<512x128xf32>
    %182 = vector.broadcast %162 : vector<1x128xf32> to vector<512x128xf32>
    %183 = arith.mulf %181, %182 : vector<512x128xf32>
    %184 = vector.broadcast %163 : vector<1x128xf32> to vector<512x128xf32>
    %185 = arith.addf %183, %184 : vector<512x128xf32>
    %186 = arith.negf %185 : vector<512x128xf32>
    %187 = math.exp %186 : vector<512x128xf32>
    %cst_163 = arith.constant 1.000000e+00 : f32
    %188 = vector.broadcast %cst_163 : f32 to vector<512x128xf32>
    %189 = arith.addf %188, %187 : vector<512x128xf32>
    %190 = arith.divf %188, %189 : vector<512x128xf32>
    %191 = arith.mulf %185, %190 : vector<512x128xf32>
    %c0_164 = arith.constant 0 : index
    %c1_165 = arith.constant 1 : index
    %c1_166 = arith.constant 1 : index
    %c0_167 = arith.constant 0 : index
    %192 = vector.load %arg0[%c0_164, %c1_165, %c1_166, %c0_167] : memref<2x18x18x128xf32, #tpu.memory_space<vmem>>, vector<2x16x16x128xf32>
    %193 = vector.shape_cast %192 : vector<2x16x16x128xf32> to vector<512x128xf32>
    %194 = arith.addf %191, %193 : vector<512x128xf32>
    %195 = vector.shape_cast %194 : vector<512x128xf32> to vector<2x16x16x128xf32>
    %c0_168 = arith.constant 0 : index
    %c0_169 = arith.constant 0 : index
    %c0_170 = arith.constant 0 : index
    %c0_171 = arith.constant 0 : index
    %196 = vector.load %arg7[%c0_168, %c0_169, %c0_170, %c0_171] : memref<2x16x16x128xf32, #tpu.memory_space<vmem>>, vector<2x16x16x128xf32>
    tpu.vector_store %arg7[%c0_168, %c0_169, %c0_170, %c0_171], %195 {strides = array<i32>} : memref<2x16x16x128xf32, #tpu.memory_space<vmem>>, vector<2x16x16x128xf32>,
    return
  }
}

</mosaic_0001>

<bundles_post_ra>
// kernel: bottleneck_adalora_forward.1
= control target key start
LH: loop header
LB: loop body
LE: loop exit
PB: predicated region body
PF: predicated region fallthrough
CT: control target
= control target key end

     0   :  { %s22403_s1 = inlined_call_operand.vmem [shape: bf16[9,128,128], index: 1, kind: input, shape index: {}]   ;;  %s22404_s0 = inlined_call_operand.vmem [shape: f32[2,18,18,128], index: 0, kind: input, shape index: {}]   ;;  %s22405_s4 = inlined_call_operand.vmem [shape: bf16[9,128,128], index: 4, kind: input, shape index: {}]   ;;  %s22406_s2 = inlined_call_operand.vmem [shape: f32[1,128], index: 2, kind: input, shape index: {}]   ;;  %s22407_s3 = inlined_call_operand.vmem [shape: f32[1,128], index: 3, kind: input, shape index: {}]   ;;  %s22408_s5 = inlined_call_operand.vmem [shape: f32[1,128], index: 5, kind: input, shape index: {}]   ;;  %s22409_s6 = inlined_call_operand.vmem [shape: f32[1,128], index: 6, kind: input, shape index: {}]   ;;  %s22410_s7 = inlined_call_operand.vmem [shape: f32[2,16,16,128], index: 7, kind: output, shape index: {}]  }
   0x1   :  { %v15446_v0 = vld [vmem:[%s22403_s1 + $0x40] sm:$0xff]   ;;  %v15447_v1 = vld [vmem:[%s22403_s1 + $0x48] sm:$0xff]   ;;  %v15448_v2 = vld [vmem:[%s22403_s1 + $0x50] sm:$0xff]  }
   0x2   :  { %12981 = vmatprep.subr.bf16.mxu0 %v15446_v0  ;;  %v15449_v3 = vld [vmem:[%s22403_s1 + $0x58] sm:$0xff]   ;;  %v139_v4 = vld [vmem:[%s22404_s0 + $0x1] sm:$0xff]  ;;  %v140_v5 = vld [vmem:[%s22404_s0 + $0x9] sm:$0xff] }
   0x3   :  { %12982 = vmatpush3.bf16.msra.mxu0 %v15446_v0  ;;  %v203_v6 = vpack.c.bf16 %v140_v5, %v139_v4  ;;  %v15450_v7 = vld [vmem:[%s22403_s1 + $0x60] sm:$0xff]   ;;  %v15451_v8 = vld [vmem:[%s22403_s1 + $0x68] sm:$0xff]   ;;  %v15452_v9 = vld [vmem:[%s22403_s1 + $0x70] sm:$0xff]  }
   0x4   :  { %12983 = vmatprep.subr.bf16.mxu0 %v15447_v1  ;;  %v15453_v10 = vld [vmem:[%s22403_s1 + $0x78] sm:$0xff]   ;;  %v142_v12 = vld [vmem:[%s22404_s0 + $0x21] sm:$0xff]  ;;  %v145_v19 = vld [vmem:[%s22404_s0 + $0x49] sm:$0xff] }
   0x5   :  { %12997 = vmatprep.mubr.bf16.mxu0 %v203_v6  ;;  %v141_v11 = vld [vmem:[%s22404_s0 + $0x19] sm:$0xff]  ;;  %v143_v14 = vld [vmem:[%s22404_s0 + $0x31] sm:$0xff]  ;;  %v15455_v18 = vld [vmem:[%s22403_s1 + $0x8] sm:$0xff]  }
   0x6   :  { %v15454_v13 = vld [vmem:[%s22403_s1] sm:$0xff]   ;;  %v204_v16 = vpack.c.bf16 %v142_v12, %v141_v11  ;;  %v146_v20 = vld [vmem:[%s22404_s0 + $0x51] sm:$0xff]  ;;  %v148_v22 = vld [vmem:[%s22404_s0 + $0x69] sm:$0xff] }
   0x7   :  { %12984 = vmatpush3.bf16.msra.mxu0 %v15447_v1  ;;  %v144_v15 = vld [vmem:[%s22404_s0 + $0x39] sm:$0xff]  ;;  %v147_v21 = vld [vmem:[%s22404_s0 + $0x61] sm:$0xff]  ;;  %v15456_v23 = vld [vmem:[%s22403_s1 + $0x10] sm:$0xff]   ;;  %v206_v24 = vpack.c.bf16 %v146_v20, %v145_v19 }
   0x8   :  { %12985 = vmatprep.subr.bf16.mxu0 %v15448_v2  ;;  %v205_v17 = vpack.c.bf16 %v144_v15, %v143_v14  ;;  %v207_v25 = vpack.c.bf16 %v148_v22, %v147_v21  ;;  %v15457_v26 = vld [vmem:[%s22403_s1 + $0x18] sm:$0xff]   ;;  %v150_v28 = vld [vmem:[%s22404_s0 + $0x81] sm:$0xff]  ;;  %v153_v35 = vld [vmem:[%s22404_s0 + $0xa9] sm:$0xff] }
   0x9   :  { %v149_v27 = vld [vmem:[%s22404_s0 + $0x79] sm:$0xff]  ;;  %v151_v29 = vld [vmem:[%s22404_s0 + $0x91] sm:$0xff]  ;;  %v15459_v33 = vld [vmem:[%s22403_s1 + $0x28] sm:$0xff]  }
   0xa   :  { %v152_v30 = vld [vmem:[%s22404_s0 + $0x99] sm:$0xff]  ;;  %v208_v32 = vpack.c.bf16 %v150_v28, %v149_v27  ;;  %v154_v36 = vld [vmem:[%s22404_s0 + $0xb1] sm:$0xff]  ;;  %v155_v37 = vld [vmem:[%s22404_s0 + $0xc1] sm:$0xff] }
   0xb   :  { %12986 = vmatpush3.bf16.msra.mxu0 %v15448_v2  ;;  %v15458_v31 = vld [vmem:[%s22403_s1 + $0x20] sm:$0xff]   ;;  %v209_v34 = vpack.c.bf16 %v152_v30, %v151_v29  ;;  %v156_v38 = vld [vmem:[%s22404_s0 + $0xc9] sm:$0xff]  ;;  %v210_v40 = vpack.c.bf16 %v154_v36, %v153_v35  ;;  %v15461_v41 = vld [vmem:[%s22403_s1 + $0x38] sm:$0xff]  }
   0xc   :  { %12987 = vmatprep.subr.bf16.mxu0 %v15449_v3  ;;  %v15460_v39 = vld [vmem:[%s22403_s1 + $0x30] sm:$0xff]   ;;  %v211_v42 = vpack.c.bf16 %v156_v38, %v155_v37  ;;  %v157_v43 = vld [vmem:[%s22404_s0 + $0xd9] sm:$0xff]  ;;  %v158_v44 = vld [vmem:[%s22404_s0 + $0xe1] sm:$0xff] }
   0xd   :  { %v159_v45 = vld [vmem:[%s22404_s0 + $0xf1] sm:$0xff]  ;;  %v160_v46 = vld [vmem:[%s22404_s0 + $0xf9] sm:$0xff]  ;;  %v212_v48 = vpack.c.bf16 %v158_v44, %v157_v43  ;;  %v161_v50 = vld [vmem:[%s22404_s0 + $0x109] sm:$0xff] }
   0xe   :  { %v16266_v47 = vld [vmem:[%s22403_s1 + $0x80] sm:$0xff]   ;;  %v213_v49 = vpack.c.bf16 %v160_v46, %v159_v45  ;;  %v162_v51 = vld [vmem:[%s22404_s0 + $0x111] sm:$0xff]  ;;  %v164_v53 = vld [vmem:[%s22404_s0 + $0x129] sm:$0xff] }
   0xf   :  { %12988 = vmatpush3.bf16.msra.mxu0 %v15449_v3  ;;  %v163_v52 = vld [vmem:[%s22404_s0 + $0x121] sm:$0xff]  ;;  %v214_v54 = vpack.c.bf16 %v162_v51, %v161_v50  ;;  %v165_v56 = vld [vmem:[%s22404_s0 + $0x139] sm:$0xff]  ;;  %v167_v58 = vld [vmem:[%s22404_s0 + $0x151] sm:$0xff] }
  0x10   :  { %12989 = vmatprep.subr.bf16.mxu0 %v15450_v7  ;;  %v215_v55 = vpack.c.bf16 %v164_v53, %v163_v52  ;;  %v166_v57 = vld [vmem:[%s22404_s0 + $0x141] sm:$0xff]  ;;  %v168_v59 = vld [vmem:[%s22404_s0 + $0x159] sm:$0xff]  ;;  %v169_v62 = vld [vmem:[%s22404_s0 + $0x169] sm:$0xff] }
  0x11   :  { %v216_v60 = vpack.c.bf16 %v166_v57, %v165_v56  ;;  %v217_v61 = vpack.c.bf16 %v168_v59, %v167_v58  ;;  %v170_v63 = vld [vmem:[%s22404_s0 + $0x171] sm:$0xff]  ;;  %v172_v1 = vld [vmem:[%s22404_s0 + $0x1b9] sm:$0xff]  ;;  %v173_v4 = vld [vmem:[%s22404_s0 + $0x1c9] sm:$0xff] }
  0x12   :  { %v171_v0 = vld [vmem:[%s22404_s0 + $0x1b1] sm:$0xff]  ;;  %v218_v2 = vpack.c.bf16 %v170_v63, %v169_v62  ;;  %v175_v6 = vld [vmem:[%s22404_s0 + $0x1e1] sm:$0xff]  ;;  %v184_v19 = vld [vmem:[%s22404_s0 + $0x249] sm:$0xff] }
  0x13   :  { %12990 = vmatpush3.bf16.msra.mxu0 %v15450_v7  ;;  %v219_v3 = vpack.c.bf16 %v172_v1, %v171_v0  ;;  %v174_v5 = vld [vmem:[%s22404_s0 + $0x1d1] sm:$0xff]  ;;  %v176_v7 = vld [vmem:[%s22404_s0 + $0x1e9] sm:$0xff]  ;;  %v178_v11 = vld [vmem:[%s22404_s0 + $0x201] sm:$0xff] }
  0x14   :  { %12991 = vmatprep.subr.bf16.mxu0 %v15451_v8  ;;  %v179_v12 = vld [vmem:[%s22404_s0 + $0x211] sm:$0xff]  ;;  %v185_v22 = vld [vmem:[%s22404_s0 + $0x259] sm:$0xff]  ;;  %v189_v28 = vld [vmem:[%s22404_s0 + $0x289] sm:$0xff] }
  0x15   :  { %v190_v29 = vld [vmem:[%s22404_s0 + $0x291] sm:$0xff]  ;;  %v191_v30 = vld [vmem:[%s22404_s0 + $0x2a1] sm:$0xff]  ;;  %v196_v37 = vld [vmem:[%s22404_s0 + $0x2d9] sm:$0xff] }
  0x16   :  { %v194_v35 = vld [vmem:[%s22404_s0 + $0x2c1] sm:$0xff]  ;;  %v195_v36 = vld [vmem:[%s22404_s0 + $0x2d1] sm:$0xff]  ;;  %v200_v43 = vld [vmem:[%s22404_s0 + $0x309] sm:$0xff] }
  0x17   :  { %12992 = vmatpush3.bf16.msra.mxu0 %v15451_v8  ;;  %v220_v8 = vpack.c.bf16 %v174_v5, %v173_v4  ;;  %v201_v46 = vld [vmem:[%s22404_s0 + $0x319] sm:$0xff]  ;;  %v28_v50 = vld [vmem:[%s22404_s0 + $0x8] sm:$0xff]  ;;  %v39_v5 = vld [vmem:[%s22404_s0 + $0x90] sm:$0xff] }
  0x18   :  { %12993 = vmatprep.subr.bf16.mxu0 %v15452_v9  ;;  %v29_v53 = vld [vmem:[%s22404_s0 + $0x18] sm:$0xff]  ;;  %v15463_v59 = vld [vmem:[%s22403_s1 + $0x88] sm:$0xff]   ;;  %v35_v62 = vld [vmem:[%s22404_s0 + $0x60] sm:$0xff] }
  0x19   :  { %v32_v56 = vld [vmem:[%s22404_s0 + $0x38] sm:$0xff]  ;;  %v36_v63 = vld [vmem:[%s22404_s0 + $0x68] sm:$0xff]  ;;  %v38_v4 = vld [vmem:[%s22404_s0 + $0x80] sm:$0xff] }
  0x1a   :  { %v16440_v1 = vpack.c.bf16 %v36_v63, %v35_v62  ;;  %v72_v62 = vld [vmem:[%s22404_s0 + $0x248] sm:$0xff] }
  0x1b   :  { %12994 = vmatpush3.bf16.msra.mxu0 %v15452_v9  ;;  %v221_v9 = vpack.c.bf16 %v176_v7, %v175_v6  ;;  %v40_v6 = vld [vmem:[%s22404_s0 + $0x98] sm:$0xff]  ;;  %v15466_v7 = vld [vmem:[%s22403_s1 + $0xa0] sm:$0xff]  }
  0x1c   :  { %12995 = vmatprep.subr.bf16.mxu0 %v15453_v10 }
  0x1f   :  { %12996 = vmatpush3.bf16.msra.mxu0 %v15453_v10  ;;  %v177_v10 = vld [vmem:[%s22404_s0 + $0x1f9] sm:$0xff] }
  0x20   :  { %13061 = vmatprep.subr.bf16.mxu0 %v15454_v13  ;;  %v222_v14 = vpack.c.bf16 %v178_v11, %v177_v10  ;;  %v15467_v10 = vld [vmem:[%s22403_s1 + $0xa8] sm:$0xff]  }
  0x21   :  { %v41_v11 = vld [vmem:[%s22404_s0 + $0xa8] sm:$0xff] }
  0x22   :  { %12998 = vmatmul.mubr.bf16.vlgmr.msra.gmra.mrb[0].mxu0 %v204_v16  ;;  %v181_v16 = vld [vmem:[%s22404_s0 + $0x229] sm:$0xff] }
  0x23   :  { %13062 = vmatpush3.bf16.msra.mxu0 %v15454_v13  ;;  %13001 = vmatprep.mubr.bf16.mxu0 %v205_v17  ;;  %v180_v13 = vld [vmem:[%s22404_s0 + $0x219] sm:$0xff]  ;;  %v182_v17 = vld [vmem:[%s22404_s0 + $0x231] sm:$0xff] }
  0x24   :  { %13063 = vmatprep.subr.bf16.mxu0 %v15455_v18  ;;  %v223_v15 = vpack.c.bf16 %v180_v13, %v179_v12  ;;  %v224_v20 = vpack.c.bf16 %v182_v17, %v181_v16  ;;  %v42_v12 = vld [vmem:[%s22404_s0 + $0xb0] sm:$0xff]  ;;  %v43_v13 = vld [vmem:[%s22404_s0 + $0xc0] sm:$0xff] }
  0x25   :  { %v16486_v16 = vpack.c.bf16 %v42_v12, %v41_v11  ;;  %v78_v11 = vld [vmem:[%s22404_s0 + $0x290] sm:$0xff]  ;;  %v79_v12 = vld [vmem:[%s22404_s0 + $0x2a0] sm:$0xff] }
  0x27   :  { %13064 = vmatpush3.bf16.msra.mxu0 %v15455_v18  ;;  %v183_v18 = vld [vmem:[%s22404_s0 + $0x241] sm:$0xff] }
  0x28   :  { %13065 = vmatprep.subr.bf16.mxu0 %v15456_v23  ;;  %v225_v21 = vpack.c.bf16 %v184_v19, %v183_v18  ;;  %v15469_v18 = vld [vmem:[%s22403_s1 + $0xb8] sm:$0xff]  }
  0x29   :  { %v45_v19 = vld [vmem:[%s22404_s0 + $0xd8] sm:$0xff] }
  0x2a   :  { %13002 = vmatmul.mubr.bf16.gmra.mrb[4].mxu0 %v206_v24  ;;  %v187_v24 = vld [vmem:[%s22404_s0 + $0x271] sm:$0xff] }
  0x2b   :  { %13005 = vmatprep.mubr.bf16.mxu0 %v207_v25  ;;  %13066 = vmatpush3.bf16.msra.mxu0 %v15456_v23  ;;  %v186_v23 = vld [vmem:[%s22404_s0 + $0x261] sm:$0xff]  ;;  %v188_v25 = vld [vmem:[%s22404_s0 + $0x279] sm:$0xff] }
  0x2c   :  { %13067 = vmatprep.subr.bf16.mxu0 %v15457_v26  ;;  %v227_v27 = vpack.c.bf16 %v188_v25, %v187_v24 }
  0x2f   :  { %13068 = vmatpush3.bf16.msra.mxu0 %v15457_v26  ;;  %v226_v26 = vpack.c.bf16 %v186_v23, %v185_v22  ;;  %v48_v22 = vld [vmem:[%s22404_s0 + $0xf8] sm:$0xff]  ;;  %v16510_v23 = vld [vmem:[%s22403_s1 + $0xc0] sm:$0xff]  }
  0x30   :  { %13069 = vmatprep.subr.bf16.mxu0 %v15458_v31 }
  0x32   :  { %13006 = vmatmul.mubr.bf16.gmra.mrb[8].mxu0 %v208_v32  ;;  %v228_v32 = vpack.c.bf16 %v190_v29, %v189_v28  ;;  %v51_v28 = vld [vmem:[%s22404_s0 + $0x120] sm:$0xff]  ;;  %v52_v29 = vld [vmem:[%s22404_s0 + $0x128] sm:$0xff] }
  0x33   :  { %13009 = vmatprep.mubr.bf16.mxu0 %v209_v34  ;;  %13070 = vmatpush3.bf16.msra.mxu0 %v15458_v31  ;;  %v192_v31 = vld [vmem:[%s22404_s0 + $0x2a9] sm:$0xff]  ;;  %v193_v34 = vld [vmem:[%s22404_s0 + $0x2b9] sm:$0xff] }
  0x34   :  { %13071 = vmatprep.subr.bf16.mxu0 %v15459_v33  ;;  %v230_v38 = vpack.c.bf16 %v194_v35, %v193_v34  ;;  %v55_v34 = vld [vmem:[%s22404_s0 + $0x150] sm:$0xff]  ;;  %v56_v35 = vld [vmem:[%s22404_s0 + $0x158] sm:$0xff] }
  0x37   :  { %13072 = vmatpush3.bf16.msra.mxu0 %v15459_v33  ;;  %v229_v33 = vpack.c.bf16 %v192_v31, %v191_v30  ;;  %v16533_v31 = vpack.c.bf16 %v52_v29, %v51_v28  ;;  %v86_v28 = vld [vmem:[%s22404_s0 + $0x2f0] sm:$0xff]  ;;  %v87_v29 = vld [vmem:[%s22404_s0 + $0x300] sm:$0xff] }
  0x38   :  { %13073 = vmatprep.subr.bf16.mxu0 %v15460_v39 }
  0x3a   :  { %13010 = vmatmul.mubr.bf16.gmra.mrb[12].mxu0 %v210_v40  ;;  %v197_v40 = vld [vmem:[%s22404_s0 + $0x2e9] sm:$0xff] }
  0x3b   :  { %13013 = vmatprep.mubr.bf16.mxu0 %v211_v42  ;;  %13074 = vmatpush3.bf16.msra.mxu0 %v15460_v39  ;;  %v231_v39 = vpack.c.bf16 %v196_v37, %v195_v36  ;;  %v199_v42 = vld [vmem:[%s22404_s0 + $0x301] sm:$0xff]  ;;  %v16551_v37 = vpack.c.bf16 %v56_v35, %v55_v34  ;;  %v89_v35 = vld [vmem:[%s22404_s0 + $0x318] sm:$0xff] }
  0x3c   :  { %13075 = vmatprep.subr.bf16.mxu0 %v15461_v41  ;;  %v233_v45 = vpack.c.bf16 %v200_v43, %v199_v42 }
  0x3f   :  { %13076 = vmatpush3.bf16.msra.mxu0 %v15461_v41  ;;  %v198_v41 = vld [vmem:[%s22404_s0 + $0x2f1] sm:$0xff] }
  0x40   :  { %13141 = vmatprep.subr.bf16.mxu0 %v16266_v47  ;;  %v232_v44 = vpack.c.bf16 %v198_v41, %v197_v40  ;;  %v59_v40 = vld [vmem:[%s22404_s0 + $0x1b0] sm:$0xff]  ;;  %v60_v41 = vld [vmem:[%s22404_s0 + $0x1b8] sm:$0xff] }
  0x41   :  { %v107_v43 = vpack.c.bf16 %v60_v41, %v59_v40  ;;  %v927_v40 = vld [vmem:[%s22404_s0 + $0xa] sm:$0xff] }
  0x42   :  { %13014 = vmatmul.mubr.bf16.gmra.mrb[16].mxu0 %v212_v48  ;;  %v202_v48 = vld [vmem:[%s22404_s0 + $0x321] sm:$0xff] }
  0x43   :  { %13017 = vmatprep.mubr.bf16.mxu0 %v213_v49  ;;  %v27_v49 = vld [vmem:[%s22404_s0] sm:$0xff]  ;;  %v234_v51 = vpack.c.bf16 %v202_v48, %v201_v46  ;;  %v64_v48 = vld [vmem:[%s22404_s0 + $0x1e8] sm:$0xff] }
  0x44   :  { %v91_v52 = vpack.c.bf16 %v28_v50, %v27_v49  ;;  %v63_v46 = vld [vmem:[%s22404_s0 + $0x1e0] sm:$0xff] }
  0x45   :  { %v16584_v50 = vpack.c.bf16 %v64_v48, %v63_v46  ;;  %v930_v46 = vld [vmem:[%s22404_s0 + $0x32] sm:$0xff]  ;;  %v931_v48 = vld [vmem:[%s22404_s0 + $0x3a] sm:$0xff] }
  0x4a   :  { %13018 = vmatmul.mubr.bf16.gmra.mrb[20].mxu0 %v214_v54  ;;  %v30_v54 = vld [vmem:[%s22404_s0 + $0x20] sm:$0xff] }
  0x4b   :  { %13021 = vmatprep.mubr.bf16.mxu0 %v215_v55  ;;  %v31_v55 = vld [vmem:[%s22404_s0 + $0x30] sm:$0xff]  ;;  %v16413_v57 = vpack.c.bf16 %v30_v54, %v29_v53  ;;  %v68_v54 = vld [vmem:[%s22404_s0 + $0x218] sm:$0xff] }
  0x4c   :  { %v16415_v58 = vpack.c.bf16 %v32_v56, %v31_v55  ;;  %v67_v53 = vld [vmem:[%s22404_s0 + $0x210] sm:$0xff] }
  0x4d   :  { %v16602_v56 = vpack.c.bf16 %v68_v54, %v67_v53  ;;  %v15471_v53 = vld [vmem:[%s22403_s1 + $0xc8] sm:$0xff]  }
  0x4e   :  { %v932_v54 = vld [vmem:[%s22404_s0 + $0x4a] sm:$0xff] }
  0x52   :  { %13022 = vmatmul.mubr.bf16.gmra.mrb[24].mxu0 %v216_v60  ;;  %v33_v60 = vld [vmem:[%s22404_s0 + $0x48] sm:$0xff] }
  0x53   :  { %13025 = vmatprep.mubr.bf16.mxu0 %v217_v61  ;;  %v34_v61 = vld [vmem:[%s22404_s0 + $0x50] sm:$0xff] }
  0x54   :  { %v16438_v0 = vpack.c.bf16 %v34_v61, %v33_v60  ;;  %v70_v60 = vld [vmem:[%s22404_s0 + $0x230] sm:$0xff]  ;;  %v71_v61 = vld [vmem:[%s22404_s0 + $0x240] sm:$0xff] }
  0x5a   :  { %13026 = vmatmul.mubr.bf16.gmra.mrb[28].mxu0 %v218_v2  ;;  %v15465_v2 = vld [vmem:[%s22403_s1 + $0x98] sm:$0xff]  }
  0x5b   :  { %13029 = vmatprep.mubr.bf16.mxu0 %v219_v3  ;;  %v37_v3 = vld [vmem:[%s22404_s0 + $0x78] sm:$0xff] }
  0x62   :  { %13030 = vmatmul.mubr.bf16.gmra.mrb[32].mxu0 %v220_v8  ;;  %v16462_v8 = vpack.c.bf16 %v38_v4, %v37_v3  ;;  %v74_v3 = vld [vmem:[%s22404_s0 + $0x260] sm:$0xff]  ;;  %v75_v4 = vld [vmem:[%s22404_s0 + $0x270] sm:$0xff] }
  0x63   :  { %13033 = vmatprep.mubr.bf16.mxu0 %v221_v9  ;;  %v16464_v9 = vpack.c.bf16 %v40_v6, %v39_v5  ;;  %v76_v5 = vld [vmem:[%s22404_s0 + $0x278] sm:$0xff] }
  0x6a   :  { %13034 = vmatmul.mubr.bf16.gmra.mrb[36].mxu0 %v222_v14  ;;  %v44_v14 = vld [vmem:[%s22404_s0 + $0xc8] sm:$0xff] }
  0x6b   :  { %13037 = vmatprep.mubr.bf16.mxu0 %v223_v15  ;;  %v15468_v15 = vld [vmem:[%s22403_s1 + $0xb0] sm:$0xff]   ;;  %v16488_v17 = vpack.c.bf16 %v44_v14, %v43_v13  ;;  %v80_v13 = vld [vmem:[%s22404_s0 + $0x2a8] sm:$0xff] }
  0x72   :  { %13038 = vmatmul.mubr.bf16.gmra.mrb[40].mxu0 %v224_v20  ;;  %v46_v20 = vld [vmem:[%s22404_s0 + $0xe0] sm:$0xff] }
  0x73   :  { %13041 = vmatprep.mubr.bf16.mxu0 %v225_v21  ;;  %v47_v21 = vld [vmem:[%s22404_s0 + $0xf0] sm:$0xff]  ;;  %v16512_v24 = vpack.c.bf16 %v46_v20, %v45_v19  ;;  %v82_v19 = vld [vmem:[%s22404_s0 + $0x2c0] sm:$0xff] }
  0x74   :  { %v16514_v25 = vpack.c.bf16 %v48_v22, %v47_v21  ;;  %v83_v20 = vld [vmem:[%s22404_s0 + $0x2d0] sm:$0xff]  ;;  %v84_v21 = vld [vmem:[%s22404_s0 + $0x2d8] sm:$0xff] }
  0x7a   :  { %13042 = vmatmul.mubr.bf16.gmra.mrb[44].mxu0 %v226_v26  ;;  %v49_v26 = vld [vmem:[%s22404_s0 + $0x108] sm:$0xff] }
  0x7b   :  { %13045 = vmatprep.mubr.bf16.mxu0 %v227_v27  ;;  %v50_v27 = vld [vmem:[%s22404_s0 + $0x110] sm:$0xff] }
  0x7c   :  { %v16531_v30 = vpack.c.bf16 %v50_v27, %v49_v26  ;;  %v16674_v26 = vpack.c.bf16 %v84_v21, %v83_v20  ;;  %v85_v27 = vld [vmem:[%s22404_s0 + $0x2e8] sm:$0xff]  ;;  %v941_v21 = vld [vmem:[%s22404_s0 + $0xb2] sm:$0xff] }
  0x7d   :  { %v940_v20 = vld [vmem:[%s22404_s0 + $0xaa] sm:$0xff] }
  0x82   :  { %13046 = vmatmul.mubr.bf16.gmra.mrb[48].mxu0 %v228_v32  ;;  %v53_v32 = vld [vmem:[%s22404_s0 + $0x138] sm:$0xff] }
  0x83   :  { %13049 = vmatprep.mubr.bf16.mxu0 %v229_v33  ;;  %v54_v33 = vld [vmem:[%s22404_s0 + $0x140] sm:$0xff] }
  0x84   :  { %v16549_v36 = vpack.c.bf16 %v54_v33, %v53_v32  ;;  %v88_v32 = vld [vmem:[%s22404_s0 + $0x308] sm:$0xff]  ;;  %v16690_v33 = vpack.c.bf16 %v86_v28, %v85_v27 }
  0x85   :  { %v16692_v34 = vpack.c.bf16 %v88_v32, %v87_v29  ;;  %v942_v27 = vld [vmem:[%s22404_s0 + $0xc2] sm:$0xff]  ;;  %v943_v28 = vld [vmem:[%s22404_s0 + $0xca] sm:$0xff]  ;;  %v16796_v32 = vpack.c.bf16 %v941_v21, %v940_v20  ;;  %v957_v20 = vld [vmem:[%s22404_s0 + $0x172] sm:$0xff] }
  0x86   :  { %v15476_v29 = vld [vmem:[%s22403_s1 + $0xf0] sm:$0xff]  }
  0x87   :  { %v958_v21 = vld [vmem:[%s22404_s0 + $0x1b2] sm:$0xff] }
  0x8a   :  { %13050 = vmatmul.mubr.bf16.gmra.mrb[52].mxu0 %v230_v38  ;;  %v57_v38 = vld [vmem:[%s22404_s0 + $0x168] sm:$0xff] }
  0x8b   :  { %13053 = vmatprep.mubr.bf16.mxu0 %v231_v39  ;;  %v58_v39 = vld [vmem:[%s22404_s0 + $0x170] sm:$0xff] }
  0x8c   :  { %v16567_v42 = vpack.c.bf16 %v58_v39, %v57_v38  ;;  %v90_v38 = vld [vmem:[%s22404_s0 + $0x320] sm:$0xff] }
  0x8d   :  { %v926_v39 = vld [vmem:[%s22404_s0 + $0x2] sm:$0xff]  ;;  %v16708_v41 = vpack.c.bf16 %v90_v38, %v89_v35  ;;  %v16798_v35 = vpack.c.bf16 %v943_v28, %v942_v27  ;;  %v15477_v38 = vld [vmem:[%s22403_s1 + $0xf8] sm:$0xff]  }
  0x8e   :  { %v959_v27 = vld [vmem:[%s22404_s0 + $0x1ba] sm:$0xff] }
  0x92   :  { %13054 = vmatmul.mubr.bf16.gmra.mrb[56].mxu0 %v232_v44  ;;  %v61_v44 = vld [vmem:[%s22404_s0 + $0x1c8] sm:$0xff] }
  0x93   :  { %13057 = vmatprep.mubr.bf16.mxu0 %v233_v45  ;;  %v62_v45 = vld [vmem:[%s22404_s0 + $0x1d0] sm:$0xff] }
  0x94   :  { %v16582_v49 = vpack.c.bf16 %v62_v45, %v61_v44  ;;  %v928_v44 = vld [vmem:[%s22404_s0 + $0x1a] sm:$0xff]  ;;  %v929_v45 = vld [vmem:[%s22404_s0 + $0x22] sm:$0xff] }
  0x9a   :  { %13058 = vmatmul.mubr.bf16.gmra.mrb[60].mxu0 %v234_v51  ;;  %v65_v51 = vld [vmem:[%s22404_s0 + $0x1f8] sm:$0xff] }
  0x9b   :  { %13077 = vmatprep.mubr.bf16.mxu0 %v91_v52  ;;  %v66_v52 = vld [vmem:[%s22404_s0 + $0x200] sm:$0xff] }
  0x9c   :  { %v16600_v55 = vpack.c.bf16 %v66_v52, %v65_v51  ;;  %v16723_v51 = vpack.c.bf16 %v929_v45, %v928_v44  ;;  %v16725_v52 = vpack.c.bf16 %v931_v48, %v930_v46  ;;  %v947_v44 = vld [vmem:[%s22404_s0 + $0xfa] sm:$0xff] }
  0x9d   :  { %v16820_v45 = vld [vmem:[%s22403_s1 + $0x100] sm:$0xff]  }
  0xa2   :  { %13078 = vmatmul.mubr.bf16.vlgmr.msra.gmra.mrb[0].mxu0 %v16413_v57 }
  0xa3   :  { %13142 = vmatpush3.bf16.msra.mxu0 %v16266_v47  ;;  %13081 = vmatprep.mubr.bf16.mxu0 %v16415_v58  ;;  %v15464_v47 = vld [vmem:[%s22403_s1 + $0x90] sm:$0xff]  }
  0xa4   :  { %13143 = vmatprep.subr.bf16.mxu0 %v15463_v59 }
  0xa7   :  { %13144 = vmatpush3.bf16.msra.mxu0 %v15463_v59  ;;  %v69_v59 = vld [vmem:[%s22404_s0 + $0x228] sm:$0xff] }
  0xa8   :  { %13145 = vmatprep.subr.bf16.mxu0 %v15464_v47  ;;  %v16618_v63 = vpack.c.bf16 %v70_v60, %v69_v59  ;;  %v933_v59 = vld [vmem:[%s22404_s0 + $0x52] sm:$0xff]  ;;  %v934_v60 = vld [vmem:[%s22404_s0 + $0x62] sm:$0xff] }
  0xaa   :  { %13082 = vmatmul.mubr.bf16.gmra.mrb[4].mxu0 %v16438_v0 }
  0xab   :  { %13085 = vmatprep.mubr.bf16.mxu0 %v16440_v1  ;;  %13146 = vmatpush3.bf16.msra.mxu0 %v15464_v47  ;;  %v16620_v47 = vpack.c.bf16 %v72_v62, %v71_v61  ;;  %v935_v61 = vld [vmem:[%s22404_s0 + $0x6a] sm:$0xff]  ;;  %v16748_v62 = vpack.c.bf16 %v933_v59, %v932_v54  ;;  %v949_v54 = vld [vmem:[%s22404_s0 + $0x112] sm:$0xff]  ;;  %v950_v59 = vld [vmem:[%s22404_s0 + $0x122] sm:$0xff] }
  0xac   :  { %13147 = vmatprep.subr.bf16.mxu0 %v15465_v2 }
  0xaf   :  { %13148 = vmatpush3.bf16.msra.mxu0 %v15465_v2  ;;  %v73_v2 = vld [vmem:[%s22404_s0 + $0x258] sm:$0xff] }
  0xb0   :  { %13149 = vmatprep.subr.bf16.mxu0 %v15466_v7  ;;  %v16636_v6 = vpack.c.bf16 %v74_v3, %v73_v2  ;;  %v16750_v2 = vpack.c.bf16 %v935_v61, %v934_v60  ;;  %v15473_v3 = vld [vmem:[%s22403_s1 + $0xd8] sm:$0xff]   ;;  %v951_v60 = vld [vmem:[%s22404_s0 + $0x12a] sm:$0xff] }
  0xb2   :  { %13086 = vmatmul.mubr.bf16.gmra.mrb[8].mxu0 %v16462_v8 }
  0xb3   :  { %13089 = vmatprep.mubr.bf16.mxu0 %v16464_v9  ;;  %13150 = vmatpush3.bf16.msra.mxu0 %v15466_v7  ;;  %v16638_v7 = vpack.c.bf16 %v76_v5, %v75_v4  ;;  %v936_v4 = vld [vmem:[%s22404_s0 + $0x7a] sm:$0xff]  ;;  %v937_v5 = vld [vmem:[%s22404_s0 + $0x82] sm:$0xff] }
  0xb4   :  { %13151 = vmatprep.subr.bf16.mxu0 %v15467_v10 }
  0xb7   :  { %13152 = vmatpush3.bf16.msra.mxu0 %v15467_v10  ;;  %v77_v10 = vld [vmem:[%s22404_s0 + $0x288] sm:$0xff] }
  0xb8   :  { %13153 = vmatprep.subr.bf16.mxu0 %v15468_v15  ;;  %v16654_v14 = vpack.c.bf16 %v78_v11, %v77_v10  ;;  %v938_v10 = vld [vmem:[%s22404_s0 + $0x92] sm:$0xff]  ;;  %v939_v11 = vld [vmem:[%s22404_s0 + $0x9a] sm:$0xff] }
  0xba   :  { %13090 = vmatmul.mubr.bf16.gmra.mrb[12].mxu0 %v16486_v16 }
  0xbb   :  { %13093 = vmatprep.mubr.bf16.mxu0 %v16488_v17  ;;  %13154 = vmatpush3.bf16.msra.mxu0 %v15468_v15  ;;  %v16656_v15 = vpack.c.bf16 %v80_v13, %v79_v12  ;;  %v15474_v12 = vld [vmem:[%s22403_s1 + $0xe0] sm:$0xff]   ;;  %v16772_v13 = vpack.c.bf16 %v937_v5, %v936_v4  ;;  %v954_v5 = vld [vmem:[%s22404_s0 + $0x152] sm:$0xff] }
  0xbc   :  { %13155 = vmatprep.subr.bf16.mxu0 %v15469_v18  ;;  %v953_v4 = vld [vmem:[%s22404_s0 + $0x142] sm:$0xff] }
  0xbf   :  { %13156 = vmatpush3.bf16.msra.mxu0 %v15469_v18  ;;  %v81_v18 = vld [vmem:[%s22404_s0 + $0x2b8] sm:$0xff] }
  0xc0   :  { %13221 = vmatprep.subr.bf16.mxu0 %v16510_v23  ;;  %v16672_v22 = vpack.c.bf16 %v82_v19, %v81_v18  ;;  %v16774_v18 = vpack.c.bf16 %v939_v11, %v938_v10  ;;  %v15475_v19 = vld [vmem:[%s22403_s1 + $0xe8] sm:$0xff]   ;;  %v955_v10 = vld [vmem:[%s22404_s0 + $0x15a] sm:$0xff] }
  0xc2   :  { %13094 = vmatmul.mubr.bf16.gmra.mrb[16].mxu0 %v16512_v24 }
  0xc3   :  { %13097 = vmatprep.mubr.bf16.mxu0 %v16514_v25 }
  0xca   :  { %13098 = vmatmul.mubr.bf16.gmra.mrb[20].mxu0 %v16531_v30 }
  0xcb   :  { %13101 = vmatprep.mubr.bf16.mxu0 %v16533_v31 }
  0xd2   :  { %13102 = vmatmul.mubr.bf16.gmra.mrb[24].mxu0 %v16549_v36 }
  0xd3   :  { %13105 = vmatprep.mubr.bf16.mxu0 %v16551_v37 }
  0xda   :  { %13106 = vmatmul.mubr.bf16.gmra.mrb[28].mxu0 %v16567_v42 }
  0xdb   :  { %13109 = vmatprep.mubr.bf16.mxu0 %v107_v43  ;;  %v990_v43 = vpack.c.bf16 %v927_v40, %v926_v39  ;;  %v944_v39 = vld [vmem:[%s22404_s0 + $0xda] sm:$0xff]  ;;  %v945_v40 = vld [vmem:[%s22404_s0 + $0xe2] sm:$0xff] }
  0xdc   :  { %v16822_v46 = vpack.c.bf16 %v945_v40, %v944_v39  ;;  %v961_v39 = vld [vmem:[%s22404_s0 + $0x1d2] sm:$0xff]  ;;  %v962_v40 = vld [vmem:[%s22404_s0 + $0x1e2] sm:$0xff] }
  0xe2   :  { %13110 = vmatmul.mubr.bf16.gmra.mrb[32].mxu0 %v16582_v49 }
  0xe3   :  { %13113 = vmatprep.mubr.bf16.mxu0 %v16584_v50 }
  0xea   :  { %13114 = vmatmul.mubr.bf16.gmra.mrb[36].mxu0 %v16600_v55 }
  0xeb   :  { %13117 = vmatprep.mubr.bf16.mxu0 %v16602_v56 }
  0xf2   :  { %13118 = vmatmul.mubr.bf16.gmra.mrb[40].mxu0 %v16618_v63 }
  0xf3   :  { %13121 = vmatprep.mubr.bf16.mxu0 %v16620_v47 }
  0xfa   :  { %13122 = vmatmul.mubr.bf16.gmra.mrb[44].mxu0 %v16636_v6 }
  0xfb   :  { %13125 = vmatprep.mubr.bf16.mxu0 %v16638_v7 }
 0x102   :  { %13126 = vmatmul.mubr.bf16.gmra.mrb[48].mxu0 %v16654_v14 }
 0x103   :  { %13129 = vmatprep.mubr.bf16.mxu0 %v16656_v15 }
 0x10a   :  { %13130 = vmatmul.mubr.bf16.gmra.mrb[52].mxu0 %v16672_v22 }
 0x10b   :  { %13133 = vmatprep.mubr.bf16.mxu0 %v16674_v26 }
 0x112   :  { %13134 = vmatmul.mubr.bf16.gmra.mrb[56].mxu0 %v16690_v33 }
 0x113   :  { %13137 = vmatprep.mubr.bf16.mxu0 %v16692_v34 }
 0x11a   :  { %13138 = vmatmul.mubr.bf16.gmra.mrb[60].mxu0 %v16708_v41 }
 0x11b   :  { %13157 = vmatprep.mubr.bf16.mxu0 %v990_v43  ;;  %v946_v43 = vld [vmem:[%s22404_s0 + $0xf2] sm:$0xff] }
 0x11c   :  { %v16824_v48 = vpack.c.bf16 %v947_v44, %v946_v43  ;;  %v963_v43 = vld [vmem:[%s22404_s0 + $0x1ea] sm:$0xff] }
 0x122   :  { %13158 = vmatmul.mubr.bf16.vlgmr.msra.gmra.mrb[0].mxu0 %v16723_v51 }
 0x123   :  { %13222 = vmatpush3.bf16.msra.mxu0 %v16510_v23  ;;  %13161 = vmatprep.mubr.bf16.mxu0 %v16725_v52  ;;  %v15472_v23 = vld [vmem:[%s22403_s1 + $0xd0] sm:$0xff]  }
 0x124   :  { %13223 = vmatprep.subr.bf16.mxu0 %v15471_v53 }
 0x127   :  { %13224 = vmatpush3.bf16.msra.mxu0 %v15471_v53  ;;  %v948_v53 = vld [vmem:[%s22404_s0 + $0x10a] sm:$0xff] }
 0x128   :  { %13225 = vmatprep.subr.bf16.mxu0 %v15472_v23  ;;  %v16841_v61 = vpack.c.bf16 %v949_v54, %v948_v53  ;;  %v16894_v53 = vpack.c.bf16 %v963_v43, %v962_v40  ;;  %v964_v54 = vld [vmem:[%s22404_s0 + $0x1fa] sm:$0xff]  ;;  %v974_v40 = vld [vmem:[%s22404_s0 + $0x272] sm:$0xff] }
 0x129   :  { %v975_v43 = vld [vmem:[%s22404_s0 + $0x27a] sm:$0xff] }
 0x12a   :  { %13162 = vmatmul.mubr.bf16.gmra.mrb[4].mxu0 %v16748_v62 }
 0x12b   :  { %13165 = vmatprep.mubr.bf16.mxu0 %v16750_v2  ;;  %13226 = vmatpush3.bf16.msra.mxu0 %v15472_v23  ;;  %v16843_v23 = vpack.c.bf16 %v951_v60, %v950_v59  ;;  %v965_v59 = vld [vmem:[%s22404_s0 + $0x202] sm:$0xff]  ;;  %v966_v60 = vld [vmem:[%s22404_s0 + $0x212] sm:$0xff] }
 0x12c   :  { %13227 = vmatprep.subr.bf16.mxu0 %v15473_v3 }
 0x12f   :  { %13228 = vmatpush3.bf16.msra.mxu0 %v15473_v3  ;;  %v952_v3 = vld [vmem:[%s22404_s0 + $0x13a] sm:$0xff] }
 0x130   :  { %13229 = vmatprep.subr.bf16.mxu0 %v15474_v12  ;;  %v16859_v11 = vpack.c.bf16 %v953_v4, %v952_v3  ;;  %v967_v3 = vld [vmem:[%s22404_s0 + $0x21a] sm:$0xff]  ;;  %v16910_v4 = vpack.c.bf16 %v965_v59, %v964_v54  ;;  %v16948_v59 = vpack.c.bf16 %v975_v43, %v974_v40  ;;  %v982_v40 = vld [vmem:[%s22404_s0 + $0x2d2] sm:$0xff] }
 0x131   :  { %v983_v43 = vld [vmem:[%s22404_s0 + $0x2da] sm:$0xff] }
 0x132   :  { %13166 = vmatmul.mubr.bf16.gmra.mrb[8].mxu0 %v16772_v13 }
 0x133   :  { %13169 = vmatprep.mubr.bf16.mxu0 %v16774_v18  ;;  %13230 = vmatpush3.bf16.msra.mxu0 %v15474_v12  ;;  %v16861_v12 = vpack.c.bf16 %v955_v10, %v954_v5  ;;  %v16912_v5 = vpack.c.bf16 %v967_v3, %v966_v60  ;;  %v968_v10 = vld [vmem:[%s22404_s0 + $0x22a] sm:$0xff]  ;;  %v977_v3 = vld [vmem:[%s22404_s0 + $0x292] sm:$0xff] }
 0x134   :  { %13231 = vmatprep.subr.bf16.mxu0 %v15475_v19  ;;  %v976_v60 = vld [vmem:[%s22404_s0 + $0x28a] sm:$0xff] }
 0x137   :  { %13232 = vmatpush3.bf16.msra.mxu0 %v15475_v19  ;;  %v956_v19 = vld [vmem:[%s22404_s0 + $0x16a] sm:$0xff] }
 0x138   :  { %13233 = vmatprep.subr.bf16.mxu0 %v15476_v29  ;;  %v16877_v28 = vpack.c.bf16 %v957_v20, %v956_v19  ;;  %v969_v19 = vld [vmem:[%s22404_s0 + $0x232] sm:$0xff]  ;;  %v970_v20 = vld [vmem:[%s22404_s0 + $0x242] sm:$0xff] }
 0x13a   :  { %13170 = vmatmul.mubr.bf16.gmra.mrb[12].mxu0 %v16796_v32 }
 0x13b   :  { %13173 = vmatprep.mubr.bf16.mxu0 %v16798_v35  ;;  %13234 = vmatpush3.bf16.msra.mxu0 %v15476_v29  ;;  %v1006_v29 = vpack.c.bf16 %v959_v27, %v958_v21  ;;  %v971_v21 = vld [vmem:[%s22404_s0 + $0x24a] sm:$0xff]  ;;  %v16928_v27 = vpack.c.bf16 %v969_v19, %v968_v10  ;;  %v978_v10 = vld [vmem:[%s22404_s0 + $0x2a2] sm:$0xff] }
 0x13c   :  { %13235 = vmatprep.subr.bf16.mxu0 %v15477_v38  ;;  %v979_v19 = vld [vmem:[%s22404_s0 + $0x2aa] sm:$0xff] }
 0x13f   :  { %13236 = vmatpush3.bf16.msra.mxu0 %v15477_v38  ;;  %v960_v38 = vld [vmem:[%s22404_s0 + $0x1ca] sm:$0xff] }
 0x140   :  { %13301 = vmatprep.subr.bf16.mxu0 %v16820_v45  ;;  %v16892_v44 = vpack.c.bf16 %v961_v39, %v960_v38  ;;  %v972_v38 = vld [vmem:[%s22404_s0 + $0x25a] sm:$0xff]  ;;  %v973_v39 = vld [vmem:[%s22404_s0 + $0x262] sm:$0xff] }
 0x141   :  { %v16946_v54 = vpack.c.bf16 %v973_v39, %v972_v38  ;;  %v980_v38 = vld [vmem:[%s22404_s0 + $0x2ba] sm:$0xff]  ;;  %v981_v39 = vld [vmem:[%s22404_s0 + $0x2c2] sm:$0xff] }
 0x142   :  { %13174 = vmatmul.mubr.bf16.gmra.mrb[16].mxu0 %v16822_v46 }
 0x143   :  { %13177 = vmatprep.mubr.bf16.mxu0 %v16824_v48 }
 0x14a   :  { %13178 = vmatmul.mubr.bf16.gmra.mrb[20].mxu0 %v16841_v61 }
 0x14b   :  { %13181 = vmatprep.mubr.bf16.mxu0 %v16843_v23 }
 0x152   :  { %13182 = vmatmul.mubr.bf16.gmra.mrb[24].mxu0 %v16859_v11 }
 0x153   :  { %13185 = vmatprep.mubr.bf16.mxu0 %v16861_v12 }
 0x15a   :  { %13186 = vmatmul.mubr.bf16.gmra.mrb[28].mxu0 %v16877_v28 }
 0x15b   :  { %13189 = vmatprep.mubr.bf16.mxu0 %v1006_v29  ;;  %v16930_v29 = vpack.c.bf16 %v971_v21, %v970_v20  ;;  %v16964_v20 = vpack.c.bf16 %v977_v3, %v976_v60  ;;  %v16966_v21 = vpack.c.bf16 %v979_v19, %v978_v10  ;;  %v16982_v60 = vpack.c.bf16 %v981_v39, %v980_v38  ;;  %v984_v10 = vld [vmem:[%s22404_s0 + $0x2ea] sm:$0xff]  ;;  %v985_v19 = vld [vmem:[%s22404_s0 + $0x2f2] sm:$0xff] }
 0x15c   :  { %v16984_v3 = vpack.c.bf16 %v983_v43, %v982_v40  ;;  %v987_v38 = vld [vmem:[%s22404_s0 + $0x30a] sm:$0xff]  ;;  %v17000_v39 = vpack.c.bf16 %v985_v19, %v984_v10  ;;  %v988_v43 = vld [vmem:[%s22404_s0 + $0x31a] sm:$0xff] }
 0x15d   :  { %22627 = vst [vmem:[#allocation3_spill] sm:$0xff] %v16966_v21  ;;  %22628 = vst [vmem:[#allocation4_spill] sm:$0xff] %v16982_v60  ;;  %v11436_v10 = vld [vmem:[%s22404_s0 + $0x99] sm:$0xff]  ;;  %v11437_v19 = vld [vmem:[%s22404_s0 + $0xa9] sm:$0xff] }
 0x15e   :  { %22629 = vst [vmem:[#allocation5_spill] sm:$0xff] %v16984_v3 }
 0x162   :  { %13190 = vmatmul.mubr.bf16.gmra.mrb[32].mxu0 %v16892_v44 }
 0x163   :  { %13193 = vmatprep.mubr.bf16.mxu0 %v16894_v53 }
 0x16a   :  { %13194 = vmatmul.mubr.bf16.gmra.mrb[36].mxu0 %v16910_v4 }
 0x16b   :  { %13197 = vmatprep.mubr.bf16.mxu0 %v16912_v5 }
 0x172   :  { %13198 = vmatmul.mubr.bf16.gmra.mrb[40].mxu0 %v16928_v27 }
 0x173   :  { %13201 = vmatprep.mubr.bf16.mxu0 %v16930_v29 }
 0x17a   :  { %13202 = vmatmul.mubr.bf16.gmra.mrb[44].mxu0 %v16946_v54 }
 0x17b   :  { %13205 = vmatprep.mubr.bf16.mxu0 %v16948_v59 }
 0x182   :  { %13206 = vmatmul.mubr.bf16.gmra.mrb[48].mxu0 %v16964_v20 }
 0x183   :  { %13209 = vmatprep.mubr.bf16.mxu0 %v16966_v21  ;;  %v986_v21 = vld [vmem:[%s22404_s0 + $0x302] sm:$0xff] }
 0x184   :  { %v17002_v40 = vpack.c.bf16 %v987_v38, %v986_v21  ;;  %v15479_v21 = vld [vmem:[%s22403_s1 + $0x108] sm:$0xff]   ;;  %v11438_v38 = vld [vmem:[%s22404_s0 + $0xb1] sm:$0xff] }
 0x18a   :  { %13210 = vmatmul.mubr.bf16.gmra.mrb[52].mxu0 %v16982_v60 }
 0x18b   :  { %13213 = vmatprep.mubr.bf16.mxu0 %v16984_v3  ;;  %v989_v3 = vld [vmem:[%s22404_s0 + $0x322] sm:$0xff] }
 0x18c   :  { %v17012_v60 = vpack.c.bf16 %v989_v3, %v988_v43  ;;  %v15480_v3 = vld [vmem:[%s22403_s1 + $0x110] sm:$0xff]   ;;  %v15490_v43 = vld [vmem:[%s22403_s1 + $0x160] sm:$0xff]  }
 0x192   :  { %13214 = vmatmul.mubr.bf16.gmra.mrb[56].mxu0 %v17000_v39 }
 0x193   :  { %13217 = vmatprep.mubr.bf16.mxu0 %v17002_v40 }
 0x19a   :  { %13218 = vmatmul.mubr.bf16.gmra.mrb[60].mxu0 %v17012_v60 }
 0x19b   :  { %13237 = vmatprep.mubr.bf16.mxu0 %v16413_v57  ;;  %v15481_v57 = vld [vmem:[%s22403_s1 + $0x118] sm:$0xff]  }
 0x1a2   :  { %13238 = vmatmul.mubr.bf16.vlgmr.msra.gmra.mrb[0].mxu0 %v16415_v58  ;;  %v15482_v58 = vld [vmem:[%s22403_s1 + $0x120] sm:$0xff]  }
 0x1a3   :  { %13302 = vmatpush3.bf16.msra.mxu0 %v16820_v45  ;;  %13241 = vmatprep.mubr.bf16.mxu0 %v16438_v0  ;;  %v15483_v0 = vld [vmem:[%s22403_s1 + $0x128] sm:$0xff]   ;;  %v11435_v45 = vld [vmem:[%s22404_s0 + $0x91] sm:$0xff] }
 0x1a4   :  { %13303 = vmatprep.subr.bf16.mxu0 %v15479_v21 }
 0x1a7   :  { %13304 = vmatpush3.bf16.msra.mxu0 %v15479_v21  ;;  %v17154_v21 = vpack.c.bf16 %v11436_v10, %v11435_v45  ;;  %v11453_v45 = vld [vmem:[%s22404_s0 + $0x169] sm:$0xff]  ;;  %v11454_v10 = vld [vmem:[%s22404_s0 + $0x171] sm:$0xff] }
 0x1a8   :  { %13305 = vmatprep.subr.bf16.mxu0 %v15480_v3 }
 0x1aa   :  { %13242 = vmatmul.mubr.bf16.gmra.mrb[4].mxu0 %v16440_v1  ;;  %v15484_v1 = vld [vmem:[%s22403_s1 + $0x130] sm:$0xff]  }
 0x1ab   :  { %13245 = vmatprep.mubr.bf16.mxu0 %v16462_v8  ;;  %13306 = vmatpush3.bf16.msra.mxu0 %v15480_v3  ;;  %v15485_v8 = vld [vmem:[%s22403_s1 + $0x138] sm:$0xff]   ;;  %v17156_v3 = vpack.c.bf16 %v11438_v38, %v11437_v19  ;;  %v17243_v38 = vpack.c.bf16 %v11454_v10, %v11453_v45  ;;  %v11467_v45 = vld [vmem:[%s22404_s0 + $0x241] sm:$0xff]  ;;  %v11468_v10 = vld [vmem:[%s22404_s0 + $0x249] sm:$0xff] }
 0x1ac   :  { %13307 = vmatprep.subr.bf16.mxu0 %v15481_v57 }
 0x1af   :  { %13308 = vmatpush3.bf16.msra.mxu0 %v15481_v57  ;;  %v15491_v57 = vld [vmem:[%s22403_s1 + $0x168] sm:$0xff]  }
 0x1b0   :  { %13309 = vmatprep.subr.bf16.mxu0 %v15482_v58 }
 0x1b2   :  { %13246 = vmatmul.mubr.bf16.gmra.mrb[8].mxu0 %v16464_v9  ;;  %v15486_v9 = vld [vmem:[%s22403_s1 + $0x140] sm:$0xff]  }
 0x1b3   :  { %13249 = vmatprep.mubr.bf16.mxu0 %v16486_v16  ;;  %13310 = vmatpush3.bf16.msra.mxu0 %v15482_v58  ;;  %v11367_v16 = vld [vmem:[%s22404_s0 + $0x180] sm:$0xff] }
 0x1b4   :  { %13311 = vmatprep.subr.bf16.mxu0 %v15483_v0  ;;  %v11439_v58 = vld [vmem:[%s22404_s0 + $0xc1] sm:$0xff] }
 0x1b7   :  { %13312 = vmatpush3.bf16.msra.mxu0 %v15483_v0  ;;  %v11440_v0 = vld [vmem:[%s22404_s0 + $0xc9] sm:$0xff] }
 0x1b8   :  { %13313 = vmatprep.subr.bf16.mxu0 %v15484_v1 }
 0x1ba   :  { %13250 = vmatmul.mubr.bf16.gmra.mrb[12].mxu0 %v16488_v17  ;;  %v11368_v17 = vld [vmem:[%s22404_s0 + $0x188] sm:$0xff] }
 0x1bb   :  { %13253 = vmatprep.mubr.bf16.mxu0 %v16512_v24  ;;  %13314 = vmatpush3.bf16.msra.mxu0 %v15484_v1  ;;  %v17061_v24 = vpack.c.bf16 %v11368_v17, %v11367_v16  ;;  %v11441_v1 = vld [vmem:[%s22404_s0 + $0xd9] sm:$0xff]  ;;  %v17178_v16 = vpack.c.bf16 %v11440_v0, %v11439_v58  ;;  %v11457_v58 = vld [vmem:[%s22404_s0 + $0x1c9] sm:$0xff]  ;;  %v11458_v0 = vld [vmem:[%s22404_s0 + $0x1d1] sm:$0xff] }
 0x1bc   :  { %13315 = vmatprep.subr.bf16.mxu0 %v15485_v8 }
 0x1bf   :  { %13316 = vmatpush3.bf16.msra.mxu0 %v15485_v8  ;;  %v11442_v8 = vld [vmem:[%s22404_s0 + $0xe1] sm:$0xff] }
 0x1c0   :  { %13381 = vmatprep.subr.bf16.mxu0 %v15486_v9  ;;  %v17180_v17 = vpack.c.bf16 %v11442_v8, %v11441_v1  ;;  %v2035_v8 = vpack.c.bf16 %v11458_v0, %v11457_v58  ;;  %v17310_v58 = vpack.c.bf16 %v11468_v10, %v11467_v45  ;;  %v11478_v45 = vld [vmem:[%s22404_s0 + $0x2c1] sm:$0xff] }
 0x1c2   :  { %13254 = vmatmul.mubr.bf16.gmra.mrb[16].mxu0 %v16514_v25  ;;  %v11399_v25 = vld [vmem:[%s22404_s0 + $0x330] sm:$0xff] }
 0x1c3   :  { %13257 = vmatprep.mubr.bf16.mxu0 %v16531_v30  ;;  %v11400_v30 = vld [vmem:[%s22404_s0 + $0x338] sm:$0xff] }
 0x1ca   :  { %13258 = vmatmul.mubr.bf16.gmra.mrb[20].mxu0 %v16533_v31  ;;  %v11425_v31 = vld [vmem:[%s22404_s0 + $0x19] sm:$0xff] }
 0x1cb   :  { %13261 = vmatprep.mubr.bf16.mxu0 %v16549_v36  ;;  %v11426_v36 = vld [vmem:[%s22404_s0 + $0x21] sm:$0xff] }
 0x1d2   :  { %13262 = vmatmul.mubr.bf16.gmra.mrb[24].mxu0 %v16551_v37  ;;  %v17091_v37 = vpack.c.bf16 %v11400_v30, %v11399_v25  ;;  %v15493_v25 = vld [vmem:[%s22403_s1 + $0x178] sm:$0xff]  }
 0x1d3   :  { %13265 = vmatprep.mubr.bf16.mxu0 %v16567_v42  ;;  %v2019_v42 = vpack.c.bf16 %v11426_v36, %v11425_v31  ;;  %v11443_v30 = vld [vmem:[%s22404_s0 + $0xf1] sm:$0xff]  ;;  %v11444_v31 = vld [vmem:[%s22404_s0 + $0xf9] sm:$0xff]  ;;  %v11445_v36 = vld [vmem:[%s22404_s0 + $0x109] sm:$0xff] }
 0x1da   :  { %13266 = vmatmul.mubr.bf16.gmra.mrb[28].mxu0 %v17061_v24 }
 0x1db   :  { %13269 = vmatprep.mubr.bf16.mxu0 %v16582_v49  ;;  %v11427_v49 = vld [vmem:[%s22404_s0 + $0x31] sm:$0xff] }
 0x1e2   :  { %13270 = vmatmul.mubr.bf16.gmra.mrb[32].mxu0 %v16584_v50  ;;  %v11428_v50 = vld [vmem:[%s22404_s0 + $0x39] sm:$0xff] }
 0x1e3   :  { %13273 = vmatprep.mubr.bf16.mxu0 %v16600_v55  ;;  %v11429_v55 = vld [vmem:[%s22404_s0 + $0x49] sm:$0xff] }
 0x1ea   :  { %13274 = vmatmul.mubr.bf16.gmra.mrb[36].mxu0 %v16602_v56  ;;  %v11430_v56 = vld [vmem:[%s22404_s0 + $0x51] sm:$0xff] }
 0x1eb   :  { %13277 = vmatprep.mubr.bf16.mxu0 %v16618_v63  ;;  %v17106_v63 = vpack.c.bf16 %v11428_v50, %v11427_v49  ;;  %v17202_v49 = vld [vmem:[%s22403_s1 + $0x180] sm:$0xff]   ;;  %v17204_v50 = vpack.c.bf16 %v11444_v31, %v11443_v30 }
 0x1ec   :  { %v11461_v30 = vld [vmem:[%s22404_s0 + $0x1f9] sm:$0xff]  ;;  %v11462_v31 = vld [vmem:[%s22404_s0 + $0x201] sm:$0xff] }
 0x1f2   :  { %13278 = vmatmul.mubr.bf16.gmra.mrb[40].mxu0 %v16620_v47  ;;  %v17108_v47 = vpack.c.bf16 %v11430_v56, %v11429_v55  ;;  %v11447_v56 = vld [vmem:[%s22404_s0 + $0x121] sm:$0xff] }
 0x1f3   :  { %13281 = vmatprep.mubr.bf16.mxu0 %v16636_v6  ;;  %v15487_v6 = vld [vmem:[%s22403_s1 + $0x148] sm:$0xff]  }
 0x1fa   :  { %13282 = vmatmul.mubr.bf16.gmra.mrb[44].mxu0 %v16638_v7  ;;  %v11431_v7 = vld [vmem:[%s22404_s0 + $0x61] sm:$0xff] }
 0x1fb   :  { %13285 = vmatprep.mubr.bf16.mxu0 %v16654_v14  ;;  %v11432_v14 = vld [vmem:[%s22404_s0 + $0x69] sm:$0xff] }
 0x202   :  { %13286 = vmatmul.mubr.bf16.gmra.mrb[48].mxu0 %v16656_v15  ;;  %v11433_v15 = vld [vmem:[%s22404_s0 + $0x79] sm:$0xff] }
 0x203   :  { %13289 = vmatprep.mubr.bf16.mxu0 %v16672_v22  ;;  %v11434_v22 = vld [vmem:[%s22404_s0 + $0x81] sm:$0xff] }
 0x20a   :  { %13290 = vmatmul.mubr.bf16.gmra.mrb[52].mxu0 %v16674_v26  ;;  %v15488_v26 = vld [vmem:[%s22403_s1 + $0x150] sm:$0xff]  }
 0x20b   :  { %13293 = vmatprep.mubr.bf16.mxu0 %v16690_v33  ;;  %v17130_v33 = vpack.c.bf16 %v11432_v14, %v11431_v7  ;;  %v11449_v7 = vld [vmem:[%s22404_s0 + $0x139] sm:$0xff]  ;;  %v11450_v14 = vld [vmem:[%s22404_s0 + $0x141] sm:$0xff] }
 0x212   :  { %13294 = vmatmul.mubr.bf16.gmra.mrb[56].mxu0 %v16692_v34  ;;  %v17132_v34 = vpack.c.bf16 %v11434_v22, %v11433_v15  ;;  %v17225_v22 = vpack.c.bf16 %v11450_v14, %v11449_v7  ;;  %v11465_v7 = vld [vmem:[%s22404_s0 + $0x229] sm:$0xff]  ;;  %v11466_v14 = vld [vmem:[%s22404_s0 + $0x231] sm:$0xff] }
 0x213   :  { %13297 = vmatprep.mubr.bf16.mxu0 %v16708_v41  ;;  %v15489_v41 = vld [vmem:[%s22403_s1 + $0x158] sm:$0xff]  }
 0x21a   :  { %13298 = vmatmul.mubr.bf16.gmra.mrb[60].mxu0 %v17091_v37 }
 0x21b   :  { %13317 = vmatprep.mubr.bf16.mxu0 %v2019_v42  ;;  %v11446_v42 = vld [vmem:[%s22404_s0 + $0x111] sm:$0xff] }
 0x21c   :  { %v17206_v55 = vpack.c.bf16 %v11446_v42, %v11445_v36  ;;  %v17276_v42 = vpack.c.bf16 %v11462_v31, %v11461_v30  ;;  %v11474_v30 = vld [vmem:[%s22404_s0 + $0x291] sm:$0xff] }
 0x222   :  { %13318 = vmatmul.mubr.bf16.vlgmr.msra.gmra.mrb[0].mxu0 %v17106_v63 }
 0x223   :  { %13382 = vmatpush3.bf16.msra.mxu0 %v15486_v9  ;;  %13321 = vmatprep.mubr.bf16.mxu0 %v17108_v47  ;;  %v15492_v9 = vld [vmem:[%s22403_s1 + $0x170] sm:$0xff]  }
 0x224   :  { %13383 = vmatprep.subr.bf16.mxu0 %v15487_v6 }
 0x227   :  { %13384 = vmatpush3.bf16.msra.mxu0 %v15487_v6  ;;  %v11448_v6 = vld [vmem:[%s22404_s0 + $0x129] sm:$0xff] }
 0x228   :  { %13385 = vmatprep.subr.bf16.mxu0 %v15488_v26  ;;  %v17223_v15 = vpack.c.bf16 %v11448_v6, %v11447_v56  ;;  %v11463_v56 = vld [vmem:[%s22404_s0 + $0x211] sm:$0xff]  ;;  %v11464_v6 = vld [vmem:[%s22404_s0 + $0x219] sm:$0xff] }
 0x22a   :  { %13322 = vmatmul.mubr.bf16.gmra.mrb[4].mxu0 %v17130_v33 }
 0x22b   :  { %13325 = vmatprep.mubr.bf16.mxu0 %v17132_v34  ;;  %13386 = vmatpush3.bf16.msra.mxu0 %v15488_v26  ;;  %v11451_v26 = vld [vmem:[%s22404_s0 + $0x151] sm:$0xff] }
 0x22c   :  { %13387 = vmatprep.subr.bf16.mxu0 %v15489_v41 }
 0x22f   :  { %13388 = vmatpush3.bf16.msra.mxu0 %v15489_v41  ;;  %v11452_v41 = vld [vmem:[%s22404_s0 + $0x159] sm:$0xff] }
 0x230   :  { %13389 = vmatprep.subr.bf16.mxu0 %v15490_v43  ;;  %v17241_v19 = vpack.c.bf16 %v11452_v41, %v11451_v26  ;;  %v17292_v26 = vpack.c.bf16 %v11464_v6, %v11463_v56  ;;  %v17294_v41 = vpack.c.bf16 %v11466_v14, %v11465_v7  ;;  %v11475_v6 = vld [vmem:[%s22404_s0 + $0x2a1] sm:$0xff]  ;;  %v11476_v7 = vld [vmem:[%s22404_s0 + $0x2a9] sm:$0xff]  ;;  %v11477_v14 = vld [vmem:[%s22404_s0 + $0x2b9] sm:$0xff] }
 0x231   :  { %v17346_v10 = vpack.c.bf16 %v11476_v7, %v11475_v6  ;;  %v11483_v7 = vld [vmem:[%s22404_s0 + $0x301] sm:$0xff] }
 0x232   :  { %13326 = vmatmul.mubr.bf16.gmra.mrb[8].mxu0 %v17154_v21 }
 0x233   :  { %13329 = vmatprep.mubr.bf16.mxu0 %v17156_v3  ;;  %13390 = vmatpush3.bf16.msra.mxu0 %v15490_v43  ;;  %v11455_v43 = vld [vmem:[%s22404_s0 + $0x181] sm:$0xff] }
 0x234   :  { %13391 = vmatprep.subr.bf16.mxu0 %v15491_v57 }
 0x237   :  { %13392 = vmatpush3.bf16.msra.mxu0 %v15491_v57  ;;  %v11456_v57 = vld [vmem:[%s22404_s0 + $0x189] sm:$0xff] }
 0x238   :  { %13393 = vmatprep.subr.bf16.mxu0 %v15492_v9  ;;  %v17259_v1 = vpack.c.bf16 %v11456_v57, %v11455_v43  ;;  %v11469_v43 = vld [vmem:[%s22404_s0 + $0x259] sm:$0xff]  ;;  %v11470_v57 = vld [vmem:[%s22404_s0 + $0x261] sm:$0xff] }
 0x239   :  { %v17312_v0 = vpack.c.bf16 %v11470_v57, %v11469_v43  ;;  %v17348_v43 = vpack.c.bf16 %v11478_v45, %v11477_v14  ;;  %v11479_v57 = vld [vmem:[%s22404_s0 + $0x2d1] sm:$0xff]  ;;  %v11484_v14 = vld [vmem:[%s22404_s0 + $0x309] sm:$0xff]  ;;  %v11485_v45 = vld [vmem:[%s22404_s0 + $0x319] sm:$0xff] }
 0x23a   :  { %13330 = vmatmul.mubr.bf16.gmra.mrb[12].mxu0 %v17178_v16 }
 0x23b   :  { %13333 = vmatprep.mubr.bf16.mxu0 %v17180_v17  ;;  %13394 = vmatpush3.bf16.msra.mxu0 %v15492_v9  ;;  %v11459_v9 = vld [vmem:[%s22404_s0 + $0x1e1] sm:$0xff] }
 0x23c   :  { %13395 = vmatprep.subr.bf16.mxu0 %v15493_v25 }
 0x23f   :  { %13396 = vmatpush3.bf16.msra.mxu0 %v15493_v25  ;;  %v11460_v25 = vld [vmem:[%s22404_s0 + $0x1e9] sm:$0xff] }
 0x240   :  { %13461 = vmatprep.subr.bf16.mxu0 %v17202_v49  ;;  %v17274_v36 = vpack.c.bf16 %v11460_v25, %v11459_v9  ;;  %v11472_v9 = vld [vmem:[%s22404_s0 + $0x279] sm:$0xff]  ;;  %v11473_v25 = vld [vmem:[%s22404_s0 + $0x289] sm:$0xff] }
 0x241   :  { %v17330_v56 = vpack.c.bf16 %v11474_v30, %v11473_v25  ;;  %v11482_v25 = vld [vmem:[%s22404_s0 + $0x2f1] sm:$0xff] }
 0x242   :  { %13334 = vmatmul.mubr.bf16.gmra.mrb[16].mxu0 %v17204_v50 }
 0x243   :  { %13337 = vmatprep.mubr.bf16.mxu0 %v17206_v55 }
 0x24a   :  { %13338 = vmatmul.mubr.bf16.gmra.mrb[20].mxu0 %v17223_v15 }
 0x24b   :  { %13341 = vmatprep.mubr.bf16.mxu0 %v17225_v22 }
 0x252   :  { %13342 = vmatmul.mubr.bf16.gmra.mrb[24].mxu0 %v17241_v19 }
 0x253   :  { %13345 = vmatprep.mubr.bf16.mxu0 %v17243_v38 }
 0x25a   :  { %13346 = vmatmul.mubr.bf16.gmra.mrb[28].mxu0 %v17259_v1 }
 0x25b   :  { %13349 = vmatprep.mubr.bf16.mxu0 %v2035_v8  ;;  %v11471_v8 = vld [vmem:[%s22404_s0 + $0x271] sm:$0xff] }
 0x25c   :  { %v17328_v31 = vpack.c.bf16 %v11472_v9, %v11471_v8  ;;  %v11480_v8 = vld [vmem:[%s22404_s0 + $0x2d9] sm:$0xff]  ;;  %v11481_v9 = vld [vmem:[%s22404_s0 + $0x2e9] sm:$0xff] }
 0x25d   :  { %v17364_v30 = vpack.c.bf16 %v11480_v8, %v11479_v57  ;;  %v17366_v6 = vpack.c.bf16 %v11482_v25, %v11481_v9  ;;  %v11486_v57 = vld [vmem:[%s22404_s0 + $0x321] sm:$0xff]  ;;  %v17382_v8 = vpack.c.bf16 %v11484_v14, %v11483_v7  ;;  %v11487_v25 = vld [vmem:[%s22404_s0 + $0x331] sm:$0xff] }
 0x25e   :  { %v17384_v9 = vpack.c.bf16 %v11486_v57, %v11485_v45  ;;  %v15495_v7 = vld [vmem:[%s22403_s1 + $0x188] sm:$0xff]   ;;  %v11610_v14 = vld [vmem:[%s22404_s0 + $0x98] sm:$0xff]  ;;  %v15504_v45 = vld [vmem:[%s22403_s1 + $0x1d0] sm:$0xff]  }
 0x25f   :  { %22630 = vst [vmem:[#allocation6_spill] sm:$0xff] %v17364_v30  ;;  %22631 = vst [vmem:[#allocation7_spill] sm:$0xff] %v17366_v6 }
 0x262   :  { %13350 = vmatmul.mubr.bf16.gmra.mrb[32].mxu0 %v17274_v36 }
 0x263   :  { %13353 = vmatprep.mubr.bf16.mxu0 %v17276_v42 }
 0x26a   :  { %13354 = vmatmul.mubr.bf16.gmra.mrb[36].mxu0 %v17292_v26 }
 0x26b   :  { %13357 = vmatprep.mubr.bf16.mxu0 %v17294_v41 }
 0x272   :  { %13358 = vmatmul.mubr.bf16.gmra.mrb[40].mxu0 %v17310_v58 }
 0x273   :  { %13361 = vmatprep.mubr.bf16.mxu0 %v17312_v0 }
 0x27a   :  { %13362 = vmatmul.mubr.bf16.gmra.mrb[44].mxu0 %v17328_v31 }
 0x27b   :  { %13365 = vmatprep.mubr.bf16.mxu0 %v17330_v56 }
 0x282   :  { %13366 = vmatmul.mubr.bf16.gmra.mrb[48].mxu0 %v17346_v10 }
 0x283   :  { %13369 = vmatprep.mubr.bf16.mxu0 %v17348_v43 }
 0x28a   :  { %13370 = vmatmul.mubr.bf16.gmra.mrb[52].mxu0 %v17364_v30 }
 0x28b   :  { %13373 = vmatprep.mubr.bf16.mxu0 %v17366_v6  ;;  %v11488_v6 = vld [vmem:[%s22404_s0 + $0x339] sm:$0xff] }
 0x28c   :  { %v17394_v30 = vpack.c.bf16 %v11488_v6, %v11487_v25  ;;  %v15496_v6 = vld [vmem:[%s22403_s1 + $0x190] sm:$0xff]  }
 0x292   :  { %13374 = vmatmul.mubr.bf16.gmra.mrb[56].mxu0 %v17382_v8 }
 0x293   :  { %13377 = vmatprep.mubr.bf16.mxu0 %v17384_v9 }
 0x29a   :  { %13378 = vmatmul.mubr.bf16.gmra.mrb[60].mxu0 %v17394_v30 }
 0x29b   :  { %13397 = vmatprep.mubr.bf16.mxu0 %v16723_v51  ;;  %v15497_v51 = vld [vmem:[%s22403_s1 + $0x198] sm:$0xff]  }
 0x2a2   :  { %13398 = vmatmul.mubr.bf16.vlgmr.msra.gmra.mrb[0].mxu0 %v16725_v52  ;;  %v15498_v52 = vld [vmem:[%s22403_s1 + $0x1a0] sm:$0xff]  }
 0x2a3   :  { %13462 = vmatpush3.bf16.msra.mxu0 %v17202_v49  ;;  %13401 = vmatprep.mubr.bf16.mxu0 %v16748_v62  ;;  %v15499_v62 = vld [vmem:[%s22403_s1 + $0x1a8] sm:$0xff]   ;;  %v11609_v49 = vld [vmem:[%s22404_s0 + $0x90] sm:$0xff] }
 0x2a4   :  { %13463 = vmatprep.subr.bf16.mxu0 %v15495_v7  ;;  %v3052_v25 = vpack.c.bf16 %v11610_v14, %v11609_v49  ;;  %v11626_v49 = vld [vmem:[%s22404_s0 + $0x158] sm:$0xff] }
 0x2a7   :  { %13464 = vmatpush3.bf16.msra.mxu0 %v15495_v7  ;;  %v15505_v7 = vld [vmem:[%s22403_s1 + $0x1d8] sm:$0xff]  }
 0x2a8   :  { %13465 = vmatprep.subr.bf16.mxu0 %v15496_v6 }
 0x2aa   :  { %13402 = vmatmul.mubr.bf16.gmra.mrb[4].mxu0 %v16750_v2  ;;  %v15500_v2 = vld [vmem:[%s22403_s1 + $0x1b0] sm:$0xff]  }
 0x2ab   :  { %13405 = vmatprep.mubr.bf16.mxu0 %v16772_v13  ;;  %13466 = vmatpush3.bf16.msra.mxu0 %v15496_v6  ;;  %v15501_v13 = vld [vmem:[%s22403_s1 + $0x1b8] sm:$0xff]   ;;  %v11611_v6 = vld [vmem:[%s22404_s0 + $0xa8] sm:$0xff] }
 0x2ac   :  { %13467 = vmatprep.subr.bf16.mxu0 %v15497_v51 }
 0x2af   :  { %13468 = vmatpush3.bf16.msra.mxu0 %v15497_v51  ;;  %v11612_v51 = vld [vmem:[%s22404_s0 + $0xb0] sm:$0xff] }
 0x2b0   :  { %13469 = vmatprep.subr.bf16.mxu0 %v15498_v52 }
 0x2b2   :  { %13406 = vmatmul.mubr.bf16.gmra.mrb[8].mxu0 %v16774_v18  ;;  %v15502_v18 = vld [vmem:[%s22403_s1 + $0x1c0] sm:$0xff]  }
 0x2b3   :  { %13409 = vmatprep.mubr.bf16.mxu0 %v16796_v32  ;;  %13470 = vmatpush3.bf16.msra.mxu0 %v15498_v52  ;;  %v11543_v32 = vld [vmem:[%s22404_s0 + $0x182] sm:$0xff] }
 0x2b4   :  { %13471 = vmatprep.subr.bf16.mxu0 %v15499_v62  ;;  %v11613_v52 = vld [vmem:[%s22404_s0 + $0xc0] sm:$0xff] }
 0x2b7   :  { %13472 = vmatpush3.bf16.msra.mxu0 %v15499_v62  ;;  %v11614_v62 = vld [vmem:[%s22404_s0 + $0xc8] sm:$0xff] }
 0x2b8   :  { %13473 = vmatprep.subr.bf16.mxu0 %v15500_v2 }
 0x2ba   :  { %13410 = vmatmul.mubr.bf16.gmra.mrb[12].mxu0 %v16798_v35  ;;  %v11544_v35 = vld [vmem:[%s22404_s0 + $0x18a] sm:$0xff] }
 0x2bb   :  { %13413 = vmatprep.mubr.bf16.mxu0 %v16822_v46  ;;  %13474 = vmatpush3.bf16.msra.mxu0 %v15500_v2  ;;  %v17443_v46 = vpack.c.bf16 %v11544_v35, %v11543_v32  ;;  %v15506_v2 = vld [vmem:[%s22403_s1 + $0x1e0] sm:$0xff]   ;;  %v15507_v32 = vld [vmem:[%s22403_s1 + $0x1e8] sm:$0xff]   ;;  %v11615_v35 = vld [vmem:[%s22404_s0 + $0xd8] sm:$0xff] }
 0x2bc   :  { %13475 = vmatprep.subr.bf16.mxu0 %v15501_v13 }
 0x2bf   :  { %13476 = vmatpush3.bf16.msra.mxu0 %v15501_v13  ;;  %v3053_v13 = vpack.c.bf16 %v11612_v51, %v11611_v6  ;;  %v11631_v6 = vld [vmem:[%s22404_s0 + $0x198] sm:$0xff]  ;;  %v11632_v51 = vld [vmem:[%s22404_s0 + $0x1a0] sm:$0xff] }
 0x2c0   :  { %13541 = vmatprep.subr.bf16.mxu0 %v15502_v18 }
 0x2c2   :  { %13414 = vmatmul.mubr.bf16.gmra.mrb[16].mxu0 %v16824_v48  ;;  %v22632_v48 = vld [vmem:[#allocation3_spill] sm:$0xff] }
 0x2c3   :  { %13417 = vmatprep.mubr.bf16.mxu0 %v16841_v61  ;;  %v22633_v61 = vld [vmem:[#allocation4_spill] sm:$0xff] }
 0x2ca   :  { %13418 = vmatmul.mubr.bf16.gmra.mrb[20].mxu0 %v16843_v23  ;;  %v22634_v23 = vld [vmem:[#allocation5_spill] sm:$0xff] }
 0x2cb   :  { %13421 = vmatprep.mubr.bf16.mxu0 %v16859_v11  ;;  %v11575_v11 = vld [vmem:[%s22404_s0 + $0x332] sm:$0xff] }
 0x2d2   :  { %13422 = vmatmul.mubr.bf16.gmra.mrb[24].mxu0 %v16861_v12  ;;  %v11576_v12 = vld [vmem:[%s22404_s0 + $0x33a] sm:$0xff] }
 0x2d3   :  { %13425 = vmatprep.mubr.bf16.mxu0 %v16877_v28  ;;  %v11601_v28 = vld [vmem:[%s22404_s0 + $0x30] sm:$0xff] }
 0x2da   :  { %13426 = vmatmul.mubr.bf16.gmra.mrb[28].mxu0 %v17443_v46 }
 0x2db   :  { %13429 = vmatprep.mubr.bf16.mxu0 %v16892_v44  ;;  %v11602_v44 = vld [vmem:[%s22404_s0 + $0x38] sm:$0xff] }
 0x2e2   :  { %13430 = vmatmul.mubr.bf16.gmra.mrb[32].mxu0 %v16894_v53  ;;  %v17473_v53 = vpack.c.bf16 %v11576_v12, %v11575_v11  ;;  %v15508_v11 = vld [vmem:[%s22403_s1 + $0x1f0] sm:$0xff]  }
 0x2e3   :  { %13433 = vmatprep.mubr.bf16.mxu0 %v16910_v4  ;;  %v3048_v4 = vpack.c.bf16 %v11602_v44, %v11601_v28  ;;  %v15509_v44 = vld [vmem:[%s22403_s1 + $0x1f8] sm:$0xff]  }
 0x2ea   :  { %13434 = vmatmul.mubr.bf16.gmra.mrb[36].mxu0 %v16912_v5  ;;  %v11603_v5 = vld [vmem:[%s22404_s0 + $0x48] sm:$0xff] }
 0x2eb   :  { %13437 = vmatprep.mubr.bf16.mxu0 %v16928_v27  ;;  %v11604_v27 = vld [vmem:[%s22404_s0 + $0x50] sm:$0xff] }
 0x2f2   :  { %13438 = vmatmul.mubr.bf16.gmra.mrb[40].mxu0 %v16930_v29  ;;  %v11605_v29 = vld [vmem:[%s22404_s0 + $0x60] sm:$0xff] }
 0x2f3   :  { %13441 = vmatprep.mubr.bf16.mxu0 %v16946_v54  ;;  %v11606_v54 = vld [vmem:[%s22404_s0 + $0x68] sm:$0xff] }
 0x2fa   :  { %13442 = vmatmul.mubr.bf16.gmra.mrb[44].mxu0 %v16948_v59  ;;  %v3049_v59 = vpack.c.bf16 %v11604_v27, %v11603_v5  ;;  %v11620_v5 = vld [vmem:[%s22404_s0 + $0x110] sm:$0xff]  ;;  %v11621_v27 = vld [vmem:[%s22404_s0 + $0x120] sm:$0xff] }
 0x2fb   :  { %13445 = vmatprep.mubr.bf16.mxu0 %v16964_v20  ;;  %v3050_v20 = vpack.c.bf16 %v11606_v54, %v11605_v29  ;;  %v11622_v29 = vld [vmem:[%s22404_s0 + $0x128] sm:$0xff]  ;;  %v17560_v54 = vld [vmem:[%s22403_s1 + $0x200] sm:$0xff]  }
 0x302   :  { %13446 = vmatmul.mubr.bf16.gmra.mrb[48].mxu0 %v22632_v48  ;;  %v11616_v48 = vld [vmem:[%s22404_s0 + $0xe0] sm:$0xff] }
 0x303   :  { %13449 = vmatprep.mubr.bf16.mxu0 %v22633_v61  ;;  %v11617_v61 = vld [vmem:[%s22404_s0 + $0xf0] sm:$0xff]  ;;  %v3055_v12 = vpack.c.bf16 %v11616_v48, %v11615_v35  ;;  %v11638_v35 = vld [vmem:[%s22404_s0 + $0x218] sm:$0xff] }
 0x30a   :  { %13450 = vmatmul.mubr.bf16.gmra.mrb[52].mxu0 %v22634_v23  ;;  %v11618_v23 = vld [vmem:[%s22404_s0 + $0xf8] sm:$0xff] }
 0x30b   :  { %13453 = vmatprep.mubr.bf16.mxu0 %v17000_v39  ;;  %v11607_v39 = vld [vmem:[%s22404_s0 + $0x78] sm:$0xff]  ;;  %v3056_v28 = vpack.c.bf16 %v11618_v23, %v11617_v61  ;;  %v11639_v23 = vld [vmem:[%s22404_s0 + $0x228] sm:$0xff] }
 0x312   :  { %13454 = vmatmul.mubr.bf16.gmra.mrb[56].mxu0 %v17002_v40  ;;  %v11608_v40 = vld [vmem:[%s22404_s0 + $0x80] sm:$0xff] }
 0x313   :  { %13457 = vmatprep.mubr.bf16.mxu0 %v17012_v60  ;;  %v15503_v60 = vld [vmem:[%s22403_s1 + $0x1c8] sm:$0xff]   ;;  %v3051_v57 = vpack.c.bf16 %v11608_v40, %v11607_v39  ;;  %v11624_v39 = vld [vmem:[%s22404_s0 + $0x140] sm:$0xff]  ;;  %v11625_v40 = vld [vmem:[%s22404_s0 + $0x150] sm:$0xff] }
 0x31a   :  { %13458 = vmatmul.mubr.bf16.gmra.mrb[60].mxu0 %v17473_v53 }
 0x31b   :  { %13477 = vmatprep.mubr.bf16.mxu0 %v3048_v4  ;;  %v11619_v4 = vld [vmem:[%s22404_s0 + $0x108] sm:$0xff] }
 0x322   :  { %13478 = vmatmul.mubr.bf16.vlgmr.msra.gmra.mrb[0].mxu0 %v3049_v59  ;;  %v3057_v59 = vpack.c.bf16 %v11620_v5, %v11619_v4  ;;  %v11643_v5 = vld [vmem:[%s22404_s0 + $0x258] sm:$0xff] }
 0x323   :  { %13542 = vmatpush3.bf16.msra.mxu0 %v15502_v18  ;;  %13481 = vmatprep.mubr.bf16.mxu0 %v3050_v20  ;;  %v3054_v18 = vpack.c.bf16 %v11614_v62, %v11613_v52  ;;  %v3058_v20 = vpack.c.bf16 %v11622_v29, %v11621_v27  ;;  %v11633_v52 = vld [vmem:[%s22404_s0 + $0x1e0] sm:$0xff]  ;;  %v11634_v62 = vld [vmem:[%s22404_s0 + $0x1e8] sm:$0xff]  ;;  %v11645_v29 = vld [vmem:[%s22404_s0 + $0x270] sm:$0xff] }
 0x324   :  { %13543 = vmatprep.subr.bf16.mxu0 %v15503_v60  ;;  %v11644_v27 = vld [vmem:[%s22404_s0 + $0x260] sm:$0xff] }
 0x327   :  { %13544 = vmatpush3.bf16.msra.mxu0 %v15503_v60  ;;  %v11623_v60 = vld [vmem:[%s22404_s0 + $0x138] sm:$0xff] }
 0x328   :  { %13545 = vmatprep.subr.bf16.mxu0 %v15504_v45  ;;  %v3059_v14 = vpack.c.bf16 %v11624_v39, %v11623_v60  ;;  %v11647_v39 = vld [vmem:[%s22404_s0 + $0x288] sm:$0xff] }
 0x32a   :  { %13482 = vmatmul.mubr.bf16.gmra.mrb[4].mxu0 %v3051_v57  ;;  %v11627_v57 = vld [vmem:[%s22404_s0 + $0x168] sm:$0xff] }
 0x32b   :  { %13485 = vmatprep.mubr.bf16.mxu0 %v3052_v25  ;;  %13546 = vmatpush3.bf16.msra.mxu0 %v15504_v45  ;;  %v3060_v45 = vpack.c.bf16 %v11626_v49, %v11625_v40  ;;  %v11628_v25 = vld [vmem:[%s22404_s0 + $0x170] sm:$0xff]  ;;  %v11649_v49 = vld [vmem:[%s22404_s0 + $0x2a0] sm:$0xff] }
 0x32c   :  { %13547 = vmatprep.subr.bf16.mxu0 %v15505_v7  ;;  %v11648_v40 = vld [vmem:[%s22404_s0 + $0x290] sm:$0xff] }
 0x32f   :  { %13548 = vmatpush3.bf16.msra.mxu0 %v15505_v7  ;;  %v3061_v7 = vpack.c.bf16 %v11628_v25, %v11627_v57  ;;  %v11651_v25 = vld [vmem:[%s22404_s0 + $0x2b8] sm:$0xff] }
 0x330   :  { %13549 = vmatprep.subr.bf16.mxu0 %v15506_v2 }
 0x332   :  { %13486 = vmatmul.mubr.bf16.gmra.mrb[8].mxu0 %v3053_v13  ;;  %v3064_v13 = vpack.c.bf16 %v11634_v62, %v11633_v52 }
 0x333   :  { %13489 = vmatprep.mubr.bf16.mxu0 %v3054_v18  ;;  %13550 = vmatpush3.bf16.msra.mxu0 %v15506_v2  ;;  %v3063_v2 = vpack.c.bf16 %v11632_v51, %v11631_v6  ;;  %v11636_v18 = vld [vmem:[%s22404_s0 + $0x200] sm:$0xff]  ;;  %v11653_v6 = vld [vmem:[%s22404_s0 + $0x2d0] sm:$0xff]  ;;  %v11654_v51 = vld [vmem:[%s22404_s0 + $0x2d8] sm:$0xff] }
 0x334   :  { %13551 = vmatprep.subr.bf16.mxu0 %v15507_v32  ;;  %v3074_v62 = vpack.c.bf16 %v11654_v51, %v11653_v6 }
 0x337   :  { %13552 = vmatpush3.bf16.msra.mxu0 %v15507_v32  ;;  %v11637_v32 = vld [vmem:[%s22404_s0 + $0x210] sm:$0xff] }
 0x338   :  { %13553 = vmatprep.subr.bf16.mxu0 %v15508_v11  ;;  %v3066_v61 = vpack.c.bf16 %v11638_v35, %v11637_v32 }
 0x33a   :  { %13490 = vmatmul.mubr.bf16.gmra.mrb[12].mxu0 %v3055_v12  ;;  %v11641_v12 = vld [vmem:[%s22404_s0 + $0x240] sm:$0xff] }
 0x33b   :  { %13493 = vmatprep.mubr.bf16.mxu0 %v3056_v28  ;;  %13554 = vmatpush3.bf16.msra.mxu0 %v15508_v11  ;;  %v11640_v11 = vld [vmem:[%s22404_s0 + $0x230] sm:$0xff]  ;;  %v11642_v28 = vld [vmem:[%s22404_s0 + $0x248] sm:$0xff] }
 0x33c   :  { %13555 = vmatprep.subr.bf16.mxu0 %v15509_v44  ;;  %v3068_v4 = vpack.c.bf16 %v11642_v28, %v11641_v12  ;;  %v11664_v12 = vld [vmem:[%s22404_s0 + $0x350] sm:$0xff] }
 0x33f   :  { %13556 = vmatpush3.bf16.msra.mxu0 %v15509_v44  ;;  %v3067_v44 = vpack.c.bf16 %v11640_v11, %v11639_v23  ;;  %v11663_v11 = vld [vmem:[%s22404_s0 + $0x348] sm:$0xff] }
 0x340   :  { %13621 = vmatprep.subr.bf16.mxu0 %v17560_v54  ;;  %v3079_v28 = vpack.c.bf16 %v11664_v12, %v11663_v11  ;;  %v11809_v11 = vld [vmem:[%s22404_s0 + $0x1e2] sm:$0xff]  ;;  %v11810_v12 = vld [vmem:[%s22404_s0 + $0x1ea] sm:$0xff] }
 0x342   :  { %13494 = vmatmul.mubr.bf16.gmra.mrb[16].mxu0 %v3057_v59  ;;  %v11646_v59 = vld [vmem:[%s22404_s0 + $0x278] sm:$0xff] }
 0x343   :  { %13497 = vmatprep.mubr.bf16.mxu0 %v3058_v20  ;;  %v3069_v20 = vpack.c.bf16 %v11644_v27, %v11643_v5  ;;  %v3070_v60 = vpack.c.bf16 %v11646_v59, %v11645_v29  ;;  %v11789_v5 = vld [vmem:[%s22404_s0 + $0xc2] sm:$0xff]  ;;  %v11790_v27 = vld [vmem:[%s22404_s0 + $0xca] sm:$0xff] }
 0x344   :  { %v4082_v59 = vpack.c.bf16 %v11790_v27, %v11789_v5  ;;  %v11832_v5 = vld [vmem:[%s22404_s0 + $0x2f2] sm:$0xff]  ;;  %v11833_v27 = vld [vmem:[%s22404_s0 + $0x302] sm:$0xff] }
 0x34a   :  { %13498 = vmatmul.mubr.bf16.gmra.mrb[20].mxu0 %v3059_v14  ;;  %v11650_v14 = vld [vmem:[%s22404_s0 + $0x2a8] sm:$0xff] }
 0x34b   :  { %13501 = vmatprep.mubr.bf16.mxu0 %v3060_v45  ;;  %v3071_v45 = vpack.c.bf16 %v11648_v40, %v11647_v39  ;;  %v3072_v57 = vpack.c.bf16 %v11650_v14, %v11649_v49  ;;  %v11793_v39 = vld [vmem:[%s22404_s0 + $0xf2] sm:$0xff]  ;;  %v11794_v40 = vld [vmem:[%s22404_s0 + $0xfa] sm:$0xff] }
 0x34c   :  { %v4084_v14 = vpack.c.bf16 %v11794_v40, %v11793_v39  ;;  %v11836_v39 = vld [vmem:[%s22404_s0 + $0x322] sm:$0xff] }
 0x352   :  { %13502 = vmatmul.mubr.bf16.gmra.mrb[24].mxu0 %v3061_v7  ;;  %v11652_v7 = vld [vmem:[%s22404_s0 + $0x2c0] sm:$0xff] }
 0x353   :  { %13505 = vmatprep.mubr.bf16.mxu0 %v17061_v24  ;;  %v11635_v24 = vld [vmem:[%s22404_s0 + $0x1f8] sm:$0xff]  ;;  %v3073_v52 = vpack.c.bf16 %v11652_v7, %v11651_v25  ;;  %v11797_v25 = vld [vmem:[%s22404_s0 + $0x122] sm:$0xff]  ;;  %v11798_v7 = vld [vmem:[%s22404_s0 + $0x12a] sm:$0xff] }
 0x354   :  { %v3065_v48 = vpack.c.bf16 %v11636_v18, %v11635_v24  ;;  %v11657_v24 = vld [vmem:[%s22404_s0 + $0x300] sm:$0xff]  ;;  %v11658_v18 = vld [vmem:[%s22404_s0 + $0x308] sm:$0xff]  ;;  %v4086_v51 = vpack.c.bf16 %v11798_v7, %v11797_v25 }
 0x355   :  { %v3076_v35 = vpack.c.bf16 %v11658_v18, %v11657_v24 }
 0x35a   :  { %13506 = vmatmul.mubr.bf16.gmra.mrb[28].mxu0 %v3063_v2  ;;  %v11655_v2 = vld [vmem:[%s22404_s0 + $0x2e8] sm:$0xff] }
 0x35b   :  { %13509 = vmatprep.mubr.bf16.mxu0 %v3064_v13  ;;  %v11656_v13 = vld [vmem:[%s22404_s0 + $0x2f0] sm:$0xff] }
 0x35c   :  { %v3075_v32 = vpack.c.bf16 %v11656_v13, %v11655_v2  ;;  %v11801_v2 = vld [vmem:[%s22404_s0 + $0x152] sm:$0xff]  ;;  %v11802_v13 = vld [vmem:[%s22404_s0 + $0x15a] sm:$0xff] }
 0x35d   :  { %v4088_v18 = vpack.c.bf16 %v11802_v13, %v11801_v2 }
 0x362   :  { %13510 = vmatmul.mubr.bf16.gmra.mrb[32].mxu0 %v3065_v48  ;;  %v11659_v48 = vld [vmem:[%s22404_s0 + $0x318] sm:$0xff] }
 0x363   :  { %13513 = vmatprep.mubr.bf16.mxu0 %v3066_v61  ;;  %v11660_v61 = vld [vmem:[%s22404_s0 + $0x320] sm:$0xff] }
 0x364   :  { %v3077_v23 = vpack.c.bf16 %v11660_v61, %v11659_v48  ;;  %v11807_v61 = vld [vmem:[%s22404_s0 + $0x19a] sm:$0xff] }
 0x36a   :  { %13514 = vmatmul.mubr.bf16.gmra.mrb[36].mxu0 %v3067_v44  ;;  %v15511_v44 = vld [vmem:[%s22403_s1 + $0x208] sm:$0xff]  }
 0x36b   :  { %13517 = vmatprep.mubr.bf16.mxu0 %v3068_v4  ;;  %v11788_v4 = vld [vmem:[%s22404_s0 + $0xb2] sm:$0xff] }
 0x372   :  { %13518 = vmatmul.mubr.bf16.gmra.mrb[40].mxu0 %v3069_v20  ;;  %v11791_v20 = vld [vmem:[%s22404_s0 + $0xda] sm:$0xff] }
 0x373   :  { %13521 = vmatprep.mubr.bf16.mxu0 %v3070_v60  ;;  %v11792_v60 = vld [vmem:[%s22404_s0 + $0xe2] sm:$0xff] }
 0x374   :  { %v4083_v49 = vpack.c.bf16 %v11792_v60, %v11791_v20  ;;  %v11835_v60 = vld [vmem:[%s22404_s0 + $0x31a] sm:$0xff] }
 0x375   :  { %v4105_v40 = vpack.c.bf16 %v11836_v39, %v11835_v60 }
 0x37a   :  { %13522 = vmatmul.mubr.bf16.gmra.mrb[44].mxu0 %v3071_v45  ;;  %v11795_v45 = vld [vmem:[%s22404_s0 + $0x10a] sm:$0xff] }
 0x37b   :  { %13525 = vmatprep.mubr.bf16.mxu0 %v3072_v57  ;;  %v11796_v57 = vld [vmem:[%s22404_s0 + $0x112] sm:$0xff] }
 0x37c   :  { %v4085_v6 = vpack.c.bf16 %v11796_v57, %v11795_v45 }
 0x382   :  { %13526 = vmatmul.mubr.bf16.gmra.mrb[48].mxu0 %v3073_v52  ;;  %v11799_v52 = vld [vmem:[%s22404_s0 + $0x13a] sm:$0xff] }
 0x383   :  { %13529 = vmatprep.mubr.bf16.mxu0 %v3074_v62  ;;  %v11800_v62 = vld [vmem:[%s22404_s0 + $0x142] sm:$0xff] }
 0x384   :  { %v4087_v24 = vpack.c.bf16 %v11800_v62, %v11799_v52 }
 0x38a   :  { %13530 = vmatmul.mubr.bf16.gmra.mrb[52].mxu0 %v3075_v32  ;;  %v11803_v32 = vld [vmem:[%s22404_s0 + $0x16a] sm:$0xff] }
 0x38b   :  { %13533 = vmatprep.mubr.bf16.mxu0 %v3076_v35  ;;  %v11804_v35 = vld [vmem:[%s22404_s0 + $0x172] sm:$0xff] }
 0x38c   :  { %v4089_v48 = vpack.c.bf16 %v11804_v35, %v11803_v32 }
 0x392   :  { %13534 = vmatmul.mubr.bf16.gmra.mrb[56].mxu0 %v3077_v23  ;;  %v11808_v23 = vld [vmem:[%s22404_s0 + $0x1a2] sm:$0xff] }
 0x393   :  { %13537 = vmatprep.mubr.bf16.mxu0 %v17091_v37  ;;  %v15512_v37 = vld [vmem:[%s22403_s1 + $0x210] sm:$0xff]  }
 0x39a   :  { %13538 = vmatmul.mubr.bf16.gmra.mrb[60].mxu0 %v3079_v28  ;;  %v4091_v28 = vpack.c.bf16 %v11808_v23, %v11807_v61 }
 0x39b   :  { %13557 = vmatprep.mubr.bf16.mxu0 %v17106_v63  ;;  %v15513_v63 = vld [vmem:[%s22403_s1 + $0x218] sm:$0xff]  }
 0x3a2   :  { %13558 = vmatmul.mubr.bf16.vlgmr.msra.gmra.mrb[0].mxu0 %v17108_v47  ;;  %v15514_v47 = vld [vmem:[%s22403_s1 + $0x220] sm:$0xff]  }
 0x3a3   :  { %13622 = vmatpush3.bf16.msra.mxu0 %v17560_v54  ;;  %13561 = vmatprep.mubr.bf16.mxu0 %v17130_v33  ;;  %v15515_v33 = vld [vmem:[%s22403_s1 + $0x228] sm:$0xff]  }
 0x3a4   :  { %13623 = vmatprep.subr.bf16.mxu0 %v15511_v44  ;;  %v11787_v54 = vld [vmem:[%s22404_s0 + $0xaa] sm:$0xff] }
 0x3a5   :  { %v4081_v29 = vpack.c.bf16 %v11788_v4, %v11787_v54  ;;  %v11831_v4 = vld [vmem:[%s22404_s0 + $0x2ea] sm:$0xff] }
 0x3a7   :  { %13624 = vmatpush3.bf16.msra.mxu0 %v15511_v44  ;;  %v4092_v44 = vpack.c.bf16 %v11810_v12, %v11809_v11 }
 0x3a8   :  { %13625 = vmatprep.subr.bf16.mxu0 %v15512_v37 }
 0x3aa   :  { %13562 = vmatmul.mubr.bf16.gmra.mrb[4].mxu0 %v17132_v34  ;;  %v15516_v34 = vld [vmem:[%s22403_s1 + $0x230] sm:$0xff]  }
 0x3ab   :  { %13565 = vmatprep.mubr.bf16.mxu0 %v17154_v21  ;;  %13626 = vmatpush3.bf16.msra.mxu0 %v15512_v37  ;;  %v15517_v21 = vld [vmem:[%s22403_s1 + $0x238] sm:$0xff]   ;;  %v11812_v37 = vld [vmem:[%s22404_s0 + $0x202] sm:$0xff] }
 0x3ac   :  { %13627 = vmatprep.subr.bf16.mxu0 %v15513_v63 }
 0x3af   :  { %13628 = vmatpush3.bf16.msra.mxu0 %v15513_v63  ;;  %v11813_v63 = vld [vmem:[%s22404_s0 + $0x212] sm:$0xff] }
 0x3b0   :  { %13629 = vmatprep.subr.bf16.mxu0 %v15514_v47 }
 0x3b2   :  { %13566 = vmatmul.mubr.bf16.gmra.mrb[8].mxu0 %v17156_v3  ;;  %v11719_v3 = vld [vmem:[%s22404_s0 + $0x199] sm:$0xff] }
 0x3b3   :  { %13569 = vmatprep.mubr.bf16.mxu0 %v17178_v16  ;;  %13630 = vmatpush3.bf16.msra.mxu0 %v15514_v47  ;;  %v11720_v16 = vld [vmem:[%s22404_s0 + $0x1a1] sm:$0xff] }
 0x3b4   :  { %13631 = vmatprep.subr.bf16.mxu0 %v15515_v33  ;;  %v11814_v47 = vld [vmem:[%s22404_s0 + $0x21a] sm:$0xff] }
 0x3b7   :  { %13632 = vmatpush3.bf16.msra.mxu0 %v15515_v33 }
 0x3b8   :  { %13633 = vmatprep.subr.bf16.mxu0 %v15516_v34 }
 0x3ba   :  { %13570 = vmatmul.mubr.bf16.gmra.mrb[12].mxu0 %v17180_v17  ;;  %v3577_v17 = vpack.c.bf16 %v11720_v16, %v11719_v3  ;;  %v11816_v3 = vld [vmem:[%s22404_s0 + $0x232] sm:$0xff]  ;;  %v11817_v16 = vld [vmem:[%s22404_s0 + $0x242] sm:$0xff] }
 0x3bb   :  { %13573 = vmatprep.mubr.bf16.mxu0 %v17204_v50  ;;  %13634 = vmatpush3.bf16.msra.mxu0 %v15516_v34  ;;  %v22635_v50 = vld [vmem:[#allocation6_spill] sm:$0xff]  ;;  %v4094_v34 = vpack.c.bf16 %v11814_v47, %v11813_v63 }
 0x3bc   :  { %13635 = vmatprep.subr.bf16.mxu0 %v15517_v21 }
 0x3bf   :  { %13636 = vmatpush3.bf16.msra.mxu0 %v15517_v21  ;;  %v11815_v21 = vld [vmem:[%s22404_s0 + $0x22a] sm:$0xff] }
 0x3c2   :  { %13574 = vmatmul.mubr.bf16.gmra.mrb[16].mxu0 %v17206_v55  ;;  %v22636_v55 = vld [vmem:[#allocation7_spill] sm:$0xff] }
 0x3c3   :  { %13577 = vmatprep.mubr.bf16.mxu0 %v17223_v15  ;;  %v11751_v15 = vld [vmem:[%s22404_s0 + $0x349] sm:$0xff] }
 0x3ca   :  { %13578 = vmatmul.mubr.bf16.gmra.mrb[20].mxu0 %v17225_v22  ;;  %v11752_v22 = vld [vmem:[%s22404_s0 + $0x351] sm:$0xff] }
 0x3cb   :  { %13581 = vmatprep.mubr.bf16.mxu0 %v17241_v19  ;;  %v11777_v19 = vld [vmem:[%s22404_s0 + $0x32] sm:$0xff] }
 0x3d2   :  { %13582 = vmatmul.mubr.bf16.gmra.mrb[24].mxu0 %v17243_v38  ;;  %v11778_v38 = vld [vmem:[%s22404_s0 + $0x3a] sm:$0xff] }
 0x3d3   :  { %13585 = vmatprep.mubr.bf16.mxu0 %v17259_v1  ;;  %v3593_v1 = vpack.c.bf16 %v11752_v22, %v11751_v15  ;;  %v11819_v15 = vld [vmem:[%s22404_s0 + $0x25a] sm:$0xff]  ;;  %v11820_v22 = vld [vmem:[%s22404_s0 + $0x262] sm:$0xff] }
 0x3da   :  { %13586 = vmatmul.mubr.bf16.gmra.mrb[28].mxu0 %v3577_v17  ;;  %v11818_v17 = vld [vmem:[%s22404_s0 + $0x24a] sm:$0xff] }
 0x3db   :  { %13589 = vmatprep.mubr.bf16.mxu0 %v17274_v36  ;;  %v4076_v36 = vpack.c.bf16 %v11778_v38, %v11777_v19  ;;  %v11821_v19 = vld [vmem:[%s22404_s0 + $0x272] sm:$0xff]  ;;  %v11822_v38 = vld [vmem:[%s22404_s0 + $0x27a] sm:$0xff] }
 0x3e2   :  { %13590 = vmatmul.mubr.bf16.gmra.mrb[32].mxu0 %v17276_v42  ;;  %v11779_v42 = vld [vmem:[%s22404_s0 + $0x4a] sm:$0xff] }
 0x3e3   :  { %13593 = vmatprep.mubr.bf16.mxu0 %v17292_v26  ;;  %v11780_v26 = vld [vmem:[%s22404_s0 + $0x52] sm:$0xff] }
 0x3ea   :  { %13594 = vmatmul.mubr.bf16.gmra.mrb[36].mxu0 %v17294_v41  ;;  %v11781_v41 = vld [vmem:[%s22404_s0 + $0x62] sm:$0xff] }
 0x3eb   :  { %13597 = vmatprep.mubr.bf16.mxu0 %v17310_v58  ;;  %v11782_v58 = vld [vmem:[%s22404_s0 + $0x6a] sm:$0xff] }
 0x3f2   :  { %13598 = vmatmul.mubr.bf16.gmra.mrb[40].mxu0 %v17312_v0  ;;  %v4077_v0 = vpack.c.bf16 %v11780_v26, %v11779_v42  ;;  %v17879_v42 = vld [vmem:[%s22404_s0 + $0x28a] sm:$0xff]  ;;  %v17884_v26 = vld [vmem:[%s22404_s0 + $0x292] sm:$0xff] }
 0x3f3   :  { %13601 = vmatprep.mubr.bf16.mxu0 %v17328_v31  ;;  %v4078_v31 = vpack.c.bf16 %v11782_v58, %v11781_v41  ;;  %v17889_v41 = vld [vmem:[%s22404_s0 + $0x2a2] sm:$0xff]  ;;  %v17894_v58 = vld [vmem:[%s22404_s0 + $0x2aa] sm:$0xff] }
 0x3fa   :  { %13602 = vmatmul.mubr.bf16.gmra.mrb[44].mxu0 %v17330_v56  ;;  %v11783_v56 = vld [vmem:[%s22404_s0 + $0x7a] sm:$0xff] }
 0x3fb   :  { %13605 = vmatprep.mubr.bf16.mxu0 %v17346_v10  ;;  %v11784_v10 = vld [vmem:[%s22404_s0 + $0x82] sm:$0xff] }
 0x402   :  { %13606 = vmatmul.mubr.bf16.gmra.mrb[48].mxu0 %v17348_v43  ;;  %v11785_v43 = vld [vmem:[%s22404_s0 + $0x92] sm:$0xff] }
 0x403   :  { %13609 = vmatprep.mubr.bf16.mxu0 %v22635_v50  ;;  %v4095_v50 = vpack.c.bf16 %v11816_v3, %v11815_v21 }
 0x40a   :  { %13610 = vmatmul.mubr.bf16.gmra.mrb[52].mxu0 %v22636_v55  ;;  %v4096_v55 = vpack.c.bf16 %v11818_v17, %v11817_v16 }
 0x40b   :  { %13613 = vmatprep.mubr.bf16.mxu0 %v17382_v8  ;;  %v4079_v8 = vpack.c.bf16 %v11784_v10, %v11783_v56  ;;  %v16108_v56 = vmov 0.0   ;;  %v11827_v10 = vld [vmem:[%s22404_s0 + $0x2ba] sm:$0xff] }
 0x40c   :  { %5452 = vst [vmem:[#allocation2] sm:$0xff] %v16108_v56  ;;  %5453 = vst [vmem:[#allocation2 + $0x8] sm:$0xff] %v16108_v56 }
 0x40d   :  { %5454 = vst [vmem:[#allocation2 + $0x10] sm:$0xff] %v16108_v56  ;;  %5455 = vst [vmem:[#allocation2 + $0x18] sm:$0xff] %v16108_v56 }
 0x40e   :  { %5456 = vst [vmem:[#allocation2 + $0x20] sm:$0xff] %v16108_v56  ;;  %5459 = vst [vmem:[#allocation2 + $0x38] sm:$0xff] %v16108_v56 }
 0x40f   :  { %5460 = vst [vmem:[#allocation2 + $0x40] sm:$0xff] %v16108_v56  ;;  %5463 = vst [vmem:[#allocation2 + $0x58] sm:$0xff] %v16108_v56 }
 0x410   :  { %5464 = vst [vmem:[#allocation2 + $0x60] sm:$0xff] %v16108_v56  ;;  %5467 = vst [vmem:[#allocation2 + $0x78] sm:$0xff] %v16108_v56 }
 0x411   :  { %5468 = vst [vmem:[#allocation2 + $0x80] sm:$0xff] %v16108_v56  ;;  %5471 = vst [vmem:[#allocation2 + $0x98] sm:$0xff] %v16108_v56 }
 0x412   :  { %13614 = vmatmul.mubr.bf16.gmra.mrb[56].mxu0 %v17384_v9  ;;  %5472 = vst [vmem:[#allocation2 + $0xa0] sm:$0xff] %v16108_v56  ;;  %5475 = vst [vmem:[#allocation2 + $0xb8] sm:$0xff] %v16108_v56 }
 0x413   :  { %13617 = vmatprep.mubr.bf16.mxu0 %v17394_v30  ;;  %v11786_v30 = vld [vmem:[%s22404_s0 + $0x9a] sm:$0xff]  ;;  %5476 = vst [vmem:[#allocation2 + $0xc0] sm:$0xff] %v16108_v56  ;;  %5479 = vst [vmem:[#allocation2 + $0xd8] sm:$0xff] %v16108_v56 }
 0x414   :  { %v4080_v9 = vpack.c.bf16 %v11786_v30, %v11785_v43  ;;  %5480 = vst [vmem:[#allocation2 + $0xe0] sm:$0xff] %v16108_v56  ;;  %5483 = vst [vmem:[#allocation2 + $0xf8] sm:$0xff] %v16108_v56  ;;  %v11828_v43 = vld [vmem:[%s22404_s0 + $0x2c2] sm:$0xff]  ;;  %v11829_v30 = vld [vmem:[%s22404_s0 + $0x2d2] sm:$0xff] }
 0x415   :  { %5484 = vst [vmem:[#allocation2 + $0x100] sm:$0xff] %v16108_v56  ;;  %5487 = vst [vmem:[#allocation2 + $0x118] sm:$0xff] %v16108_v56 }
 0x416   :  { %5488 = vst [vmem:[#allocation2 + $0x120] sm:$0xff] %v16108_v56  ;;  %5491 = vst [vmem:[#allocation2 + $0x138] sm:$0xff] %v16108_v56 }
 0x417   :  { %5492 = vst [vmem:[#allocation2 + $0x140] sm:$0xff] %v16108_v56  ;;  %5495 = vst [vmem:[#allocation2 + $0x158] sm:$0xff] %v16108_v56 }
 0x418   :  { %5496 = vst [vmem:[#allocation2 + $0x160] sm:$0xff] %v16108_v56  ;;  %5499 = vst [vmem:[#allocation2 + $0x178] sm:$0xff] %v16108_v56 }
 0x419   :  { %5500 = vst [vmem:[#allocation2 + $0x180] sm:$0xff] %v16108_v56  ;;  %5503 = vst [vmem:[#allocation2 + $0x198] sm:$0xff] %v16108_v56 }
 0x41a   :  { %13618 = vmatmul.mubr.bf16.gmra.mrb[60].mxu0 %v3593_v1  ;;  %v4097_v1 = vpack.c.bf16 %v11820_v22, %v11819_v15  ;;  %5504 = vst [vmem:[#allocation2 + $0x1a0] sm:$0xff] %v16108_v56  ;;  %5507 = vst [vmem:[#allocation2 + $0x1b8] sm:$0xff] %v16108_v56 }
 0x41b   :  { %13637 = vmatprep.mubr.bf16.mxu0 %v4076_v36  ;;  %v4098_v36 = vpack.c.bf16 %v11822_v38, %v11821_v19  ;;  %5508 = vst [vmem:[#allocation2 + $0x1c0] sm:$0xff] %v16108_v56  ;;  %5511 = vst [vmem:[#allocation2 + $0x1d8] sm:$0xff] %v16108_v56 }
 0x41c   :  { %5512 = vst [vmem:[#allocation2 + $0x1e0] sm:$0xff] %v16108_v56  ;;  %5515 = vst [vmem:[#allocation2 + $0x1f8] sm:$0xff] %v16108_v56 }
 0x41d   :  { %5516 = vst [vmem:[#allocation2 + $0x200] sm:$0xff] %v16108_v56  ;;  %5519 = vst [vmem:[#allocation2 + $0x218] sm:$0xff] %v16108_v56 }
 0x41e   :  { %5520 = vst [vmem:[#allocation2 + $0x220] sm:$0xff] %v16108_v56  ;;  %5521 = vst [vmem:[#allocation2 + $0x228] sm:$0xff] %v16108_v56 }
 0x41f   :  { %5522 = vst [vmem:[#allocation2 + $0x230] sm:$0xff] %v16108_v56  ;;  %5523 = vst [vmem:[#allocation2 + $0x238] sm:$0xff] %v16108_v56 }
 0x420   :  { %5524 = vst [vmem:[#allocation2 + $0x240] sm:$0xff] %v16108_v56  ;;  %5525 = vst [vmem:[#allocation2 + $0x248] sm:$0xff] %v16108_v56 }
 0x421   :  { %5526 = vst [vmem:[#allocation2 + $0x250] sm:$0xff] %v16108_v56  ;;  %5527 = vst [vmem:[#allocation2 + $0x258] sm:$0xff] %v16108_v56 }
 0x422   :  { %13638 = vmatmul.mubr.bf16.vlgmr.msra.gmra.mrb[0].mxu0 %v4077_v0  ;;  %v4099_v0 = vpack.c.bf16 %v17884_v26, %v17879_v42  ;;  %5528 = vst [vmem:[#allocation2 + $0x260] sm:$0xff] %v16108_v56  ;;  %5531 = vst [vmem:[#allocation2 + $0x278] sm:$0xff] %v16108_v56 }
 0x423   :  { %13641 = vmatprep.mubr.bf16.mxu0 %v4078_v31  ;;  %v4100_v31 = vpack.c.bf16 %v17894_v58, %v17889_v41  ;;  %5532 = vst [vmem:[#allocation2 + $0x280] sm:$0xff] %v16108_v56  ;;  %5535 = vst [vmem:[#allocation2 + $0x298] sm:$0xff] %v16108_v56 }
 0x424   :  { %5536 = vst [vmem:[#allocation2 + $0x2a0] sm:$0xff] %v16108_v56  ;;  %5539 = vst [vmem:[#allocation2 + $0x2b8] sm:$0xff] %v16108_v56 }
 0x425   :  { %5540 = vst [vmem:[#allocation2 + $0x2c0] sm:$0xff] %v16108_v56  ;;  %5543 = vst [vmem:[#allocation2 + $0x2d8] sm:$0xff] %v16108_v56 }
 0x426   :  { %5544 = vst [vmem:[#allocation2 + $0x2e0] sm:$0xff] %v16108_v56  ;;  %5547 = vst [vmem:[#allocation2 + $0x2f8] sm:$0xff] %v16108_v56 }
 0x427   :  { %5548 = vst [vmem:[#allocation2 + $0x300] sm:$0xff] %v16108_v56  ;;  %5551 = vst [vmem:[#allocation2 + $0x318] sm:$0xff] %v16108_v56 }
 0x428   :  { %5552 = vst [vmem:[#allocation2 + $0x320] sm:$0xff] %v16108_v56  ;;  %5555 = vst [vmem:[#allocation2 + $0x338] sm:$0xff] %v16108_v56 }
 0x429   :  { %5556 = vst [vmem:[#allocation2 + $0x340] sm:$0xff] %v16108_v56  ;;  %5559 = vst [vmem:[#allocation2 + $0x358] sm:$0xff] %v16108_v56 }
 0x42a   :  { %13642 = vmatmul.mubr.bf16.gmra.mrb[4].mxu0 %v4079_v8  ;;  %5560 = vst [vmem:[#allocation2 + $0x360] sm:$0xff] %v16108_v56  ;;  %5563 = vst [vmem:[#allocation2 + $0x378] sm:$0xff] %v16108_v56  ;;  %v11830_v8 = vld [vmem:[%s22404_s0 + $0x2da] sm:$0xff] }
 0x42b   :  { %13645 = vmatprep.mubr.bf16.mxu0 %v4080_v9  ;;  %5564 = vst [vmem:[#allocation2 + $0x380] sm:$0xff] %v16108_v56  ;;  %5567 = vst [vmem:[#allocation2 + $0x398] sm:$0xff] %v16108_v56  ;;  %v4101_v9 = vpack.c.bf16 %v11828_v43, %v11827_v10  ;;  %v4102_v54 = vpack.c.bf16 %v11830_v8, %v11829_v30 }
 0x42c   :  { %5568 = vst [vmem:[#allocation2 + $0x3a0] sm:$0xff] %v16108_v56  ;;  %5571 = vst [vmem:[#allocation2 + $0x3b8] sm:$0xff] %v16108_v56 }
 0x42d   :  { %5572 = vst [vmem:[#allocation2 + $0x3c0] sm:$0xff] %v16108_v56  ;;  %5575 = vst [vmem:[#allocation2 + $0x3d8] sm:$0xff] %v16108_v56 }
 0x42e   :  { %5576 = vst [vmem:[#allocation2 + $0x3e0] sm:$0xff] %v16108_v56  ;;  %5579 = vst [vmem:[#allocation2 + $0x3f8] sm:$0xff] %v16108_v56 }
 0x42f   :  { %5580 = vst [vmem:[#allocation2 + $0x400] sm:$0xff] %v16108_v56  ;;  %5583 = vst [vmem:[#allocation2 + $0x418] sm:$0xff] %v16108_v56 }
 0x430   :  { %5584 = vst [vmem:[#allocation2 + $0x420] sm:$0xff] %v16108_v56  ;;  %5587 = vst [vmem:[#allocation2 + $0x438] sm:$0xff] %v16108_v56 }
 0x431   :  { %5588 = vst [vmem:[#allocation2 + $0x440] sm:$0xff] %v16108_v56  ;;  %5591 = vst [vmem:[#allocation2 + $0x458] sm:$0xff] %v16108_v56 }
 0x432   :  { %13646 = vmatmul.mubr.bf16.gmra.mrb[8].mxu0 %v4081_v29  ;;  %5592 = vst [vmem:[#allocation2 + $0x460] sm:$0xff] %v16108_v56  ;;  %5593 = vst [vmem:[#allocation2 + $0x468] sm:$0xff] %v16108_v56  ;;  %v11834_v29 = vld [vmem:[%s22404_s0 + $0x30a] sm:$0xff] }
 0x433   :  { %13649 = vmatprep.mubr.bf16.mxu0 %v4082_v59  ;;  %5594 = vst [vmem:[#allocation2 + $0x470] sm:$0xff] %v16108_v56  ;;  %5595 = vst [vmem:[#allocation2 + $0x478] sm:$0xff] %v16108_v56  ;;  %v4103_v59 = vpack.c.bf16 %v11832_v5, %v11831_v4  ;;  %v4104_v20 = vpack.c.bf16 %v11834_v29, %v11833_v27 }
 0x43a   :  { %13650 = vmatmul.mubr.bf16.gmra.mrb[12].mxu0 %v4083_v49  ;;  %v11839_v49 = vld [vmem:[%s22404_s0 + $0x34a] sm:$0xff] }
 0x43b   :  { %13653 = vmatprep.mubr.bf16.mxu0 %v4084_v14  ;;  %v11840_v14 = vld [vmem:[%s22404_s0 + $0x352] sm:$0xff] }
 0x43c   :  { %v4107_v45 = vpack.c.bf16 %v11840_v14, %v11839_v49 }
 0x442   :  { %13654 = vmatmul.mubr.bf16.gmra.mrb[16].mxu0 %v4085_v6 }
 0x443   :  { %13657 = vmatprep.mubr.bf16.mxu0 %v4086_v51 }
 0x44a   :  { %13658 = vmatmul.mubr.bf16.gmra.mrb[20].mxu0 %v4087_v24 }
 0x44b   :  { %13661 = vmatprep.mubr.bf16.mxu0 %v4088_v18 }
 0x452   :  { %13662 = vmatmul.mubr.bf16.gmra.mrb[24].mxu0 %v4089_v48 }
 0x453   :  { %13665 = vmatprep.mubr.bf16.mxu0 %v17443_v46  ;;  %v11811_v46 = vld [vmem:[%s22404_s0 + $0x1fa] sm:$0xff] }
 0x454   :  { %v4093_v33 = vpack.c.bf16 %v11812_v37, %v11811_v46 }
 0x45a   :  { %13666 = vmatmul.mubr.bf16.gmra.mrb[28].mxu0 %v4091_v28 }
 0x45b   :  { %13669 = vmatprep.mubr.bf16.mxu0 %v4092_v44 }
 0x462   :  { %13670 = vmatmul.mubr.bf16.gmra.mrb[32].mxu0 %v4093_v33 }
 0x463   :  { %13673 = vmatprep.mubr.bf16.mxu0 %v4094_v34 }
 0x46a   :  { %13674 = vmatmul.mubr.bf16.gmra.mrb[36].mxu0 %v4095_v50 }
 0x46b   :  { %13677 = vmatprep.mubr.bf16.mxu0 %v4096_v55 }
 0x472   :  { %13678 = vmatmul.mubr.bf16.gmra.mrb[40].mxu0 %v4097_v1 }
 0x473   :  { %13681 = vmatprep.mubr.bf16.mxu0 %v4098_v36 }
 0x47a   :  { %13682 = vmatmul.mubr.bf16.gmra.mrb[44].mxu0 %v4099_v0 }
 0x47b   :  { %13685 = vmatprep.mubr.bf16.mxu0 %v4100_v31 }
 0x482   :  { %13686 = vmatmul.mubr.bf16.gmra.mrb[48].mxu0 %v4101_v9 }
 0x483   :  { %13689 = vmatprep.mubr.bf16.mxu0 %v4102_v54 }
 0x48a   :  { %13690 = vmatmul.mubr.bf16.gmra.mrb[52].mxu0 %v4103_v59 }
 0x48b   :  { %13693 = vmatprep.mubr.bf16.mxu0 %v4104_v20 }
 0x492   :  { %13694 = vmatmul.mubr.bf16.gmra.mrb[56].mxu0 %v4105_v40 }
 0x493   :  { %13697 = vmatprep.mubr.bf16.mxu0 %v17473_v53 }
 0x49a   :  { %13698 = vmatmul.mubr.bf16.gmra.mrb[60].mxu0 %v4107_v45 }
 0x4f5   :  { %v18023_v57 = vpop.f32.mrb[0].mxu0 }
 0x4f6   :  { %v18025_v25 = vpop.f32.mrb[1].mxu0  ;;  %v4600_v62 = vmul.f32 %v18023_v57, %v18023_v57 }
 0x4f7   :  { %v18027_v7 = vpop.f32.mrb[2].mxu0  ;;  %v4598_v53 = vmul.f32 %v18025_v25, %v18025_v25 }
 0x4f8   :  { %v18029_v6 = vpop.f32.mrb[3].mxu0  ;;  %v4601_v24 = vmul.f32 %v18027_v7, %v18027_v7 }
 0x4f9   :  { %v4528_v51 = vadd.f32 %v18029_v6, %v18025_v25  ;;  %v4599_v52 = vmul.f32 %v18029_v6, %v18029_v6 }
 0x4fb   :  { %v4529_v2 = vadd.f32 %v18023_v57, %v4528_v51  ;;  %v4662_v13 = vadd.f32 %v4599_v52, %v4598_v53 }
 0x4fd   :  { %v4663_v18 = vadd.f32 %v4662_v13, %v4600_v62  ;;  %v18042_v32 = vpop.f32.mrb[4].mxu0  ;;  %v4530_v35 = vadd.f32 %v18027_v7, %v4529_v2 }
 0x4fe   :  { %v18045_v48 = vpop.f32.mrb[5].mxu0  ;;  %v4604_v63 = vmul.f32 %v18042_v32, %v18042_v32 }
 0x4ff   :  { %v4531_v61 = vadd.f32 %v4530_v35, %v18045_v48  ;;  %v4602_v23 = vmul.f32 %v18045_v48, %v18045_v48  ;;  %v4664_v11 = vadd.f32 %v4663_v18, %v4601_v24  ;;  %v18050_v12 = vpop.f32.mrb[6].mxu0 }
 0x500   :  { %v18052_v28 = vpop.f32.mrb[7].mxu0  ;;  %v4605_v34 = vmul.f32 %v18050_v12, %v18050_v12 }
 0x501   :  { %v4665_v44 = vadd.f32 %v4664_v11, %v4602_v23  ;;  %v4532_v46 = vadd.f32 %v4531_v61, %v18052_v28  ;;  %v4603_v37 = vmul.f32 %v18052_v28, %v18052_v28 }
 0x503   :  { %v4533_v47 = vadd.f32 %v18042_v32, %v4532_v46  ;;  %v4666_v33 = vadd.f32 %v4665_v44, %v4603_v37 }
 0x505   :  { %v4667_v21 = vadd.f32 %v4666_v33, %v4604_v63  ;;  %v18062_v3 = vpop.f32.mrb[8].mxu0  ;;  %v4534_v16 = vadd.f32 %v18050_v12, %v4533_v47 }
 0x506   :  { %v18065_v17 = vpop.f32.mrb[9].mxu0  ;;  %v4608_v42 = vmul.f32 %v18062_v3, %v18062_v3 }
 0x507   :  { %v4535_v50 = vadd.f32 %v4534_v16, %v18065_v17  ;;  %v4606_v55 = vmul.f32 %v18065_v17, %v18065_v17  ;;  %v4668_v15 = vadd.f32 %v4667_v21, %v4605_v34  ;;  %v18070_v22 = vpop.f32.mrb[10].mxu0 }
 0x508   :  { %v18072_v19 = vpop.f32.mrb[11].mxu0  ;;  %v4609_v58 = vmul.f32 %v18070_v22, %v18070_v22 }
 0x509   :  { %v4669_v38 = vadd.f32 %v4668_v15, %v4606_v55  ;;  %v4536_v1 = vadd.f32 %v4535_v50, %v18072_v19  ;;  %v4607_v36 = vmul.f32 %v18072_v19, %v18072_v19 }
 0x50b   :  { %v4537_v26 = vadd.f32 %v18062_v3, %v4536_v1  ;;  %v4670_v41 = vadd.f32 %v4669_v38, %v4607_v36 }
 0x50d   :  { %v4671_v0 = vadd.f32 %v4670_v41, %v4608_v42  ;;  %v18082_v31 = vpop.f32.mrb[12].mxu0  ;;  %v4538_v56 = vadd.f32 %v18070_v22, %v4537_v26 }
 0x50e   :  { %v18085_v10 = vpop.f32.mrb[13].mxu0  ;;  %v4612_v29 = vmul.f32 %v18082_v31, %v18082_v31 }
 0x50f   :  { %v4539_v43 = vadd.f32 %v4538_v56, %v18085_v10  ;;  %v4610_v30 = vmul.f32 %v18085_v10, %v18085_v10  ;;  %v4672_v8 = vadd.f32 %v4671_v0, %v4609_v58  ;;  %v18090_v9 = vpop.f32.mrb[14].mxu0 }
 0x510   :  { %v18092_v54 = vpop.f32.mrb[15].mxu0  ;;  %v4613_v60 = vmul.f32 %v18090_v9, %v18090_v9 }
 0x511   :  { %v4673_v4 = vadd.f32 %v4672_v8, %v4610_v30  ;;  %v4540_v5 = vadd.f32 %v4539_v43, %v18092_v54  ;;  %v4611_v27 = vmul.f32 %v18092_v54, %v18092_v54 }
 0x513   :  { %v4541_v59 = vadd.f32 %v18082_v31, %v4540_v5  ;;  %v4674_v20 = vadd.f32 %v4673_v4, %v4611_v27 }
 0x515   :  { %v4675_v39 = vadd.f32 %v4674_v20, %v4612_v29  ;;  %v18102_v40 = vpop.f32.mrb[16].mxu0  ;;  %v4542_v49 = vadd.f32 %v18090_v9, %v4541_v59 }
 0x516   :  { %v18105_v14 = vpop.f32.mrb[17].mxu0  ;;  %v4616_v18 = vmul.f32 %v18102_v40, %v18102_v40 }
 0x517   :  { %v4543_v45 = vadd.f32 %v4542_v49, %v18105_v14  ;;  %v4614_v53 = vmul.f32 %v18105_v14, %v18105_v14  ;;  %v4676_v51 = vadd.f32 %v4675_v39, %v4613_v60  ;;  %v18110_v52 = vpop.f32.mrb[18].mxu0 }
 0x518   :  { %v18112_v62 = vpop.f32.mrb[19].mxu0  ;;  %v4617_v23 = vmul.f32 %v18110_v52, %v18110_v52 }
 0x519   :  { %v4677_v2 = vadd.f32 %v4676_v51, %v4614_v53  ;;  %v4544_v13 = vadd.f32 %v4543_v45, %v18112_v62  ;;  %v4615_v24 = vmul.f32 %v18112_v62, %v18112_v62 }
 0x51b   :  { %v4545_v35 = vadd.f32 %v18102_v40, %v4544_v13  ;;  %v4678_v61 = vadd.f32 %v4677_v2, %v4615_v24 }
 0x51d   :  { %v4679_v11 = vadd.f32 %v4678_v61, %v4616_v18  ;;  %v18122_v44 = vpop.f32.mrb[20].mxu0  ;;  %v4546_v46 = vadd.f32 %v18110_v52, %v4545_v35 }
 0x51e   :  { %v18125_v37 = vpop.f32.mrb[21].mxu0  ;;  %v4620_v15 = vmul.f32 %v18122_v44, %v18122_v44 }
 0x51f   :  { %v4547_v63 = vadd.f32 %v4546_v46, %v18125_v37  ;;  %v4618_v47 = vmul.f32 %v18125_v37, %v18125_v37  ;;  %v4680_v33 = vadd.f32 %v4679_v11, %v4617_v23  ;;  %v18130_v34 = vpop.f32.mrb[22].mxu0 }
 0x520   :  { %v18132_v21 = vpop.f32.mrb[23].mxu0  ;;  %v4621_v36 = vmul.f32 %v18130_v34, %v18130_v34 }
 0x521   :  { %v4681_v16 = vadd.f32 %v4680_v33, %v4618_v47  ;;  %v4548_v50 = vadd.f32 %v4547_v63, %v18132_v21  ;;  %v4619_v55 = vmul.f32 %v18132_v21, %v18132_v21 }
 0x523   :  { %v4549_v38 = vadd.f32 %v18122_v44, %v4548_v50  ;;  %v4682_v1 = vadd.f32 %v4681_v16, %v4619_v55 }
 0x525   :  { %v4683_v42 = vadd.f32 %v4682_v1, %v4620_v15  ;;  %v18142_v26 = vpop.f32.mrb[24].mxu0  ;;  %v4550_v41 = vadd.f32 %v18130_v34, %v4549_v38 }
 0x526   :  { %v18145_v58 = vpop.f32.mrb[25].mxu0  ;;  %v4624_v29 = vmul.f32 %v18142_v26, %v18142_v26 }
 0x527   :  { %v4551_v0 = vadd.f32 %v4550_v41, %v18145_v58  ;;  %v4622_v56 = vmul.f32 %v18145_v58, %v18145_v58  ;;  %v4684_v43 = vadd.f32 %v4683_v42, %v4621_v36  ;;  %v18150_v30 = vpop.f32.mrb[26].mxu0 }
 0x528   :  { %v18152_v8 = vpop.f32.mrb[27].mxu0  ;;  %v4625_v60 = vmul.f32 %v18150_v30, %v18150_v30 }
 0x529   :  { %v4685_v4 = vadd.f32 %v4684_v43, %v4622_v56  ;;  %v4552_v5 = vadd.f32 %v4551_v0, %v18152_v8  ;;  %v4623_v27 = vmul.f32 %v18152_v8, %v18152_v8 }
 0x52b   :  { %v4553_v59 = vadd.f32 %v18142_v26, %v4552_v5  ;;  %v4686_v20 = vadd.f32 %v4685_v4, %v4623_v27 }
 0x52d   :  { %v4687_v39 = vadd.f32 %v4686_v20, %v4624_v29  ;;  %v18162_v49 = vpop.f32.mrb[28].mxu0  ;;  %v4554_v45 = vadd.f32 %v18150_v30, %v4553_v59 }
 0x52e   :  { %v18165_v53 = vpop.f32.mrb[29].mxu0  ;;  %v4628_v11 = vmul.f32 %v18162_v49, %v18162_v49 }
 0x52f   :  { %v4555_v51 = vadd.f32 %v4554_v45, %v18165_v53  ;;  %v4626_v2 = vmul.f32 %v18165_v53, %v18165_v53  ;;  %v4688_v13 = vadd.f32 %v4687_v39, %v4625_v60  ;;  %v18170_v24 = vpop.f32.mrb[30].mxu0 }
 0x530   :  { %v18172_v18 = vpop.f32.mrb[31].mxu0  ;;  %v4629_v47 = vmul.f32 %v18170_v24, %v18170_v24 }
 0x531   :  { %v4689_v35 = vadd.f32 %v4688_v13, %v4626_v2  ;;  %v4556_v61 = vadd.f32 %v4555_v51, %v18172_v18  ;;  %v4627_v23 = vmul.f32 %v18172_v18, %v18172_v18 }
 0x533   :  { %v4557_v46 = vadd.f32 %v18162_v49, %v4556_v61  ;;  %v4690_v63 = vadd.f32 %v4689_v35, %v4627_v23 }
 0x535   :  { %v4691_v33 = vadd.f32 %v4690_v63, %v4628_v11  ;;  %v18182_v16 = vpop.f32.mrb[32].mxu0  ;;  %v4558_v50 = vadd.f32 %v18170_v24, %v4557_v46 }
 0x536   :  { %v18185_v55 = vpop.f32.mrb[33].mxu0  ;;  %v4632_v43 = vmul.f32 %v18182_v16, %v18182_v16 }
 0x537   :  { %v4559_v15 = vadd.f32 %v4558_v50, %v18185_v55  ;;  %v4630_v38 = vmul.f32 %v18185_v55, %v18185_v55  ;;  %v4692_v1 = vadd.f32 %v4691_v33, %v4629_v47  ;;  %v18190_v36 = vpop.f32.mrb[34].mxu0 }
 0x538   :  { %v18192_v42 = vpop.f32.mrb[35].mxu0  ;;  %v4633_v27 = vmul.f32 %v18190_v36, %v18190_v36 }
 0x539   :  { %v4693_v41 = vadd.f32 %v4692_v1, %v4630_v38  ;;  %v4560_v0 = vadd.f32 %v4559_v15, %v18192_v42  ;;  %v4631_v56 = vmul.f32 %v18192_v42, %v18192_v42 }
 0x53b   :  { %v4561_v4 = vadd.f32 %v18182_v16, %v4560_v0  ;;  %v4694_v5 = vadd.f32 %v4693_v41, %v4631_v56 }
 0x53d   :  { %v4695_v29 = vadd.f32 %v4694_v5, %v4632_v43  ;;  %v18202_v59 = vpop.f32.mrb[36].mxu0  ;;  %v4562_v20 = vadd.f32 %v18190_v36, %v4561_v4 }
 0x53e   :  { %v18205_v60 = vpop.f32.mrb[37].mxu0  ;;  %v4636_v11 = vmul.f32 %v18202_v59, %v18202_v59 }
 0x53f   :  { %v4563_v39 = vadd.f32 %v4562_v20, %v18205_v60  ;;  %v4634_v45 = vmul.f32 %v18205_v60, %v18205_v60  ;;  %v4696_v51 = vadd.f32 %v4695_v29, %v4633_v27  ;;  %v18210_v2 = vpop.f32.mrb[38].mxu0 }
 0x540   :  { %v18212_v13 = vpop.f32.mrb[39].mxu0  ;;  %v4637_v47 = vmul.f32 %v18210_v2, %v18210_v2 }
 0x541   :  { %v4697_v35 = vadd.f32 %v4696_v51, %v4634_v45  ;;  %v4564_v61 = vadd.f32 %v4563_v39, %v18212_v13  ;;  %v4635_v23 = vmul.f32 %v18212_v13, %v18212_v13 }
 0x543   :  { %v4565_v46 = vadd.f32 %v18202_v59, %v4564_v61  ;;  %v4698_v63 = vadd.f32 %v4697_v35, %v4635_v23 }
 0x545   :  { %v4699_v33 = vadd.f32 %v4698_v63, %v4636_v11  ;;  %v18222_v50 = vpop.f32.mrb[40].mxu0  ;;  %v4566_v15 = vadd.f32 %v18210_v2, %v4565_v46 }
 0x546   :  { %22637 = vst [vmem:[#allocation3_spill] sm:$0xff] %v18222_v50  ;;  %v18225_v38 = vpop.f32.mrb[41].mxu0  ;;  %v4640_v29 = vmul.f32 %v18222_v50, %v18222_v50 }
 0x547   :  { %22638 = vst [vmem:[#allocation4_spill] sm:$0xff] %v18225_v38  ;;  %v4567_v1 = vadd.f32 %v4566_v15, %v18225_v38  ;;  %v4638_v41 = vmul.f32 %v18225_v38, %v18225_v38  ;;  %v4700_v0 = vadd.f32 %v4699_v33, %v4637_v47  ;;  %v18230_v56 = vpop.f32.mrb[42].mxu0 }
 0x548   :  { %22639 = vst [vmem:[#allocation5_spill] sm:$0xff] %v18230_v56  ;;  %v18232_v43 = vpop.f32.mrb[43].mxu0  ;;  %v4641_v45 = vmul.f32 %v18230_v56, %v18230_v56 }
 0x549   :  { %22640 = vst [vmem:[#allocation6_spill] sm:$0xff] %v18232_v43  ;;  %v4701_v4 = vadd.f32 %v4700_v0, %v4638_v41  ;;  %v4568_v5 = vadd.f32 %v4567_v1, %v18232_v43  ;;  %v4639_v27 = vmul.f32 %v18232_v43, %v18232_v43 }
 0x54b   :  { %v4569_v20 = vadd.f32 %v18222_v50, %v4568_v5  ;;  %v4702_v39 = vadd.f32 %v4701_v4, %v4639_v27 }
 0x54d   :  { %v4703_v51 = vadd.f32 %v4702_v39, %v4640_v29  ;;  %v18242_v35 = vpop.f32.mrb[44].mxu0  ;;  %v4570_v61 = vadd.f32 %v18230_v56, %v4569_v20 }
 0x54e   :  { %22641 = vst [vmem:[#allocation7_spill] sm:$0xff] %v18242_v35  ;;  %v18245_v23 = vpop.f32.mrb[45].mxu0  ;;  %v4644_v0 = vmul.f32 %v18242_v35, %v18242_v35 }
 0x54f   :  { %22642 = vst [vmem:[#allocation8_spill] sm:$0xff] %v18245_v23  ;;  %v4571_v11 = vadd.f32 %v4570_v61, %v18245_v23  ;;  %v4642_v46 = vmul.f32 %v18245_v23, %v18245_v23  ;;  %v4704_v63 = vadd.f32 %v4703_v51, %v4641_v45  ;;  %v18250_v47 = vpop.f32.mrb[46].mxu0 }
 0x550   :  { %22643 = vst [vmem:[#allocation9_spill] sm:$0xff] %v18250_v47  ;;  %v18252_v33 = vpop.f32.mrb[47].mxu0  ;;  %v4645_v27 = vmul.f32 %v18250_v47, %v18250_v47 }
 0x551   :  { %22644 = vst [vmem:[#allocation10_spill] sm:$0xff] %v18252_v33  ;;  %v4705_v15 = vadd.f32 %v4704_v63, %v4642_v46  ;;  %v4572_v1 = vadd.f32 %v4571_v11, %v18252_v33  ;;  %v4643_v41 = vmul.f32 %v18252_v33, %v18252_v33 }
 0x553   :  { %v4573_v4 = vadd.f32 %v18242_v35, %v4572_v1  ;;  %v4706_v5 = vadd.f32 %v4705_v15, %v4643_v41 }
 0x555   :  { %v4707_v29 = vadd.f32 %v4706_v5, %v4644_v0  ;;  %v18262_v20 = vpop.f32.mrb[48].mxu0  ;;  %v4574_v39 = vadd.f32 %v18250_v47, %v4573_v4 }
 0x556   :  { %22645 = vst [vmem:[#allocation11_spill] sm:$0xff] %v18262_v20  ;;  %v18265_v45 = vpop.f32.mrb[49].mxu0  ;;  %v4648_v0 = vmul.f32 %v18262_v20, %v18262_v20 }
 0x557   :  { %22646 = vst [vmem:[#allocation12_spill] sm:$0xff] %v18265_v45  ;;  %v4575_v51 = vadd.f32 %v4574_v39, %v18265_v45  ;;  %v4646_v61 = vmul.f32 %v18265_v45, %v18265_v45  ;;  %v4708_v11 = vadd.f32 %v4707_v29, %v4645_v27  ;;  %v18270_v46 = vpop.f32.mrb[50].mxu0 }
 0x558   :  { %22647 = vst [vmem:[#allocation13_spill] sm:$0xff] %v18270_v46  ;;  %v18272_v63 = vpop.f32.mrb[51].mxu0  ;;  %v4649_v39 = vmul.f32 %v18270_v46, %v18270_v46 }
 0x559   :  { %22648 = vst [vmem:[#allocation14_spill] sm:$0xff] %v18272_v63  ;;  %v4709_v15 = vadd.f32 %v4708_v11, %v4646_v61  ;;  %v4576_v1 = vadd.f32 %v4575_v51, %v18272_v63  ;;  %v4647_v41 = vmul.f32 %v18272_v63, %v18272_v63 }
 0x55b   :  { %v4577_v4 = vadd.f32 %v18262_v20, %v4576_v1  ;;  %v4710_v5 = vadd.f32 %v4709_v15, %v4647_v41 }
 0x55d   :  { %v4711_v27 = vadd.f32 %v4710_v5, %v4648_v0  ;;  %v18282_v29 = vpop.f32.mrb[52].mxu0  ;;  %v4578_v45 = vadd.f32 %v18270_v46, %v4577_v4 }
 0x55e   :  { %22649 = vst [vmem:[#allocation15_spill] sm:$0xff] %v18282_v29  ;;  %v18285_v61 = vpop.f32.mrb[53].mxu0  ;;  %v4652_v4 = vmul.f32 %v18282_v29, %v18282_v29 }
 0x55f   :  { %22650 = vst [vmem:[#allocation16_spill] sm:$0xff] %v18285_v61  ;;  %v4579_v51 = vadd.f32 %v4578_v45, %v18285_v61  ;;  %v4650_v11 = vmul.f32 %v18285_v61, %v18285_v61  ;;  %v4712_v63 = vadd.f32 %v4711_v27, %v4649_v39  ;;  %v18290_v47 = vpop.f32.mrb[54].mxu0 }
 0x560   :  { %22651 = vst [vmem:[#allocation17_spill] sm:$0xff] %v18290_v47  ;;  %v18292_v1 = vpop.f32.mrb[55].mxu0  ;;  %v4653_v61 = vmul.f32 %v18290_v47, %v18290_v47 }
 0x561   :  { %22652 = vst [vmem:[#allocation18_spill] sm:$0xff] %v18292_v1  ;;  %v4713_v15 = vadd.f32 %v4712_v63, %v4650_v11  ;;  %v4580_v41 = vadd.f32 %v4579_v51, %v18292_v1  ;;  %v4651_v0 = vmul.f32 %v18292_v1, %v18292_v1 }
 0x563   :  { %v4581_v5 = vadd.f32 %v18282_v29, %v4580_v41  ;;  %v4714_v45 = vadd.f32 %v4713_v15, %v4651_v0 }
 0x565   :  { %v4715_v39 = vadd.f32 %v4714_v45, %v4652_v4  ;;  %v18302_v27 = vpop.f32.mrb[56].mxu0  ;;  %v4582_v46 = vadd.f32 %v18290_v47, %v4581_v5 }
 0x566   :  { %22653 = vst [vmem:[#allocation19_spill] sm:$0xff] %v18302_v27  ;;  %v18305_v63 = vpop.f32.mrb[57].mxu0  ;;  %v4656_v5 = vmul.f32 %v18302_v27, %v18302_v27 }
 0x567   :  { %22654 = vst [vmem:[#allocation20_spill] sm:$0xff] %v18305_v63  ;;  %v4583_v51 = vadd.f32 %v4582_v46, %v18305_v63  ;;  %v4654_v11 = vmul.f32 %v18305_v63, %v18305_v63  ;;  %v4716_v1 = vadd.f32 %v4715_v39, %v4653_v61  ;;  %v18310_v20 = vpop.f32.mrb[58].mxu0 }
 0x568   :  { %22655 = vst [vmem:[#allocation21_spill] sm:$0xff] %v18310_v20  ;;  %v18312_v41 = vpop.f32.mrb[59].mxu0  ;;  %v4657_v63 = vmul.f32 %v18310_v20, %v18310_v20 }
 0x569   :  { %22656 = vst [vmem:[#allocation22_spill] sm:$0xff] %v18312_v41  ;;  %v4717_v15 = vadd.f32 %v4716_v1, %v4654_v11  ;;  %v4584_v0 = vadd.f32 %v4583_v51, %v18312_v41  ;;  %v4655_v4 = vmul.f32 %v18312_v41, %v18312_v41 }
 0x56b   :  { %v4585_v45 = vadd.f32 %v18302_v27, %v4584_v0  ;;  %v4718_v46 = vadd.f32 %v4717_v15, %v4655_v4 }
 0x56d   :  { %v4719_v61 = vadd.f32 %v4718_v46, %v4656_v5  ;;  %v18322_v39 = vpop.f32.mrb[60].mxu0  ;;  %v4586_v47 = vadd.f32 %v18310_v20, %v4585_v45 }
 0x56e   :  { %v18325_v1 = vpop.f32.mrb[61].mxu0  ;;  %v4660_v45 = vmul.f32 %v18322_v39, %v18322_v39 }
 0x56f   :  { %22657 = vst [vmem:[#allocation23_spill] sm:$0xff] %v18325_v1  ;;  %v4587_v51 = vadd.f32 %v4586_v47, %v18325_v1  ;;  %v4658_v11 = vmul.f32 %v18325_v1, %v18325_v1  ;;  %v4720_v41 = vadd.f32 %v4719_v61, %v4657_v63  ;;  %v18330_v29 = vpop.f32.mrb[62].mxu0 }
 0x570   :  { %v18332_v0 = vpop.f32.mrb[63].mxu0  ;;  %v4661_v1 = vmul.f32 %v18330_v29, %v18330_v29 }
 0x571   :  { %v4721_v15 = vadd.f32 %v4720_v41, %v4658_v11  ;;  %v4588_v4 = vadd.f32 %v4587_v51, %v18332_v0  ;;  %v4659_v5 = vmul.f32 %v18332_v0, %v18332_v0 }
 0x573   :  { %v4589_v46 = vadd.f32 %v18322_v39, %v4588_v4  ;;  %v4722_v47 = vadd.f32 %v4721_v15, %v4659_v5 }
 0x575   :  { %v4590_v63 = vadd.f32 %v18330_v29, %v4589_v46  ;;  %v4723_v61 = vadd.f32 %v4722_v47, %v4660_v45 }
 0x577   :  { %v4591_v20 = vrot.slane %v4590_v63, 4  ;;  %v4724_v27 = vadd.f32 %v4723_v61, %v4661_v1  ;;  %v18470_v1 = vld [vmem:[%s22406_s2] ss:$0 sm:$0xff] }
 0x578   :  { %v22678_v61 = vld [vmem:[#allocation23_spill] sm:$0xff] }
 0x579   :  { %v4592_v41 = vadd.f32 %v4591_v20, %v4590_v63  ;;  %v4725_v11 = vrot.slane %v4724_v27, 4 }
 0x57b   :  { %v4593_v51 = vrot.slane %v4592_v41, 2  ;;  %v4726_v35 = vadd.f32 %v4725_v11, %v4724_v27  ;;  %v22658_v11 = vld [vmem:[#allocation4_spill] sm:$0xff] }
 0x57d   :  { %v4594_v33 = vadd.f32 %v4593_v51, %v4592_v41  ;;  %v4727_v23 = vrot.slane %v4726_v35, 2  ;;  %v22659_v51 = vld [vmem:[#allocation6_spill] sm:$0xff] }
 0x57f   :  { %v4595_v56 = vrot.slane %v4594_v33, 1  ;;  %v4728_v50 = vadd.f32 %v4727_v23, %v4726_v35  ;;  %v22670_v23 = vld [vmem:[#allocation16_spill] sm:$0xff]  ;;  %v22671_v35 = vld [vmem:[#allocation18_spill] sm:$0xff] }
 0x581   :  { %v4596_v43 = vadd.f32 %v4595_v56, %v4594_v33  ;;  %v4729_v38 = vrot.slane %v4728_v50, 1  ;;  %v22669_v33 = vld [vmem:[#allocation13_spill] sm:$0xff] }
 0x583   :  { %v18343_v4 = vmul.f32 0.001953125, %v4596_v43  ;;  %v4730_v15 = vadd.f32 %v4729_v38, %v4728_v50 }
 0x585   :  { %v4731_v5 = vmul.f32 0.001953125, %v4730_v15  ;;  %v4732_v46 = vmul.f32 %v18343_v4, %v18343_v4  ;;  %v22660_v15 = vld [vmem:[#allocation3_spill] sm:$0xff]  ;;  %v22679_v45 = vsub.f32 %v18332_v0, %v18343_v4  ;;  %v22680_v20 = vsub.f32 %v18025_v25, %v18343_v4 }
 0x586   :  { %v22681_v43 = vsub.f32 %v18029_v6, %v18343_v4  ;;  %v18501_v0 = vld [vmem:[%s22407_s3] ss:$0 sm:$0xff]  ;;  %v22684_v25 = vsub.f32 %v18027_v7, %v18343_v4  ;;  %v22685_v6 = vsub.f32 %v18045_v48, %v18343_v4  ;;  %v22686_v47 = vsub.f32 %v18052_v28, %v18343_v4 }
 0x587   :  { %v4733_v38 = vsub.f32 %v4731_v5, %v4732_v46  ;;  %v22661_v5 = vld [vmem:[#allocation5_spill] sm:$0xff]  ;;  %v22662_v46 = vld [vmem:[#allocation8_spill] sm:$0xff]  ;;  %22682 = vst [vmem:[#allocation4_spill] sm:$0xff] %v18501_v0  ;;  %v22687_v7 = vsub.f32 %v18042_v32, %v18343_v4  ;;  %v22688_v48 = vsub.f32 %v18050_v12, %v18343_v4  ;;  %v22689_v28 = vsub.f32 %v18065_v17, %v18343_v4 }
 0x589   :  { %v4798_v41 = vadd.f32 1e-05, %v4733_v38  ;;  %v22677_v38 = vld [vmem:[#allocation21_spill] sm:$0xff] }
 0x58b   :  { %15590 = vrsqrt.f32 %v4798_v41 }
 0x595   :  { %v18465_v63 = vpop.eup %15590 }
 0x596   :  { %v4861_v27 = vmul.f32 %v18465_v63, %v22679_v45  ;;  %v18490_v41 = vmul.f32 %v18465_v63, %v22680_v20  ;;  %v18496_v50 = vmul.f32 %v18465_v63, %v22681_v43  ;;  %v22683_v45 = vsub.f32 %v18023_v57, %v18343_v4 }
 0x597   :  { %v18513_v20 = vmul.f32 %v18465_v63, %v22684_v25  ;;  %v18519_v43 = vmul.f32 %v18465_v63, %v22685_v6  ;;  %v18525_v57 = vmul.f32 %v18465_v63, %v22686_v47  ;;  %v18532_v25 = vmul.f32 %v18465_v63, %v22687_v7 }
 0x598   :  { %v18507_v56 = vmul.f32 %v18465_v63, %v22683_v45  ;;  %v4931_v45 = vmul.f32 %v18470_v1, %v4861_v27  ;;  %v18538_v6 = vmul.f32 %v18465_v63, %v22688_v48  ;;  %v18544_v47 = vmul.f32 %v18465_v63, %v22689_v28 }
 0x599   :  { %v22690_v27 = vsub.f32 %v18072_v19, %v18343_v4  ;;  %v22691_v7 = vsub.f32 %v18062_v3, %v18343_v4  ;;  %v22692_v48 = vsub.f32 %v18070_v22, %v18343_v4  ;;  %v22693_v28 = vsub.f32 %v18085_v10, %v18343_v4 }
 0x59a   :  { %v22695_v3 = vsub.f32 %v18092_v54, %v18343_v4  ;;  %v22696_v22 = vsub.f32 %v18082_v31, %v18343_v4  ;;  %v22697_v10 = vsub.f32 %v18090_v9, %v18343_v4 }
 0x59b   :  { %v18550_v32 = vmul.f32 %v18465_v63, %v22690_v27  ;;  %v18556_v12 = vmul.f32 %v18465_v63, %v22691_v7  ;;  %v18562_v17 = vmul.f32 %v18465_v63, %v22692_v48  ;;  %v18568_v19 = vmul.f32 %v18465_v63, %v22693_v28 }
 0x59c   :  { %v18571_v27 = vadd.f32 %v18501_v0, %v4931_v45  ;;  %v18577_v7 = vmul.f32 %v18465_v63, %v22695_v3  ;;  %v18583_v48 = vmul.f32 %v18465_v63, %v22696_v22  ;;  %v18589_v28 = vmul.f32 %v18465_v63, %v22697_v10 }
 0x59d   :  { %v22698_v45 = vsub.f32 %v18105_v14, %v18343_v4  ;;  %v22699_v3 = vsub.f32 %v18112_v62, %v18343_v4  ;;  %v22700_v22 = vsub.f32 %v18102_v40, %v18343_v4  ;;  %v22701_v10 = vsub.f32 %v18110_v52, %v18343_v4 }
 0x59e   :  { %22694 = vst [vmem:[#allocation6_spill] sm:$0xff] %v18571_v27  ;;  %v22702_v62 = vsub.f32 %v18125_v37, %v18343_v4  ;;  %v22703_v40 = vsub.f32 %v18132_v21, %v18343_v4  ;;  %v22704_v52 = vsub.f32 %v18122_v44, %v18343_v4  ;;  %v22705_v0 = vsub.f32 %v18130_v34, %v18343_v4 }
 0x59f   :  { %v18595_v54 = vmul.f32 %v18465_v63, %v22698_v45  ;;  %v18601_v31 = vmul.f32 %v18465_v63, %v22699_v3  ;;  %v18607_v9 = vmul.f32 %v18465_v63, %v22700_v22  ;;  %v18613_v14 = vmul.f32 %v18465_v63, %v22701_v10 }
 0x5a0   :  { %v11928_v45 = vmul.f32 -1.442695, %v18571_v27  ;;  %v18620_v3 = vmul.f32 %v18465_v63, %v22702_v62  ;;  %v18626_v22 = vmul.f32 %v18465_v63, %v22703_v40  ;;  %v18632_v10 = vmul.f32 %v18465_v63, %v22704_v52 }
 0x5a1   :  { %v18638_v37 = vmul.f32 %v18465_v63, %v22705_v0  ;;  %v22706_v62 = vsub.f32 %v18145_v58, %v18343_v4  ;;  %v22707_v40 = vsub.f32 %v18152_v8, %v18343_v4  ;;  %v22708_v52 = vsub.f32 %v18142_v26, %v18343_v4 }
 0x5a2   :  { %15592 = vpow2.f32 %v11928_v45  ;;  %v22709_v0 = vsub.f32 %v18150_v30, %v18343_v4  ;;  %v22712_v45 = vsub.f32 %v18162_v49, %v18343_v4 }
 0x5a3   :  { %v18644_v21 = vmul.f32 %v18465_v63, %v22706_v62  ;;  %v18650_v44 = vmul.f32 %v18465_v63, %v22707_v40  ;;  %v18656_v34 = vmul.f32 %v18465_v63, %v22708_v52  ;;  %v22710_v62 = vsub.f32 %v18165_v53, %v18343_v4 }
 0x5a4   :  { %v18662_v58 = vmul.f32 %v18465_v63, %v22709_v0  ;;  %v22711_v40 = vsub.f32 %v18172_v18, %v18343_v4  ;;  %v18680_v30 = vmul.f32 %v18465_v63, %v22712_v45  ;;  %v22713_v52 = vsub.f32 %v18170_v24, %v18343_v4 }
 0x5a5   :  { %v18668_v8 = vmul.f32 %v18465_v63, %v22710_v62  ;;  %v22714_v0 = vsub.f32 %v18185_v55, %v18343_v4  ;;  %v22715_v62 = vsub.f32 %v18192_v42, %v18343_v4  ;;  %v22717_v45 = vsub.f32 %v18190_v36, %v18343_v4 }
 0x5a6   :  { %v18674_v26 = vmul.f32 %v18465_v63, %v22711_v40  ;;  %v18686_v53 = vmul.f32 %v18465_v63, %v22713_v52  ;;  %v22716_v40 = vsub.f32 %v18182_v16, %v18343_v4  ;;  %v22718_v52 = vsub.f32 %v18205_v60, %v18343_v4 }
 0x5a7   :  { %v18692_v18 = vmul.f32 %v18465_v63, %v22714_v0  ;;  %v18698_v49 = vmul.f32 %v18465_v63, %v22715_v62  ;;  %v18710_v55 = vmul.f32 %v18465_v63, %v22717_v45  ;;  %v22719_v0 = vsub.f32 %v18212_v13, %v18343_v4 }
 0x5a8   :  { %v18704_v24 = vmul.f32 %v18465_v63, %v22716_v40  ;;  %v18716_v42 = vmul.f32 %v18465_v63, %v22718_v52  ;;  %v22720_v62 = vsub.f32 %v18202_v59, %v18343_v4  ;;  %v22721_v40 = vsub.f32 %v18210_v2, %v18343_v4 }
 0x5a9   :  { %v18722_v16 = vmul.f32 %v18465_v63, %v22719_v0  ;;  %v22722_v45 = vsub.f32 %v22658_v11, %v18343_v4  ;;  %v22723_v52 = vsub.f32 %v22659_v51, %v18343_v4  ;;  %v22724_v0 = vsub.f32 %v22660_v15, %v18343_v4 }
 0x5aa   :  { %v18728_v36 = vmul.f32 %v18465_v63, %v22720_v62  ;;  %v18734_v60 = vmul.f32 %v18465_v63, %v22721_v40  ;;  %v22725_v62 = vsub.f32 %v22661_v5, %v18343_v4  ;;  %v22727_v40 = vsub.f32 %v22662_v46, %v18343_v4 }
 0x5ab   :  { %v18740_v13 = vmul.f32 %v18465_v63, %v22722_v45  ;;  %v18746_v59 = vmul.f32 %v18465_v63, %v22723_v52  ;;  %v18752_v2 = vmul.f32 %v18465_v63, %v22724_v0  ;;  %v22729_v45 = vld [vmem:[#allocation10_spill] sm:$0xff]  ;;  %v22732_v0 = vld [vmem:[#allocation7_spill] sm:$0xff] }
 0x5ac   :  { %v18758_v11 = vmul.f32 %v18465_v63, %v22725_v62  ;;  %v18764_v51 = vmul.f32 %v18465_v63, %v22727_v40  ;;  %v22730_v52 = vsub.f32 %v22729_v45, %v18343_v4  ;;  %v22733_v27 = vsub.f32 %v22732_v0, %v18343_v4  ;;  %v22735_v62 = vld [vmem:[#allocation9_spill] sm:$0xff]  ;;  %v22737_v40 = vld [vmem:[#allocation12_spill] sm:$0xff] }
 0x5ae   :  { %22726 = vst [vmem:[#allocation3_spill] sm:$0xff] %v18758_v11  ;;  %22728 = vst [vmem:[#allocation5_spill] sm:$0xff] %v18764_v51  ;;  %v18770_v15 = vmul.f32 %v18465_v63, %v22730_v52  ;;  %v18776_v5 = vmul.f32 %v18465_v63, %v22733_v27  ;;  %v22736_v11 = vsub.f32 %v22735_v62, %v18343_v4  ;;  %v22739_v52 = vld [vmem:[#allocation14_spill] sm:$0xff]  ;;  %v22741_v27 = vld [vmem:[#allocation11_spill] sm:$0xff] }
 0x5af   :  { %v22738_v51 = vsub.f32 %v22737_v40, %v18343_v4 }
 0x5b0   :  { %22731 = vst [vmem:[#allocation8_spill] sm:$0xff] %v18770_v15  ;;  %22734 = vst [vmem:[#allocation13_spill] sm:$0xff] %v18776_v5  ;;  %v18782_v46 = vmul.f32 %v18465_v63, %v22736_v11  ;;  %v22740_v15 = vsub.f32 %v22739_v52, %v18343_v4  ;;  %v22742_v5 = vsub.f32 %v22741_v27, %v18343_v4 }
 0x5b1   :  { %v18788_v45 = vmul.f32 %v18465_v63, %v22738_v51  ;;  %v22744_v11 = vsub.f32 %v22669_v33, %v18343_v4  ;;  %v22746_v51 = vsub.f32 %v22670_v23, %v18343_v4 }
 0x5b2   :  { %v18794_v0 = vmul.f32 %v18465_v63, %v22740_v15  ;;  %v18800_v62 = vmul.f32 %v18465_v63, %v22742_v5  ;;  %v22748_v15 = vsub.f32 %v22671_v35, %v18343_v4  ;;  %v22750_v5 = vld [vmem:[#allocation15_spill] sm:$0xff] }
 0x5b3   :  { %v18806_v40 = vmul.f32 %v18465_v63, %v22744_v11  ;;  %v18812_v52 = vmul.f32 %v18465_v63, %v22746_v51  ;;  %v22753_v11 = vld [vmem:[#allocation17_spill] sm:$0xff]  ;;  %v22755_v51 = vld [vmem:[#allocation20_spill] sm:$0xff] }
 0x5b4   :  { %22743 = vst [vmem:[#allocation16_spill] sm:$0xff] %v18800_v62  ;;  %v18818_v27 = vmul.f32 %v18465_v63, %v22748_v15  ;;  %v22751_v62 = vsub.f32 %v22750_v5, %v18343_v4  ;;  %v22757_v15 = vld [vmem:[#allocation22_spill] sm:$0xff] }
 0x5b5   :  { %22745 = vst [vmem:[#allocation18_spill] sm:$0xff] %v18806_v40  ;;  %22747 = vst [vmem:[#allocation21_spill] sm:$0xff] %v18812_v52  ;;  %v22754_v40 = vsub.f32 %v22753_v11, %v18343_v4  ;;  %v22756_v52 = vsub.f32 %v22755_v51, %v18343_v4 }
 0x5b6   :  { %22749 = vst [vmem:[#allocation23_spill] sm:$0xff] %v18818_v27  ;;  %v18824_v33 = vmul.f32 %v18465_v63, %v22751_v62  ;;  %v22758_v27 = vsub.f32 %v22757_v15, %v18343_v4  ;;  %v22759_v62 = vld [vmem:[#allocation19_spill] sm:$0xff] }
 0x5b7   :  { %v18830_v23 = vmul.f32 %v18465_v63, %v22754_v40  ;;  %v18836_v35 = vmul.f32 %v18465_v63, %v22756_v52  ;;  %v22761_v40 = vsub.f32 %v22677_v38, %v18343_v4  ;;  %v22762_v52 = vsub.f32 %v22678_v61, %v18343_v4 }
 0x5b8   :  { %22752 = vst [vmem:[#allocation10_spill] sm:$0xff] %v18824_v33  ;;  %v18842_v5 = vmul.f32 %v18465_v63, %v22758_v27  ;;  %v22760_v33 = vsub.f32 %v22759_v62, %v18343_v4  ;;  %v22763_v27 = vsub.f32 %v18322_v39, %v18343_v4  ;;  %v18880_v61 = vmul.f32 %v18470_v1, %v18496_v50 }
 0x5b9   :  { %v18854_v51 = vmul.f32 %v18465_v63, %v22761_v40  ;;  %v18860_v15 = vmul.f32 %v18465_v63, %v22762_v52  ;;  %v18876_v40 = vmul.f32 %v18470_v1, %v18490_v41  ;;  %v18884_v39 = vmul.f32 %v18470_v1, %v18507_v56  ;;  %v15593_v52 = vpop.eup %15592 }
 0x5ba   :  { %v18848_v11 = vmul.f32 %v18465_v63, %v22760_v33  ;;  %v18866_v62 = vmul.f32 %v18465_v63, %v22763_v27  ;;  %v22764_v33 = vsub.f32 %v18330_v29, %v18343_v4  ;;  %v18888_v27 = vmul.f32 %v18470_v1, %v18513_v20 }
 0x5bb   :  { %v18892_v29 = vmul.f32 %v18470_v1, %v18519_v43  ;;  %v18896_v4 = vmul.f32 %v18470_v1, %v18525_v57  ;;  %v18900_v50 = vmul.f32 %v18470_v1, %v18532_v25  ;;  %v18904_v56 = vmul.f32 %v18470_v1, %v18538_v6 }
 0x5bc   :  { %v18872_v38 = vmul.f32 %v18465_v63, %v22764_v33  ;;  %v5257_v63 = vadd.f32 1.0, %v15593_v52  ;;  %v18908_v41 = vmul.f32 %v18470_v1, %v18544_v47  ;;  %v18912_v20 = vmul.f32 %v18470_v1, %v18550_v32  ;;  %v22768_v33 = vld [vmem:[#allocation5_spill] sm:$0xff]  ;;  %v22770_v52 = vld [vmem:[#allocation8_spill] sm:$0xff] }
 0x5bd   :  { %v18916_v43 = vmul.f32 %v18470_v1, %v18556_v12  ;;  %v18920_v57 = vmul.f32 %v18470_v1, %v18562_v17  ;;  %v18924_v25 = vmul.f32 %v18470_v1, %v18568_v19  ;;  %v18928_v6 = vmul.f32 %v18470_v1, %v18577_v7 }
 0x5be   :  { %15594 = vrcp.f32 %v5257_v63  ;;  %v18932_v47 = vmul.f32 %v18470_v1, %v18583_v48  ;;  %v18936_v32 = vmul.f32 %v18470_v1, %v18589_v28  ;;  %v18940_v12 = vmul.f32 %v18470_v1, %v18595_v54  ;;  %v22772_v63 = vld [vmem:[#allocation13_spill] sm:$0xff] }
 0x5bf   :  { %v18944_v17 = vmul.f32 %v18470_v1, %v18601_v31  ;;  %v18948_v19 = vmul.f32 %v18470_v1, %v18607_v9  ;;  %v18952_v7 = vmul.f32 %v18470_v1, %v18613_v14  ;;  %v18956_v48 = vmul.f32 %v18470_v1, %v18620_v3 }
 0x5c0   :  { %v18960_v28 = vmul.f32 %v18470_v1, %v18626_v22  ;;  %v18964_v54 = vmul.f32 %v18470_v1, %v18632_v10  ;;  %v18968_v31 = vmul.f32 %v18470_v1, %v18638_v37  ;;  %v18972_v9 = vmul.f32 %v18470_v1, %v18644_v21 }
 0x5c1   :  { %v18976_v14 = vmul.f32 %v18470_v1, %v18650_v44  ;;  %v18980_v3 = vmul.f32 %v18470_v1, %v18656_v34  ;;  %v18984_v22 = vmul.f32 %v18470_v1, %v18662_v58  ;;  %v18988_v10 = vmul.f32 %v18470_v1, %v18668_v8 }
 0x5c2   :  { %v18992_v37 = vmul.f32 %v18470_v1, %v18674_v26  ;;  %v18996_v21 = vmul.f32 %v18470_v1, %v18680_v30  ;;  %v19000_v44 = vmul.f32 %v18470_v1, %v18686_v53  ;;  %v19004_v34 = vmul.f32 %v18470_v1, %v18692_v18 }
 0x5c3   :  { %v19008_v58 = vmul.f32 %v18470_v1, %v18698_v49  ;;  %v19012_v8 = vmul.f32 %v18470_v1, %v18704_v24  ;;  %v19016_v26 = vmul.f32 %v18470_v1, %v18710_v55  ;;  %v19020_v30 = vmul.f32 %v18470_v1, %v18716_v42 }
 0x5c4   :  { %v19024_v53 = vmul.f32 %v18470_v1, %v18722_v16  ;;  %v19028_v18 = vmul.f32 %v18470_v1, %v18728_v36  ;;  %v19032_v49 = vmul.f32 %v18470_v1, %v18734_v60  ;;  %v19036_v24 = vmul.f32 %v18470_v1, %v18740_v13  ;;  %v22766_v16 = vld [vmem:[#allocation3_spill] sm:$0xff] }
 0x5c5   :  { %v19040_v55 = vmul.f32 %v18470_v1, %v18746_v59  ;;  %v19044_v42 = vmul.f32 %v18470_v1, %v18752_v2  ;;  %v19048_v36 = vmul.f32 %v18470_v1, %v22766_v16  ;;  %v19052_v60 = vmul.f32 %v18470_v1, %v22768_v33  ;;  %v15518_v33 = vld [vmem:[%s22405_s4 + $0x40] sm:$0xff]  }
 0x5c6   :  { %v19056_v13 = vmul.f32 %v18470_v1, %v22770_v52  ;;  %v19060_v59 = vmul.f32 %v18470_v1, %v22772_v63  ;;  %v19064_v2 = vmul.f32 %v18470_v1, %v18782_v46  ;;  %v19068_v16 = vmul.f32 %v18470_v1, %v18788_v45  ;;  %13701 = vmatprep.subr.bf16.mxu1 %v15518_v33 }
 0x5c7   :  { %22765 = vst [vmem:[#allocation7_spill] sm:$0xff] %v19044_v42  ;;  %22767 = vst [vmem:[#allocation9_spill] sm:$0xff] %v19048_v36  ;;  %v19075_v52 = vmul.f32 %v18470_v1, %v18794_v0  ;;  %v22782_v42 = vld [vmem:[#allocation10_spill] sm:$0xff]  ;;  %13702 = vmatpush3.bf16.msra.mxu1 %v15518_v33 }
 0x5c8   :  { %22769 = vst [vmem:[#allocation12_spill] sm:$0xff] %v19052_v60  ;;  %22771 = vst [vmem:[#allocation14_spill] sm:$0xff] %v19056_v13  ;;  %v22776_v13 = vld [vmem:[#allocation16_spill] sm:$0xff]  ;;  %v22781_v60 = vld [vmem:[#allocation23_spill] sm:$0xff]  ;;  %v19095_v0 = vmul.f32 %v18470_v1, %v22782_v42  ;;  %v19116_v42 = vmul.f32 %v18470_v1, %v18854_v51 }
 0x5c9   :  { %22773 = vst [vmem:[#allocation11_spill] sm:$0xff] %v19060_v59  ;;  %22774 = vst [vmem:[#allocation15_spill] sm:$0xff] %v19064_v2  ;;  %v19079_v63 = vmul.f32 %v18470_v1, %v22776_v13  ;;  %v22777_v59 = vld [vmem:[#allocation18_spill] sm:$0xff]  ;;  %v22779_v2 = vld [vmem:[#allocation21_spill] sm:$0xff]  ;;  %v19091_v36 = vmul.f32 %v18470_v1, %v22781_v60  ;;  %v19099_v13 = vmul.f32 %v18470_v1, %v18830_v23 }
 0x5ca   :  { %22775 = vst [vmem:[#allocation17_spill] sm:$0xff] %v19068_v16  ;;  %v19083_v46 = vmul.f32 %v18470_v1, %v22777_v59  ;;  %v19087_v45 = vmul.f32 %v18470_v1, %v22779_v2  ;;  %v15595_v16 = vpop.eup %15594  ;;  %v19103_v59 = vmul.f32 %v18470_v1, %v18836_v35  ;;  %v22783_v2 = vld [vmem:[#allocation6_spill] sm:$0xff]  ;;  %v19112_v60 = vmul.f32 %v18470_v1, %v18848_v11  ;;  %v22784_v11 = vld [vmem:[#allocation4_spill] sm:$0xff] }
 0x5cb   :  { %v19120_v23 = vmul.f32 %v18470_v1, %v18860_v15  ;;  %v19124_v35 = vmul.f32 %v18470_v1, %v18866_v62  ;;  %v15519_v51 = vld [vmem:[%s22405_s4 + $0x48] sm:$0xff]   ;;  %v19139_v15 = vadd.f32 %v22784_v11, %v18880_v61  ;;  %v19143_v62 = vadd.f32 %v22784_v11, %v18884_v39 }
 0x5cc   :  { %22778 = vst [vmem:[#allocation20_spill] sm:$0xff] %v19083_v46  ;;  %22780 = vst [vmem:[#allocation22_spill] sm:$0xff] %v19087_v45  ;;  %v5449_v45 = vmul.f32 %v15595_v16, %v22783_v2  ;;  %v19108_v46 = vmul.f32 %v18470_v1, %v18842_v5  ;;  %v19128_v5 = vmul.f32 %v18470_v1, %v18872_v38  ;;  %13703 = vmatprep.subr.bf16.mxu1 %v15519_v51 }
 0x5cd   :  { %v19132_v16 = vadd.f32 %v22784_v11, %v18876_v40  ;;  %22786 = vst [vmem:[#allocation3_spill] sm:$0xff] %v19139_v15  ;;  %v19147_v1 = vadd.f32 %v22784_v11, %v18888_v27  ;;  %v19151_v38 = vadd.f32 %v22784_v11, %v18892_v29  ;;  %v19155_v40 = vadd.f32 %v22784_v11, %v18896_v4 }
 0x5ce   :  { %5658 = vst [vmem:[#allocation2 + $0x430] sm:$0xff] %v5449_v45  ;;  %v19159_v61 = vadd.f32 %v22784_v11, %v18900_v50  ;;  %v19163_v39 = vadd.f32 %v22784_v11, %v18904_v56  ;;  %v19167_v27 = vadd.f32 %v22784_v11, %v18908_v41  ;;  %v19171_v29 = vadd.f32 %v22784_v11, %v18912_v20  ;;  %v22822_v2 = vld [vmem:[#allocation7_spill] sm:$0xff] }
 0x5cf   :  { %22785 = vst [vmem:[#allocation19_spill] sm:$0xff] %v19132_v16  ;;  %22787 = vst [vmem:[#allocation5_spill] sm:$0xff] %v19147_v1  ;;  %v19175_v4 = vadd.f32 %v22784_v11, %v18916_v43  ;;  %v19179_v50 = vadd.f32 %v22784_v11, %v18920_v57  ;;  %v19183_v56 = vadd.f32 %v22784_v11, %v18924_v25  ;;  %13704 = vmatpush3.bf16.msra.mxu1 %v15519_v51  ;;  %v15520_v25 = vld [vmem:[%s22405_s4 + $0x50] sm:$0xff]  }
 0x5d0   :  { %22788 = vst [vmem:[#allocation8_spill] sm:$0xff] %v19167_v27  ;;  %22789 = vst [vmem:[#allocation13_spill] sm:$0xff] %v19171_v29  ;;  %v19187_v41 = vadd.f32 %v22784_v11, %v18928_v6  ;;  %v19191_v20 = vadd.f32 %v22784_v11, %v18932_v47  ;;  %v19195_v43 = vadd.f32 %v22784_v11, %v18936_v32  ;;  %13705 = vmatprep.subr.bf16.mxu1 %v15520_v25  ;;  %v22824_v51 = vld [vmem:[#allocation9_spill] sm:$0xff] }
 0x5d1   :  { %22790 = vst [vmem:[#allocation16_spill] sm:$0xff] %v19175_v4  ;;  %22791 = vst [vmem:[#allocation18_spill] sm:$0xff] %v19179_v50  ;;  %v19199_v57 = vadd.f32 %v22784_v11, %v18940_v12  ;;  %v19206_v6 = vadd.f32 %v22784_v11, %v18944_v17  ;;  %v19210_v47 = vadd.f32 %v22784_v11, %v18948_v19 }
 0x5d2   :  { %22792 = vst [vmem:[#allocation21_spill] sm:$0xff] %v19183_v56  ;;  %22793 = vst [vmem:[#allocation23_spill] sm:$0xff] %v19187_v41  ;;  %v19214_v32 = vadd.f32 %v22784_v11, %v18952_v7  ;;  %v19218_v12 = vadd.f32 %v22784_v11, %v18956_v48  ;;  %v19222_v33 = vadd.f32 %v22784_v11, %v18960_v28 }
 0x5d3   :  { %22794 = vst [vmem:[#allocation10_spill] sm:$0xff] %v19191_v20  ;;  %22795 = vst [vmem:[#allocation6_spill] sm:$0xff] %v19195_v43  ;;  %v19226_v17 = vadd.f32 %v22784_v11, %v18964_v54  ;;  %v19230_v19 = vadd.f32 %v22784_v11, %v18968_v31  ;;  %v19234_v7 = vadd.f32 %v22784_v11, %v18972_v9  ;;  %13706 = vmatpush3.bf16.msra.mxu1 %v15520_v25  ;;  %v22826_v25 = vld [vmem:[#allocation12_spill] sm:$0xff] }
 0x5d4   :  { %22796 = vst [vmem:[#allocation4_spill] sm:$0xff] %v19199_v57  ;;  %22797 = vst [vmem:[#allocation24_spill] sm:$0xff] %v19206_v6  ;;  %v19238_v48 = vadd.f32 %v22784_v11, %v18976_v14  ;;  %v19242_v28 = vadd.f32 %v22784_v11, %v18980_v3  ;;  %v19246_v54 = vadd.f32 %v22784_v11, %v18984_v22 }
 0x5d5   :  { %22798 = vst [vmem:[#allocation25_spill] sm:$0xff] %v19210_v47  ;;  %22799 = vst [vmem:[#allocation26_spill] sm:$0xff] %v19214_v32  ;;  %v19250_v31 = vadd.f32 %v22784_v11, %v18988_v10  ;;  %v19254_v9 = vadd.f32 %v22784_v11, %v18992_v37  ;;  %v19258_v14 = vadd.f32 %v22784_v11, %v18996_v21  ;;  %v15521_v10 = vld [vmem:[%s22405_s4 + $0x58] sm:$0xff]  }
 0x5d6   :  { %22800 = vst [vmem:[#allocation27_spill] sm:$0xff] %v19218_v12  ;;  %22801 = vst [vmem:[#allocation28_spill] sm:$0xff] %v19222_v33  ;;  %v19262_v3 = vadd.f32 %v22784_v11, %v19000_v44  ;;  %v19266_v22 = vadd.f32 %v22784_v11, %v19004_v34  ;;  %v19273_v37 = vadd.f32 %v22784_v11, %v19008_v58  ;;  %13707 = vmatprep.subr.bf16.mxu1 %v15521_v10 }
 0x5d7   :  { %22802 = vst [vmem:[#allocation29_spill] sm:$0xff] %v19226_v17  ;;  %22803 = vst [vmem:[#allocation30_spill] sm:$0xff] %v19230_v19  ;;  %v19277_v21 = vadd.f32 %v22784_v11, %v19012_v8  ;;  %v19281_v44 = vadd.f32 %v22784_v11, %v19016_v26  ;;  %v19285_v34 = vadd.f32 %v22784_v11, %v19020_v30  ;;  %13708 = vmatpush3.bf16.msra.mxu1 %v15521_v10  ;;  %v15522_v10 = vld [vmem:[%s22405_s4 + $0x60] sm:$0xff]  }
 0x5d8   :  { %22804 = vst [vmem:[#allocation31_spill] sm:$0xff] %v19234_v7  ;;  %22805 = vst [vmem:[#allocation32_spill] sm:$0xff] %v19238_v48  ;;  %v19289_v45 = vadd.f32 %v22784_v11, %v19024_v53  ;;  %v19293_v58 = vadd.f32 %v22784_v11, %v19028_v18  ;;  %v19297_v8 = vadd.f32 %v22784_v11, %v19032_v49  ;;  %13709 = vmatprep.subr.bf16.mxu1 %v15522_v10 }
 0x5d9   :  { %22806 = vst [vmem:[#allocation33_spill] sm:$0xff] %v19242_v28  ;;  %22807 = vst [vmem:[#allocation34_spill] sm:$0xff] %v19246_v54  ;;  %v19301_v26 = vadd.f32 %v22784_v11, %v19036_v24  ;;  %v19305_v30 = vadd.f32 %v22784_v11, %v19040_v55  ;;  %v19309_v53 = vadd.f32 %v22784_v11, %v22822_v2  ;;  %v22828_v24 = vld [vmem:[#allocation14_spill] sm:$0xff] }
 0x5da   :  { %22808 = vst [vmem:[#allocation35_spill] sm:$0xff] %v19250_v31  ;;  %22809 = vst [vmem:[#allocation36_spill] sm:$0xff] %v19254_v9  ;;  %v19313_v18 = vadd.f32 %v22784_v11, %v22824_v51  ;;  %v19317_v49 = vadd.f32 %v22784_v11, %v22826_v25  ;;  %v19340_v25 = vadd.f32 %v22784_v11, %v19075_v52 }
 0x5db   :  { %22810 = vst [vmem:[#allocation37_spill] sm:$0xff] %v19258_v14  ;;  %22811 = vst [vmem:[#allocation38_spill] sm:$0xff] %v19262_v3  ;;  %v19360_v52 = vadd.f32 %v22784_v11, %v19095_v0  ;;  %v19380_v0 = vadd.f32 %v22784_v11, %v19116_v42  ;;  %13710 = vmatpush3.bf16.msra.mxu1 %v15522_v10  ;;  %v15523_v42 = vld [vmem:[%s22405_s4 + $0x68] sm:$0xff]   ;;  %v11870_v10 = vmul.f32 -1.442695, %v19147_v1 }
 0x5dc   :  { %22812 = vst [vmem:[#allocation39_spill] sm:$0xff] %v19266_v22  ;;  %22813 = vst [vmem:[#allocation40_spill] sm:$0xff] %v19273_v37  ;;  %13711 = vmatprep.subr.bf16.mxu1 %v15523_v42  ;;  %v11876_v1 = vmul.f32 -1.442695, %v19171_v29 }
 0x5dd   :  { %22814 = vst [vmem:[#allocation41_spill] sm:$0xff] %v19277_v21  ;;  %22815 = vst [vmem:[#allocation42_spill] sm:$0xff] %v19281_v44 }
 0x5de   :  { %22816 = vst [vmem:[#allocation43_spill] sm:$0xff] %v19285_v34  ;;  %22817 = vst [vmem:[#allocation44_spill] sm:$0xff] %v19289_v45 }
 0x5df   :  { %22818 = vst [vmem:[#allocation45_spill] sm:$0xff] %v19293_v58  ;;  %22819 = vst [vmem:[#allocation46_spill] sm:$0xff] %v19297_v8  ;;  %v22830_v8 = vld [vmem:[#allocation11_spill] sm:$0xff]  ;;  %13712 = vmatpush3.bf16.msra.mxu1 %v15523_v42  ;;  %v11879_v42 = vmul.f32 -1.442695, %v19183_v56 }
 0x5e0   :  { %22820 = vst [vmem:[#allocation47_spill] sm:$0xff] %v19301_v26  ;;  %22821 = vst [vmem:[#allocation48_spill] sm:$0xff] %v19305_v30  ;;  %v19321_v26 = vadd.f32 %v22784_v11, %v22828_v24  ;;  %v19325_v55 = vadd.f32 %v22784_v11, %v22830_v8  ;;  %v22832_v30 = vld [vmem:[#allocation15_spill] sm:$0xff]  ;;  %v19344_v8 = vadd.f32 %v22784_v11, %v19079_v63  ;;  %v22838_v24 = vld [vmem:[#allocation20_spill] sm:$0xff]  ;;  %v11894_v56 = vmul.f32 -1.442695, %v19246_v54 }
 0x5e1   :  { %22823 = vst [vmem:[#allocation7_spill] sm:$0xff] %v19309_v53  ;;  %22825 = vst [vmem:[#allocation9_spill] sm:$0xff] %v19313_v18  ;;  %v19329_v2 = vadd.f32 %v22784_v11, %v22832_v30  ;;  %v22834_v53 = vld [vmem:[#allocation17_spill] sm:$0xff]  ;;  %v19348_v30 = vadd.f32 %v22784_v11, %v22838_v24  ;;  %v19364_v63 = vadd.f32 %v22784_v11, %v19099_v13 }
 0x5e2   :  { %22827 = vst [vmem:[#allocation12_spill] sm:$0xff] %v19317_v49  ;;  %22829 = vst [vmem:[#allocation14_spill] sm:$0xff] %v19321_v26  ;;  %v19333_v51 = vadd.f32 %v22784_v11, %v22834_v53  ;;  %v19368_v24 = vadd.f32 %v22784_v11, %v19103_v59  ;;  %v19384_v13 = vadd.f32 %v22784_v11, %v19120_v23  ;;  %v11869_v23 = vmul.f32 -1.442695, %v19143_v62 }
 0x5e3   :  { %22831 = vst [vmem:[#allocation11_spill] sm:$0xff] %v19325_v55  ;;  %22833 = vst [vmem:[#allocation15_spill] sm:$0xff] %v19329_v2  ;;  %v22840_v2 = vld [vmem:[#allocation22_spill] sm:$0xff]  ;;  %v19388_v59 = vadd.f32 %v22784_v11, %v19124_v35  ;;  %v11871_v35 = vmul.f32 -1.442695, %v19151_v38 }
 0x5e4   :  { %22835 = vst [vmem:[#allocation17_spill] sm:$0xff] %v19333_v51  ;;  %22836 = vst [vmem:[#allocation49_spill] sm:$0xff] %v19340_v25  ;;  %v19352_v53 = vadd.f32 %v22784_v11, %v22840_v2  ;;  %v19356_v51 = vadd.f32 %v22784_v11, %v19091_v36  ;;  %v19372_v2 = vadd.f32 %v22784_v11, %v19108_v46 }
 0x5e5   :  { %22837 = vst [vmem:[#allocation50_spill] sm:$0xff] %v19344_v8  ;;  %22839 = vst [vmem:[#allocation20_spill] sm:$0xff] %v19348_v30  ;;  %v19376_v36 = vadd.f32 %v22784_v11, %v19112_v60  ;;  %v19392_v46 = vadd.f32 %v22784_v11, %v19128_v5  ;;  %v11867_v60 = vmul.f32 -1.442695, %v19132_v16  ;;  %v11872_v5 = vmul.f32 -1.442695, %v19155_v40 }
 0x5e6   :  { %22841 = vst [vmem:[#allocation22_spill] sm:$0xff] %v19352_v53  ;;  %22842 = vst [vmem:[#allocation51_spill] sm:$0xff] %v19356_v51  ;;  %v11873_v11 = vmul.f32 -1.442695, %v19159_v61  ;;  %v11875_v16 = vmul.f32 -1.442695, %v19167_v27 }
 0x5e7   :  { %22843 = vst [vmem:[#allocation52_spill] sm:$0xff] %v19360_v52  ;;  %22844 = vst [vmem:[#allocation53_spill] sm:$0xff] %v19364_v63  ;;  %15596 = vpow2.f32 %v11867_v60  ;;  %v11877_v60 = vmul.f32 -1.442695, %v19175_v4 }
 0x5e8   :  { %22845 = vst [vmem:[#allocation54_spill] sm:$0xff] %v19368_v24  ;;  %22846 = vst [vmem:[#allocation55_spill] sm:$0xff] %v19372_v2 }
 0x5e9   :  { %22847 = vst [vmem:[#allocation56_spill] sm:$0xff] %v19376_v36  ;;  %22848 = vst [vmem:[#allocation57_spill] sm:$0xff] %v19380_v0  ;;  %v11868_v36 = vmul.f32 -1.442695, %v19139_v15  ;;  %v11874_v15 = vmul.f32 -1.442695, %v19163_v39 }
 0x5ea   :  { %22849 = vst [vmem:[#allocation58_spill] sm:$0xff] %v19384_v13  ;;  %22850 = vst [vmem:[#allocation59_spill] sm:$0xff] %v19388_v59 }
 0x5eb   :  { %22851 = vst [vmem:[#allocation60_spill] sm:$0xff] %v19392_v46  ;;  %15598 = vpow2.f32 %v11868_v36  ;;  %v11878_v36 = vmul.f32 -1.442695, %v19179_v50 }
 0x5ec   :  { %15600 = vpow2.f32 %v11869_v23  ;;  %v11880_v23 = vmul.f32 -1.442695, %v19187_v41 }
 0x5ed   :  { %15602 = vpow2.f32 %v11870_v10 }
 0x5ee   :  { %15604 = vpow2.f32 %v11871_v35  ;;  %v11881_v35 = vmul.f32 -1.442695, %v19191_v20 }
 0x5ef   :  { %15606 = vpow2.f32 %v11872_v5 }
 0x5f0   :  { %15608 = vpow2.f32 %v11873_v11  ;;  %v11882_v11 = vmul.f32 -1.442695, %v19195_v43 }
 0x5f1   :  { %15610 = vpow2.f32 %v11874_v15  ;;  %v19411_v10 = vpop.eup %15596 }
 0x5f2   :  { %15612 = vpow2.f32 %v11875_v16  ;;  %v11883_v16 = vmul.f32 -1.442695, %v19199_v57 }
 0x5f3   :  { %15614 = vpow2.f32 %v11876_v1  ;;  %v11884_v1 = vmul.f32 -1.442695, %v19206_v6 }
 0x5f4   :  { %15616 = vpow2.f32 %v11877_v60  ;;  %v11885_v60 = vmul.f32 -1.442695, %v19210_v47 }
 0x5f5   :  { %v19414_v5 = vpop.eup %15598  ;;  %15618 = vpow2.f32 %v11878_v36  ;;  %v11886_v36 = vmul.f32 -1.442695, %v19214_v32 }
 0x5f6   :  { %v19417_v4 = vpop.eup %15600  ;;  %15620 = vpow2.f32 %v11879_v42  ;;  %v11887_v42 = vmul.f32 -1.442695, %v19218_v12 }
 0x5f7   :  { %v19420_v15 = vpop.eup %15602  ;;  %15622 = vpow2.f32 %v11880_v23  ;;  %v11888_v23 = vmul.f32 -1.442695, %v19222_v33 }
 0x5f8   :  { %v19423_v41 = vpop.eup %15604  ;;  %15624 = vpow2.f32 %v11881_v35  ;;  %v11889_v35 = vmul.f32 -1.442695, %v19226_v17  ;;  %v11893_v17 = vmul.f32 -1.442695, %v19242_v28 }
 0x5f9   :  { %v19426_v20 = vpop.eup %15606  ;;  %15626 = vpow2.f32 %v11882_v11  ;;  %v11890_v11 = vmul.f32 -1.442695, %v19230_v19 }
 0x5fa   :  { %v19429_v43 = vpop.eup %15608  ;;  %15628 = vpow2.f32 %v11883_v16  ;;  %v15524_v16 = vld [vmem:[%s22405_s4 + $0x70] sm:$0xff]  }
 0x5fb   :  { %v19432_v57 = vpop.eup %15610  ;;  %15630 = vpow2.f32 %v11884_v1  ;;  %v15525_v1 = vld [vmem:[%s22405_s4 + $0x78] sm:$0xff]   ;;  %13713 = vmatprep.subr.bf16.mxu1 %v15524_v16 }
 0x5fc   :  { %v19435_v6 = vpop.eup %15612  ;;  %15632 = vpow2.f32 %v11885_v60  ;;  %v11891_v60 = vmul.f32 -1.442695, %v19234_v7  ;;  %13714 = vmatpush3.bf16.msra.mxu1 %v15524_v16 }
 0x5fd   :  { %v19438_v47 = vpop.eup %15614  ;;  %15634 = vpow2.f32 %v11886_v36  ;;  %v11892_v36 = vmul.f32 -1.442695, %v19238_v48  ;;  %13715 = vmatprep.subr.bf16.mxu1 %v15525_v1 }
 0x5fe   :  { %v19447_v12 = vpop.eup %15616  ;;  %15636 = vpow2.f32 %v11887_v42  ;;  %v16106_v42 = vld [vmem:[#allocation2] sm:$0xff] }
 0x5ff   :  { %v19450_v33 = vpop.eup %15618  ;;  %15638 = vpow2.f32 %v11888_v23  ;;  %v19459_v7 = vpack.c.bf16 %v16106_v42, %v16106_v42  ;;  %v19464_v23 = vld [vmem:[%s22405_s4] sm:$0xff]   ;;  %v11897_v42 = vmul.f32 -1.442695, %v19258_v14 }
 0x600   :  { %v19453_v19 = vpop.eup %15620  ;;  %15640 = vpow2.f32 %v11889_v35  ;;  %v11895_v35 = vmul.f32 -1.442695, %v19250_v31  ;;  %13716 = vmatpush3.bf16.msra.mxu1 %v15525_v1  ;;  %v11901_v1 = vmul.f32 -1.442695, %v19277_v21 }
 0x601   :  { %v19456_v32 = vpop.eup %15622  ;;  %15642 = vpow2.f32 %v11890_v11  ;;  %22852 = vst [vmem:[#allocation61_spill] sm:$0xff] %v19459_v7  ;;  %v11896_v11 = vmul.f32 -1.442695, %v19254_v9  ;;  %13717 = vmatprep.mubr.bf16.mxu1 %v19459_v7  ;;  %13781 = vmatprep.subr.bf16.mxu1 %v19464_v23 }
 0x602   :  { %v19466_v48 = vpop.eup %15624  ;;  %15644 = vpow2.f32 %v11891_v60  ;;  %v11898_v60 = vmul.f32 -1.442695, %v19262_v3  ;;  %v11902_v3 = vmul.f32 -1.442695, %v19281_v44 }
 0x603   :  { %v19469_v16 = vpop.eup %15626  ;;  %15646 = vpow2.f32 %v11892_v36  ;;  %v11899_v36 = vmul.f32 -1.442695, %v19266_v22 }
 0x604   :  { %v19473_v54 = vpop.eup %15628  ;;  %15648 = vpow2.f32 %v11893_v17  ;;  %v11900_v17 = vmul.f32 -1.442695, %v19273_v37 }
 0x605   :  { %v19476_v28 = vpop.eup %15630  ;;  %15650 = vpow2.f32 %v11894_v56 }
 0x606   :  { %v19480_v31 = vpop.eup %15632  ;;  %15652 = vpow2.f32 %v11895_v35  ;;  %v11903_v35 = vmul.f32 -1.442695, %v19285_v34 }
 0x607   :  { %v19483_v9 = vpop.eup %15634  ;;  %15654 = vpow2.f32 %v11896_v11  ;;  %v11904_v11 = vmul.f32 -1.442695, %v19289_v45 }
 0x608   :  { %v19486_v7 = vpop.eup %15636  ;;  %15656 = vpow2.f32 %v11897_v42  ;;  %v11905_v42 = vmul.f32 -1.442695, %v19293_v58 }
 0x609   :  { %v19489_v56 = vpop.eup %15638  ;;  %15658 = vpow2.f32 %v11898_v60  ;;  %v22854_v60 = vld [vmem:[#allocation46_spill] sm:$0xff] }
 0x60a   :  { %v19492_v14 = vpop.eup %15640  ;;  %15660 = vpow2.f32 %v11899_v36  ;;  %v11906_v44 = vmul.f32 -1.442695, %v22854_v60  ;;  %v22855_v36 = vld [vmem:[#allocation47_spill] sm:$0xff] }
 0x60b   :  { %v19495_v22 = vpop.eup %15642  ;;  %15662 = vpow2.f32 %v11900_v17  ;;  %v11907_v34 = vmul.f32 -1.442695, %v22855_v36  ;;  %v22856_v17 = vld [vmem:[#allocation48_spill] sm:$0xff] }
 0x60c   :  { %v19498_v37 = vpop.eup %15644  ;;  %15664 = vpow2.f32 %v11901_v1  ;;  %v11908_v45 = vmul.f32 -1.442695, %v22856_v17  ;;  %v22857_v1 = vld [vmem:[#allocation7_spill] sm:$0xff] }
 0x60d   :  { %22853 = vst [vmem:[#allocation62_spill] sm:$0xff] %v19498_v37  ;;  %v19501_v21 = vpop.eup %15646  ;;  %15666 = vpow2.f32 %v11902_v3  ;;  %v11909_v58 = vmul.f32 -1.442695, %v22857_v1  ;;  %v11910_v3 = vmul.f32 -1.442695, %v19313_v18 }
 0x60e   :  { %v19504_v50 = vpop.eup %15648  ;;  %15668 = vpow2.f32 %v11903_v35  ;;  %v11911_v35 = vmul.f32 -1.442695, %v19317_v49 }
 0x60f   :  { %v19507_v29 = vpop.eup %15650  ;;  %15670 = vpow2.f32 %v11904_v11  ;;  %v11912_v11 = vmul.f32 -1.442695, %v19321_v26 }
 0x610   :  { %v19510_v27 = vpop.eup %15652  ;;  %15672 = vpow2.f32 %v11905_v42  ;;  %v11913_v42 = vmul.f32 -1.442695, %v19325_v55 }
 0x611   :  { %v19513_v37 = vpop.eup %15654  ;;  %15674 = vpow2.f32 %v11906_v44  ;;  %v22860_v44 = vld [vmem:[#allocation15_spill] sm:$0xff] }
 0x612   :  { %22858 = vst [vmem:[#allocation63_spill] sm:$0xff] %v19513_v37  ;;  %v19516_v60 = vpop.eup %15656  ;;  %15676 = vpow2.f32 %v11907_v34  ;;  %v11914_v18 = vmul.f32 -1.442695, %v22860_v44  ;;  %v22861_v34 = vld [vmem:[#allocation17_spill] sm:$0xff] }
 0x613   :  { %22859 = vst [vmem:[#allocation64_spill] sm:$0xff] %v19516_v60  ;;  %v19519_v36 = vpop.eup %15658  ;;  %15678 = vpow2.f32 %v11908_v45  ;;  %v11915_v49 = vmul.f32 -1.442695, %v22861_v34  ;;  %v11916_v45 = vmul.f32 -1.442695, %v19340_v25 }
 0x614   :  { %v19522_v17 = vpop.eup %15660  ;;  %15680 = vpow2.f32 %v11909_v58  ;;  %v11917_v58 = vmul.f32 -1.442695, %v19344_v8 }
 0x615   :  { %v19525_v1 = vpop.eup %15662  ;;  %15682 = vpow2.f32 %v11910_v3  ;;  %v11918_v3 = vmul.f32 -1.442695, %v19348_v30 }
 0x616   :  { %v19528_v37 = vpop.eup %15664  ;;  %15684 = vpow2.f32 %v11911_v35  ;;  %v11919_v35 = vmul.f32 -1.442695, %v19352_v53 }
 0x617   :  { %v19531_v60 = vpop.eup %15666  ;;  %15686 = vpow2.f32 %v11912_v11  ;;  %v11920_v11 = vmul.f32 -1.442695, %v19356_v51 }
 0x618   :  { %v19534_v26 = vpop.eup %15668  ;;  %15688 = vpow2.f32 %v11913_v42  ;;  %v11921_v42 = vmul.f32 -1.442695, %v19360_v52 }
 0x619   :  { %v19537_v55 = vpop.eup %15670  ;;  %15690 = vpow2.f32 %v11914_v18  ;;  %v11922_v18 = vmul.f32 -1.442695, %v19364_v63 }
 0x61a   :  { %v19540_v44 = vpop.eup %15672  ;;  %15692 = vpow2.f32 %v11915_v49  ;;  %v11923_v49 = vmul.f32 -1.442695, %v19368_v24 }
 0x61b   :  { %v19543_v34 = vpop.eup %15674  ;;  %15694 = vpow2.f32 %v11916_v45  ;;  %v11924_v45 = vmul.f32 -1.442695, %v19372_v2 }
 0x61c   :  { %v19546_v25 = vpop.eup %15676  ;;  %15696 = vpow2.f32 %v11917_v58  ;;  %v22863_v58 = vld [vmem:[#allocation56_spill] sm:$0xff] }
 0x61d   :  { %22862 = vst [vmem:[#allocation65_spill] sm:$0xff] %v19546_v25  ;;  %v19549_v8 = vpop.eup %15678  ;;  %15698 = vpow2.f32 %v11918_v3  ;;  %v11925_v52 = vmul.f32 -1.442695, %v22863_v58  ;;  %v11926_v3 = vmul.f32 -1.442695, %v19380_v0 }
 0x61e   :  { %v19552_v30 = vpop.eup %15680  ;;  %15700 = vpow2.f32 %v11919_v35  ;;  %v11927_v35 = vmul.f32 -1.442695, %v19384_v13 }
 0x61f   :  { %v19555_v53 = vpop.eup %15682  ;;  %15702 = vpow2.f32 %v11920_v11  ;;  %v11929_v11 = vmul.f32 -1.442695, %v19388_v59 }
 0x620   :  { %v19558_v51 = vpop.eup %15684  ;;  %15704 = vpow2.f32 %v11921_v42  ;;  %v11930_v42 = vmul.f32 -1.442695, %v19392_v46 }
 0x621   :  { %v19561_v25 = vpop.eup %15686  ;;  %15706 = vpow2.f32 %v11922_v18  ;;  %v5196_v18 = vadd.f32 1.0, %v19411_v10 }
 0x622   :  { %v19564_v63 = vpop.eup %15688  ;;  %15708 = vpow2.f32 %v11923_v49  ;;  %v5197_v49 = vadd.f32 1.0, %v19414_v5 }
 0x623   :  { %v19567_v24 = vpop.eup %15690  ;;  %15710 = vpow2.f32 %v11924_v45  ;;  %v5198_v45 = vadd.f32 1.0, %v19417_v4 }
 0x624   :  { %v19570_v2 = vpop.eup %15692  ;;  %15712 = vpow2.f32 %v11925_v52  ;;  %v5199_v52 = vadd.f32 1.0, %v19420_v15 }
 0x625   :  { %v19573_v58 = vpop.eup %15694  ;;  %15714 = vpow2.f32 %v11926_v3  ;;  %v5200_v3 = vadd.f32 1.0, %v19423_v41  ;;  %v5204_v41 = vadd.f32 1.0, %v19435_v6  ;;  %v5208_v6 = vadd.f32 1.0, %v19453_v19  ;;  %v22869_v19 = vld [vmem:[#allocation3_spill] sm:$0xff] }
 0x626   :  { %v19576_v0 = vpop.eup %15696  ;;  %15716 = vpow2.f32 %v11927_v35  ;;  %v5201_v35 = vadd.f32 1.0, %v19426_v20  ;;  %v5205_v20 = vadd.f32 1.0, %v19438_v47  ;;  %v5209_v47 = vadd.f32 1.0, %v19456_v32 }
 0x627   :  { %v19579_v13 = vpop.eup %15698  ;;  %15718 = vpow2.f32 %v11929_v11  ;;  %v5202_v11 = vadd.f32 1.0, %v19429_v43  ;;  %v5206_v43 = vadd.f32 1.0, %v19447_v12  ;;  %v5213_v32 = vadd.f32 1.0, %v19476_v28 }
 0x628   :  { %v19582_v59 = vpop.eup %15700  ;;  %15720 = vpow2.f32 %v11930_v42  ;;  %v5203_v42 = vadd.f32 1.0, %v19432_v57  ;;  %v5207_v57 = vadd.f32 1.0, %v19450_v33  ;;  %v22868_v33 = vld [vmem:[#allocation19_spill] sm:$0xff] }
 0x629   :  { %v19585_v46 = vpop.eup %15702  ;;  %15722 = vrcp.f32 %v5196_v18 }
 0x62a   :  { %v19588_v10 = vpop.eup %15704  ;;  %15724 = vrcp.f32 %v5197_v49 }
 0x62b   :  { %v19591_v5 = vpop.eup %15706  ;;  %15726 = vrcp.f32 %v5198_v45 }
 0x62c   :  { %v19594_v4 = vpop.eup %15708  ;;  %15728 = vrcp.f32 %v5199_v52 }
 0x62d   :  { %v19597_v15 = vpop.eup %15710  ;;  %15730 = vrcp.f32 %v5200_v3 }
 0x62e   :  { %v19600_v18 = vpop.eup %15712  ;;  %15732 = vrcp.f32 %v5201_v35 }
 0x62f   :  { %v19603_v49 = vpop.eup %15714  ;;  %15734 = vrcp.f32 %v5202_v11  ;;  %v5211_v11 = vadd.f32 1.0, %v19469_v16  ;;  %v22870_v16 = vld [vmem:[#allocation5_spill] sm:$0xff] }
 0x630   :  { %22864 = vst [vmem:[#allocation66_spill] sm:$0xff] %v19603_v49  ;;  %v19606_v45 = vpop.eup %15716  ;;  %15736 = vrcp.f32 %v5203_v42  ;;  %v5210_v49 = vadd.f32 1.0, %v19466_v48 }
 0x631   :  { %22865 = vst [vmem:[#allocation67_spill] sm:$0xff] %v19606_v45  ;;  %v19609_v52 = vpop.eup %15718  ;;  %15738 = vrcp.f32 %v5204_v41 }
 0x632   :  { %22866 = vst [vmem:[#allocation68_spill] sm:$0xff] %v19609_v52  ;;  %v19612_v3 = vpop.eup %15720  ;;  %15740 = vrcp.f32 %v5205_v20  ;;  %v5212_v52 = vadd.f32 1.0, %v19473_v54  ;;  %v15527_v54 = vld [vmem:[%s22405_s4 + $0x8] sm:$0xff]  }
 0x633   :  { %22867 = vst [vmem:[#allocation69_spill] sm:$0xff] %v19612_v3  ;;  %v15723_v35 = vpop.eup %15722  ;;  %15742 = vrcp.f32 %v5206_v43  ;;  %v5214_v43 = vadd.f32 1.0, %v19480_v31 }
 0x634   :  { %v15725_v12 = vpop.eup %15724  ;;  %15744 = vrcp.f32 %v5207_v57  ;;  %v5388_v42 = vmul.f32 %v15723_v35, %v22868_v33 }
 0x635   :  { %v15727_v45 = vpop.eup %15726  ;;  %15746 = vrcp.f32 %v5208_v6  ;;  %v5389_v41 = vmul.f32 %v15725_v12, %v22869_v19  ;;  %v5215_v12 = vadd.f32 1.0, %v19483_v9  ;;  %v5218_v9 = vadd.f32 1.0, %v19492_v14 }
 0x636   :  { %v15729_v3 = vpop.eup %15728  ;;  %15748 = vrcp.f32 %v5209_v47  ;;  %v5390_v20 = vmul.f32 %v15727_v45, %v19143_v62  ;;  %5597 = vst [vmem:[#allocation2 + $0x28] sm:$0xff] %v5388_v42  ;;  %v5216_v45 = vadd.f32 1.0, %v19486_v7  ;;  %v5217_v47 = vadd.f32 1.0, %v19489_v56  ;;  %v15528_v56 = vld [vmem:[%s22405_s4 + $0x10] sm:$0xff]  }
 0x637   :  { %v15731_v48 = vpop.eup %15730  ;;  %15750 = vrcp.f32 %v5210_v49  ;;  %v5391_v57 = vmul.f32 %v15729_v3, %v22870_v16  ;;  %5598 = vst [vmem:[#allocation2 + $0x30] sm:$0xff] %v5389_v41  ;;  %v5838_v35 = vpack.c.bf16 %v5389_v41, %v5388_v42  ;;  %v22872_v42 = vld [vmem:[#allocation62_spill] sm:$0xff] }
 0x638   :  { %v15733_v6 = vpop.eup %15732  ;;  %15752 = vrcp.f32 %v5211_v11  ;;  %v5392_v28 = vmul.f32 %v15731_v48, %v19151_v38  ;;  %5599 = vst [vmem:[#allocation2 + $0x48] sm:$0xff] %v5390_v20  ;;  %v22871_v11 = vld [vmem:[#allocation8_spill] sm:$0xff]  ;;  %v5220_v19 = vadd.f32 1.0, %v22872_v42  ;;  %v5221_v48 = vadd.f32 1.0, %v19501_v21  ;;  %v15529_v21 = vld [vmem:[%s22405_s4 + $0x18] sm:$0xff]   ;;  %v15530_v42 = vld [vmem:[%s22405_s4 + $0x20] sm:$0xff]  }
 0x639   :  { %v15735_v62 = vpop.eup %15734  ;;  %15754 = vrcp.f32 %v5212_v52  ;;  %v5393_v31 = vmul.f32 %v15733_v6, %v19155_v40  ;;  %5600 = vst [vmem:[#allocation2 + $0x50] sm:$0xff] %v5391_v57  ;;  %13718 = vmatmul.mubr.bf16.vlgmr.msra.gmra.mrb[0].mxu1 %v5838_v35  ;;  %v5839_v49 = vpack.c.bf16 %v5391_v57, %v5390_v20  ;;  %v5222_v57 = vadd.f32 1.0, %v19504_v50  ;;  %v22875_v35 = vld [vmem:[#allocation18_spill] sm:$0xff] }
 0x63a   :  { %v15737_v3 = vpop.eup %15736  ;;  %15756 = vrcp.f32 %v5213_v32  ;;  %v5394_v33 = vmul.f32 %v15735_v62, %v19159_v61  ;;  %5601 = vst [vmem:[#allocation2 + $0x68] sm:$0xff] %v5392_v28  ;;  %13782 = vmatpush3.bf16.msra.mxu1 %v19464_v23  ;;  %v5219_v61 = vadd.f32 1.0, %v19495_v22  ;;  %v22876_v62 = vld [vmem:[#allocation21_spill] sm:$0xff] }
 0x63b   :  { %v15739_v38 = vpop.eup %15738  ;;  %15758 = vrcp.f32 %v5214_v43  ;;  %v5395_v7 = vmul.f32 %v15737_v3, %v19163_v39  ;;  %5602 = vst [vmem:[#allocation2 + $0x70] sm:$0xff] %v5393_v31  ;;  %13721 = vmatprep.mubr.bf16.mxu1 %v5839_v49  ;;  %v5840_v40 = vpack.c.bf16 %v5393_v31, %v5392_v28  ;;  %13783 = vmatprep.subr.bf16.mxu1 %v15527_v54  ;;  %v22873_v39 = vld [vmem:[#allocation13_spill] sm:$0xff]  ;;  %v22874_v43 = vld [vmem:[#allocation16_spill] sm:$0xff]  ;;  %v5224_v31 = vadd.f32 1.0, %v19510_v27  ;;  %v22877_v49 = vld [vmem:[#allocation23_spill] sm:$0xff] }
 0x63c   :  { %v15741_v52 = vpop.eup %15740  ;;  %15760 = vrcp.f32 %v5215_v12  ;;  %v19641_v23 = vmul.f32 %v15739_v38, %v22871_v11  ;;  %5603 = vst [vmem:[#allocation2 + $0x88] sm:$0xff] %v5394_v33  ;;  %v22881_v11 = vld [vmem:[#allocation6_spill] sm:$0xff] }
 0x63d   :  { %v15743_v14 = vpop.eup %15742  ;;  %15762 = vrcp.f32 %v5216_v45  ;;  %v19645_v41 = vmul.f32 %v15741_v52, %v22873_v39  ;;  %5604 = vst [vmem:[#allocation2 + $0x90] sm:$0xff] %v5395_v7  ;;  %v5841_v32 = vpack.c.bf16 %v5395_v7, %v5394_v33  ;;  %v22878_v33 = vld [vmem:[#allocation63_spill] sm:$0xff]  ;;  %v22880_v52 = vld [vmem:[#allocation64_spill] sm:$0xff] }
 0x63e   :  { %v15745_v20 = vpop.eup %15744  ;;  %15764 = vrcp.f32 %v5217_v47  ;;  %v19649_v22 = vmul.f32 %v15743_v14, %v22874_v43  ;;  %5605 = vst [vmem:[#allocation2 + $0xa8] sm:$0xff] %v19641_v23  ;;  %13784 = vmatpush3.bf16.msra.mxu1 %v15527_v54  ;;  %v5223_v54 = vadd.f32 1.0, %v19507_v29  ;;  %v5225_v38 = vadd.f32 1.0, %v22878_v33  ;;  %v22882_v39 = vld [vmem:[#allocation4_spill] sm:$0xff] }
 0x63f   :  { %v15747_v16 = vpop.eup %15746  ;;  %15766 = vrcp.f32 %v5218_v9  ;;  %v19654_v6 = vmul.f32 %v15745_v20, %v22875_v35  ;;  %5606 = vst [vmem:[#allocation2 + $0xb0] sm:$0xff] %v19645_v41  ;;  %v5842_v12 = vpack.c.bf16 %v19645_v41, %v19641_v23  ;;  %13785 = vmatprep.subr.bf16.mxu1 %v15528_v56  ;;  %v22879_v9 = vld [vmem:[#allocation10_spill] sm:$0xff]  ;;  %v22883_v43 = vld [vmem:[#allocation24_spill] sm:$0xff]  ;;  %v22884_v35 = vld [vmem:[#allocation25_spill] sm:$0xff]  ;;  %v5232_v33 = vadd.f32 1.0, %v19534_v26 }
 0x640   :  { %v15749_v28 = vpop.eup %15748  ;;  %15768 = vrcp.f32 %v5219_v61  ;;  %v19664_v50 = vmul.f32 %v15747_v16, %v22876_v62  ;;  %5607 = vst [vmem:[#allocation2 + $0xc8] sm:$0xff] %v19649_v22  ;;  %v5226_v61 = vadd.f32 1.0, %v22880_v52  ;;  %v5233_v52 = vadd.f32 1.0, %v19537_v55  ;;  %v22889_v23 = vld [vmem:[#allocation30_spill] sm:$0xff] }
 0x641   :  { %v15751_v45 = vpop.eup %15750  ;;  %15770 = vrcp.f32 %v5220_v19  ;;  %v19669_v3 = vmul.f32 %v15749_v28, %v22877_v49  ;;  %5608 = vst [vmem:[#allocation2 + $0xd0] sm:$0xff] %v19654_v6  ;;  %13722 = vmatmul.mubr.bf16.gmra.mrb[4].mxu1 %v5840_v40  ;;  %v5843_v47 = vpack.c.bf16 %v19654_v6, %v19649_v22  ;;  %v5230_v28 = vadd.f32 1.0, %v19528_v37  ;;  %v22886_v49 = vld [vmem:[#allocation27_spill] sm:$0xff] }
 0x642   :  { %v15753_v29 = vpop.eup %15752  ;;  %15772 = vrcp.f32 %v5221_v48  ;;  %v19676_v7 = vmul.f32 %v15751_v45, %v22879_v9  ;;  %5609 = vst [vmem:[#allocation2 + $0xe8] sm:$0xff] %v19664_v50  ;;  %13725 = vmatprep.mubr.bf16.mxu1 %v5841_v32  ;;  %13786 = vmatpush3.bf16.msra.mxu1 %v15528_v56  ;;  %v5227_v56 = vadd.f32 1.0, %v19519_v36  ;;  %v5228_v48 = vadd.f32 1.0, %v19522_v17 }
 0x643   :  { %v15755_v27 = vpop.eup %15754  ;;  %15774 = vrcp.f32 %v5222_v57  ;;  %v19681_v40 = vmul.f32 %v15753_v29, %v22881_v11  ;;  %5610 = vst [vmem:[#allocation2 + $0xf0] sm:$0xff] %v19669_v3  ;;  %v5844_v14 = vpack.c.bf16 %v19669_v3, %v19664_v50  ;;  %13787 = vmatprep.subr.bf16.mxu1 %v15529_v21  ;;  %v5229_v36 = vadd.f32 1.0, %v19525_v1  ;;  %v15531_v1 = vld [vmem:[%s22405_s4 + $0x28] sm:$0xff]   ;;  %v22898_v3 = vld [vmem:[#allocation38_spill] sm:$0xff] }
 0x644   :  { %v15757_v19 = vpop.eup %15756  ;;  %15776 = vrcp.f32 %v5223_v54  ;;  %v19691_v32 = vmul.f32 %v15755_v27, %v22882_v39  ;;  %5611 = vst [vmem:[#allocation2 + $0x108] sm:$0xff] %v19676_v7  ;;  %v22885_v54 = vld [vmem:[#allocation26_spill] sm:$0xff]  ;;  %v5242_v50 = vadd.f32 1.0, %v19564_v63 }
 0x645   :  { %v15759_v20 = vpop.eup %15758  ;;  %15778 = vrcp.f32 %v5224_v31  ;;  %v19696_v22 = vmul.f32 %v15757_v19, %v22883_v43  ;;  %5612 = vst [vmem:[#allocation2 + $0x110] sm:$0xff] %v19681_v40  ;;  %v5845_v16 = vpack.c.bf16 %v19681_v40, %v19676_v7  ;;  %v5234_v19 = vadd.f32 1.0, %v19540_v44  ;;  %v22892_v43 = vld [vmem:[#allocation32_spill] sm:$0xff] }
 0x646   :  { %v15761_v57 = vpop.eup %15760  ;;  %15780 = vrcp.f32 %v5225_v38  ;;  %v19703_v6 = vmul.f32 %v15759_v20, %v22884_v35  ;;  %5613 = vst [vmem:[#allocation2 + $0x128] sm:$0xff] %v19691_v32  ;;  %13788 = vmatpush3.bf16.msra.mxu1 %v15529_v21  ;;  %v5231_v21 = vadd.f32 1.0, %v19531_v60  ;;  %v22887_v38 = vld [vmem:[#allocation28_spill] sm:$0xff]  ;;  %v22891_v20 = vld [vmem:[#allocation65_spill] sm:$0xff]  ;;  %v5243_v40 = vadd.f32 1.0, %v19567_v24 }
 0x647   :  { %v15763_v17 = vpop.eup %15762  ;;  %15782 = vrcp.f32 %v5226_v61  ;;  %v19708_v62 = vmul.f32 %v15761_v57, %v22885_v54  ;;  %5614 = vst [vmem:[#allocation2 + $0x130] sm:$0xff] %v19696_v22  ;;  %v5846_v45 = vpack.c.bf16 %v19696_v22, %v19691_v32  ;;  %13789 = vmatprep.subr.bf16.mxu1 %v15530_v42  ;;  %v22888_v61 = vld [vmem:[#allocation29_spill] sm:$0xff]  ;;  %v5250_v32 = vadd.f32 1.0, %v19588_v10  ;;  %v22906_v22 = vld [vmem:[#allocation46_spill] sm:$0xff] }
 0x648   :  { %v15765_v31 = vpop.eup %15764  ;;  %15784 = vrcp.f32 %v5227_v56  ;;  %v19718_v37 = vmul.f32 %v15763_v17, %v22886_v49  ;;  %5615 = vst [vmem:[#allocation2 + $0x148] sm:$0xff] %v19703_v6  ;;  %v22893_v17 = vld [vmem:[#allocation33_spill] sm:$0xff]  ;;  %v5252_v10 = vadd.f32 1.0, %v19594_v4  ;;  %v5254_v4 = vadd.f32 1.0, %v19600_v18  ;;  %v22913_v18 = vld [vmem:[#allocation67_spill] sm:$0xff] }
 0x649   :  { %v15767_v29 = vpop.eup %15766  ;;  %15786 = vrcp.f32 %v5228_v48  ;;  %v19723_v9 = vmul.f32 %v15765_v31, %v22887_v38  ;;  %5616 = vst [vmem:[#allocation2 + $0x150] sm:$0xff] %v19708_v62  ;;  %13726 = vmatmul.mubr.bf16.gmra.mrb[8].mxu1 %v5842_v12  ;;  %v5847_v60 = vpack.c.bf16 %v19708_v62, %v19703_v6  ;;  %v15532_v12 = vld [vmem:[%s22405_s4 + $0x30] sm:$0xff]   ;;  %v5236_v48 = vadd.f32 1.0, %v22891_v20  ;;  %v22895_v38 = vld [vmem:[#allocation35_spill] sm:$0xff]  ;;  %v22900_v20 = vld [vmem:[#allocation40_spill] sm:$0xff] }
 0x64a   :  { %v15769_v27 = vpop.eup %15768  ;;  %15788 = vrcp.f32 %v5229_v36  ;;  %v19733_v11 = vmul.f32 %v15767_v29, %v22888_v61  ;;  %5617 = vst [vmem:[#allocation2 + $0x168] sm:$0xff] %v19718_v37  ;;  %13729 = vmatprep.mubr.bf16.mxu1 %v5843_v47  ;;  %13790 = vmatpush3.bf16.msra.mxu1 %v15530_v42  ;;  %v5235_v47 = vadd.f32 1.0, %v19543_v34  ;;  %v22890_v42 = vld [vmem:[#allocation31_spill] sm:$0xff]  ;;  %v5237_v34 = vadd.f32 1.0, %v19549_v8  ;;  %v15533_v8 = vld [vmem:[%s22405_s4 + $0x38] sm:$0xff]   ;;  %v22896_v61 = vld [vmem:[#allocation36_spill] sm:$0xff] }
 0x64b   :  { %v15771_v26 = vpop.eup %15770  ;;  %15790 = vrcp.f32 %v5230_v28  ;;  %v19738_v41 = vmul.f32 %v15769_v27, %v22889_v23  ;;  %5618 = vst [vmem:[#allocation2 + $0x170] sm:$0xff] %v19723_v9  ;;  %v5848_v55 = vpack.c.bf16 %v19723_v9, %v19718_v37  ;;  %13791 = vmatprep.subr.bf16.mxu1 %v15531_v1  ;;  %v5238_v31 = vadd.f32 1.0, %v19552_v30  ;;  %v22908_v62 = vld [vmem:[#allocation48_spill] sm:$0xff]  ;;  %v22918_v9 = vld [vmem:[#allocation15_spill] sm:$0xff] }
 0x64c   :  { %v15773_v56 = vpop.eup %15772  ;;  %15792 = vrcp.f32 %v5231_v21  ;;  %v19748_v44 = vmul.f32 %v15771_v26, %v22890_v42  ;;  %5619 = vst [vmem:[#allocation2 + $0x188] sm:$0xff] %v19733_v11  ;;  %v22894_v21 = vld [vmem:[#allocation34_spill] sm:$0xff]  ;;  %v5241_v23 = vadd.f32 1.0, %v19561_v25  ;;  %v19802_v42 = vld [vmem:[%s22405_s4 + $0x80] sm:$0xff]  }
 0x64d   :  { %v15775_v39 = vpop.eup %15774  ;;  %15794 = vrcp.f32 %v5232_v33  ;;  %v19753_v57 = vmul.f32 %v15773_v56, %v22892_v43  ;;  %5620 = vst [vmem:[#allocation2 + $0x190] sm:$0xff] %v19738_v41  ;;  %v5849_v36 = vpack.c.bf16 %v19738_v41, %v19733_v11  ;;  %v22897_v56 = vld [vmem:[#allocation37_spill] sm:$0xff] }
 0x64e   :  { %v15777_v35 = vpop.eup %15776  ;;  %15796 = vrcp.f32 %v5233_v52  ;;  %v19760_v28 = vmul.f32 %v15775_v39, %v22893_v17  ;;  %5621 = vst [vmem:[#allocation2 + $0x1a8] sm:$0xff] %v19748_v44  ;;  %13792 = vmatpush3.bf16.msra.mxu1 %v15531_v1  ;;  %v5239_v1 = vadd.f32 1.0, %v19555_v53  ;;  %v5240_v52 = vadd.f32 1.0, %v19558_v51  ;;  %v22920_v41 = vld [vmem:[#allocation49_spill] sm:$0xff] }
 0x64f   :  { %v15779_v54 = vpop.eup %15778  ;;  %15798 = vrcp.f32 %v5234_v19  ;;  %v19765_v49 = vmul.f32 %v15777_v35, %v22894_v21  ;;  %5622 = vst [vmem:[#allocation2 + $0x1b0] sm:$0xff] %v19753_v57  ;;  %v5850_v29 = vpack.c.bf16 %v19753_v57, %v19748_v44  ;;  %13793 = vmatprep.subr.bf16.mxu1 %v15532_v12  ;;  %v5244_v39 = vadd.f32 1.0, %v19570_v2  ;;  %v22902_v2 = vld [vmem:[#allocation42_spill] sm:$0xff]  ;;  %v22928_v57 = vld [vmem:[#allocation55_spill] sm:$0xff] }
 0x650   :  { %v15781_v33 = vpop.eup %15780  ;;  %15800 = vrcp.f32 %v5235_v47  ;;  %v19775_v30 = vmul.f32 %v15779_v54, %v22895_v38  ;;  %5623 = vst [vmem:[#allocation2 + $0x1c8] sm:$0xff] %v19760_v28  ;;  %v5245_v35 = vadd.f32 1.0, %v19573_v58  ;;  %v5246_v54 = vadd.f32 1.0, %v19576_v0 }
 0x651   :  { %v15783_v27 = vpop.eup %15782  ;;  %15802 = vrcp.f32 %v5236_v48  ;;  %v19780_v26 = vmul.f32 %v15781_v33, %v22896_v61  ;;  %5624 = vst [vmem:[#allocation2 + $0x1d0] sm:$0xff] %v19765_v49  ;;  %13730 = vmatmul.mubr.bf16.gmra.mrb[12].mxu1 %v5844_v14  ;;  %v5851_v53 = vpack.c.bf16 %v19765_v49, %v19760_v28  ;;  %v5247_v33 = vadd.f32 1.0, %v19579_v13  ;;  %v22930_v49 = vld [vmem:[#allocation57_spill] sm:$0xff] }
 0x652   :  { %v15785_v19 = vpop.eup %15784  ;;  %15804 = vrcp.f32 %v5237_v34  ;;  %v5418_v47 = vmul.f32 %v15783_v27, %v22897_v56  ;;  %5625 = vst [vmem:[#allocation2 + $0x1e8] sm:$0xff] %v19775_v30  ;;  %13733 = vmatprep.mubr.bf16.mxu1 %v5845_v16  ;;  %13794 = vmatpush3.bf16.msra.mxu1 %v15532_v12  ;;  %v22899_v16 = vld [vmem:[#allocation39_spill] sm:$0xff]  ;;  %v22901_v34 = vld [vmem:[#allocation41_spill] sm:$0xff]  ;;  %v5248_v38 = vadd.f32 1.0, %v19582_v59  ;;  %v22904_v27 = vld [vmem:[#allocation44_spill] sm:$0xff] }
 0x653   :  { %v15787_v51 = vpop.eup %15786  ;;  %15806 = vrcp.f32 %v5238_v31  ;;  %v5419_v14 = vmul.f32 %v15785_v19, %v22898_v3  ;;  %5626 = vst [vmem:[#allocation2 + $0x1f0] sm:$0xff] %v19780_v26  ;;  %v5852_v25 = vpack.c.bf16 %v19780_v26, %v19775_v30  ;;  %13795 = vmatprep.subr.bf16.mxu1 %v15533_v8  ;;  %v5249_v19 = vadd.f32 1.0, %v19585_v46  ;;  %v5661_v30 = vld [vmem:[#allocation2 + $0x7] sm:$0xff]  ;;  %v5662_v26 = vld [vmem:[#allocation2 + $0xf] sm:$0xff] }
 0x654   :  { %v15789_v7 = vpop.eup %15788  ;;  %15808 = vrcp.f32 %v5239_v1  ;;  %v19806_v63 = vmul.f32 %v15787_v51, %v22899_v16  ;;  %5627 = vst [vmem:[#allocation2 + $0x208] sm:$0xff] %v5418_v47  ;;  %v22903_v1 = vld [vmem:[#allocation43_spill] sm:$0xff]  ;;  %v5251_v51 = vadd.f32 1.0, %v19591_v5  ;;  %v5253_v5 = vadd.f32 1.0, %v19597_v15  ;;  %v22911_v15 = vld [vmem:[#allocation66_spill] sm:$0xff] }
 0x655   :  { %v15791_v12 = vpop.eup %15790  ;;  %15810 = vrcp.f32 %v5240_v52  ;;  %v19810_v48 = vmul.f32 %v15789_v7, %v22900_v20  ;;  %5628 = vst [vmem:[#allocation2 + $0x210] sm:$0xff] %v5419_v14 }
 0x656   :  { %v15793_v43 = vpop.eup %15792  ;;  %15812 = vrcp.f32 %v5241_v23  ;;  %v19814_v17 = vmul.f32 %v15791_v12, %v22901_v34  ;;  %5629 = vst [vmem:[#allocation2 + $0x268] sm:$0xff] %v19806_v63  ;;  %13796 = vmatpush3.bf16.msra.mxu1 %v15533_v8  ;;  %v22905_v23 = vld [vmem:[#allocation45_spill] sm:$0xff]  ;;  %v5255_v34 = vadd.f32 1.0, %v22911_v15 }
 0x657   :  { %v15795_v24 = vpop.eup %15794  ;;  %15814 = vrcp.f32 %v5242_v50  ;;  %v19819_v31 = vmul.f32 %v15793_v43, %v22902_v2  ;;  %5630 = vst [vmem:[#allocation2 + $0x270] sm:$0xff] %v19810_v48  ;;  %v5854_v21 = vpack.c.bf16 %v19810_v48, %v19806_v63  ;;  %13861 = vmatprep.subr.bf16.mxu1 %v19802_v42  ;;  %v22907_v50 = vld [vmem:[#allocation47_spill] sm:$0xff]  ;;  %v5725_v63 = vpack.c.bf16 %v5662_v26, %v5661_v30 }
 0x658   :  { %v15797_v58 = vpop.eup %15796  ;;  %15816 = vrcp.f32 %v5243_v40  ;;  %v19827_v8 = vmul.f32 %v15795_v24, %v22903_v1  ;;  %5631 = vst [vmem:[#allocation2 + $0x288] sm:$0xff] %v19814_v17  ;;  %v22909_v40 = vld [vmem:[#allocation7_spill] sm:$0xff]  ;;  %v22912_v24 = vld [vmem:[#allocation12_spill] sm:$0xff] }
 0x659   :  { %v15799_v0 = vpop.eup %15798  ;;  %15818 = vrcp.f32 %v5244_v39  ;;  %v19832_v52 = vmul.f32 %v15797_v58, %v22904_v27  ;;  %5632 = vst [vmem:[#allocation2 + $0x290] sm:$0xff] %v19819_v31  ;;  %13734 = vmatmul.mubr.bf16.gmra.mrb[16].mxu1 %v5846_v45  ;;  %v5855_v13 = vpack.c.bf16 %v19819_v31, %v19814_v17  ;;  %v22910_v39 = vld [vmem:[#allocation9_spill] sm:$0xff]  ;;  %v5256_v58 = vadd.f32 1.0, %v22913_v18  ;;  %v22915_v27 = vld [vmem:[#allocation68_spill] sm:$0xff] }
 0x65a   :  { %v15801_v61 = vpop.eup %15800  ;;  %15820 = vrcp.f32 %v5245_v35  ;;  %v19842_v56 = vmul.f32 %v15799_v0, %v22905_v23  ;;  %5633 = vst [vmem:[#allocation2 + $0x2a8] sm:$0xff] %v19827_v8  ;;  %13737 = vmatprep.mubr.bf16.mxu1 %v5847_v60  ;;  %v5663_v17 = vld [vmem:[#allocation2 + $0x27] sm:$0xff]  ;;  %v5664_v31 = vld [vmem:[#allocation2 + $0x2f] sm:$0xff] }
 0x65b   :  { %v15803_v59 = vpop.eup %15802  ;;  %15822 = vrcp.f32 %v5246_v54  ;;  %v19850_v45 = vmul.f32 %v15801_v61, %v22906_v22  ;;  %5634 = vst [vmem:[#allocation2 + $0x2b0] sm:$0xff] %v19832_v52  ;;  %v5856_v46 = vpack.c.bf16 %v19832_v52, %v19827_v8  ;;  %v5258_v61 = vadd.f32 1.0, %v22915_v27  ;;  %v5666_v8 = vld [vmem:[#allocation2 + $0x4f] sm:$0xff] }
 0x65c   :  { %v15805_v47 = vpop.eup %15804  ;;  %15824 = vrcp.f32 %v5247_v33  ;;  %v19857_v3 = vmul.f32 %v15803_v59, %v22907_v50  ;;  %5635 = vst [vmem:[#allocation2 + $0x2c8] sm:$0xff] %v19842_v56  ;;  %v22914_v33 = vld [vmem:[#allocation14_spill] sm:$0xff]  ;;  %v19967_v52 = vpack.c.bf16 %v5664_v31, %v5663_v17 }
 0x65d   :  { %v15807_v6 = vpop.eup %15806  ;;  %15826 = vrcp.f32 %v5248_v38  ;;  %v19862_v60 = vmul.f32 %v15805_v47, %v22908_v62  ;;  %5636 = vst [vmem:[#allocation2 + $0x2d0] sm:$0xff] %v19850_v45  ;;  %v5857_v14 = vpack.c.bf16 %v19850_v45, %v19842_v56  ;;  %v22921_v62 = vld [vmem:[#allocation50_spill] sm:$0xff]  ;;  %v15536_v45 = vld [vmem:[%s22405_s4 + $0x90] sm:$0xff]  }
 0x65e   :  { %v15809_v7 = vpop.eup %15808  ;;  %15828 = vrcp.f32 %v5249_v19  ;;  %v19869_v16 = vmul.f32 %v15807_v6, %v22909_v40  ;;  %5637 = vst [vmem:[#allocation2 + $0x2e8] sm:$0xff] %v19857_v3  ;;  %v22916_v19 = vld [vmem:[#allocation11_spill] sm:$0xff]  ;;  %v22922_v40 = vld [vmem:[#allocation20_spill] sm:$0xff] }
 0x65f   :  { %v15811_v12 = vpop.eup %15810  ;;  %15830 = vrcp.f32 %v5250_v32  ;;  %v19874_v20 = vmul.f32 %v15809_v7, %v22910_v39  ;;  %5638 = vst [vmem:[#allocation2 + $0x2f0] sm:$0xff] %v19862_v60  ;;  %v5858_v43 = vpack.c.bf16 %v19862_v60, %v19857_v3  ;;  %v22917_v32 = vld [vmem:[#allocation69_spill] sm:$0xff]  ;;  %v5669_v60 = vld [vmem:[#allocation2 + $0x87] sm:$0xff] }
 0x660   :  { %v15813_v35 = vpop.eup %15812  ;;  %15832 = vrcp.f32 %v5251_v51  ;;  %v19881_v54 = vmul.f32 %v15811_v12, %v22912_v24  ;;  %5639 = vst [vmem:[#allocation2 + $0x308] sm:$0xff] %v19869_v16  ;;  %v5259_v37 = vadd.f32 1.0, %v22917_v32  ;;  %v22919_v51 = vld [vmem:[#allocation17_spill] sm:$0xff]  ;;  %v22924_v24 = vld [vmem:[#allocation51_spill] sm:$0xff]  ;;  %v22927_v32 = vld [vmem:[#allocation54_spill] sm:$0xff] }
 0x661   :  { %v15815_v2 = vpop.eup %15814  ;;  %15834 = vrcp.f32 %v5252_v10  ;;  %v19886_v1 = vmul.f32 %v15813_v35, %v22914_v33  ;;  %5640 = vst [vmem:[#allocation2 + $0x310] sm:$0xff] %v19874_v20  ;;  %13738 = vmatmul.mubr.bf16.gmra.mrb[20].mxu1 %v5848_v55  ;;  %v5859_v0 = vpack.c.bf16 %v19874_v20, %v19869_v16  ;;  %v22923_v35 = vld [vmem:[#allocation22_spill] sm:$0xff]  ;;  %v22925_v33 = vld [vmem:[#allocation52_spill] sm:$0xff] }
 0x662   :  { %v15817_v38 = vpop.eup %15816  ;;  %15836 = vrcp.f32 %v5253_v5  ;;  %v19896_v23 = vmul.f32 %v15815_v2, %v22916_v19  ;;  %5641 = vst [vmem:[#allocation2 + $0x328] sm:$0xff] %v19881_v54  ;;  %13741 = vmatprep.mubr.bf16.mxu1 %v5849_v36  ;;  %v5668_v3 = vld [vmem:[#allocation2 + $0x6f] sm:$0xff]  ;;  %v15537_v20 = vld [vmem:[%s22405_s4 + $0x98] sm:$0xff]  }
 0x663   :  { %v15819_v59 = vpop.eup %15818  ;;  %15838 = vrcp.f32 %v5254_v4  ;;  %v19904_v55 = vmul.f32 %v15817_v38, %v22918_v9  ;;  %5642 = vst [vmem:[#allocation2 + $0x330] sm:$0xff] %v19886_v1  ;;  %v5860_v22 = vpack.c.bf16 %v19886_v1, %v19881_v54  ;;  %v5671_v54 = vld [vmem:[#allocation2 + $0xa7] sm:$0xff]  ;;  %v5672_v1 = vld [vmem:[#allocation2 + $0xaf] sm:$0xff] }
 0x664   :  { %v15821_v47 = vpop.eup %15820  ;;  %15840 = vrcp.f32 %v5255_v34  ;;  %v19910_v50 = vmul.f32 %v15819_v59, %v22919_v51  ;;  %5643 = vst [vmem:[#allocation2 + $0x348] sm:$0xff] %v19896_v23  ;;  %v5698_v30 = vld [vmem:[#allocation2 + $0x28f] sm:$0xff]  ;;  %v5701_v17 = vld [vmem:[#allocation2 + $0x2c7] sm:$0xff] }
 0x665   :  { %v15823_v11 = vpop.eup %15822  ;;  %15842 = vrcp.f32 %v5256_v58  ;;  %v19914_v36 = vmul.f32 %v15821_v47, %v22920_v41  ;;  %5644 = vst [vmem:[#allocation2 + $0x350] sm:$0xff] %v19904_v55  ;;  %v5861_v6 = vpack.c.bf16 %v19904_v55, %v19896_v23  ;;  %v22929_v47 = vld [vmem:[#allocation56_spill] sm:$0xff]  ;;  %v22931_v41 = vld [vmem:[#allocation58_spill] sm:$0xff] }
 0x666   :  { %v15825_v10 = vpop.eup %15824  ;;  %15844 = vrcp.f32 %v5258_v61  ;;  %v5438_v7 = vmul.f32 %v15823_v11, %v22921_v62  ;;  %5645 = vst [vmem:[#allocation2 + $0x368] sm:$0xff] %v19910_v50  ;;  %v22926_v61 = vld [vmem:[#allocation53_spill] sm:$0xff]  ;;  %v22932_v62 = vld [vmem:[#allocation59_spill] sm:$0xff] }
 0x667   :  { %v15827_v5 = vpop.eup %15826  ;;  %15846 = vrcp.f32 %v5259_v37  ;;  %v5439_v12 = vmul.f32 %v15825_v10, %v22922_v40  ;;  %5646 = vst [vmem:[#allocation2 + $0x370] sm:$0xff] %v19914_v36  ;;  %v5862_v4 = vpack.c.bf16 %v19914_v36, %v19910_v50  ;;  %v22933_v40 = vld [vmem:[#allocation60_spill] sm:$0xff] }
 0x668   :  { %v15829_v39 = vpop.eup %15828  ;;  %v5440_v15 = vmul.f32 %v15827_v5, %v22923_v35  ;;  %5647 = vst [vmem:[#allocation2 + $0x388] sm:$0xff] %v5438_v7  ;;  %v5702_v31 = vld [vmem:[#allocation2 + $0x2cf] sm:$0xff] }
 0x669   :  { %v15831_v34 = vpop.eup %15830  ;;  %v5441_v2 = vmul.f32 %v15829_v39, %v22924_v24  ;;  %5648 = vst [vmem:[#allocation2 + $0x390] sm:$0xff] %v5439_v12  ;;  %13742 = vmatmul.mubr.bf16.gmra.mrb[24].mxu1 %v5850_v29  ;;  %v5863_v18 = vpack.c.bf16 %v5439_v12, %v5438_v7  ;;  %v22934_v39 = vld [vmem:[#allocation61_spill] sm:$0xff] }
 0x66a   :  { %v15833_v58 = vpop.eup %15832  ;;  %v5442_v38 = vmul.f32 %v15831_v34, %v22925_v33  ;;  %5649 = vst [vmem:[#allocation2 + $0x3a8] sm:$0xff] %v5440_v15  ;;  %13745 = vmatprep.mubr.bf16.mxu1 %v5851_v53  ;;  %v5675_v34 = vld [vmem:[#allocation2 + $0xe7] sm:$0xff]  ;;  %v5676_v24 = vld [vmem:[#allocation2 + $0xef] sm:$0xff]  ;;  %v15541_v33 = vld [vmem:[%s22405_s4 + $0xb8] sm:$0xff]  }
 0x66b   :  { %v15835_v27 = vpop.eup %15834  ;;  %v5443_v19 = vmul.f32 %v15833_v58, %v22926_v61  ;;  %5650 = vst [vmem:[#allocation2 + $0x3b0] sm:$0xff] %v5441_v2  ;;  %v5864_v23 = vpack.c.bf16 %v5441_v2, %v5440_v15  ;;  %v15540_v15 = vld [vmem:[%s22405_s4 + $0xb0] sm:$0xff]   ;;  %v5677_v2 = vld [vmem:[#allocation2 + $0x107] sm:$0xff]  ;;  %v20004_v58 = vpack.c.bf16 %v5676_v24, %v5675_v34 }
 0x66c   :  { %v15837_v59 = vpop.eup %15836  ;;  %v5444_v37 = vmul.f32 %v15835_v27, %v22927_v32  ;;  %5651 = vst [vmem:[#allocation2 + $0x3c8] sm:$0xff] %v5442_v38  ;;  %v20016_v27 = vld [vmem:[%s22405_s4 + $0xc0] sm:$0xff]  }
 0x66d   :  { %v15839_v44 = vpop.eup %15838  ;;  %v5445_v29 = vmul.f32 %v15837_v59, %v22928_v57  ;;  %5652 = vst [vmem:[#allocation2 + $0x3d0] sm:$0xff] %v5443_v19  ;;  %v5865_v9 = vpack.c.bf16 %v5443_v19, %v5442_v38  ;;  %v5679_v61 = vld [vmem:[#allocation2 + $0x127] sm:$0xff]  ;;  %v5680_v19 = vld [vmem:[#allocation2 + $0x12f] sm:$0xff] }
 0x66e   :  { %v15841_v55 = vpop.eup %15840  ;;  %v5446_v51 = vmul.f32 %v15839_v44, %v22929_v47  ;;  %5653 = vst [vmem:[#allocation2 + $0x3e8] sm:$0xff] %v5444_v37  ;;  %v5682_v59 = vld [vmem:[#allocation2 + $0x14f] sm:$0xff]  ;;  %v20018_v32 = vpack.c.bf16 %v5680_v19, %v5679_v61  ;;  %v5683_v44 = vld [vmem:[#allocation2 + $0x167] sm:$0xff] }
 0x66f   :  { %v15843_v28 = vpop.eup %15842  ;;  %v5447_v53 = vmul.f32 %v15841_v55, %v22930_v49  ;;  %5654 = vst [vmem:[#allocation2 + $0x3f0] sm:$0xff] %v5445_v29  ;;  %v5866_v50 = vpack.c.bf16 %v5445_v29, %v5444_v37  ;;  %v5684_v57 = vld [vmem:[#allocation2 + $0x16f] sm:$0xff]  ;;  %v5685_v29 = vld [vmem:[#allocation2 + $0x187] sm:$0xff] }
 0x670   :  { %v15845_v11 = vpop.eup %15844  ;;  %v5448_v36 = vmul.f32 %v15843_v28, %v22931_v41  ;;  %5655 = vst [vmem:[#allocation2 + $0x408] sm:$0xff] %v5446_v51  ;;  %v20025_v55 = vpack.c.bf16 %v5684_v57, %v5683_v44  ;;  %v5688_v28 = vld [vmem:[#allocation2 + $0x1af] sm:$0xff]  ;;  %v5689_v49 = vld [vmem:[#allocation2 + $0x1c7] sm:$0xff] }
 0x671   :  { %v15847_v10 = vpop.eup %15846  ;;  %v5450_v7 = vmul.f32 %v15845_v11, %v22932_v62  ;;  %5656 = vst [vmem:[#allocation2 + $0x410] sm:$0xff] %v5447_v53  ;;  %13746 = vmatmul.mubr.bf16.gmra.mrb[28].mxu1 %v5852_v25  ;;  %v5867_v5 = vpack.c.bf16 %v5447_v53, %v5446_v51  ;;  %v5836_v25 = vld [vmem:[#allocation2 + $0x430] sm:$0xff]  ;;  %v5687_v51 = vld [vmem:[#allocation2 + $0x1a7] sm:$0xff] }
 0x672   :  { %v5451_v12 = vmul.f32 %v15847_v10, %v22933_v40  ;;  %5657 = vst [vmem:[#allocation2 + $0x428] sm:$0xff] %v5448_v36  ;;  %13749 = vmatprep.mubr.bf16.mxu1 %v22934_v39  ;;  %v5868_v48 = vpack.c.bf16 %v5836_v25, %v5448_v36  ;;  %v5690_v53 = vld [vmem:[#allocation2 + $0x1cf] sm:$0xff]  ;;  %v5693_v41 = vld [vmem:[#allocation2 + $0x247] sm:$0xff] }
 0x673   :  { %5659 = vst [vmem:[#allocation2 + $0x448] sm:$0xff] %v5450_v7  ;;  %v20033_v11 = vpack.c.bf16 %v5690_v53, %v5689_v49  ;;  %v5694_v36 = vld [vmem:[#allocation2 + $0x24f] sm:$0xff]  ;;  %v5691_v10 = vld [vmem:[#allocation2 + $0x1e7] sm:$0xff] }
 0x674   :  { %5660 = vst [vmem:[#allocation2 + $0x450] sm:$0xff] %v5451_v12  ;;  %v5692_v62 = vld [vmem:[#allocation2 + $0x1ef] sm:$0xff]  ;;  %v5741_v7 = vpack.c.bf16 %v5694_v36, %v5693_v41  ;;  %v5695_v40 = vld [vmem:[#allocation2 + $0x267] sm:$0xff] }
 0x675   :  { %v5696_v12 = vld [vmem:[#allocation2 + $0x26f] sm:$0xff]  ;;  %v5697_v39 = vld [vmem:[#allocation2 + $0x287] sm:$0xff] }
 0x676   :  { %v20040_v26 = vpack.c.bf16 %v5696_v12, %v5695_v40  ;;  %v20042_v25 = vpack.c.bf16 %v5698_v30, %v5697_v39  ;;  %v5713_v34 = vld [vmem:[#allocation2 + $0x387] sm:$0xff]  ;;  %v5714_v24 = vld [vmem:[#allocation2 + $0x38f] sm:$0xff] }
 0x677   :  { %v5716_v61 = vld [vmem:[#allocation2 + $0x3af] sm:$0xff]  ;;  %v5717_v19 = vld [vmem:[#allocation2 + $0x3c7] sm:$0xff] }
 0x678   :  { %v5719_v57 = vld [vmem:[#allocation2 + $0x3e7] sm:$0xff]  ;;  %v6561_v41 = vld [vmem:[#allocation2 + $0x11] sm:$0xff] }
 0x679   :  { %13750 = vmatmul.mubr.bf16.gmra.mrb[32].mxu1 %v5854_v21  ;;  %v5665_v21 = vld [vmem:[#allocation2 + $0x47] sm:$0xff]  ;;  %v6563_v12 = vld [vmem:[#allocation2 + $0x31] sm:$0xff] }
 0x67a   :  { %13753 = vmatprep.mubr.bf16.mxu1 %v5855_v13  ;;  %v15535_v13 = vld [vmem:[%s22405_s4 + $0x88] sm:$0xff]   ;;  %v19972_v56 = vpack.c.bf16 %v5666_v8, %v5665_v21  ;;  %v20048_v8 = vpack.c.bf16 %v5702_v31, %v5701_v17  ;;  %v6565_v30 = vld [vmem:[#allocation2 + $0x51] sm:$0xff] }
 0x67b   :  { %v6560_v53 = vld [vmem:[#allocation2 + $0x9] sm:$0xff] }
 0x67c   :  { %v5723_v36 = vld [vmem:[#allocation2 + $0x427] sm:$0xff]  ;;  %v15544_v31 = vld [vmem:[%s22405_s4 + $0xd0] sm:$0xff]  }
 0x67d   :  { %v6562_v40 = vld [vmem:[#allocation2 + $0x29] sm:$0xff] }
 0x67e   :  { %v6564_v39 = vld [vmem:[#allocation2 + $0x49] sm:$0xff] }
 0x67f   :  { %v20090_v17 = vpack.c.bf16 %v6565_v30, %v6564_v39 }
 0x681   :  { %13754 = vmatmul.mubr.bf16.gmra.mrb[36].mxu1 %v5856_v46  ;;  %v5667_v46 = vld [vmem:[#allocation2 + $0x67] sm:$0xff] }
 0x682   :  { %13757 = vmatprep.mubr.bf16.mxu1 %v5857_v14  ;;  %v5670_v14 = vld [vmem:[#allocation2 + $0x8f] sm:$0xff]  ;;  %v19980_v16 = vpack.c.bf16 %v5668_v3, %v5667_v46  ;;  %v5705_v46 = vld [vmem:[#allocation2 + $0x307] sm:$0xff] }
 0x683   :  { %v5706_v3 = vld [vmem:[#allocation2 + $0x30f] sm:$0xff] }
 0x689   :  { %13758 = vmatmul.mubr.bf16.gmra.mrb[40].mxu1 %v5858_v43  ;;  %v19985_v43 = vpack.c.bf16 %v5670_v14, %v5669_v60  ;;  %v20054_v14 = vpack.c.bf16 %v5706_v3, %v5705_v46  ;;  %v6568_v46 = vld [vmem:[#allocation2 + $0x89] sm:$0xff]  ;;  %v6569_v3 = vld [vmem:[#allocation2 + $0x91] sm:$0xff] }
 0x68a   :  { %13761 = vmatprep.mubr.bf16.mxu1 %v5859_v0  ;;  %v5673_v0 = vld [vmem:[#allocation2 + $0xc7] sm:$0xff] }
 0x691   :  { %13762 = vmatmul.mubr.bf16.gmra.mrb[44].mxu1 %v5860_v22  ;;  %v5674_v22 = vld [vmem:[#allocation2 + $0xcf] sm:$0xff] }
 0x692   :  { %13765 = vmatprep.mubr.bf16.mxu1 %v5861_v6  ;;  %v19992_v6 = vpack.c.bf16 %v5672_v1, %v5671_v54  ;;  %v19997_v35 = vpack.c.bf16 %v5674_v22, %v5673_v0  ;;  %v5709_v54 = vld [vmem:[#allocation2 + $0x347] sm:$0xff]  ;;  %v5710_v1 = vld [vmem:[#allocation2 + $0x34f] sm:$0xff] }
 0x693   :  { %v20060_v22 = vpack.c.bf16 %v5710_v1, %v5709_v54  ;;  %v20103_v54 = vpack.c.bf16 %v6569_v3, %v6568_v46  ;;  %v6570_v1 = vld [vmem:[#allocation2 + $0xa9] sm:$0xff] }
 0x699   :  { %13766 = vmatmul.mubr.bf16.gmra.mrb[48].mxu1 %v5862_v4  ;;  %v15539_v4 = vld [vmem:[%s22405_s4 + $0xa8] sm:$0xff]  }
 0x69a   :  { %13769 = vmatprep.mubr.bf16.mxu1 %v5863_v18  ;;  %v5678_v18 = vld [vmem:[#allocation2 + $0x10f] sm:$0xff] }
 0x69b   :  { %v20009_v38 = vpack.c.bf16 %v5678_v18, %v5677_v2  ;;  %v20066_v18 = vpack.c.bf16 %v5714_v24, %v5713_v34  ;;  %v6573_v34 = vld [vmem:[#allocation2 + $0xd1] sm:$0xff] }
 0x6a1   :  { %13770 = vmatmul.mubr.bf16.gmra.mrb[52].mxu1 %v5864_v23  ;;  %v5681_v23 = vld [vmem:[#allocation2 + $0x147] sm:$0xff] }
 0x6a2   :  { %13773 = vmatprep.mubr.bf16.mxu1 %v5865_v9  ;;  %v20021_v37 = vpack.c.bf16 %v5682_v59, %v5681_v23  ;;  %v5686_v9 = vld [vmem:[#allocation2 + $0x18f] sm:$0xff] }
 0x6a3   :  { %v20027_v47 = vpack.c.bf16 %v5686_v9, %v5685_v29  ;;  %v5718_v23 = vld [vmem:[#allocation2 + $0x3cf] sm:$0xff]  ;;  %v5721_v9 = vld [vmem:[#allocation2 + $0x407] sm:$0xff] }
 0x6a4   :  { %v20072_v44 = vpack.c.bf16 %v5718_v23, %v5717_v19  ;;  %v5720_v29 = vld [vmem:[#allocation2 + $0x3ef] sm:$0xff] }
 0x6a5   :  { %v15548_v19 = vld [vmem:[%s22405_s4 + $0xf0] sm:$0xff]  }
 0x6a6   :  { %v6574_v23 = vld [vmem:[#allocation2 + $0xe9] sm:$0xff] }
 0x6a9   :  { %13774 = vmatmul.mubr.bf16.gmra.mrb[56].mxu1 %v5866_v50  ;;  %v20031_v50 = vpack.c.bf16 %v5688_v28, %v5687_v51  ;;  %v5722_v51 = vld [vmem:[#allocation2 + $0x40f] sm:$0xff]  ;;  %v20076_v28 = vpack.c.bf16 %v5720_v29, %v5719_v57 }
 0x6aa   :  { %13777 = vmatprep.mubr.bf16.mxu1 %v5867_v5  ;;  %v20037_v5 = vpack.c.bf16 %v5692_v62, %v5691_v10  ;;  %v20078_v49 = vpack.c.bf16 %v5722_v51, %v5721_v9  ;;  %v5724_v10 = vld [vmem:[#allocation2 + $0x42f] sm:$0xff]  ;;  %v6624_v62 = vpack.c.bf16 %v6561_v41, %v6560_v53  ;;  %v15549_v53 = vld [vmem:[%s22405_s4 + $0xf8] sm:$0xff]  }
 0x6ab   :  { %v6575_v57 = vld [vmem:[#allocation2 + $0xf1] sm:$0xff]  ;;  %v6576_v29 = vld [vmem:[#allocation2 + $0x109] sm:$0xff] }
 0x6ac   :  { %v6577_v9 = vld [vmem:[#allocation2 + $0x111] sm:$0xff]  ;;  %v20122_v51 = vpack.c.bf16 %v6575_v57, %v6574_v23  ;;  %v6590_v23 = vld [vmem:[#allocation2 + $0x1e9] sm:$0xff] }
 0x6ad   :  { %v20127_v41 = vpack.c.bf16 %v6577_v9, %v6576_v29  ;;  %v6591_v57 = vld [vmem:[#allocation2 + $0x1f1] sm:$0xff] }
 0x6ae   :  { %v20155_v9 = vpack.c.bf16 %v6591_v57, %v6590_v23  ;;  %v6605_v23 = vld [vmem:[#allocation2 + $0x311] sm:$0xff] }
 0x6b1   :  { %13778 = vmatmul.mubr.bf16.gmra.mrb[60].mxu1 %v5868_v48  ;;  %v5700_v48 = vld [vmem:[#allocation2 + $0x2af] sm:$0xff] }
 0x6b2   :  { %13797 = vmatprep.mubr.bf16.mxu1 %v5725_v63  ;;  %v5699_v63 = vld [vmem:[#allocation2 + $0x2a7] sm:$0xff] }
 0x6b3   :  { %v20046_v21 = vpack.c.bf16 %v5700_v48, %v5699_v63  ;;  %v20085_v63 = vpack.c.bf16 %v6563_v12, %v6562_v40  ;;  %v15543_v48 = vld [vmem:[%s22405_s4 + $0xc8] sm:$0xff]   ;;  %v6581_v12 = vld [vmem:[#allocation2 + $0x151] sm:$0xff] }
 0x6b4   :  { %v6580_v40 = vld [vmem:[#allocation2 + $0x149] sm:$0xff] }
 0x6b5   :  { %v20139_v30 = vpack.c.bf16 %v6581_v12, %v6580_v40  ;;  %v6597_v40 = vld [vmem:[#allocation2 + $0x291] sm:$0xff] }
 0x6b9   :  { %13798 = vmatmul.mubr.bf16.vlgmr.msra.gmra.mrb[0].mxu1 %v19967_v52 }
 0x6ba   :  { %13801 = vmatprep.mubr.bf16.mxu1 %v19972_v56  ;;  %13862 = vmatpush3.bf16.msra.mxu1 %v19802_v42  ;;  %v15538_v42 = vld [vmem:[%s22405_s4 + $0xa0] sm:$0xff]  }
 0x6bb   :  { %13863 = vmatprep.subr.bf16.mxu1 %v15535_v13 }
 0x6be   :  { %13864 = vmatpush3.bf16.msra.mxu1 %v15535_v13  ;;  %v5703_v13 = vld [vmem:[#allocation2 + $0x2e7] sm:$0xff] }
 0x6bf   :  { %13865 = vmatprep.subr.bf16.mxu1 %v15536_v45 }
 0x6c1   :  { %13802 = vmatmul.mubr.bf16.gmra.mrb[4].mxu1 %v19980_v16 }
 0x6c2   :  { %13805 = vmatprep.mubr.bf16.mxu1 %v19985_v43  ;;  %13866 = vmatpush3.bf16.msra.mxu1 %v15536_v45  ;;  %v5704_v45 = vld [vmem:[#allocation2 + $0x2ef] sm:$0xff] }
 0x6c3   :  { %13867 = vmatprep.subr.bf16.mxu1 %v15537_v20  ;;  %v20052_v60 = vpack.c.bf16 %v5704_v45, %v5703_v13  ;;  %v6566_v13 = vld [vmem:[#allocation2 + $0x69] sm:$0xff]  ;;  %v6567_v45 = vld [vmem:[#allocation2 + $0x71] sm:$0xff] }
 0x6c6   :  { %13868 = vmatpush3.bf16.msra.mxu1 %v15537_v20  ;;  %v5707_v20 = vld [vmem:[#allocation2 + $0x327] sm:$0xff] }
 0x6c7   :  { %13869 = vmatprep.subr.bf16.mxu1 %v15538_v42 }
 0x6c9   :  { %13806 = vmatmul.mubr.bf16.gmra.mrb[8].mxu1 %v19992_v6 }
 0x6ca   :  { %13809 = vmatprep.mubr.bf16.mxu1 %v19997_v35  ;;  %13870 = vmatpush3.bf16.msra.mxu1 %v15538_v42  ;;  %v5708_v42 = vld [vmem:[#allocation2 + $0x32f] sm:$0xff] }
 0x6cb   :  { %13871 = vmatprep.subr.bf16.mxu1 %v15539_v4  ;;  %v20058_v0 = vpack.c.bf16 %v5708_v42, %v5707_v20  ;;  %v20098_v20 = vpack.c.bf16 %v6567_v45, %v6566_v13  ;;  %v15545_v42 = vld [vmem:[%s22405_s4 + $0xd8] sm:$0xff]   ;;  %v6584_v13 = vld [vmem:[#allocation2 + $0x189] sm:$0xff] }
 0x6cc   :  { %v6585_v45 = vld [vmem:[#allocation2 + $0x191] sm:$0xff] }
 0x6cd   :  { %v20145_v3 = vpack.c.bf16 %v6585_v45, %v6584_v13  ;;  %v6599_v13 = vld [vmem:[#allocation2 + $0x2b1] sm:$0xff]  ;;  %v6600_v45 = vld [vmem:[#allocation2 + $0x2c9] sm:$0xff] }
 0x6ce   :  { %13872 = vmatpush3.bf16.msra.mxu1 %v15539_v4  ;;  %v5711_v4 = vld [vmem:[#allocation2 + $0x367] sm:$0xff] }
 0x6cf   :  { %13873 = vmatprep.subr.bf16.mxu1 %v15540_v15 }
 0x6d1   :  { %13810 = vmatmul.mubr.bf16.gmra.mrb[12].mxu1 %v20004_v58 }
 0x6d2   :  { %13813 = vmatprep.mubr.bf16.mxu1 %v20009_v38  ;;  %13874 = vmatpush3.bf16.msra.mxu1 %v15540_v15  ;;  %v5712_v15 = vld [vmem:[#allocation2 + $0x36f] sm:$0xff] }
 0x6d3   :  { %13875 = vmatprep.subr.bf16.mxu1 %v15541_v33  ;;  %v20064_v2 = vpack.c.bf16 %v5712_v15, %v5711_v4  ;;  %v6571_v4 = vld [vmem:[#allocation2 + $0xb1] sm:$0xff]  ;;  %v6572_v15 = vld [vmem:[#allocation2 + $0xc9] sm:$0xff] }
 0x6d4   :  { %v20110_v24 = vpack.c.bf16 %v6571_v4, %v6570_v1  ;;  %v6588_v1 = vld [vmem:[#allocation2 + $0x1c9] sm:$0xff]  ;;  %v6589_v4 = vld [vmem:[#allocation2 + $0x1d1] sm:$0xff] }
 0x6d6   :  { %13876 = vmatpush3.bf16.msra.mxu1 %v15541_v33  ;;  %v5715_v33 = vld [vmem:[#allocation2 + $0x3a7] sm:$0xff] }
 0x6d7   :  { %13941 = vmatprep.subr.bf16.mxu1 %v20016_v27  ;;  %v20070_v59 = vpack.c.bf16 %v5716_v61, %v5715_v33  ;;  %v15547_v33 = vld [vmem:[%s22405_s4 + $0xe8] sm:$0xff]   ;;  %v20115_v61 = vpack.c.bf16 %v6573_v34, %v6572_v15  ;;  %v20151_v34 = vpack.c.bf16 %v6589_v4, %v6588_v1 }
 0x6d8   :  { %v6602_v4 = vld [vmem:[#allocation2 + $0x2e9] sm:$0xff] }
 0x6d9   :  { %13814 = vmatmul.mubr.bf16.gmra.mrb[16].mxu1 %v20018_v32 }
 0x6da   :  { %13817 = vmatprep.mubr.bf16.mxu1 %v20021_v37 }
 0x6e1   :  { %13818 = vmatmul.mubr.bf16.gmra.mrb[20].mxu1 %v20025_v55 }
 0x6e2   :  { %13821 = vmatprep.mubr.bf16.mxu1 %v20027_v47 }
 0x6e9   :  { %13822 = vmatmul.mubr.bf16.gmra.mrb[24].mxu1 %v20031_v50 }
 0x6ea   :  { %13825 = vmatprep.mubr.bf16.mxu1 %v20033_v11 }
 0x6f1   :  { %13826 = vmatmul.mubr.bf16.gmra.mrb[28].mxu1 %v20037_v5 }
 0x6f2   :  { %13829 = vmatprep.mubr.bf16.mxu1 %v5741_v7  ;;  %v20082_v7 = vpack.c.bf16 %v5724_v10, %v5723_v36  ;;  %v20134_v36 = vld [vmem:[%s22405_s4 + $0x100] sm:$0xff]   ;;  %v6578_v10 = vld [vmem:[#allocation2 + $0x129] sm:$0xff] }
 0x6f9   :  { %13830 = vmatmul.mubr.bf16.gmra.mrb[32].mxu1 %v20040_v26 }
 0x6fa   :  { %13833 = vmatprep.mubr.bf16.mxu1 %v20042_v25 }
 0x701   :  { %13834 = vmatmul.mubr.bf16.gmra.mrb[36].mxu1 %v20046_v21 }
 0x702   :  { %13837 = vmatprep.mubr.bf16.mxu1 %v20048_v8 }
 0x709   :  { %13838 = vmatmul.mubr.bf16.gmra.mrb[40].mxu1 %v20052_v60 }
 0x70a   :  { %13841 = vmatprep.mubr.bf16.mxu1 %v20054_v14 }
 0x711   :  { %13842 = vmatmul.mubr.bf16.gmra.mrb[44].mxu1 %v20058_v0 }
 0x712   :  { %13845 = vmatprep.mubr.bf16.mxu1 %v20060_v22 }
 0x719   :  { %13846 = vmatmul.mubr.bf16.gmra.mrb[48].mxu1 %v20064_v2 }
 0x71a   :  { %13849 = vmatprep.mubr.bf16.mxu1 %v20066_v18 }
 0x721   :  { %13850 = vmatmul.mubr.bf16.gmra.mrb[52].mxu1 %v20070_v59 }
 0x722   :  { %13853 = vmatprep.mubr.bf16.mxu1 %v20072_v44 }
 0x729   :  { %13854 = vmatmul.mubr.bf16.gmra.mrb[56].mxu1 %v20076_v28 }
 0x72a   :  { %13857 = vmatprep.mubr.bf16.mxu1 %v20078_v49 }
 0x731   :  { %13858 = vmatmul.mubr.bf16.gmra.mrb[60].mxu1 %v20082_v7 }
 0x732   :  { %13877 = vmatprep.mubr.bf16.mxu1 %v6624_v62  ;;  %v6579_v62 = vld [vmem:[#allocation2 + $0x131] sm:$0xff] }
 0x733   :  { %v20136_v39 = vpack.c.bf16 %v6579_v62, %v6578_v10  ;;  %v6595_v10 = vld [vmem:[#allocation2 + $0x271] sm:$0xff]  ;;  %v6596_v62 = vld [vmem:[#allocation2 + $0x289] sm:$0xff] }
 0x739   :  { %13878 = vmatmul.mubr.bf16.vlgmr.msra.gmra.mrb[0].mxu1 %v20085_v63 }
 0x73a   :  { %13881 = vmatprep.mubr.bf16.mxu1 %v20090_v17  ;;  %13942 = vmatpush3.bf16.msra.mxu1 %v20016_v27  ;;  %v15546_v27 = vld [vmem:[%s22405_s4 + $0xe0] sm:$0xff]  }
 0x73b   :  { %13943 = vmatprep.subr.bf16.mxu1 %v15543_v48 }
 0x73e   :  { %13944 = vmatpush3.bf16.msra.mxu1 %v15543_v48  ;;  %v6582_v48 = vld [vmem:[#allocation2 + $0x169] sm:$0xff] }
 0x73f   :  { %13945 = vmatprep.subr.bf16.mxu1 %v15544_v31 }
 0x741   :  { %13882 = vmatmul.mubr.bf16.gmra.mrb[4].mxu1 %v20098_v20 }
 0x742   :  { %13885 = vmatprep.mubr.bf16.mxu1 %v20103_v54  ;;  %13946 = vmatpush3.bf16.msra.mxu1 %v15544_v31  ;;  %v6583_v31 = vld [vmem:[#allocation2 + $0x171] sm:$0xff] }
 0x743   :  { %13947 = vmatprep.subr.bf16.mxu1 %v15545_v42  ;;  %v20143_v46 = vpack.c.bf16 %v6583_v31, %v6582_v48  ;;  %v20160_v48 = vpack.c.bf16 %v6597_v40, %v6596_v62  ;;  %v6598_v31 = vld [vmem:[#allocation2 + $0x2a9] sm:$0xff]  ;;  %v6609_v40 = vld [vmem:[#allocation2 + $0x351] sm:$0xff] }
 0x744   :  { %v6608_v62 = vld [vmem:[#allocation2 + $0x349] sm:$0xff] }
 0x746   :  { %13948 = vmatpush3.bf16.msra.mxu1 %v15545_v42  ;;  %v6586_v42 = vld [vmem:[#allocation2 + $0x1a9] sm:$0xff] }
 0x747   :  { %13949 = vmatprep.subr.bf16.mxu1 %v15546_v27 }
 0x749   :  { %13886 = vmatmul.mubr.bf16.gmra.mrb[8].mxu1 %v20110_v24 }
 0x74a   :  { %13889 = vmatprep.mubr.bf16.mxu1 %v20115_v61  ;;  %13950 = vmatpush3.bf16.msra.mxu1 %v15546_v27  ;;  %v6587_v27 = vld [vmem:[#allocation2 + $0x1b1] sm:$0xff] }
 0x74b   :  { %13951 = vmatprep.subr.bf16.mxu1 %v15547_v33  ;;  %v20149_v15 = vpack.c.bf16 %v6587_v27, %v6586_v42  ;;  %v6601_v42 = vld [vmem:[#allocation2 + $0x2d1] sm:$0xff]  ;;  %v20164_v27 = vpack.c.bf16 %v6599_v13, %v6598_v31  ;;  %v20178_v13 = vpack.c.bf16 %v6609_v40, %v6608_v62  ;;  %v6616_v62 = vld [vmem:[#allocation2 + $0x3c9] sm:$0xff] }
 0x74c   :  { %v20166_v1 = vpack.c.bf16 %v6601_v42, %v6600_v45  ;;  %v6610_v45 = vld [vmem:[#allocation2 + $0x369] sm:$0xff]  ;;  %v6611_v42 = vld [vmem:[#allocation2 + $0x371] sm:$0xff] }
 0x74d   :  { %22937 = vst [vmem:[#allocation5_spill] sm:$0xff] %v20178_v13  ;;  %v6617_v40 = vld [vmem:[#allocation2 + $0x3d1] sm:$0xff] }
 0x74e   :  { %13952 = vmatpush3.bf16.msra.mxu1 %v15547_v33  ;;  %v6592_v33 = vld [vmem:[#allocation2 + $0x249] sm:$0xff] }
 0x74f   :  { %13953 = vmatprep.subr.bf16.mxu1 %v15548_v19 }
 0x751   :  { %13890 = vmatmul.mubr.bf16.gmra.mrb[12].mxu1 %v20122_v51 }
 0x752   :  { %13893 = vmatprep.mubr.bf16.mxu1 %v20127_v41  ;;  %13954 = vmatpush3.bf16.msra.mxu1 %v15548_v19  ;;  %v6593_v19 = vld [vmem:[#allocation2 + $0x251] sm:$0xff] }
 0x753   :  { %13955 = vmatprep.subr.bf16.mxu1 %v15549_v53  ;;  %v6640_v29 = vpack.c.bf16 %v6593_v19, %v6592_v33  ;;  %v6603_v33 = vld [vmem:[#allocation2 + $0x2f1] sm:$0xff]  ;;  %v6604_v19 = vld [vmem:[#allocation2 + $0x309] sm:$0xff] }
 0x754   :  { %v20170_v57 = vpack.c.bf16 %v6603_v33, %v6602_v4  ;;  %v6612_v4 = vld [vmem:[#allocation2 + $0x389] sm:$0xff]  ;;  %v6613_v33 = vld [vmem:[#allocation2 + $0x391] sm:$0xff] }
 0x756   :  { %13956 = vmatpush3.bf16.msra.mxu1 %v15549_v53  ;;  %v6594_v53 = vld [vmem:[#allocation2 + $0x269] sm:$0xff] }
 0x757   :  { %14021 = vmatprep.subr.bf16.mxu1 %v20134_v36  ;;  %v20158_v12 = vpack.c.bf16 %v6595_v10, %v6594_v53  ;;  %v6606_v53 = vld [vmem:[#allocation2 + $0x329] sm:$0xff]  ;;  %v6607_v10 = vld [vmem:[#allocation2 + $0x331] sm:$0xff] }
 0x758   :  { %v20176_v31 = vpack.c.bf16 %v6607_v10, %v6606_v53  ;;  %v6614_v53 = vld [vmem:[#allocation2 + $0x3a9] sm:$0xff]  ;;  %v6615_v10 = vld [vmem:[#allocation2 + $0x3b1] sm:$0xff] }
 0x759   :  { %13894 = vmatmul.mubr.bf16.gmra.mrb[16].mxu1 %v20136_v39 }
 0x75a   :  { %13897 = vmatprep.mubr.bf16.mxu1 %v20139_v30  ;;  %22936 = vst [vmem:[#allocation3_spill] sm:$0xff] %v20176_v31 }
 0x761   :  { %13898 = vmatmul.mubr.bf16.gmra.mrb[20].mxu1 %v20143_v46 }
 0x762   :  { %13901 = vmatprep.mubr.bf16.mxu1 %v20145_v3 }
 0x769   :  { %13902 = vmatmul.mubr.bf16.gmra.mrb[24].mxu1 %v20149_v15 }
 0x76a   :  { %13905 = vmatprep.mubr.bf16.mxu1 %v20151_v34 }
 0x771   :  { %13906 = vmatmul.mubr.bf16.gmra.mrb[28].mxu1 %v20155_v9 }
 0x772   :  { %13909 = vmatprep.mubr.bf16.mxu1 %v6640_v29  ;;  %v20172_v29 = vpack.c.bf16 %v6605_v23, %v6604_v19  ;;  %v20182_v19 = vpack.c.bf16 %v6611_v42, %v6610_v45  ;;  %v20184_v23 = vpack.c.bf16 %v6613_v33, %v6612_v4  ;;  %v6618_v45 = vld [vmem:[#allocation2 + $0x3e9] sm:$0xff]  ;;  %v6619_v42 = vld [vmem:[#allocation2 + $0x3f1] sm:$0xff] }
 0x773   :  { %v6620_v4 = vld [vmem:[#allocation2 + $0x409] sm:$0xff]  ;;  %v6621_v33 = vld [vmem:[#allocation2 + $0x411] sm:$0xff] }
 0x774   :  { %22935 = vst [vmem:[#allocation19_spill] sm:$0xff] %v20172_v29  ;;  %22938 = vst [vmem:[#allocation8_spill] sm:$0xff] %v20182_v19 }
 0x779   :  { %13910 = vmatmul.mubr.bf16.gmra.mrb[32].mxu1 %v20158_v12 }
 0x77a   :  { %13913 = vmatprep.mubr.bf16.mxu1 %v20160_v48 }
 0x781   :  { %13914 = vmatmul.mubr.bf16.gmra.mrb[36].mxu1 %v20164_v27 }
 0x782   :  { %13917 = vmatprep.mubr.bf16.mxu1 %v20166_v1 }
 0x789   :  { %13918 = vmatmul.mubr.bf16.gmra.mrb[40].mxu1 %v20170_v57 }
 0x78a   :  { %13921 = vmatprep.mubr.bf16.mxu1 %v20172_v29  ;;  %v20188_v29 = vpack.c.bf16 %v6615_v10, %v6614_v53  ;;  %v6622_v53 = vld [vmem:[#allocation2 + $0x429] sm:$0xff]  ;;  %v6623_v10 = vld [vmem:[#allocation2 + $0x431] sm:$0xff] }
 0x791   :  { %13922 = vmatmul.mubr.bf16.gmra.mrb[44].mxu1 %v20176_v31  ;;  %v20190_v31 = vpack.c.bf16 %v6617_v40, %v6616_v62  ;;  %v20200_v62 = vpack.c.bf16 %v6623_v10, %v6622_v53  ;;  %v15551_v40 = vld [vmem:[%s22405_s4 + $0x108] sm:$0xff]   ;;  %v7601_v53 = vld [vmem:[#allocation2 + $0xf0] sm:$0xff] }
 0x792   :  { %13925 = vmatprep.mubr.bf16.mxu1 %v20178_v13  ;;  %v20194_v13 = vpack.c.bf16 %v6619_v42, %v6618_v45  ;;  %v15552_v45 = vld [vmem:[%s22405_s4 + $0x110] sm:$0xff]   ;;  %v7598_v42 = vld [vmem:[#allocation2 + $0xc8] sm:$0xff] }
 0x799   :  { %13926 = vmatmul.mubr.bf16.gmra.mrb[48].mxu1 %v20182_v19  ;;  %v20196_v19 = vpack.c.bf16 %v6621_v33, %v6620_v4  ;;  %v7599_v4 = vld [vmem:[#allocation2 + $0xd0] sm:$0xff]  ;;  %v7600_v33 = vld [vmem:[#allocation2 + $0xe8] sm:$0xff] }
 0x79a   :  { %13929 = vmatprep.mubr.bf16.mxu1 %v20184_v23  ;;  %v20288_v10 = vpack.c.bf16 %v7599_v4, %v7598_v42 }
 0x7a1   :  { %13930 = vmatmul.mubr.bf16.gmra.mrb[52].mxu1 %v20188_v29 }
 0x7a2   :  { %13933 = vmatprep.mubr.bf16.mxu1 %v20190_v31 }
 0x7a9   :  { %13934 = vmatmul.mubr.bf16.gmra.mrb[56].mxu1 %v20194_v13 }
 0x7aa   :  { %13937 = vmatprep.mubr.bf16.mxu1 %v20196_v19 }
 0x7b1   :  { %13938 = vmatmul.mubr.bf16.gmra.mrb[60].mxu1 %v20200_v62 }
 0x7b2   :  { %13957 = vmatprep.mubr.bf16.mxu1 %v19967_v52  ;;  %v15553_v52 = vld [vmem:[%s22405_s4 + $0x118] sm:$0xff]  }
 0x7b9   :  { %13958 = vmatmul.mubr.bf16.vlgmr.msra.gmra.mrb[0].mxu1 %v19972_v56  ;;  %v15554_v56 = vld [vmem:[%s22405_s4 + $0x120] sm:$0xff]  }
 0x7ba   :  { %13961 = vmatprep.mubr.bf16.mxu1 %v19980_v16  ;;  %14022 = vmatpush3.bf16.msra.mxu1 %v20134_v36  ;;  %v15555_v16 = vld [vmem:[%s22405_s4 + $0x128] sm:$0xff]   ;;  %v15562_v36 = vld [vmem:[%s22405_s4 + $0x160] sm:$0xff]  }
 0x7bb   :  { %14023 = vmatprep.subr.bf16.mxu1 %v15551_v40 }
 0x7be   :  { %14024 = vmatpush3.bf16.msra.mxu1 %v15551_v40  ;;  %v15563_v40 = vld [vmem:[%s22405_s4 + $0x168] sm:$0xff]  }
 0x7bf   :  { %14025 = vmatprep.subr.bf16.mxu1 %v15552_v45 }
 0x7c1   :  { %13962 = vmatmul.mubr.bf16.gmra.mrb[4].mxu1 %v19985_v43  ;;  %v15556_v43 = vld [vmem:[%s22405_s4 + $0x130] sm:$0xff]  }
 0x7c2   :  { %13965 = vmatprep.mubr.bf16.mxu1 %v19992_v6  ;;  %14026 = vmatpush3.bf16.msra.mxu1 %v15552_v45  ;;  %v15557_v6 = vld [vmem:[%s22405_s4 + $0x138] sm:$0xff]   ;;  %v20293_v45 = vpack.c.bf16 %v7601_v53, %v7600_v33  ;;  %v7618_v33 = vld [vmem:[#allocation2 + $0x208] sm:$0xff]  ;;  %v7619_v53 = vld [vmem:[#allocation2 + $0x210] sm:$0xff] }
 0x7c3   :  { %14027 = vmatprep.subr.bf16.mxu1 %v15553_v52 }
 0x7c6   :  { %14028 = vmatpush3.bf16.msra.mxu1 %v15553_v52  ;;  %v15564_v52 = vld [vmem:[%s22405_s4 + $0x170] sm:$0xff]  }
 0x7c7   :  { %14029 = vmatprep.subr.bf16.mxu1 %v15554_v56 }
 0x7c9   :  { %13966 = vmatmul.mubr.bf16.gmra.mrb[8].mxu1 %v19997_v35  ;;  %v15558_v35 = vld [vmem:[%s22405_s4 + $0x140] sm:$0xff]  }
 0x7ca   :  { %13969 = vmatprep.mubr.bf16.mxu1 %v20004_v58  ;;  %14030 = vmatpush3.bf16.msra.mxu1 %v15554_v56  ;;  %v7104_v58 = vld [vmem:[#allocation2 + $0x207] sm:$0xff] }
 0x7cb   :  { %14031 = vmatprep.subr.bf16.mxu1 %v15555_v16  ;;  %v7602_v56 = vld [vmem:[#allocation2 + $0x108] sm:$0xff] }
 0x7ce   :  { %14032 = vmatpush3.bf16.msra.mxu1 %v15555_v16  ;;  %v7603_v16 = vld [vmem:[#allocation2 + $0x110] sm:$0xff] }
 0x7cf   :  { %14033 = vmatprep.subr.bf16.mxu1 %v15556_v43 }
 0x7d1   :  { %13970 = vmatmul.mubr.bf16.gmra.mrb[12].mxu1 %v20009_v38  ;;  %v7105_v38 = vld [vmem:[#allocation2 + $0x20f] sm:$0xff] }
 0x7d2   :  { %13973 = vmatprep.mubr.bf16.mxu1 %v20018_v32  ;;  %14034 = vmatpush3.bf16.msra.mxu1 %v15556_v43  ;;  %v20243_v32 = vpack.c.bf16 %v7105_v38, %v7104_v58  ;;  %v7604_v43 = vld [vmem:[#allocation2 + $0x128] sm:$0xff]  ;;  %v15565_v58 = vld [vmem:[%s22405_s4 + $0x178] sm:$0xff]  }
 0x7d3   :  { %14035 = vmatprep.subr.bf16.mxu1 %v15557_v6 }
 0x7d6   :  { %14036 = vmatpush3.bf16.msra.mxu1 %v15557_v6  ;;  %v7605_v6 = vld [vmem:[#allocation2 + $0x130] sm:$0xff] }
 0x7d7   :  { %14101 = vmatprep.subr.bf16.mxu1 %v15558_v35  ;;  %v20305_v38 = vpack.c.bf16 %v7605_v6, %v7604_v43  ;;  %v7622_v43 = vld [vmem:[#allocation2 + $0x288] sm:$0xff]  ;;  %v7623_v6 = vld [vmem:[#allocation2 + $0x290] sm:$0xff] }
 0x7d9   :  { %13974 = vmatmul.mubr.bf16.gmra.mrb[16].mxu1 %v20021_v37  ;;  %v7136_v37 = vld [vmem:[#allocation2 + $0x447] sm:$0xff] }
 0x7da   :  { %13977 = vmatprep.mubr.bf16.mxu1 %v20025_v55  ;;  %v7137_v55 = vld [vmem:[#allocation2 + $0x44f] sm:$0xff] }
 0x7e1   :  { %13978 = vmatmul.mubr.bf16.gmra.mrb[20].mxu1 %v20027_v47  ;;  %v7588_v47 = vld [vmem:[#allocation2 + $0x28] sm:$0xff] }
 0x7e2   :  { %13981 = vmatprep.mubr.bf16.mxu1 %v20031_v50  ;;  %v7589_v50 = vld [vmem:[#allocation2 + $0x30] sm:$0xff] }
 0x7e9   :  { %13982 = vmatmul.mubr.bf16.gmra.mrb[24].mxu1 %v20033_v11  ;;  %v20261_v11 = vpack.c.bf16 %v7137_v55, %v7136_v37  ;;  %v20312_v37 = vld [vmem:[%s22405_s4 + $0x180] sm:$0xff]   ;;  %v7606_v55 = vld [vmem:[#allocation2 + $0x148] sm:$0xff] }
 0x7ea   :  { %13985 = vmatprep.mubr.bf16.mxu1 %v20037_v5  ;;  %v7652_v5 = vpack.c.bf16 %v7589_v50, %v7588_v47  ;;  %v7607_v47 = vld [vmem:[#allocation2 + $0x150] sm:$0xff]  ;;  %v7608_v50 = vld [vmem:[#allocation2 + $0x168] sm:$0xff] }
 0x7f1   :  { %13986 = vmatmul.mubr.bf16.gmra.mrb[28].mxu1 %v20243_v32 }
 0x7f2   :  { %13989 = vmatprep.mubr.bf16.mxu1 %v20040_v26  ;;  %v7590_v26 = vld [vmem:[#allocation2 + $0x48] sm:$0xff] }
 0x7f9   :  { %13990 = vmatmul.mubr.bf16.gmra.mrb[32].mxu1 %v20042_v25  ;;  %v7591_v25 = vld [vmem:[#allocation2 + $0x50] sm:$0xff] }
 0x7fa   :  { %13993 = vmatprep.mubr.bf16.mxu1 %v20046_v21  ;;  %v7592_v21 = vld [vmem:[#allocation2 + $0x68] sm:$0xff] }
 0x801   :  { %13994 = vmatmul.mubr.bf16.gmra.mrb[36].mxu1 %v20048_v8  ;;  %v7593_v8 = vld [vmem:[#allocation2 + $0x70] sm:$0xff] }
 0x802   :  { %13997 = vmatprep.mubr.bf16.mxu1 %v20052_v60  ;;  %v20264_v60 = vpack.c.bf16 %v7591_v25, %v7590_v26  ;;  %v20314_v26 = vpack.c.bf16 %v7607_v47, %v7606_v55  ;;  %v7625_v55 = vld [vmem:[#allocation2 + $0x2b0] sm:$0xff]  ;;  %v20336_v47 = vpack.c.bf16 %v7623_v6, %v7622_v43  ;;  %v7636_v43 = vld [vmem:[#allocation2 + $0x368] sm:$0xff] }
 0x803   :  { %v7637_v6 = vld [vmem:[#allocation2 + $0x370] sm:$0xff] }
 0x809   :  { %13998 = vmatmul.mubr.bf16.gmra.mrb[40].mxu1 %v20054_v14  ;;  %v15559_v14 = vld [vmem:[%s22405_s4 + $0x148] sm:$0xff]  }
 0x80a   :  { %14001 = vmatprep.mubr.bf16.mxu1 %v20058_v0  ;;  %v20269_v0 = vpack.c.bf16 %v7593_v8, %v7592_v21  ;;  %v7610_v21 = vld [vmem:[#allocation2 + $0x188] sm:$0xff]  ;;  %v7611_v8 = vld [vmem:[#allocation2 + $0x190] sm:$0xff] }
 0x811   :  { %14002 = vmatmul.mubr.bf16.gmra.mrb[44].mxu1 %v20060_v22  ;;  %v15560_v22 = vld [vmem:[%s22405_s4 + $0x150] sm:$0xff]  }
 0x812   :  { %14005 = vmatprep.mubr.bf16.mxu1 %v20064_v2  ;;  %v7594_v2 = vld [vmem:[#allocation2 + $0x88] sm:$0xff] }
 0x819   :  { %14006 = vmatmul.mubr.bf16.gmra.mrb[48].mxu1 %v20066_v18  ;;  %v7595_v18 = vld [vmem:[#allocation2 + $0x90] sm:$0xff] }
 0x81a   :  { %14009 = vmatprep.mubr.bf16.mxu1 %v20070_v59  ;;  %v7596_v59 = vld [vmem:[#allocation2 + $0xa8] sm:$0xff] }
 0x821   :  { %14010 = vmatmul.mubr.bf16.gmra.mrb[52].mxu1 %v20072_v44  ;;  %v7597_v44 = vld [vmem:[#allocation2 + $0xb0] sm:$0xff] }
 0x822   :  { %14013 = vmatprep.mubr.bf16.mxu1 %v20076_v28  ;;  %v20276_v28 = vpack.c.bf16 %v7595_v18, %v7594_v2  ;;  %v20321_v2 = vpack.c.bf16 %v7611_v8, %v7610_v21  ;;  %v7627_v21 = vld [vmem:[#allocation2 + $0x2d0] sm:$0xff]  ;;  %v7628_v8 = vld [vmem:[#allocation2 + $0x2e8] sm:$0xff] }
 0x829   :  { %14014 = vmatmul.mubr.bf16.gmra.mrb[56].mxu1 %v20078_v49  ;;  %v15561_v49 = vld [vmem:[%s22405_s4 + $0x158] sm:$0xff]  }
 0x82a   :  { %14017 = vmatprep.mubr.bf16.mxu1 %v20082_v7  ;;  %v20281_v7 = vpack.c.bf16 %v7597_v44, %v7596_v59  ;;  %v7614_v59 = vld [vmem:[#allocation2 + $0x1c8] sm:$0xff]  ;;  %v7615_v44 = vld [vmem:[#allocation2 + $0x1d0] sm:$0xff] }
 0x82b   :  { %v20327_v42 = vpack.c.bf16 %v7615_v44, %v7614_v59  ;;  %v7630_v44 = vld [vmem:[#allocation2 + $0x308] sm:$0xff] }
 0x831   :  { %14018 = vmatmul.mubr.bf16.gmra.mrb[60].mxu1 %v20261_v11 }
 0x832   :  { %14037 = vmatprep.mubr.bf16.mxu1 %v7652_v5  ;;  %v7609_v5 = vld [vmem:[#allocation2 + $0x170] sm:$0xff] }
 0x833   :  { %v20317_v25 = vpack.c.bf16 %v7609_v5, %v7608_v50  ;;  %v7626_v5 = vld [vmem:[#allocation2 + $0x2c8] sm:$0xff] }
 0x839   :  { %14038 = vmatmul.mubr.bf16.vlgmr.msra.gmra.mrb[0].mxu1 %v20264_v60 }
 0x83a   :  { %14041 = vmatprep.mubr.bf16.mxu1 %v20269_v0  ;;  %14102 = vmatpush3.bf16.msra.mxu1 %v15558_v35  ;;  %v20300_v35 = vpack.c.bf16 %v7603_v16, %v7602_v56  ;;  %v20333_v56 = vpack.c.bf16 %v7619_v53, %v7618_v33  ;;  %v7633_v33 = vld [vmem:[#allocation2 + $0x330] sm:$0xff] }
 0x83b   :  { %14103 = vmatprep.subr.bf16.mxu1 %v15559_v14 }
 0x83e   :  { %14104 = vmatpush3.bf16.msra.mxu1 %v15559_v14  ;;  %v7612_v14 = vld [vmem:[#allocation2 + $0x1a8] sm:$0xff] }
 0x83f   :  { %14105 = vmatprep.subr.bf16.mxu1 %v15560_v22 }
 0x841   :  { %14042 = vmatmul.mubr.bf16.gmra.mrb[4].mxu1 %v20276_v28 }
 0x842   :  { %14045 = vmatprep.mubr.bf16.mxu1 %v20281_v7  ;;  %14106 = vmatpush3.bf16.msra.mxu1 %v15560_v22  ;;  %v7613_v22 = vld [vmem:[#allocation2 + $0x1b0] sm:$0xff] }
 0x843   :  { %14107 = vmatprep.subr.bf16.mxu1 %v15561_v49  ;;  %v20323_v18 = vpack.c.bf16 %v7613_v22, %v7612_v14  ;;  %v7629_v14 = vld [vmem:[#allocation2 + $0x2f0] sm:$0xff]  ;;  %v20342_v22 = vpack.c.bf16 %v7627_v21, %v7626_v5  ;;  %v7638_v5 = vld [vmem:[#allocation2 + $0x388] sm:$0xff] }
 0x844   :  { %v20344_v59 = vpack.c.bf16 %v7629_v14, %v7628_v8  ;;  %v7639_v21 = vld [vmem:[#allocation2 + $0x390] sm:$0xff]  ;;  %v7640_v8 = vld [vmem:[#allocation2 + $0x3a8] sm:$0xff] }
 0x845   :  { %v7641_v14 = vld [vmem:[#allocation2 + $0x3b0] sm:$0xff] }
 0x846   :  { %14108 = vmatpush3.bf16.msra.mxu1 %v15561_v49  ;;  %v7616_v49 = vld [vmem:[#allocation2 + $0x1e8] sm:$0xff] }
 0x847   :  { %14109 = vmatprep.subr.bf16.mxu1 %v15562_v36 }
 0x849   :  { %14046 = vmatmul.mubr.bf16.gmra.mrb[8].mxu1 %v20288_v10 }
 0x84a   :  { %14049 = vmatprep.mubr.bf16.mxu1 %v20293_v45  ;;  %14110 = vmatpush3.bf16.msra.mxu1 %v15562_v36  ;;  %v7617_v36 = vld [vmem:[#allocation2 + $0x1f0] sm:$0xff] }
 0x84b   :  { %14111 = vmatprep.subr.bf16.mxu1 %v15563_v40  ;;  %v20329_v4 = vpack.c.bf16 %v7617_v36, %v7616_v49  ;;  %v7631_v49 = vld [vmem:[#allocation2 + $0x310] sm:$0xff]  ;;  %v7632_v36 = vld [vmem:[#allocation2 + $0x328] sm:$0xff] }
 0x84c   :  { %v20348_v53 = vpack.c.bf16 %v7631_v49, %v7630_v44  ;;  %v20360_v44 = vpack.c.bf16 %v7639_v21, %v7638_v5  ;;  %v20362_v49 = vpack.c.bf16 %v7641_v14, %v7640_v8  ;;  %v7646_v5 = vld [vmem:[#allocation2 + $0x408] sm:$0xff]  ;;  %v7647_v21 = vld [vmem:[#allocation2 + $0x410] sm:$0xff] }
 0x84d   :  { %v7648_v8 = vld [vmem:[#allocation2 + $0x428] sm:$0xff]  ;;  %v7649_v14 = vld [vmem:[#allocation2 + $0x430] sm:$0xff] }
 0x84e   :  { %14112 = vmatpush3.bf16.msra.mxu1 %v15563_v40  ;;  %v7620_v40 = vld [vmem:[#allocation2 + $0x268] sm:$0xff]  ;;  %22940 = vst [vmem:[#allocation13_spill] sm:$0xff] %v20360_v44 }
 0x84f   :  { %14113 = vmatprep.subr.bf16.mxu1 %v15564_v52 }
 0x851   :  { %14050 = vmatmul.mubr.bf16.gmra.mrb[12].mxu1 %v20300_v35 }
 0x852   :  { %14053 = vmatprep.mubr.bf16.mxu1 %v20305_v38  ;;  %14114 = vmatpush3.bf16.msra.mxu1 %v15564_v52  ;;  %v7621_v52 = vld [vmem:[#allocation2 + $0x270] sm:$0xff] }
 0x853   :  { %14115 = vmatprep.subr.bf16.mxu1 %v15565_v58  ;;  %v7668_v16 = vpack.c.bf16 %v7621_v52, %v7620_v40  ;;  %v20350_v40 = vpack.c.bf16 %v7633_v33, %v7632_v36  ;;  %v7634_v52 = vld [vmem:[#allocation2 + $0x348] sm:$0xff]  ;;  %v7643_v33 = vld [vmem:[#allocation2 + $0x3d0] sm:$0xff] }
 0x854   :  { %v7642_v36 = vld [vmem:[#allocation2 + $0x3c8] sm:$0xff] }
 0x856   :  { %14116 = vmatpush3.bf16.msra.mxu1 %v15565_v58  ;;  %v7624_v58 = vld [vmem:[#allocation2 + $0x2a8] sm:$0xff] }
 0x857   :  { %14181 = vmatprep.subr.bf16.mxu1 %v20312_v37  ;;  %v20338_v50 = vpack.c.bf16 %v7625_v55, %v7624_v58  ;;  %v20356_v55 = vpack.c.bf16 %v7637_v6, %v7636_v43  ;;  %v20366_v43 = vpack.c.bf16 %v7643_v33, %v7642_v36  ;;  %v7650_v36 = vld [vmem:[#allocation2 + $0x448] sm:$0xff]  ;;  %v7651_v33 = vld [vmem:[#allocation2 + $0x450] sm:$0xff] }
 0x859   :  { %14054 = vmatmul.mubr.bf16.gmra.mrb[16].mxu1 %v20314_v26  ;;  %22939 = vst [vmem:[#allocation62_spill] sm:$0xff] %v20356_v55 }
 0x85a   :  { %14057 = vmatprep.mubr.bf16.mxu1 %v20317_v25 }
 0x861   :  { %14058 = vmatmul.mubr.bf16.gmra.mrb[20].mxu1 %v20321_v2 }
 0x862   :  { %14061 = vmatprep.mubr.bf16.mxu1 %v20323_v18 }
 0x869   :  { %14062 = vmatmul.mubr.bf16.gmra.mrb[24].mxu1 %v20327_v42 }
 0x86a   :  { %14065 = vmatprep.mubr.bf16.mxu1 %v20329_v4 }
 0x871   :  { %14066 = vmatmul.mubr.bf16.gmra.mrb[28].mxu1 %v20333_v56 }
 0x872   :  { %14069 = vmatprep.mubr.bf16.mxu1 %v7668_v16  ;;  %v7635_v16 = vld [vmem:[#allocation2 + $0x350] sm:$0xff] }
 0x873   :  { %v20354_v58 = vpack.c.bf16 %v7635_v16, %v7634_v52  ;;  %v7644_v52 = vld [vmem:[#allocation2 + $0x3e8] sm:$0xff]  ;;  %v7645_v16 = vld [vmem:[#allocation2 + $0x3f0] sm:$0xff] }
 0x874   :  { %v20368_v6 = vpack.c.bf16 %v7645_v16, %v7644_v52  ;;  %v20378_v52 = vpack.c.bf16 %v7651_v33, %v7650_v36  ;;  %v15567_v16 = vld [vmem:[%s22405_s4 + $0x188] sm:$0xff]  }
 0x875   :  { %v8626_v36 = vld [vmem:[#allocation2 + $0xcf] sm:$0xff] }
 0x879   :  { %14070 = vmatmul.mubr.bf16.gmra.mrb[32].mxu1 %v20336_v47 }
 0x87a   :  { %14073 = vmatprep.mubr.bf16.mxu1 %v20338_v50 }
 0x881   :  { %14074 = vmatmul.mubr.bf16.gmra.mrb[36].mxu1 %v20342_v22 }
 0x882   :  { %14077 = vmatprep.mubr.bf16.mxu1 %v20344_v59 }
 0x889   :  { %14078 = vmatmul.mubr.bf16.gmra.mrb[40].mxu1 %v20348_v53 }
 0x88a   :  { %14081 = vmatprep.mubr.bf16.mxu1 %v20350_v40 }
 0x891   :  { %14082 = vmatmul.mubr.bf16.gmra.mrb[44].mxu1 %v20354_v58 }
 0x892   :  { %14085 = vmatprep.mubr.bf16.mxu1 %v20356_v55  ;;  %v20372_v55 = vpack.c.bf16 %v7647_v21, %v7646_v5  ;;  %v15568_v5 = vld [vmem:[%s22405_s4 + $0x190] sm:$0xff]   ;;  %v8623_v21 = vld [vmem:[#allocation2 + $0xa7] sm:$0xff] }
 0x899   :  { %14086 = vmatmul.mubr.bf16.gmra.mrb[48].mxu1 %v20360_v44  ;;  %v20374_v44 = vpack.c.bf16 %v7649_v14, %v7648_v8  ;;  %v8624_v8 = vld [vmem:[#allocation2 + $0xaf] sm:$0xff]  ;;  %v8625_v14 = vld [vmem:[#allocation2 + $0xc7] sm:$0xff] }
 0x89a   :  { %14089 = vmatprep.mubr.bf16.mxu1 %v20362_v49  ;;  %v8684_v33 = vpack.c.bf16 %v8624_v8, %v8623_v21  ;;  %v8641_v21 = vld [vmem:[#allocation2 + $0x1c7] sm:$0xff]  ;;  %v8642_v8 = vld [vmem:[#allocation2 + $0x1cf] sm:$0xff] }
 0x8a1   :  { %14090 = vmatmul.mubr.bf16.gmra.mrb[52].mxu1 %v20366_v43 }
 0x8a2   :  { %14093 = vmatprep.mubr.bf16.mxu1 %v20368_v6 }
 0x8a9   :  { %14094 = vmatmul.mubr.bf16.gmra.mrb[56].mxu1 %v20372_v55 }
 0x8aa   :  { %14097 = vmatprep.mubr.bf16.mxu1 %v20374_v44 }
 0x8b1   :  { %14098 = vmatmul.mubr.bf16.gmra.mrb[60].mxu1 %v20378_v52 }
 0x8b2   :  { %14117 = vmatprep.mubr.bf16.mxu1 %v20085_v63  ;;  %v15569_v63 = vld [vmem:[%s22405_s4 + $0x198] sm:$0xff]  }
 0x8b9   :  { %14118 = vmatmul.mubr.bf16.vlgmr.msra.gmra.mrb[0].mxu1 %v20090_v17  ;;  %v15570_v17 = vld [vmem:[%s22405_s4 + $0x1a0] sm:$0xff]  }
 0x8ba   :  { %14121 = vmatprep.mubr.bf16.mxu1 %v20098_v20  ;;  %14182 = vmatpush3.bf16.msra.mxu1 %v20312_v37  ;;  %v15571_v20 = vld [vmem:[%s22405_s4 + $0x1a8] sm:$0xff]  }
 0x8bb   :  { %14183 = vmatprep.subr.bf16.mxu1 %v15567_v16 }
 0x8be   :  { %14184 = vmatpush3.bf16.msra.mxu1 %v15567_v16  ;;  %v15577_v16 = vld [vmem:[%s22405_s4 + $0x1d8] sm:$0xff]  }
 0x8bf   :  { %14185 = vmatprep.subr.bf16.mxu1 %v15568_v5 }
 0x8c1   :  { %14122 = vmatmul.mubr.bf16.gmra.mrb[4].mxu1 %v20103_v54  ;;  %v15572_v54 = vld [vmem:[%s22405_s4 + $0x1b0] sm:$0xff]  }
 0x8c2   :  { %14125 = vmatprep.mubr.bf16.mxu1 %v20110_v24  ;;  %14186 = vmatpush3.bf16.msra.mxu1 %v15568_v5  ;;  %v15573_v24 = vld [vmem:[%s22405_s4 + $0x1b8] sm:$0xff]   ;;  %v8685_v5 = vpack.c.bf16 %v8626_v36, %v8625_v14  ;;  %v8693_v36 = vpack.c.bf16 %v8642_v8, %v8641_v21  ;;  %v8664_v21 = vld [vmem:[#allocation2 + $0x36f] sm:$0xff]  ;;  %v8665_v8 = vld [vmem:[#allocation2 + $0x387] sm:$0xff] }
 0x8c3   :  { %14187 = vmatprep.subr.bf16.mxu1 %v15569_v63 }
 0x8c6   :  { %14188 = vmatpush3.bf16.msra.mxu1 %v15569_v63  ;;  %v15578_v63 = vld [vmem:[%s22405_s4 + $0x1e0] sm:$0xff]  }
 0x8c7   :  { %14189 = vmatprep.subr.bf16.mxu1 %v15570_v17 }
 0x8c9   :  { %14126 = vmatmul.mubr.bf16.gmra.mrb[8].mxu1 %v20115_v61  ;;  %v15574_v61 = vld [vmem:[%s22405_s4 + $0x1c0] sm:$0xff]  }
 0x8ca   :  { %14129 = vmatprep.mubr.bf16.mxu1 %v20122_v51  ;;  %14190 = vmatpush3.bf16.msra.mxu1 %v15570_v17  ;;  %v8132_v51 = vld [vmem:[#allocation2 + $0x209] sm:$0xff] }
 0x8cb   :  { %14191 = vmatprep.subr.bf16.mxu1 %v15571_v20  ;;  %v8627_v17 = vld [vmem:[#allocation2 + $0xe7] sm:$0xff] }
 0x8ce   :  { %14192 = vmatpush3.bf16.msra.mxu1 %v15571_v20  ;;  %v8628_v20 = vld [vmem:[#allocation2 + $0xef] sm:$0xff] }
 0x8cf   :  { %14193 = vmatprep.subr.bf16.mxu1 %v15572_v54 }
 0x8d1   :  { %14130 = vmatmul.mubr.bf16.gmra.mrb[12].mxu1 %v20127_v41  ;;  %v8133_v41 = vld [vmem:[#allocation2 + $0x211] sm:$0xff] }
 0x8d2   :  { %14133 = vmatprep.mubr.bf16.mxu1 %v20136_v39  ;;  %14194 = vmatpush3.bf16.msra.mxu1 %v15572_v54  ;;  %v20421_v39 = vpack.c.bf16 %v8133_v41, %v8132_v51  ;;  %v8629_v54 = vld [vmem:[#allocation2 + $0x107] sm:$0xff] }
 0x8d3   :  { %14195 = vmatprep.subr.bf16.mxu1 %v15573_v24  ;;  %v15579_v51 = vld [vmem:[%s22405_s4 + $0x1e8] sm:$0xff]  }
 0x8d6   :  { %14196 = vmatpush3.bf16.msra.mxu1 %v15573_v24  ;;  %v8630_v24 = vld [vmem:[#allocation2 + $0x10f] sm:$0xff] }
 0x8d7   :  { %14261 = vmatprep.subr.bf16.mxu1 %v15574_v61  ;;  %v8687_v41 = vpack.c.bf16 %v8630_v24, %v8629_v54  ;;  %v8649_v54 = vld [vmem:[#allocation2 + $0x287] sm:$0xff]  ;;  %v8650_v24 = vld [vmem:[#allocation2 + $0x28f] sm:$0xff] }
 0x8d9   :  { %14134 = vmatmul.mubr.bf16.gmra.mrb[16].mxu1 %v20139_v30  ;;  %v22941_v30 = vld [vmem:[#allocation19_spill] sm:$0xff] }
 0x8da   :  { %14137 = vmatprep.mubr.bf16.mxu1 %v20143_v46  ;;  %v22942_v46 = vld [vmem:[#allocation3_spill] sm:$0xff] }
 0x8e1   :  { %14138 = vmatmul.mubr.bf16.gmra.mrb[20].mxu1 %v20145_v3  ;;  %v22943_v3 = vld [vmem:[#allocation5_spill] sm:$0xff] }
 0x8e2   :  { %14141 = vmatprep.mubr.bf16.mxu1 %v20149_v15  ;;  %v22944_v15 = vld [vmem:[#allocation8_spill] sm:$0xff] }
 0x8e9   :  { %14142 = vmatmul.mubr.bf16.gmra.mrb[24].mxu1 %v20151_v34  ;;  %v8164_v34 = vld [vmem:[#allocation2 + $0x449] sm:$0xff] }
 0x8ea   :  { %14145 = vmatprep.mubr.bf16.mxu1 %v20155_v9  ;;  %v8165_v9 = vld [vmem:[#allocation2 + $0x451] sm:$0xff] }
 0x8f1   :  { %14146 = vmatmul.mubr.bf16.gmra.mrb[28].mxu1 %v20421_v39 }
 0x8f2   :  { %14149 = vmatprep.mubr.bf16.mxu1 %v20158_v12  ;;  %v8617_v12 = vld [vmem:[#allocation2 + $0x47] sm:$0xff] }
 0x8f9   :  { %14150 = vmatmul.mubr.bf16.gmra.mrb[32].mxu1 %v20160_v48  ;;  %v8618_v48 = vld [vmem:[#allocation2 + $0x4f] sm:$0xff] }
 0x8fa   :  { %14153 = vmatprep.mubr.bf16.mxu1 %v20164_v27  ;;  %v20439_v27 = vpack.c.bf16 %v8165_v9, %v8164_v34  ;;  %v8634_v34 = vld [vmem:[#allocation2 + $0x14f] sm:$0xff] }
 0x901   :  { %14154 = vmatmul.mubr.bf16.gmra.mrb[36].mxu1 %v20166_v1  ;;  %v8681_v1 = vpack.c.bf16 %v8618_v48, %v8617_v12  ;;  %v15581_v12 = vld [vmem:[%s22405_s4 + $0x1f8] sm:$0xff]  }
 0x902   :  { %14157 = vmatprep.mubr.bf16.mxu1 %v20170_v57  ;;  %v8619_v57 = vld [vmem:[#allocation2 + $0x67] sm:$0xff] }
 0x909   :  { %14158 = vmatmul.mubr.bf16.gmra.mrb[40].mxu1 %v22941_v30  ;;  %v15580_v30 = vld [vmem:[%s22405_s4 + $0x1f0] sm:$0xff]  }
 0x90a   :  { %14161 = vmatprep.mubr.bf16.mxu1 %v22942_v46  ;;  %v8631_v46 = vld [vmem:[#allocation2 + $0x127] sm:$0xff] }
 0x911   :  { %14162 = vmatmul.mubr.bf16.gmra.mrb[44].mxu1 %v22943_v3  ;;  %v8632_v3 = vld [vmem:[#allocation2 + $0x12f] sm:$0xff] }
 0x912   :  { %14165 = vmatprep.mubr.bf16.mxu1 %v22944_v15  ;;  %v8633_v15 = vld [vmem:[#allocation2 + $0x147] sm:$0xff]  ;;  %v8688_v9 = vpack.c.bf16 %v8632_v3, %v8631_v46  ;;  %v8654_v46 = vld [vmem:[#allocation2 + $0x2cf] sm:$0xff] }
 0x913   :  { %v8689_v48 = vpack.c.bf16 %v8634_v34, %v8633_v15  ;;  %v8655_v34 = vld [vmem:[#allocation2 + $0x2e7] sm:$0xff] }
 0x919   :  { %14166 = vmatmul.mubr.bf16.gmra.mrb[48].mxu1 %v20184_v23  ;;  %v8621_v23 = vld [vmem:[#allocation2 + $0x87] sm:$0xff] }
 0x91a   :  { %14169 = vmatprep.mubr.bf16.mxu1 %v20188_v29  ;;  %v8620_v29 = vld [vmem:[#allocation2 + $0x6f] sm:$0xff] }
 0x91b   :  { %v8682_v37 = vpack.c.bf16 %v8620_v29, %v8619_v57  ;;  %v8635_v57 = vld [vmem:[#allocation2 + $0x167] sm:$0xff]  ;;  %v8636_v29 = vld [vmem:[#allocation2 + $0x16f] sm:$0xff] }
 0x921   :  { %14170 = vmatmul.mubr.bf16.gmra.mrb[52].mxu1 %v20190_v31  ;;  %v8622_v31 = vld [vmem:[#allocation2 + $0x8f] sm:$0xff] }
 0x922   :  { %14173 = vmatprep.mubr.bf16.mxu1 %v20194_v13  ;;  %v15575_v13 = vld [vmem:[%s22405_s4 + $0x1c8] sm:$0xff]  }
 0x929   :  { %14174 = vmatmul.mubr.bf16.gmra.mrb[56].mxu1 %v20196_v19  ;;  %v8683_v19 = vpack.c.bf16 %v8622_v31, %v8621_v23  ;;  %v8637_v23 = vld [vmem:[#allocation2 + $0x187] sm:$0xff]  ;;  %v8638_v31 = vld [vmem:[#allocation2 + $0x18f] sm:$0xff] }
 0x92a   :  { %14177 = vmatprep.mubr.bf16.mxu1 %v20200_v62  ;;  %v15576_v62 = vld [vmem:[%s22405_s4 + $0x1d0] sm:$0xff]  }
 0x931   :  { %14178 = vmatmul.mubr.bf16.gmra.mrb[60].mxu1 %v20439_v27 }
 0x932   :  { %14197 = vmatprep.mubr.bf16.mxu1 %v8681_v1  ;;  %v20466_v1 = vld [vmem:[%s22405_s4 + $0x200] sm:$0xff]  }
 0x939   :  { %14198 = vmatmul.mubr.bf16.vlgmr.msra.gmra.mrb[0].mxu1 %v8682_v37  ;;  %v8690_v37 = vpack.c.bf16 %v8636_v29, %v8635_v57  ;;  %v8659_v29 = vld [vmem:[#allocation2 + $0x327] sm:$0xff] }
 0x93a   :  { %14201 = vmatprep.mubr.bf16.mxu1 %v8683_v19  ;;  %14262 = vmatpush3.bf16.msra.mxu1 %v15574_v61  ;;  %v8686_v61 = vpack.c.bf16 %v8628_v20, %v8627_v17  ;;  %v8639_v19 = vld [vmem:[#allocation2 + $0x1a7] sm:$0xff]  ;;  %v8648_v17 = vld [vmem:[#allocation2 + $0x22f] sm:$0xff] }
 0x93b   :  { %14263 = vmatprep.subr.bf16.mxu1 %v15575_v13 }
 0x93e   :  { %14264 = vmatpush3.bf16.msra.mxu1 %v15575_v13  ;;  %v8691_v13 = vpack.c.bf16 %v8638_v31, %v8637_v23  ;;  %v8660_v23 = vld [vmem:[#allocation2 + $0x32f] sm:$0xff]  ;;  %v8661_v31 = vld [vmem:[#allocation2 + $0x347] sm:$0xff] }
 0x93f   :  { %14265 = vmatprep.subr.bf16.mxu1 %v15576_v62 }
 0x941   :  { %14202 = vmatmul.mubr.bf16.gmra.mrb[4].mxu1 %v8684_v33  ;;  %v8643_v33 = vld [vmem:[#allocation2 + $0x1e7] sm:$0xff] }
 0x942   :  { %14205 = vmatprep.mubr.bf16.mxu1 %v8685_v5  ;;  %14266 = vmatpush3.bf16.msra.mxu1 %v15576_v62  ;;  %v8640_v62 = vld [vmem:[#allocation2 + $0x1af] sm:$0xff] }
 0x943   :  { %14267 = vmatprep.subr.bf16.mxu1 %v15577_v16  ;;  %v8692_v14 = vpack.c.bf16 %v8640_v62, %v8639_v19  ;;  %v8663_v62 = vld [vmem:[#allocation2 + $0x367] sm:$0xff] }
 0x946   :  { %14268 = vmatpush3.bf16.msra.mxu1 %v15577_v16  ;;  %v8644_v16 = vld [vmem:[#allocation2 + $0x1ef] sm:$0xff] }
 0x947   :  { %14269 = vmatprep.subr.bf16.mxu1 %v15578_v63  ;;  %v8694_v5 = vpack.c.bf16 %v8644_v16, %v8643_v33  ;;  %v8667_v16 = vld [vmem:[#allocation2 + $0x3a7] sm:$0xff] }
 0x949   :  { %14206 = vmatmul.mubr.bf16.gmra.mrb[8].mxu1 %v8686_v61  ;;  %v8697_v61 = vpack.c.bf16 %v8650_v24, %v8649_v54  ;;  %v8671_v24 = vld [vmem:[#allocation2 + $0x3e7] sm:$0xff] }
 0x94a   :  { %14209 = vmatprep.mubr.bf16.mxu1 %v8687_v41  ;;  %14270 = vmatpush3.bf16.msra.mxu1 %v15578_v63  ;;  %v8647_v63 = vld [vmem:[#allocation2 + $0x227] sm:$0xff]  ;;  %v8652_v41 = vld [vmem:[#allocation2 + $0x2af] sm:$0xff] }
 0x94b   :  { %14271 = vmatprep.subr.bf16.mxu1 %v15579_v51  ;;  %v8696_v20 = vpack.c.bf16 %v8648_v17, %v8647_v63  ;;  %v8669_v63 = vld [vmem:[#allocation2 + $0x3c7] sm:$0xff]  ;;  %v8670_v17 = vld [vmem:[#allocation2 + $0x3cf] sm:$0xff] }
 0x94c   :  { %v8707_v54 = vpack.c.bf16 %v8670_v17, %v8669_v63  ;;  %v9669_v63 = vld [vmem:[#allocation2 + $0x1c9] sm:$0xff]  ;;  %v9670_v17 = vld [vmem:[#allocation2 + $0x1d1] sm:$0xff] }
 0x94e   :  { %14272 = vmatpush3.bf16.msra.mxu1 %v15579_v51  ;;  %v8651_v51 = vld [vmem:[#allocation2 + $0x2a7] sm:$0xff] }
 0x94f   :  { %14273 = vmatprep.subr.bf16.mxu1 %v15580_v30  ;;  %v8698_v3 = vpack.c.bf16 %v8652_v41, %v8651_v51  ;;  %v8673_v51 = vld [vmem:[#allocation2 + $0x407] sm:$0xff]  ;;  %v8674_v41 = vld [vmem:[#allocation2 + $0x40f] sm:$0xff] }
 0x951   :  { %14210 = vmatmul.mubr.bf16.gmra.mrb[12].mxu1 %v8688_v9  ;;  %v8656_v9 = vld [vmem:[#allocation2 + $0x2ef] sm:$0xff] }
 0x952   :  { %14213 = vmatprep.mubr.bf16.mxu1 %v8689_v48  ;;  %14274 = vmatpush3.bf16.msra.mxu1 %v15580_v30  ;;  %v8653_v30 = vld [vmem:[#allocation2 + $0x2c7] sm:$0xff]  ;;  %v8700_v48 = vpack.c.bf16 %v8656_v9, %v8655_v34 }
 0x953   :  { %14275 = vmatprep.subr.bf16.mxu1 %v15581_v12  ;;  %v8699_v15 = vpack.c.bf16 %v8654_v46, %v8653_v30  ;;  %v8709_v46 = vpack.c.bf16 %v8674_v41, %v8673_v51  ;;  %v8679_v9 = vld [vmem:[#allocation2 + $0x467] sm:$0xff] }
 0x954   :  { %v9675_v41 = vld [vmem:[#allocation2 + $0x229] sm:$0xff] }
 0x956   :  { %14276 = vmatpush3.bf16.msra.mxu1 %v15581_v12  ;;  %v8657_v12 = vld [vmem:[#allocation2 + $0x307] sm:$0xff] }
 0x957   :  { %14341 = vmatprep.subr.bf16.mxu1 %v20466_v1 }
 0x959   :  { %14214 = vmatmul.mubr.bf16.gmra.mrb[16].mxu1 %v8690_v37  ;;  %v8662_v37 = vld [vmem:[#allocation2 + $0x34f] sm:$0xff] }
 0x95a   :  { %14217 = vmatprep.mubr.bf16.mxu1 %v8691_v13  ;;  %v8702_v13 = vpack.c.bf16 %v8660_v23, %v8659_v29  ;;  %v8703_v19 = vpack.c.bf16 %v8662_v37, %v8661_v31  ;;  %v9659_v29 = vld [vmem:[#allocation2 + $0x129] sm:$0xff]  ;;  %v9660_v23 = vld [vmem:[#allocation2 + $0x131] sm:$0xff] }
 0x95b   :  { %v9661_v31 = vld [vmem:[#allocation2 + $0x149] sm:$0xff]  ;;  %v9662_v37 = vld [vmem:[#allocation2 + $0x151] sm:$0xff] }
 0x961   :  { %14218 = vmatmul.mubr.bf16.gmra.mrb[20].mxu1 %v8692_v14  ;;  %v8666_v14 = vld [vmem:[#allocation2 + $0x38f] sm:$0xff] }
 0x962   :  { %14221 = vmatprep.mubr.bf16.mxu1 %v8693_v36  ;;  %v8704_v36 = vpack.c.bf16 %v8664_v21, %v8663_v62  ;;  %v8705_v33 = vpack.c.bf16 %v8666_v14, %v8665_v8  ;;  %v9663_v62 = vld [vmem:[#allocation2 + $0x169] sm:$0xff]  ;;  %v9664_v21 = vld [vmem:[#allocation2 + $0x171] sm:$0xff] }
 0x963   :  { %v9665_v8 = vld [vmem:[#allocation2 + $0x189] sm:$0xff]  ;;  %v9666_v14 = vld [vmem:[#allocation2 + $0x191] sm:$0xff] }
 0x969   :  { %14222 = vmatmul.mubr.bf16.gmra.mrb[24].mxu1 %v8694_v5  ;;  %v8668_v5 = vld [vmem:[#allocation2 + $0x3af] sm:$0xff] }
 0x96a   :  { %14225 = vmatprep.mubr.bf16.mxu1 %v20243_v32  ;;  %v8658_v32 = vld [vmem:[#allocation2 + $0x30f] sm:$0xff] }
 0x96b   :  { %v8701_v57 = vpack.c.bf16 %v8658_v32, %v8657_v12  ;;  %v8680_v12 = vld [vmem:[#allocation2 + $0x46f] sm:$0xff] }
 0x96c   :  { %v8712_v32 = vpack.c.bf16 %v8680_v12, %v8679_v9  ;;  %v9679_v9 = vld [vmem:[#allocation2 + $0x2a9] sm:$0xff]  ;;  %v9680_v12 = vld [vmem:[#allocation2 + $0x2b1] sm:$0xff] }
 0x971   :  { %14226 = vmatmul.mubr.bf16.gmra.mrb[28].mxu1 %v8696_v20  ;;  %v8706_v20 = vpack.c.bf16 %v8668_v5, %v8667_v16  ;;  %v9667_v16 = vld [vmem:[#allocation2 + $0x1a9] sm:$0xff]  ;;  %v9668_v5 = vld [vmem:[#allocation2 + $0x1b1] sm:$0xff] }
 0x972   :  { %14229 = vmatprep.mubr.bf16.mxu1 %v8697_v61  ;;  %v8672_v61 = vld [vmem:[#allocation2 + $0x3ef] sm:$0xff] }
 0x973   :  { %v8708_v30 = vpack.c.bf16 %v8672_v61, %v8671_v24  ;;  %v9671_v24 = vld [vmem:[#allocation2 + $0x1e9] sm:$0xff]  ;;  %v9672_v61 = vld [vmem:[#allocation2 + $0x1f1] sm:$0xff] }
 0x974   :  { %v9722_v51 = vpack.c.bf16 %v9672_v61, %v9671_v24 }
 0x979   :  { %14230 = vmatmul.mubr.bf16.gmra.mrb[32].mxu1 %v8698_v3  ;;  %v8675_v3 = vld [vmem:[#allocation2 + $0x427] sm:$0xff] }
 0x97a   :  { %14233 = vmatprep.mubr.bf16.mxu1 %v8699_v15  ;;  %v8676_v15 = vld [vmem:[#allocation2 + $0x42f] sm:$0xff] }
 0x97b   :  { %v8710_v34 = vpack.c.bf16 %v8676_v15, %v8675_v3  ;;  %v9677_v3 = vld [vmem:[#allocation2 + $0x289] sm:$0xff]  ;;  %v9678_v15 = vld [vmem:[#allocation2 + $0x291] sm:$0xff] }
 0x981   :  { %14234 = vmatmul.mubr.bf16.gmra.mrb[36].mxu1 %v8700_v48  ;;  %v15583_v48 = vld [vmem:[%s22405_s4 + $0x208] sm:$0xff]  }
 0x982   :  { %14237 = vmatprep.mubr.bf16.mxu1 %v8701_v57 }
 0x989   :  { %14238 = vmatmul.mubr.bf16.gmra.mrb[40].mxu1 %v8702_v13  ;;  %v9716_v13 = vpack.c.bf16 %v9660_v23, %v9659_v29  ;;  %v9703_v29 = vld [vmem:[#allocation2 + $0x429] sm:$0xff]  ;;  %v9704_v23 = vld [vmem:[#allocation2 + $0x431] sm:$0xff] }
 0x98a   :  { %14241 = vmatprep.mubr.bf16.mxu1 %v8703_v19  ;;  %v9717_v19 = vpack.c.bf16 %v9662_v37, %v9661_v31  ;;  %v9738_v31 = vpack.c.bf16 %v9704_v23, %v9703_v29  ;;  %v9707_v37 = vld [vmem:[#allocation2 + $0x469] sm:$0xff] }
 0x991   :  { %14242 = vmatmul.mubr.bf16.gmra.mrb[44].mxu1 %v8704_v36  ;;  %v9718_v36 = vpack.c.bf16 %v9664_v21, %v9663_v62 }
 0x992   :  { %14245 = vmatprep.mubr.bf16.mxu1 %v8705_v33  ;;  %v9719_v33 = vpack.c.bf16 %v9666_v14, %v9665_v8 }
 0x999   :  { %14246 = vmatmul.mubr.bf16.gmra.mrb[48].mxu1 %v8706_v20  ;;  %v9720_v20 = vpack.c.bf16 %v9668_v5, %v9667_v16 }
 0x99a   :  { %14249 = vmatprep.mubr.bf16.mxu1 %v8707_v54  ;;  %v9721_v54 = vpack.c.bf16 %v9670_v17, %v9669_v63 }
 0x9a1   :  { %14250 = vmatmul.mubr.bf16.gmra.mrb[52].mxu1 %v8708_v30  ;;  %v9676_v30 = vld [vmem:[#allocation2 + $0x231] sm:$0xff] }
 0x9a2   :  { %14253 = vmatprep.mubr.bf16.mxu1 %v8709_v46  ;;  %v9724_v46 = vpack.c.bf16 %v9676_v30, %v9675_v41 }
 0x9a9   :  { %14254 = vmatmul.mubr.bf16.gmra.mrb[56].mxu1 %v8710_v34  ;;  %v9725_v34 = vpack.c.bf16 %v9678_v15, %v9677_v3 }
 0x9aa   :  { %14257 = vmatprep.mubr.bf16.mxu1 %v20261_v11  ;;  %v15584_v11 = vld [vmem:[%s22405_s4 + $0x210] sm:$0xff]  }
 0x9b1   :  { %14258 = vmatmul.mubr.bf16.gmra.mrb[60].mxu1 %v8712_v32  ;;  %v9681_v32 = vld [vmem:[#allocation2 + $0x2c9] sm:$0xff] }
 0x9b2   :  { %14277 = vmatprep.mubr.bf16.mxu1 %v20264_v60  ;;  %v15585_v60 = vld [vmem:[%s22405_s4 + $0x218] sm:$0xff]  }
 0x9b9   :  { %14278 = vmatmul.mubr.bf16.vlgmr.msra.gmra.mrb[0].mxu1 %v20269_v0  ;;  %v15586_v0 = vld [vmem:[%s22405_s4 + $0x220] sm:$0xff]  }
 0x9ba   :  { %14281 = vmatprep.mubr.bf16.mxu1 %v20276_v28  ;;  %14342 = vmatpush3.bf16.msra.mxu1 %v20466_v1  ;;  %v15587_v28 = vld [vmem:[%s22405_s4 + $0x228] sm:$0xff]  }
 0x9bb   :  { %14343 = vmatprep.subr.bf16.mxu1 %v15583_v48 }
 0x9be   :  { %14344 = vmatpush3.bf16.msra.mxu1 %v15583_v48  ;;  %v9682_v48 = vld [vmem:[#allocation2 + $0x2d1] sm:$0xff] }
 0x9bf   :  { %14345 = vmatprep.subr.bf16.mxu1 %v15584_v11 }
 0x9c1   :  { %14282 = vmatmul.mubr.bf16.gmra.mrb[4].mxu1 %v20281_v7  ;;  %v15588_v7 = vld [vmem:[%s22405_s4 + $0x230] sm:$0xff]  }
 0x9c2   :  { %14285 = vmatprep.mubr.bf16.mxu1 %v20288_v10  ;;  %14346 = vmatpush3.bf16.msra.mxu1 %v15584_v11  ;;  %v15589_v10 = vld [vmem:[%s22405_s4 + $0x238] sm:$0xff]   ;;  %v9726_v11 = vpack.c.bf16 %v9680_v12, %v9679_v9 }
 0x9c3   :  { %14347 = vmatprep.subr.bf16.mxu1 %v15585_v60 }
 0x9c6   :  { %14348 = vmatpush3.bf16.msra.mxu1 %v15585_v60  ;;  %v9727_v60 = vpack.c.bf16 %v9682_v48, %v9681_v32 }
 0x9c7   :  { %14349 = vmatprep.subr.bf16.mxu1 %v15586_v0 }
 0x9c9   :  { %14286 = vmatmul.mubr.bf16.gmra.mrb[8].mxu1 %v20293_v45  ;;  %v16107_v45 = vld [vmem:[#allocation2] sm:$0xff] }
 0x9ca   :  { %14289 = vmatprep.mubr.bf16.mxu1 %v20300_v35  ;;  %14350 = vmatpush3.bf16.msra.mxu1 %v15586_v0  ;;  %v9210_v35 = vpack.c.bf16 %v16107_v45, %v16107_v45  ;;  %v9683_v0 = vld [vmem:[#allocation2 + $0x2e9] sm:$0xff] }
 0x9cb   :  { %14351 = vmatprep.subr.bf16.mxu1 %v15587_v28 }
 0x9ce   :  { %14352 = vmatpush3.bf16.msra.mxu1 %v15587_v28  ;;  %v9684_v28 = vld [vmem:[#allocation2 + $0x2f1] sm:$0xff] }
 0x9cf   :  { %14353 = vmatprep.subr.bf16.mxu1 %v15588_v7 }
 0x9d1   :  { %14290 = vmatmul.mubr.bf16.gmra.mrb[12].mxu1 %v20305_v38  ;;  %v22945_v38 = vld [vmem:[#allocation62_spill] sm:$0xff] }
 0x9d2   :  { %14293 = vmatprep.mubr.bf16.mxu1 %v20314_v26  ;;  %14354 = vmatpush3.bf16.msra.mxu1 %v15588_v7  ;;  %v22946_v26 = vld [vmem:[#allocation13_spill] sm:$0xff] }
 0x9d3   :  { %14355 = vmatprep.subr.bf16.mxu1 %v15589_v10  ;;  %v9685_v7 = vld [vmem:[#allocation2 + $0x309] sm:$0xff] }
 0x9d6   :  { %14356 = vmatpush3.bf16.msra.mxu1 %v15589_v10  ;;  %v9728_v10 = vpack.c.bf16 %v9684_v28, %v9683_v0 }
 0x9d9   :  { %14294 = vmatmul.mubr.bf16.gmra.mrb[16].mxu1 %v20317_v25  ;;  %v9645_v25 = vld [vmem:[#allocation2 + $0x49] sm:$0xff] }
 0x9da   :  { %14297 = vmatprep.mubr.bf16.mxu1 %v20321_v2  ;;  %v9646_v2 = vld [vmem:[#allocation2 + $0x51] sm:$0xff] }
 0x9e1   :  { %14298 = vmatmul.mubr.bf16.gmra.mrb[20].mxu1 %v20323_v18  ;;  %v9709_v18 = vpack.c.bf16 %v9646_v2, %v9645_v25  ;;  %v9690_v25 = vld [vmem:[#allocation2 + $0x351] sm:$0xff] }
 0x9e2   :  { %14301 = vmatprep.mubr.bf16.mxu1 %v20327_v42  ;;  %v9647_v42 = vld [vmem:[#allocation2 + $0x69] sm:$0xff] }
 0x9e9   :  { %14302 = vmatmul.mubr.bf16.gmra.mrb[24].mxu1 %v20329_v4  ;;  %v9648_v4 = vld [vmem:[#allocation2 + $0x71] sm:$0xff] }
 0x9ea   :  { %14305 = vmatprep.mubr.bf16.mxu1 %v20333_v56  ;;  %v9649_v56 = vld [vmem:[#allocation2 + $0x89] sm:$0xff] }
 0x9f1   :  { %14306 = vmatmul.mubr.bf16.gmra.mrb[28].mxu1 %v9210_v35 }
 0x9f2   :  { %14309 = vmatprep.mubr.bf16.mxu1 %v20336_v47  ;;  %v9650_v47 = vld [vmem:[#allocation2 + $0x91] sm:$0xff] }
 0x9f9   :  { %14310 = vmatmul.mubr.bf16.gmra.mrb[32].mxu1 %v20338_v50  ;;  %v9710_v50 = vpack.c.bf16 %v9648_v4, %v9647_v42  ;;  %v9691_v42 = vld [vmem:[#allocation2 + $0x369] sm:$0xff]  ;;  %v9692_v4 = vld [vmem:[#allocation2 + $0x371] sm:$0xff] }
 0x9fa   :  { %14313 = vmatprep.mubr.bf16.mxu1 %v20342_v22  ;;  %v9711_v22 = vpack.c.bf16 %v9650_v47, %v9649_v56  ;;  %v9693_v56 = vld [vmem:[#allocation2 + $0x389] sm:$0xff]  ;;  %v9694_v47 = vld [vmem:[#allocation2 + $0x391] sm:$0xff] }
 0xa01   :  { %14314 = vmatmul.mubr.bf16.gmra.mrb[36].mxu1 %v20344_v59  ;;  %v9651_v59 = vld [vmem:[#allocation2 + $0xa9] sm:$0xff] }
 0xa02   :  { %14317 = vmatprep.mubr.bf16.mxu1 %v20348_v53  ;;  %v9652_v53 = vld [vmem:[#allocation2 + $0xb1] sm:$0xff] }
 0xa09   :  { %14318 = vmatmul.mubr.bf16.gmra.mrb[40].mxu1 %v20350_v40  ;;  %v9653_v40 = vld [vmem:[#allocation2 + $0xc9] sm:$0xff] }
 0xa0a   :  { %14321 = vmatprep.mubr.bf16.mxu1 %v20354_v58  ;;  %v9654_v58 = vld [vmem:[#allocation2 + $0xd1] sm:$0xff] }
 0xa11   :  { %14322 = vmatmul.mubr.bf16.gmra.mrb[44].mxu1 %v22945_v38  ;;  %v9688_v38 = vld [vmem:[#allocation2 + $0x331] sm:$0xff] }
 0xa12   :  { %14325 = vmatprep.mubr.bf16.mxu1 %v22946_v26  ;;  %v9689_v26 = vld [vmem:[#allocation2 + $0x349] sm:$0xff] }
 0xa19   :  { %14326 = vmatmul.mubr.bf16.gmra.mrb[48].mxu1 %v20362_v49  ;;  %v9655_v49 = vld [vmem:[#allocation2 + $0xe9] sm:$0xff] }
 0xa1a   :  { %14329 = vmatprep.mubr.bf16.mxu1 %v20366_v43  ;;  %v9656_v43 = vld [vmem:[#allocation2 + $0xf1] sm:$0xff] }
 0xa1b   :  { %v9714_v1 = vpack.c.bf16 %v9656_v43, %v9655_v49  ;;  %v9699_v49 = vld [vmem:[#allocation2 + $0x3e9] sm:$0xff]  ;;  %v9700_v43 = vld [vmem:[#allocation2 + $0x3f1] sm:$0xff] }
 0xa21   :  { %14330 = vmatmul.mubr.bf16.gmra.mrb[52].mxu1 %v20368_v6  ;;  %v9657_v6 = vld [vmem:[#allocation2 + $0x109] sm:$0xff] }
 0xa22   :  { %14333 = vmatprep.mubr.bf16.mxu1 %v20372_v55  ;;  %v9712_v55 = vpack.c.bf16 %v9652_v53, %v9651_v59  ;;  %v9695_v59 = vld [vmem:[#allocation2 + $0x3a9] sm:$0xff]  ;;  %v9696_v53 = vld [vmem:[#allocation2 + $0x3b1] sm:$0xff] }
 0xa29   :  { %14334 = vmatmul.mubr.bf16.gmra.mrb[56].mxu1 %v20374_v44  ;;  %v9713_v44 = vpack.c.bf16 %v9654_v58, %v9653_v40  ;;  %v9697_v40 = vld [vmem:[#allocation2 + $0x3c9] sm:$0xff]  ;;  %v9698_v58 = vld [vmem:[#allocation2 + $0x3d1] sm:$0xff] }
 0xa2a   :  { %14337 = vmatprep.mubr.bf16.mxu1 %v20378_v52  ;;  %v9658_v52 = vld [vmem:[#allocation2 + $0x111] sm:$0xff] }
 0xa2b   :  { %v9715_v57 = vpack.c.bf16 %v9658_v52, %v9657_v6  ;;  %v9701_v6 = vld [vmem:[#allocation2 + $0x409] sm:$0xff]  ;;  %v9702_v52 = vld [vmem:[#allocation2 + $0x411] sm:$0xff] }
 0xa31   :  { %14338 = vmatmul.mubr.bf16.gmra.mrb[60].mxu1 %v9210_v35  ;;  %v9687_v35 = vld [vmem:[#allocation2 + $0x329] sm:$0xff] }
 0xa32   :  { %14357 = vmatprep.mubr.bf16.mxu1 %v9709_v18  ;;  %v9730_v2 = vpack.c.bf16 %v9688_v38, %v9687_v35  ;;  %v9731_v18 = vpack.c.bf16 %v9690_v25, %v9689_v26 }
 0xa39   :  { %14358 = vmatmul.mubr.bf16.vlgmr.msra.gmra.mrb[0].mxu1 %v9710_v50  ;;  %v9732_v50 = vpack.c.bf16 %v9692_v4, %v9691_v42 }
 0xa3a   :  { %14361 = vmatprep.mubr.bf16.mxu1 %v9711_v22  ;;  %v9733_v22 = vpack.c.bf16 %v9694_v47, %v9693_v56 }
 0xa41   :  { %14362 = vmatmul.mubr.bf16.gmra.mrb[4].mxu1 %v9712_v55  ;;  %v9734_v55 = vpack.c.bf16 %v9696_v53, %v9695_v59 }
 0xa42   :  { %14365 = vmatprep.mubr.bf16.mxu1 %v9713_v44  ;;  %v9735_v44 = vpack.c.bf16 %v9698_v58, %v9697_v40 }
 0xa49   :  { %14366 = vmatmul.mubr.bf16.gmra.mrb[8].mxu1 %v9714_v1  ;;  %v9736_v1 = vpack.c.bf16 %v9700_v43, %v9699_v49 }
 0xa4a   :  { %14369 = vmatprep.mubr.bf16.mxu1 %v9715_v57  ;;  %v9737_v57 = vpack.c.bf16 %v9702_v52, %v9701_v6 }
 0xa51   :  { %14370 = vmatmul.mubr.bf16.gmra.mrb[12].mxu1 %v9716_v13  ;;  %v9708_v13 = vld [vmem:[#allocation2 + $0x471] sm:$0xff] }
 0xa52   :  { %14373 = vmatprep.mubr.bf16.mxu1 %v9717_v19  ;;  %v9740_v19 = vpack.c.bf16 %v9708_v13, %v9707_v37 }
 0xa59   :  { %14374 = vmatmul.mubr.bf16.gmra.mrb[16].mxu1 %v9718_v36 }
 0xa5a   :  { %14377 = vmatprep.mubr.bf16.mxu1 %v9719_v33 }
 0xa61   :  { %14378 = vmatmul.mubr.bf16.gmra.mrb[20].mxu1 %v9720_v20 }
 0xa62   :  { %14381 = vmatprep.mubr.bf16.mxu1 %v9721_v54 }
 0xa69   :  { %14382 = vmatmul.mubr.bf16.gmra.mrb[24].mxu1 %v9722_v51 }
 0xa6a   :  { %14385 = vmatprep.mubr.bf16.mxu1 %v20421_v39  ;;  %v9686_v39 = vld [vmem:[#allocation2 + $0x311] sm:$0xff] }
 0xa6b   :  { %v9729_v45 = vpack.c.bf16 %v9686_v39, %v9685_v7 }
 0xa71   :  { %14386 = vmatmul.mubr.bf16.gmra.mrb[28].mxu1 %v9724_v46 }
 0xa72   :  { %14389 = vmatprep.mubr.bf16.mxu1 %v9725_v34 }
 0xa79   :  { %14390 = vmatmul.mubr.bf16.gmra.mrb[32].mxu1 %v9726_v11 }
 0xa7a   :  { %14393 = vmatprep.mubr.bf16.mxu1 %v9727_v60 }
 0xa81   :  { %14394 = vmatmul.mubr.bf16.gmra.mrb[36].mxu1 %v9728_v10 }
 0xa82   :  { %14397 = vmatprep.mubr.bf16.mxu1 %v9729_v45 }
 0xa89   :  { %14398 = vmatmul.mubr.bf16.gmra.mrb[40].mxu1 %v9730_v2 }
 0xa8a   :  { %14401 = vmatprep.mubr.bf16.mxu1 %v9731_v18 }
 0xa91   :  { %14402 = vmatmul.mubr.bf16.gmra.mrb[44].mxu1 %v9732_v50 }
 0xa92   :  { %14405 = vmatprep.mubr.bf16.mxu1 %v9733_v22 }
 0xa99   :  { %14406 = vmatmul.mubr.bf16.gmra.mrb[48].mxu1 %v9734_v55 }
 0xa9a   :  { %14409 = vmatprep.mubr.bf16.mxu1 %v9735_v44 }
 0xaa1   :  { %14410 = vmatmul.mubr.bf16.gmra.mrb[52].mxu1 %v9736_v1 }
 0xaa2   :  { %14413 = vmatprep.mubr.bf16.mxu1 %v9737_v57 }
 0xaa9   :  { %14414 = vmatmul.mubr.bf16.gmra.mrb[56].mxu1 %v9738_v31 }
 0xaaa   :  { %14417 = vmatprep.mubr.bf16.mxu1 %v20439_v27 }
 0xab1   :  { %14418 = vmatmul.mubr.bf16.gmra.mrb[60].mxu1 %v9740_v19 }
 0xb0c   :  { %v20525_v62 = vpop.f32.mrb[0].mxu1 }
 0xb0d   :  { %v20527_v21 = vpop.f32.mrb[1].mxu1  ;;  %v10233_v16 = vmul.f32 %v20525_v62, %v20525_v62 }
 0xb0e   :  { %v20529_v8 = vpop.f32.mrb[2].mxu1  ;;  %v10231_v36 = vmul.f32 %v20527_v21, %v20527_v21 }
 0xb0f   :  { %v20531_v14 = vpop.f32.mrb[3].mxu1  ;;  %v10234_v17 = vmul.f32 %v20529_v8, %v20529_v8 }
 0xb10   :  { %v10161_v33 = vadd.f32 %v20531_v14, %v20527_v21  ;;  %v10232_v27 = vmul.f32 %v20531_v14, %v20531_v14 }
 0xb12   :  { %v10162_v5 = vadd.f32 %v20525_v62, %v10161_v33  ;;  %v10295_v63 = vadd.f32 %v10232_v27, %v10231_v36 }
 0xb14   :  { %v10296_v20 = vadd.f32 %v10295_v63, %v10233_v16  ;;  %v20544_v54 = vpop.f32.mrb[4].mxu1  ;;  %v10163_v24 = vadd.f32 %v20529_v8, %v10162_v5 }
 0xb15   :  { %v20547_v61 = vpop.f32.mrb[5].mxu1  ;;  %v10237_v12 = vmul.f32 %v20544_v54, %v20544_v54 }
 0xb16   :  { %v10164_v51 = vadd.f32 %v10163_v24, %v20547_v61  ;;  %v10235_v41 = vmul.f32 %v20547_v61, %v20547_v61  ;;  %v10297_v30 = vadd.f32 %v10296_v20, %v10234_v17  ;;  %v20552_v46 = vpop.f32.mrb[6].mxu1 }
 0xb17   :  { %v20554_v3 = vpop.f32.mrb[7].mxu1  ;;  %v10238_v11 = vmul.f32 %v20552_v46, %v20552_v46 }
 0xb18   :  { %v10298_v15 = vadd.f32 %v10297_v30, %v10235_v41  ;;  %v10165_v34 = vadd.f32 %v10164_v51, %v20554_v3  ;;  %v10236_v9 = vmul.f32 %v20554_v3, %v20554_v3 }
 0xb1a   :  { %v10166_v32 = vadd.f32 %v20544_v54, %v10165_v34  ;;  %v10299_v48 = vadd.f32 %v10298_v15, %v10236_v9 }
 0xb1c   :  { %v10300_v60 = vadd.f32 %v10299_v48, %v10237_v12  ;;  %v20564_v0 = vpop.f32.mrb[8].mxu1  ;;  %v10167_v28 = vadd.f32 %v20552_v46, %v10166_v32 }
 0xb1d   :  { %v20567_v7 = vpop.f32.mrb[9].mxu1  ;;  %v10241_v18 = vmul.f32 %v20564_v0, %v20564_v0 }
 0xb1e   :  { %v10168_v39 = vadd.f32 %v10167_v28, %v20567_v7  ;;  %v10239_v10 = vmul.f32 %v20567_v7, %v20567_v7  ;;  %v10301_v45 = vadd.f32 %v10300_v60, %v10238_v11  ;;  %v20572_v35 = vpop.f32.mrb[10].mxu1 }
 0xb1f   :  { %v20574_v38 = vpop.f32.mrb[11].mxu1  ;;  %v10242_v56 = vmul.f32 %v20572_v35, %v20572_v35 }
 0xb20   :  { %v10302_v26 = vadd.f32 %v10301_v45, %v10239_v10  ;;  %v10169_v25 = vadd.f32 %v10168_v39, %v20574_v38  ;;  %v10240_v2 = vmul.f32 %v20574_v38, %v20574_v38 }
 0xb22   :  { %v10170_v42 = vadd.f32 %v20564_v0, %v10169_v25  ;;  %v10303_v4 = vadd.f32 %v10302_v26, %v10240_v2 }
 0xb24   :  { %v10304_v47 = vadd.f32 %v10303_v4, %v10241_v18  ;;  %v20584_v50 = vpop.f32.mrb[12].mxu1  ;;  %v10171_v22 = vadd.f32 %v20572_v35, %v10170_v42 }
 0xb25   :  { %v20587_v59 = vpop.f32.mrb[13].mxu1  ;;  %v10245_v52 = vmul.f32 %v20584_v50, %v20584_v50 }
 0xb26   :  { %v10172_v53 = vadd.f32 %v10171_v22, %v20587_v59  ;;  %v10243_v40 = vmul.f32 %v20587_v59, %v20587_v59  ;;  %v10305_v58 = vadd.f32 %v10304_v47, %v10242_v56  ;;  %v20592_v55 = vpop.f32.mrb[14].mxu1 }
 0xb27   :  { %v20594_v44 = vpop.f32.mrb[15].mxu1  ;;  %v10246_v29 = vmul.f32 %v20592_v55, %v20592_v55 }
 0xb28   :  { %v10306_v49 = vadd.f32 %v10305_v58, %v10243_v40  ;;  %v10173_v43 = vadd.f32 %v10172_v53, %v20594_v44  ;;  %v10244_v6 = vmul.f32 %v20594_v44, %v20594_v44 }
 0xb2a   :  { %v10174_v1 = vadd.f32 %v20584_v50, %v10173_v43  ;;  %v10307_v57 = vadd.f32 %v10306_v49, %v10244_v6 }
 0xb2c   :  { %v10308_v23 = vadd.f32 %v10307_v57, %v10245_v52  ;;  %v20604_v31 = vpop.f32.mrb[16].mxu1  ;;  %v10175_v37 = vadd.f32 %v20592_v55, %v10174_v1 }
 0xb2d   :  { %v20607_v13 = vpop.f32.mrb[17].mxu1  ;;  %v10249_v20 = vmul.f32 %v20604_v31, %v20604_v31 }
 0xb2e   :  { %v10176_v19 = vadd.f32 %v10175_v37, %v20607_v13  ;;  %v10247_v36 = vmul.f32 %v20607_v13, %v20607_v13  ;;  %v10309_v33 = vadd.f32 %v10308_v23, %v10246_v29  ;;  %v20612_v27 = vpop.f32.mrb[18].mxu1 }
 0xb2f   :  { %v20614_v16 = vpop.f32.mrb[19].mxu1  ;;  %v10250_v41 = vmul.f32 %v20612_v27, %v20612_v27 }
 0xb30   :  { %v10310_v5 = vadd.f32 %v10309_v33, %v10247_v36  ;;  %v10177_v63 = vadd.f32 %v10176_v19, %v20614_v16  ;;  %v10248_v17 = vmul.f32 %v20614_v16, %v20614_v16 }
 0xb32   :  { %v10178_v24 = vadd.f32 %v20604_v31, %v10177_v63  ;;  %v10311_v51 = vadd.f32 %v10310_v5, %v10248_v17 }
 0xb34   :  { %v10312_v30 = vadd.f32 %v10311_v51, %v10249_v20  ;;  %v20624_v15 = vpop.f32.mrb[20].mxu1  ;;  %v10179_v34 = vadd.f32 %v20612_v27, %v10178_v24 }
 0xb35   :  { %v20627_v9 = vpop.f32.mrb[21].mxu1  ;;  %v10253_v45 = vmul.f32 %v20624_v15, %v20624_v15 }
 0xb36   :  { %v10180_v12 = vadd.f32 %v10179_v34, %v20627_v9  ;;  %v10251_v32 = vmul.f32 %v20627_v9, %v20627_v9  ;;  %v10313_v48 = vadd.f32 %v10312_v30, %v10250_v41  ;;  %v20632_v11 = vpop.f32.mrb[22].mxu1 }
 0xb37   :  { %v20634_v60 = vpop.f32.mrb[23].mxu1  ;;  %v10254_v2 = vmul.f32 %v20632_v11, %v20632_v11 }
 0xb38   :  { %v10314_v28 = vadd.f32 %v10313_v48, %v10251_v32  ;;  %v10181_v39 = vadd.f32 %v10180_v12, %v20634_v60  ;;  %v10252_v10 = vmul.f32 %v20634_v60, %v20634_v60 }
 0xb3a   :  { %v10182_v26 = vadd.f32 %v20624_v15, %v10181_v39  ;;  %v10315_v25 = vadd.f32 %v10314_v28, %v10252_v10 }
 0xb3c   :  { %v10316_v18 = vadd.f32 %v10315_v25, %v10253_v45  ;;  %v20644_v42 = vpop.f32.mrb[24].mxu1  ;;  %v10183_v4 = vadd.f32 %v20632_v11, %v10182_v26 }
 0xb3d   :  { %v20647_v56 = vpop.f32.mrb[25].mxu1  ;;  %v10257_v52 = vmul.f32 %v20644_v42, %v20644_v42 }
 0xb3e   :  { %v10184_v47 = vadd.f32 %v10183_v4, %v20647_v56  ;;  %v10255_v22 = vmul.f32 %v20647_v56, %v20647_v56  ;;  %v10317_v53 = vadd.f32 %v10316_v18, %v10254_v2  ;;  %v20652_v40 = vpop.f32.mrb[26].mxu1 }
 0xb3f   :  { %v20654_v58 = vpop.f32.mrb[27].mxu1  ;;  %v10258_v29 = vmul.f32 %v20652_v40, %v20652_v40 }
 0xb40   :  { %v10318_v49 = vadd.f32 %v10317_v53, %v10255_v22  ;;  %v10185_v43 = vadd.f32 %v10184_v47, %v20654_v58  ;;  %v10256_v6 = vmul.f32 %v20654_v58, %v20654_v58 }
 0xb42   :  { %v10186_v1 = vadd.f32 %v20644_v42, %v10185_v43  ;;  %v10319_v57 = vadd.f32 %v10318_v49, %v10256_v6 }
 0xb44   :  { %v10320_v23 = vadd.f32 %v10319_v57, %v10257_v52  ;;  %v20664_v37 = vpop.f32.mrb[28].mxu1  ;;  %v10187_v19 = vadd.f32 %v20652_v40, %v10186_v1 }
 0xb45   :  { %v20667_v36 = vpop.f32.mrb[29].mxu1  ;;  %v10261_v30 = vmul.f32 %v20664_v37, %v20664_v37 }
 0xb46   :  { %v10188_v33 = vadd.f32 %v10187_v19, %v20667_v36  ;;  %v10259_v5 = vmul.f32 %v20667_v36, %v20667_v36  ;;  %v10321_v63 = vadd.f32 %v10320_v23, %v10258_v29  ;;  %v20672_v17 = vpop.f32.mrb[30].mxu1 }
 0xb47   :  { %v20674_v20 = vpop.f32.mrb[31].mxu1  ;;  %v10262_v32 = vmul.f32 %v20672_v17, %v20672_v17 }
 0xb48   :  { %v10322_v24 = vadd.f32 %v10321_v63, %v10259_v5  ;;  %v10189_v51 = vadd.f32 %v10188_v33, %v20674_v20  ;;  %v10260_v41 = vmul.f32 %v20674_v20, %v20674_v20 }
 0xb4a   :  { %v10190_v34 = vadd.f32 %v20664_v37, %v10189_v51  ;;  %v10323_v12 = vadd.f32 %v10322_v24, %v10260_v41 }
 0xb4c   :  { %v10324_v48 = vadd.f32 %v10323_v12, %v10261_v30  ;;  %v20684_v28 = vpop.f32.mrb[32].mxu1  ;;  %v10191_v39 = vadd.f32 %v20672_v17, %v10190_v34 }
 0xb4d   :  { %v20687_v10 = vpop.f32.mrb[33].mxu1  ;;  %v10265_v53 = vmul.f32 %v20684_v28, %v20684_v28 }
 0xb4e   :  { %v10192_v45 = vadd.f32 %v10191_v39, %v20687_v10  ;;  %v10263_v26 = vmul.f32 %v20687_v10, %v20687_v10  ;;  %v10325_v25 = vadd.f32 %v10324_v48, %v10262_v32  ;;  %v20692_v2 = vpop.f32.mrb[34].mxu1 }
 0xb4f   :  { %v20694_v18 = vpop.f32.mrb[35].mxu1  ;;  %v10266_v6 = vmul.f32 %v20692_v2, %v20692_v2 }
 0xb50   :  { %v10326_v4 = vadd.f32 %v10325_v25, %v10263_v26  ;;  %v10193_v47 = vadd.f32 %v10192_v45, %v20694_v18  ;;  %v10264_v22 = vmul.f32 %v20694_v18, %v20694_v18 }
 0xb52   :  { %v10194_v49 = vadd.f32 %v20684_v28, %v10193_v47  ;;  %v10327_v43 = vadd.f32 %v10326_v4, %v10264_v22 }
 0xb54   :  { %v10328_v52 = vadd.f32 %v10327_v43, %v10265_v53  ;;  %v20704_v1 = vpop.f32.mrb[36].mxu1  ;;  %v10195_v57 = vadd.f32 %v20692_v2, %v10194_v49 }
 0xb55   :  { %v20707_v29 = vpop.f32.mrb[37].mxu1  ;;  %v10269_v30 = vmul.f32 %v20704_v1, %v20704_v1 }
 0xb56   :  { %v10196_v23 = vadd.f32 %v10195_v57, %v20707_v29  ;;  %v10267_v19 = vmul.f32 %v20707_v29, %v20707_v29  ;;  %v10329_v33 = vadd.f32 %v10328_v52, %v10266_v6  ;;  %v20712_v5 = vpop.f32.mrb[38].mxu1 }
 0xb57   :  { %v20714_v63 = vpop.f32.mrb[39].mxu1  ;;  %v10270_v32 = vmul.f32 %v20712_v5, %v20712_v5 }
 0xb58   :  { %v10330_v24 = vadd.f32 %v10329_v33, %v10267_v19  ;;  %v10197_v51 = vadd.f32 %v10196_v23, %v20714_v63  ;;  %v10268_v41 = vmul.f32 %v20714_v63, %v20714_v63 }
 0xb5a   :  { %v10198_v34 = vadd.f32 %v20704_v1, %v10197_v51  ;;  %v10331_v12 = vadd.f32 %v10330_v24, %v10268_v41 }
 0xb5c   :  { %v10332_v48 = vadd.f32 %v10331_v12, %v10269_v30  ;;  %v20724_v39 = vpop.f32.mrb[40].mxu1  ;;  %v10199_v45 = vadd.f32 %v20712_v5, %v10198_v34 }
 0xb5d   :  { %22947 = vst [vmem:[#allocation16_spill] sm:$0xff] %v20724_v39  ;;  %v20727_v26 = vpop.f32.mrb[41].mxu1  ;;  %v10273_v52 = vmul.f32 %v20724_v39, %v20724_v39 }
 0xb5e   :  { %v10200_v25 = vadd.f32 %v10199_v45, %v20727_v26  ;;  %v10271_v4 = vmul.f32 %v20727_v26, %v20727_v26  ;;  %v10333_v47 = vadd.f32 %v10332_v48, %v10270_v32  ;;  %v20732_v22 = vpop.f32.mrb[42].mxu1 }
 0xb5f   :  { %22948 = vst [vmem:[#allocation18_spill] sm:$0xff] %v20732_v22  ;;  %v20734_v53 = vpop.f32.mrb[43].mxu1  ;;  %v10274_v19 = vmul.f32 %v20732_v22, %v20732_v22 }
 0xb60   :  { %22949 = vst [vmem:[#allocation21_spill] sm:$0xff] %v20734_v53  ;;  %v10334_v49 = vadd.f32 %v10333_v47, %v10271_v4  ;;  %v10201_v43 = vadd.f32 %v10200_v25, %v20734_v53  ;;  %v10272_v6 = vmul.f32 %v20734_v53, %v20734_v53 }
 0xb62   :  { %v10202_v57 = vadd.f32 %v20724_v39, %v10201_v43  ;;  %v10335_v23 = vadd.f32 %v10334_v49, %v10272_v6 }
 0xb64   :  { %v10336_v33 = vadd.f32 %v10335_v23, %v10273_v52  ;;  %v20744_v24 = vpop.f32.mrb[44].mxu1  ;;  %v10203_v51 = vadd.f32 %v20732_v22, %v10202_v57 }
 0xb65   :  { %22950 = vst [vmem:[#allocation23_spill] sm:$0xff] %v20744_v24  ;;  %v20747_v41 = vpop.f32.mrb[45].mxu1  ;;  %v10277_v47 = vmul.f32 %v20744_v24, %v20744_v24 }
 0xb66   :  { %22951 = vst [vmem:[#allocation63_spill] sm:$0xff] %v20747_v41  ;;  %v10204_v30 = vadd.f32 %v10203_v51, %v20747_v41  ;;  %v10275_v34 = vmul.f32 %v20747_v41, %v20747_v41  ;;  %v10337_v12 = vadd.f32 %v10336_v33, %v10274_v19  ;;  %v20752_v32 = vpop.f32.mrb[46].mxu1 }
 0xb67   :  { %22952 = vst [vmem:[#allocation10_spill] sm:$0xff] %v20752_v32  ;;  %v20754_v48 = vpop.f32.mrb[47].mxu1  ;;  %v10278_v6 = vmul.f32 %v20752_v32, %v20752_v32 }
 0xb68   :  { %22953 = vst [vmem:[#allocation64_spill] sm:$0xff] %v20754_v48  ;;  %v10338_v45 = vadd.f32 %v10337_v12, %v10275_v34  ;;  %v10205_v25 = vadd.f32 %v10204_v30, %v20754_v48  ;;  %v10276_v4 = vmul.f32 %v20754_v48, %v20754_v48 }
 0xb6a   :  { %v10206_v49 = vadd.f32 %v20744_v24, %v10205_v25  ;;  %v10339_v43 = vadd.f32 %v10338_v45, %v10276_v4 }
 0xb6c   :  { %v10340_v52 = vadd.f32 %v10339_v43, %v10277_v47  ;;  %v20764_v57 = vpop.f32.mrb[48].mxu1  ;;  %v10207_v23 = vadd.f32 %v20752_v32, %v10206_v49 }
 0xb6d   :  { %22954 = vst [vmem:[#allocation6_spill] sm:$0xff] %v20764_v57  ;;  %v20767_v19 = vpop.f32.mrb[49].mxu1  ;;  %v10281_v47 = vmul.f32 %v20764_v57, %v20764_v57 }
 0xb6e   :  { %22955 = vst [vmem:[#allocation4_spill] sm:$0xff] %v20767_v19  ;;  %v10208_v33 = vadd.f32 %v10207_v23, %v20767_v19  ;;  %v10279_v51 = vmul.f32 %v20767_v19, %v20767_v19  ;;  %v10341_v30 = vadd.f32 %v10340_v52, %v10278_v6  ;;  %v20772_v34 = vpop.f32.mrb[50].mxu1 }
 0xb6f   :  { %22956 = vst [vmem:[#allocation24_spill] sm:$0xff] %v20772_v34  ;;  %v20774_v12 = vpop.f32.mrb[51].mxu1  ;;  %v10282_v23 = vmul.f32 %v20772_v34, %v20772_v34 }
 0xb70   :  { %22957 = vst [vmem:[#allocation25_spill] sm:$0xff] %v20774_v12  ;;  %v10342_v45 = vadd.f32 %v10341_v30, %v10279_v51  ;;  %v10209_v25 = vadd.f32 %v10208_v33, %v20774_v12  ;;  %v10280_v4 = vmul.f32 %v20774_v12, %v20774_v12 }
 0xb72   :  { %v10210_v49 = vadd.f32 %v20764_v57, %v10209_v25  ;;  %v10343_v43 = vadd.f32 %v10342_v45, %v10280_v4 }
 0xb74   :  { %v10344_v6 = vadd.f32 %v10343_v43, %v10281_v47  ;;  %v20784_v52 = vpop.f32.mrb[52].mxu1  ;;  %v10211_v19 = vadd.f32 %v20772_v34, %v10210_v49 }
 0xb75   :  { %22958 = vst [vmem:[#allocation26_spill] sm:$0xff] %v20784_v52  ;;  %v20787_v51 = vpop.f32.mrb[53].mxu1  ;;  %v10285_v49 = vmul.f32 %v20784_v52, %v20784_v52 }
 0xb76   :  { %22959 = vst [vmem:[#allocation27_spill] sm:$0xff] %v20787_v51  ;;  %v10212_v33 = vadd.f32 %v10211_v19, %v20787_v51  ;;  %v10283_v30 = vmul.f32 %v20787_v51, %v20787_v51  ;;  %v10345_v12 = vadd.f32 %v10344_v6, %v10282_v23  ;;  %v20792_v32 = vpop.f32.mrb[54].mxu1 }
 0xb77   :  { %22960 = vst [vmem:[#allocation28_spill] sm:$0xff] %v20792_v32  ;;  %v20794_v25 = vpop.f32.mrb[55].mxu1  ;;  %v10286_v51 = vmul.f32 %v20792_v32, %v20792_v32 }
 0xb78   :  { %22961 = vst [vmem:[#allocation29_spill] sm:$0xff] %v20794_v25  ;;  %v10346_v45 = vadd.f32 %v10345_v12, %v10283_v30  ;;  %v10213_v4 = vadd.f32 %v10212_v33, %v20794_v25  ;;  %v10284_v47 = vmul.f32 %v20794_v25, %v20794_v25 }
 0xb7a   :  { %v10214_v43 = vadd.f32 %v20784_v52, %v10213_v4  ;;  %v10347_v19 = vadd.f32 %v10346_v45, %v10284_v47 }
 0xb7c   :  { %v10348_v23 = vadd.f32 %v10347_v19, %v10285_v49  ;;  %v20804_v6 = vpop.f32.mrb[56].mxu1  ;;  %v10215_v34 = vadd.f32 %v20792_v32, %v10214_v43 }
 0xb7d   :  { %22962 = vst [vmem:[#allocation30_spill] sm:$0xff] %v20804_v6  ;;  %v20807_v12 = vpop.f32.mrb[57].mxu1  ;;  %v10289_v43 = vmul.f32 %v20804_v6, %v20804_v6 }
 0xb7e   :  { %22963 = vst [vmem:[#allocation31_spill] sm:$0xff] %v20807_v12  ;;  %v10216_v33 = vadd.f32 %v10215_v34, %v20807_v12  ;;  %v10287_v30 = vmul.f32 %v20807_v12, %v20807_v12  ;;  %v10349_v25 = vadd.f32 %v10348_v23, %v10286_v51  ;;  %v20812_v57 = vpop.f32.mrb[58].mxu1 }
 0xb7f   :  { %22964 = vst [vmem:[#allocation65_spill] sm:$0xff] %v20812_v57  ;;  %v20814_v4 = vpop.f32.mrb[59].mxu1  ;;  %v10290_v12 = vmul.f32 %v20812_v57, %v20812_v57 }
 0xb80   :  { %22965 = vst [vmem:[#allocation32_spill] sm:$0xff] %v20814_v4  ;;  %v10350_v45 = vadd.f32 %v10349_v25, %v10287_v30  ;;  %v10217_v47 = vadd.f32 %v10216_v33, %v20814_v4  ;;  %v10288_v49 = vmul.f32 %v20814_v4, %v20814_v4 }
 0xb82   :  { %v10218_v19 = vadd.f32 %v20804_v6, %v10217_v47  ;;  %v10351_v34 = vadd.f32 %v10350_v45, %v10288_v49 }
 0xb84   :  { %v10352_v51 = vadd.f32 %v10351_v34, %v10289_v43  ;;  %v20824_v23 = vpop.f32.mrb[60].mxu1  ;;  %v10219_v32 = vadd.f32 %v20812_v57, %v10218_v19 }
 0xb85   :  { %v20827_v25 = vpop.f32.mrb[61].mxu1  ;;  %v10293_v19 = vmul.f32 %v20824_v23, %v20824_v23 }
 0xb86   :  { %22966 = vst [vmem:[#allocation33_spill] sm:$0xff] %v20827_v25  ;;  %v10220_v33 = vadd.f32 %v10219_v32, %v20827_v25  ;;  %v10291_v30 = vmul.f32 %v20827_v25, %v20827_v25  ;;  %v10353_v4 = vadd.f32 %v10352_v51, %v10290_v12  ;;  %v20832_v52 = vpop.f32.mrb[62].mxu1 }
 0xb87   :  { %v20834_v47 = vpop.f32.mrb[63].mxu1  ;;  %v10294_v25 = vmul.f32 %v20832_v52, %v20832_v52 }
 0xb88   :  { %22967 = vst [vmem:[#allocation34_spill] sm:$0xff] %v20834_v47  ;;  %v10354_v45 = vadd.f32 %v10353_v4, %v10291_v30  ;;  %v10221_v49 = vadd.f32 %v10220_v33, %v20834_v47  ;;  %v10292_v43 = vmul.f32 %v20834_v47, %v20834_v47 }
 0xb8a   :  { %v10222_v34 = vadd.f32 %v20824_v23, %v10221_v49  ;;  %v10355_v32 = vadd.f32 %v10354_v45, %v10292_v43 }
 0xb8c   :  { %v10223_v12 = vadd.f32 %v20832_v52, %v10222_v34  ;;  %v10356_v51 = vadd.f32 %v10355_v32, %v10293_v19 }
 0xb8e   :  { %v10224_v57 = vrot.slane %v10223_v12, 4  ;;  %v10357_v6 = vadd.f32 %v10356_v51, %v10294_v25 }
 0xb8f   :  { %v22988_v51 = vld [vmem:[#allocation34_spill] sm:$0xff] }
 0xb90   :  { %v10225_v4 = vadd.f32 %v10224_v57, %v10223_v12  ;;  %v10358_v30 = vrot.slane %v10357_v6, 4  ;;  %v22986_v57 = vld [vmem:[#allocation65_spill] sm:$0xff] }
 0xb92   :  { %v10226_v33 = vrot.slane %v10225_v4, 2  ;;  %v10359_v24 = vadd.f32 %v10358_v30, %v10357_v6  ;;  %v22969_v30 = vld [vmem:[#allocation16_spill] sm:$0xff]  ;;  %v22985_v6 = vld [vmem:[#allocation30_spill] sm:$0xff] }
 0xb94   :  { %v10227_v48 = vadd.f32 %v10226_v33, %v10225_v4  ;;  %v10360_v47 = vrot.slane %v10359_v24, 2  ;;  %v22968_v4 = vld [vmem:[#allocation21_spill] sm:$0xff]  ;;  %v22970_v33 = vld [vmem:[#allocation18_spill] sm:$0xff] }
 0xb96   :  { %v10228_v41 = vrot.slane %v10227_v48, 1  ;;  %v10361_v22 = vadd.f32 %v10360_v47, %v10359_v24  ;;  %v22984_v24 = vld [vmem:[#allocation32_spill] sm:$0xff] }
 0xb98   :  { %v10229_v39 = vadd.f32 %v10228_v41, %v10227_v48  ;;  %v10362_v53 = vrot.slane %v10361_v22, 1 }
 0xb9a   :  { %v20845_v49 = vmul.f32 0.001953125, %v10229_v39  ;;  %v10363_v45 = vadd.f32 %v10362_v53, %v10361_v22  ;;  %v22982_v22 = vld [vmem:[#allocation28_spill] sm:$0xff] }
 0xb9c   :  { %v20847_v43 = vmul.f32 0.001953125, %v10363_v45  ;;  %v20851_v19 = vmul.f32 %v20845_v49, %v20845_v49  ;;  %v22971_v45 = vld [vmem:[#allocation63_spill] sm:$0xff]  ;;  %v22989_v47 = vsub.f32 %v20527_v21, %v20845_v49  ;;  %v22990_v48 = vsub.f32 %v20531_v14, %v20845_v49 }
 0xb9d   :  { %v22991_v12 = vsub.f32 %v20525_v62, %v20845_v49 }
 0xb9e   :  { %v10366_v41 = vsub.f32 %v20847_v43, %v20851_v19  ;;  %v22972_v43 = vld [vmem:[#allocation64_spill] sm:$0xff]  ;;  %v22987_v19 = vld [vmem:[#allocation33_spill] sm:$0xff] }
 0xba0   :  { %v10431_v39 = vadd.f32 1e-05, %v10366_v41 }
 0xba2   :  { %15848 = vrsqrt.f32 %v10431_v39  ;;  %v22992_v39 = vsub.f32 %v20529_v8, %v20845_v49 }
 0xbac   :  { %v20983_v34 = vpop.eup %15848 }
 0xbad   :  { %v20989_v25 = vmul.f32 %v20983_v34, %v22989_v47  ;;  %v20995_v53 = vmul.f32 %v20983_v34, %v22990_v48  ;;  %v21001_v41 = vmul.f32 %v20983_v34, %v22991_v12  ;;  %v21007_v21 = vmul.f32 %v20983_v34, %v22992_v39 }
 0xbae   :  { %v22993_v47 = vsub.f32 %v20547_v61, %v20845_v49  ;;  %v22994_v48 = vsub.f32 %v20554_v3, %v20845_v49  ;;  %v22995_v12 = vsub.f32 %v20544_v54, %v20845_v49  ;;  %v22996_v39 = vsub.f32 %v20552_v46, %v20845_v49 }
 0xbb0   :  { %v21013_v14 = vmul.f32 %v20983_v34, %v22993_v47  ;;  %v21019_v62 = vmul.f32 %v20983_v34, %v22994_v48  ;;  %v21025_v8 = vmul.f32 %v20983_v34, %v22995_v12  ;;  %v21031_v61 = vmul.f32 %v20983_v34, %v22996_v39 }
 0xbb1   :  { %v22997_v47 = vsub.f32 %v20567_v7, %v20845_v49  ;;  %v22998_v48 = vsub.f32 %v20574_v38, %v20845_v49  ;;  %v22999_v12 = vsub.f32 %v20564_v0, %v20845_v49  ;;  %v23000_v39 = vsub.f32 %v20572_v35, %v20845_v49 }
 0xbb3   :  { %v21037_v3 = vmul.f32 %v20983_v34, %v22997_v47  ;;  %v21043_v54 = vmul.f32 %v20983_v34, %v22998_v48  ;;  %v21049_v46 = vmul.f32 %v20983_v34, %v22999_v12  ;;  %v21055_v7 = vmul.f32 %v20983_v34, %v23000_v39 }
 0xbb4   :  { %v23001_v47 = vsub.f32 %v20587_v59, %v20845_v49  ;;  %v23002_v48 = vsub.f32 %v20594_v44, %v20845_v49  ;;  %v23003_v12 = vsub.f32 %v20584_v50, %v20845_v49  ;;  %v23004_v39 = vsub.f32 %v20592_v55, %v20845_v49 }
 0xbb6   :  { %v21061_v38 = vmul.f32 %v20983_v34, %v23001_v47  ;;  %v21067_v0 = vmul.f32 %v20983_v34, %v23002_v48  ;;  %v21073_v35 = vmul.f32 %v20983_v34, %v23003_v12  ;;  %v21079_v59 = vmul.f32 %v20983_v34, %v23004_v39 }
 0xbb7   :  { %v23005_v47 = vsub.f32 %v20607_v13, %v20845_v49  ;;  %v23006_v48 = vsub.f32 %v20614_v16, %v20845_v49  ;;  %v23007_v12 = vsub.f32 %v20604_v31, %v20845_v49  ;;  %v23008_v39 = vsub.f32 %v20612_v27, %v20845_v49 }
 0xbb9   :  { %v21085_v44 = vmul.f32 %v20983_v34, %v23005_v47  ;;  %v21091_v50 = vmul.f32 %v20983_v34, %v23006_v48  ;;  %v21097_v55 = vmul.f32 %v20983_v34, %v23007_v12  ;;  %v21103_v13 = vmul.f32 %v20983_v34, %v23008_v39 }
 0xbba   :  { %v23009_v47 = vsub.f32 %v20627_v9, %v20845_v49  ;;  %v23010_v48 = vsub.f32 %v20634_v60, %v20845_v49  ;;  %v23011_v12 = vsub.f32 %v20624_v15, %v20845_v49  ;;  %v23012_v39 = vsub.f32 %v20632_v11, %v20845_v49 }
 0xbbc   :  { %v21109_v16 = vmul.f32 %v20983_v34, %v23009_v47  ;;  %v21115_v31 = vmul.f32 %v20983_v34, %v23010_v48  ;;  %v21121_v27 = vmul.f32 %v20983_v34, %v23011_v12  ;;  %v21127_v9 = vmul.f32 %v20983_v34, %v23012_v39 }
 0xbbd   :  { %v23013_v47 = vsub.f32 %v20647_v56, %v20845_v49  ;;  %v23014_v48 = vsub.f32 %v20654_v58, %v20845_v49  ;;  %v23015_v12 = vsub.f32 %v20644_v42, %v20845_v49  ;;  %v23016_v39 = vsub.f32 %v20652_v40, %v20845_v49 }
 0xbbf   :  { %v21133_v60 = vmul.f32 %v20983_v34, %v23013_v47  ;;  %v21139_v15 = vmul.f32 %v20983_v34, %v23014_v48  ;;  %v21145_v11 = vmul.f32 %v20983_v34, %v23015_v12  ;;  %v21151_v56 = vmul.f32 %v20983_v34, %v23016_v39 }
 0xbc0   :  { %v23017_v47 = vsub.f32 %v20667_v36, %v20845_v49  ;;  %v23018_v48 = vsub.f32 %v20674_v20, %v20845_v49  ;;  %v23019_v12 = vsub.f32 %v20664_v37, %v20845_v49  ;;  %v23020_v39 = vsub.f32 %v20672_v17, %v20845_v49 }
 0xbc2   :  { %v21157_v58 = vmul.f32 %v20983_v34, %v23017_v47  ;;  %v21163_v42 = vmul.f32 %v20983_v34, %v23018_v48  ;;  %v21169_v40 = vmul.f32 %v20983_v34, %v23019_v12  ;;  %v21175_v36 = vmul.f32 %v20983_v34, %v23020_v39 }
 0xbc3   :  { %v23021_v47 = vsub.f32 %v20687_v10, %v20845_v49  ;;  %v23022_v48 = vsub.f32 %v20694_v18, %v20845_v49  ;;  %v23023_v12 = vsub.f32 %v20684_v28, %v20845_v49  ;;  %v23024_v39 = vsub.f32 %v20692_v2, %v20845_v49 }
 0xbc5   :  { %v21181_v20 = vmul.f32 %v20983_v34, %v23021_v47  ;;  %v21187_v37 = vmul.f32 %v20983_v34, %v23022_v48  ;;  %v21193_v17 = vmul.f32 %v20983_v34, %v23023_v12  ;;  %v21199_v10 = vmul.f32 %v20983_v34, %v23024_v39 }
 0xbc6   :  { %v23025_v47 = vsub.f32 %v20707_v29, %v20845_v49  ;;  %v23026_v48 = vsub.f32 %v20714_v63, %v20845_v49  ;;  %v23027_v12 = vsub.f32 %v20704_v1, %v20845_v49  ;;  %v23028_v39 = vsub.f32 %v20712_v5, %v20845_v49 }
 0xbc8   :  { %v21205_v18 = vmul.f32 %v20983_v34, %v23025_v47  ;;  %v21211_v28 = vmul.f32 %v20983_v34, %v23026_v48  ;;  %v21217_v2 = vmul.f32 %v20983_v34, %v23027_v12  ;;  %v21223_v29 = vmul.f32 %v20983_v34, %v23028_v39 }
 0xbc9   :  { %v23029_v47 = vsub.f32 %v20727_v26, %v20845_v49  ;;  %v23030_v48 = vsub.f32 %v22968_v4, %v20845_v49  ;;  %v23031_v12 = vsub.f32 %v22969_v30, %v20845_v49  ;;  %v23032_v39 = vsub.f32 %v22970_v33, %v20845_v49 }
 0xbcb   :  { %v21229_v63 = vmul.f32 %v20983_v34, %v23029_v47  ;;  %v21235_v1 = vmul.f32 %v20983_v34, %v23030_v48  ;;  %v21241_v5 = vmul.f32 %v20983_v34, %v23031_v12  ;;  %v21247_v26 = vmul.f32 %v20983_v34, %v23032_v39  ;;  %v23038_v12 = vld [vmem:[#allocation23_spill] sm:$0xff]  ;;  %v23041_v39 = vld [vmem:[#allocation10_spill] sm:$0xff] }
 0xbcc   :  { %v23034_v47 = vsub.f32 %v22971_v45, %v20845_v49  ;;  %v23036_v48 = vsub.f32 %v22972_v43, %v20845_v49  ;;  %v23039_v32 = vsub.f32 %v23038_v12, %v20845_v49 }
 0xbcd   :  { %23033 = vst [vmem:[#allocation35_spill] sm:$0xff] %v21247_v26  ;;  %v23042_v26 = vsub.f32 %v23041_v39, %v20845_v49 }
 0xbce   :  { %v21253_v4 = vmul.f32 %v20983_v34, %v23034_v47  ;;  %v21259_v30 = vmul.f32 %v20983_v34, %v23036_v48  ;;  %v21265_v33 = vmul.f32 %v20983_v34, %v23039_v32  ;;  %v23044_v47 = vld [vmem:[#allocation4_spill] sm:$0xff]  ;;  %v23047_v48 = vld [vmem:[#allocation25_spill] sm:$0xff]  ;;  %v23050_v32 = vld [vmem:[#allocation6_spill] sm:$0xff] }
 0xbcf   :  { %v21271_v45 = vmul.f32 %v20983_v34, %v23042_v26  ;;  %v23053_v26 = vld [vmem:[#allocation24_spill] sm:$0xff] }
 0xbd0   :  { %23035 = vst [vmem:[#allocation36_spill] sm:$0xff] %v21253_v4  ;;  %23037 = vst [vmem:[#allocation37_spill] sm:$0xff] %v21259_v30  ;;  %v23045_v4 = vsub.f32 %v23044_v47, %v20845_v49  ;;  %v23048_v30 = vsub.f32 %v23047_v48, %v20845_v49 }
 0xbd1   :  { %23040 = vst [vmem:[#allocation38_spill] sm:$0xff] %v21265_v33  ;;  %23043 = vst [vmem:[#allocation39_spill] sm:$0xff] %v21271_v45  ;;  %v23051_v33 = vsub.f32 %v23050_v32, %v20845_v49  ;;  %v23054_v45 = vsub.f32 %v23053_v26, %v20845_v49 }
 0xbd2   :  { %v21277_v43 = vmul.f32 %v20983_v34, %v23045_v4  ;;  %v21283_v12 = vmul.f32 %v20983_v34, %v23048_v30  ;;  %v23055_v4 = vld [vmem:[#allocation27_spill] sm:$0xff]  ;;  %v23058_v30 = vld [vmem:[#allocation29_spill] sm:$0xff] }
 0xbd3   :  { %v21289_v39 = vmul.f32 %v20983_v34, %v23051_v33  ;;  %v21295_v47 = vmul.f32 %v20983_v34, %v23054_v45  ;;  %v23060_v33 = vld [vmem:[#allocation26_spill] sm:$0xff]  ;;  %v23062_v45 = vsub.f32 %v22982_v22, %v20845_v49 }
 0xbd4   :  { %23046 = vst [vmem:[#allocation40_spill] sm:$0xff] %v21277_v43  ;;  %23049 = vst [vmem:[#allocation41_spill] sm:$0xff] %v21283_v12  ;;  %v23056_v43 = vsub.f32 %v23055_v4, %v20845_v49  ;;  %v23059_v12 = vsub.f32 %v23058_v30, %v20845_v49 }
 0xbd5   :  { %23052 = vst [vmem:[#allocation42_spill] sm:$0xff] %v21289_v39  ;;  %v23061_v39 = vsub.f32 %v23060_v33, %v20845_v49  ;;  %v21319_v4 = vmul.f32 %v20983_v34, %v23062_v45  ;;  %v23067_v45 = vsub.f32 %v22986_v57, %v20845_v49 }
 0xbd6   :  { %v21301_v48 = vmul.f32 %v20983_v34, %v23056_v43  ;;  %v21307_v32 = vmul.f32 %v20983_v34, %v23059_v12  ;;  %v23063_v43 = vld [vmem:[#allocation31_spill] sm:$0xff]  ;;  %v23065_v12 = vsub.f32 %v22984_v24, %v20845_v49 }
 0xbd7   :  { %v21313_v26 = vmul.f32 %v20983_v34, %v23061_v39  ;;  %v23066_v39 = vsub.f32 %v22985_v6, %v20845_v49 }
 0xbd8   :  { %23057 = vst [vmem:[#allocation43_spill] sm:$0xff] %v21301_v48  ;;  %v23064_v48 = vsub.f32 %v23063_v43, %v20845_v49  ;;  %v21331_v33 = vmul.f32 %v20983_v34, %v23065_v12  ;;  %v21343_v43 = vmul.f32 %v20983_v34, %v23067_v45  ;;  %v23069_v12 = vsub.f32 %v22988_v51, %v20845_v49 }
 0xbd9   :  { %v21337_v22 = vmul.f32 %v20983_v34, %v23066_v39  ;;  %v23070_v39 = vsub.f32 %v20824_v23, %v20845_v49  ;;  %v23071_v45 = vsub.f32 %v20832_v52, %v20845_v49  ;;  %v21383_v52 = vld [vmem:[%s22409_s6] ss:$0 sm:$0xff] }
 0xbda   :  { %v21325_v30 = vmul.f32 %v20983_v34, %v23064_v48  ;;  %v23068_v48 = vsub.f32 %v22987_v19, %v20845_v49  ;;  %v21355_v6 = vmul.f32 %v20983_v34, %v23069_v12 }
 0xbdb   :  { %v21361_v57 = vmul.f32 %v20983_v34, %v23070_v39  ;;  %v21367_v19 = vmul.f32 %v20983_v34, %v23071_v45 }
 0xbdc   :  { %v21349_v24 = vmul.f32 %v20983_v34, %v23068_v48  ;;  %v21372_v48 = vld [vmem:[%s22408_s5] ss:$0 sm:$0xff] }
 0xbdd   :  { %23072 = vst [vmem:[#allocation44_spill] sm:$0xff] %v21367_v19  ;;  %v10503_v51 = vmul.f32 %v21372_v48, %v20989_v25  ;;  %v10504_v23 = vmul.f32 %v21372_v48, %v20995_v53  ;;  %v10505_v12 = vmul.f32 %v21372_v48, %v21001_v41  ;;  %v10506_v49 = vmul.f32 %v21372_v48, %v21007_v21 }
 0xbde   :  { %v10507_v34 = vmul.f32 %v21372_v48, %v21013_v14  ;;  %v10508_v25 = vmul.f32 %v21372_v48, %v21019_v62  ;;  %v10509_v53 = vmul.f32 %v21372_v48, %v21025_v8  ;;  %v10510_v21 = vmul.f32 %v21372_v48, %v21031_v61 }
 0xbdf   :  { %v21394_v39 = vadd.f32 %v21383_v52, %v10503_v51  ;;  %v21397_v41 = vadd.f32 %v21383_v52, %v10504_v23  ;;  %v21400_v45 = vadd.f32 %v21383_v52, %v10505_v12  ;;  %v21405_v14 = vadd.f32 %v21383_v52, %v10506_v49 }
 0xbe0   :  { %v10511_v62 = vmul.f32 %v21372_v48, %v21037_v3  ;;  %v21410_v8 = vadd.f32 %v21383_v52, %v10507_v34  ;;  %v10512_v51 = vmul.f32 %v21372_v48, %v21043_v54  ;;  %v10513_v23 = vmul.f32 %v21372_v48, %v21049_v46 }
 0xbe1   :  { %23073 = vst [vmem:[#allocation45_spill] sm:$0xff] %v21394_v39  ;;  %23074 = vst [vmem:[#allocation46_spill] sm:$0xff] %v21397_v41  ;;  %v21417_v12 = vadd.f32 %v21383_v52, %v10508_v25  ;;  %v21420_v61 = vadd.f32 %v21383_v52, %v10509_v53  ;;  %v12133_v49 = vmul.f32 -1.442695, %v21394_v39  ;;  %v12134_v19 = vmul.f32 -1.442695, %v21397_v41 }
 0xbe2   :  { %23075 = vst [vmem:[#allocation47_spill] sm:$0xff] %v21400_v45  ;;  %v12135_v3 = vmul.f32 -1.442695, %v21400_v45  ;;  %v10514_v34 = vmul.f32 %v21372_v48, %v21055_v7  ;;  %v21428_v54 = vadd.f32 %v21383_v52, %v10510_v21  ;;  %v12136_v46 = vmul.f32 -1.442695, %v21405_v14 }
 0xbe3   :  { %v10515_v25 = vmul.f32 %v21372_v48, %v21061_v38  ;;  %v21434_v53 = vadd.f32 %v21383_v52, %v10511_v62  ;;  %15850 = vpow2.f32 %v12133_v49  ;;  %v12137_v39 = vmul.f32 -1.442695, %v21410_v8 }
 0xbe4   :  { %v10516_v45 = vmul.f32 %v21372_v48, %v21067_v0  ;;  %v21440_v41 = vadd.f32 %v21383_v52, %v10512_v51  ;;  %15852 = vpow2.f32 %v12134_v19  ;;  %v12138_v7 = vmul.f32 -1.442695, %v21417_v12 }
 0xbe5   :  { %23076 = vst [vmem:[#allocation48_spill] sm:$0xff] %v21434_v53  ;;  %v10517_v21 = vmul.f32 %v21372_v48, %v21073_v35  ;;  %v21446_v38 = vadd.f32 %v21383_v52, %v10513_v23  ;;  %15854 = vpow2.f32 %v12135_v3  ;;  %v12139_v62 = vmul.f32 -1.442695, %v21420_v61 }
 0xbe6   :  { %23077 = vst [vmem:[#allocation7_spill] sm:$0xff] %v21440_v41  ;;  %v10518_v49 = vmul.f32 %v21372_v48, %v21079_v59  ;;  %v21452_v0 = vadd.f32 %v21383_v52, %v10514_v34  ;;  %15856 = vpow2.f32 %v12136_v46  ;;  %v12140_v19 = vmul.f32 -1.442695, %v21428_v54 }
 0xbe7   :  { %23078 = vst [vmem:[#allocation9_spill] sm:$0xff] %v21446_v38  ;;  %v10519_v51 = vmul.f32 %v21372_v48, %v21085_v44  ;;  %v21458_v35 = vadd.f32 %v21383_v52, %v10515_v25  ;;  %15858 = vpow2.f32 %v12137_v39  ;;  %v12141_v23 = vmul.f32 -1.442695, %v21434_v53 }
 0xbe8   :  { %23079 = vst [vmem:[#allocation66_spill] sm:$0xff] %v21452_v0  ;;  %v10520_v3 = vmul.f32 %v21372_v48, %v21091_v50  ;;  %v21464_v59 = vadd.f32 %v21383_v52, %v10516_v45  ;;  %15860 = vpow2.f32 %v12138_v7  ;;  %v12142_v34 = vmul.f32 -1.442695, %v21440_v41 }
 0xbe9   :  { %23080 = vst [vmem:[#allocation12_spill] sm:$0xff] %v21458_v35  ;;  %v10521_v46 = vmul.f32 %v21372_v48, %v21097_v55  ;;  %v21470_v44 = vadd.f32 %v21383_v52, %v10517_v21  ;;  %15862 = vpow2.f32 %v12139_v62  ;;  %v12143_v39 = vmul.f32 -1.442695, %v21446_v38 }
 0xbea   :  { %23081 = vst [vmem:[#allocation67_spill] sm:$0xff] %v21464_v59  ;;  %v10522_v25 = vmul.f32 %v21372_v48, %v21103_v13  ;;  %v21476_v50 = vadd.f32 %v21383_v52, %v10518_v49  ;;  %15864 = vpow2.f32 %v12140_v19  ;;  %v12144_v45 = vmul.f32 -1.442695, %v21452_v0 }
 0xbeb   :  { %23082 = vst [vmem:[#allocation14_spill] sm:$0xff] %v21470_v44  ;;  %v10523_v7 = vmul.f32 %v21372_v48, %v21109_v16  ;;  %v21482_v55 = vadd.f32 %v21383_v52, %v10519_v51  ;;  %15866 = vpow2.f32 %v12141_v23  ;;  %v12145_v21 = vmul.f32 -1.442695, %v21458_v35 }
 0xbec   :  { %23083 = vst [vmem:[#allocation68_spill] sm:$0xff] %v21476_v50  ;;  %v10524_v62 = vmul.f32 %v21372_v48, %v21115_v31  ;;  %v21488_v13 = vadd.f32 %v21383_v52, %v10520_v3  ;;  %15868 = vpow2.f32 %v12142_v34  ;;  %v12146_v49 = vmul.f32 -1.442695, %v21464_v59 }
 0xbed   :  { %23084 = vst [vmem:[#allocation11_spill] sm:$0xff] %v21482_v55  ;;  %v21491_v19 = vpop.eup %15850  ;;  %v10525_v16 = vmul.f32 %v21372_v48, %v21121_v27  ;;  %v21496_v51 = vadd.f32 %v21383_v52, %v10521_v46  ;;  %15870 = vpow2.f32 %v12143_v39  ;;  %v12147_v23 = vmul.f32 -1.442695, %v21470_v44 }
 0xbee   :  { %23085 = vst [vmem:[#allocation69_spill] sm:$0xff] %v21488_v13  ;;  %v21499_v35 = vpop.eup %15852  ;;  %v10526_v31 = vmul.f32 %v21372_v48, %v21127_v9  ;;  %v21504_v3 = vadd.f32 %v21383_v52, %v10522_v25  ;;  %15872 = vpow2.f32 %v12144_v45  ;;  %v12148_v34 = vmul.f32 -1.442695, %v21476_v50 }
 0xbef   :  { %23086 = vst [vmem:[#allocation15_spill] sm:$0xff] %v21496_v51  ;;  %v21507_v59 = vpop.eup %15854  ;;  %v10527_v27 = vmul.f32 %v21372_v48, %v21133_v60  ;;  %v21512_v46 = vadd.f32 %v21383_v52, %v10523_v7  ;;  %15874 = vpow2.f32 %v12145_v21  ;;  %v12149_v39 = vmul.f32 -1.442695, %v21482_v55 }
 0xbf0   :  { %23087 = vst [vmem:[#allocation17_spill] sm:$0xff] %v21504_v3  ;;  %v21515_v44 = vpop.eup %15856  ;;  %v10528_v9 = vmul.f32 %v21372_v48, %v21139_v15  ;;  %v21520_v25 = vadd.f32 %v21383_v52, %v10524_v62  ;;  %15876 = vpow2.f32 %v12146_v49  ;;  %v12150_v45 = vmul.f32 -1.442695, %v21488_v13 }
 0xbf1   :  { %23088 = vst [vmem:[#allocation49_spill] sm:$0xff] %v21512_v46  ;;  %v21523_v50 = vpop.eup %15858  ;;  %v10529_v60 = vmul.f32 %v21372_v48, %v21145_v11  ;;  %v21528_v7 = vadd.f32 %v21383_v52, %v10525_v16  ;;  %15878 = vpow2.f32 %v12147_v23  ;;  %v12151_v21 = vmul.f32 -1.442695, %v21496_v51 }
 0xbf2   :  { %23089 = vst [vmem:[#allocation50_spill] sm:$0xff] %v21520_v25  ;;  %v21531_v55 = vpop.eup %15860  ;;  %v10530_v15 = vmul.f32 %v21372_v48, %v21151_v56  ;;  %v21536_v62 = vadd.f32 %v21383_v52, %v10526_v31  ;;  %15880 = vpow2.f32 %v12148_v34  ;;  %v12152_v49 = vmul.f32 -1.442695, %v21504_v3 }
 0xbf3   :  { %23090 = vst [vmem:[#allocation20_spill] sm:$0xff] %v21528_v7  ;;  %v21539_v13 = vpop.eup %15862  ;;  %v10531_v11 = vmul.f32 %v21372_v48, %v21157_v58  ;;  %v21544_v16 = vadd.f32 %v21383_v52, %v10527_v27  ;;  %15882 = vpow2.f32 %v12149_v39  ;;  %v12153_v23 = vmul.f32 -1.442695, %v21512_v46 }
 0xbf4   :  { %23091 = vst [vmem:[#allocation22_spill] sm:$0xff] %v21536_v62  ;;  %v21547_v51 = vpop.eup %15864  ;;  %v10532_v56 = vmul.f32 %v21372_v48, %v21163_v42  ;;  %v21552_v31 = vadd.f32 %v21383_v52, %v10528_v9  ;;  %15884 = vpow2.f32 %v12150_v45  ;;  %v12154_v34 = vmul.f32 -1.442695, %v21520_v25 }
 0xbf5   :  { %23092 = vst [vmem:[#allocation51_spill] sm:$0xff] %v21544_v16  ;;  %v21555_v3 = vpop.eup %15866  ;;  %v10533_v58 = vmul.f32 %v21372_v48, %v21169_v40  ;;  %v21560_v27 = vadd.f32 %v21383_v52, %v10529_v60  ;;  %15886 = vpow2.f32 %v12151_v21  ;;  %v12155_v39 = vmul.f32 -1.442695, %v21528_v7 }
 0xbf6   :  { %23093 = vst [vmem:[#allocation52_spill] sm:$0xff] %v21552_v31  ;;  %v21563_v46 = vpop.eup %15868  ;;  %v10534_v42 = vmul.f32 %v21372_v48, %v21175_v36  ;;  %v21568_v9 = vadd.f32 %v21383_v52, %v10530_v15  ;;  %15888 = vpow2.f32 %v12152_v49  ;;  %v12156_v45 = vmul.f32 -1.442695, %v21536_v62 }
 0xbf7   :  { %23094 = vst [vmem:[#allocation53_spill] sm:$0xff] %v21560_v27  ;;  %v21571_v25 = vpop.eup %15870  ;;  %v10535_v40 = vmul.f32 %v21372_v48, %v21181_v20  ;;  %v21576_v60 = vadd.f32 %v21383_v52, %v10531_v11  ;;  %15890 = vpow2.f32 %v12153_v23  ;;  %v12157_v21 = vmul.f32 -1.442695, %v21544_v16 }
 0xbf8   :  { %23095 = vst [vmem:[#allocation54_spill] sm:$0xff] %v21568_v9  ;;  %v21579_v7 = vpop.eup %15872  ;;  %v10536_v36 = vmul.f32 %v21372_v48, %v21187_v37  ;;  %v21584_v15 = vadd.f32 %v21383_v52, %v10532_v56  ;;  %15892 = vpow2.f32 %v12154_v34  ;;  %v12158_v49 = vmul.f32 -1.442695, %v21552_v31 }
 0xbf9   :  { %23096 = vst [vmem:[#allocation55_spill] sm:$0xff] %v21576_v60  ;;  %v21587_v62 = vpop.eup %15874  ;;  %v10537_v20 = vmul.f32 %v21372_v48, %v21193_v17  ;;  %v21592_v11 = vadd.f32 %v21383_v52, %v10533_v58  ;;  %15894 = vpow2.f32 %v12155_v39  ;;  %v12159_v23 = vmul.f32 -1.442695, %v21560_v27 }
 0xbfa   :  { %23097 = vst [vmem:[#allocation56_spill] sm:$0xff] %v21584_v15  ;;  %v21595_v16 = vpop.eup %15876  ;;  %v10538_v37 = vmul.f32 %v21372_v48, %v21199_v10  ;;  %v21600_v56 = vadd.f32 %v21383_v52, %v10534_v42  ;;  %15896 = vpow2.f32 %v12156_v45  ;;  %v12160_v34 = vmul.f32 -1.442695, %v21568_v9 }
 0xbfb   :  { %23098 = vst [vmem:[#allocation57_spill] sm:$0xff] %v21592_v11  ;;  %v21603_v31 = vpop.eup %15878  ;;  %v10539_v17 = vmul.f32 %v21372_v48, %v21205_v18  ;;  %v21608_v58 = vadd.f32 %v21383_v52, %v10535_v40  ;;  %15898 = vpow2.f32 %v12157_v21  ;;  %v12161_v39 = vmul.f32 -1.442695, %v21576_v60 }
 0xbfc   :  { %23099 = vst [vmem:[#allocation58_spill] sm:$0xff] %v21600_v56  ;;  %v21611_v27 = vpop.eup %15880  ;;  %v10540_v10 = vmul.f32 %v21372_v48, %v21211_v28  ;;  %v21616_v42 = vadd.f32 %v21383_v52, %v10536_v36  ;;  %15900 = vpow2.f32 %v12158_v49  ;;  %v12162_v45 = vmul.f32 -1.442695, %v21584_v15 }
 0xbfd   :  { %23100 = vst [vmem:[#allocation59_spill] sm:$0xff] %v21608_v58  ;;  %v21619_v9 = vpop.eup %15882  ;;  %v10541_v18 = vmul.f32 %v21372_v48, %v21217_v2  ;;  %v21624_v40 = vadd.f32 %v21383_v52, %v10537_v20  ;;  %15902 = vpow2.f32 %v12159_v23  ;;  %v12163_v21 = vmul.f32 -1.442695, %v21592_v11 }
 0xbfe   :  { %23101 = vst [vmem:[#allocation60_spill] sm:$0xff] %v21616_v42  ;;  %v21627_v60 = vpop.eup %15884  ;;  %v10542_v28 = vmul.f32 %v21372_v48, %v21223_v29  ;;  %v21632_v36 = vadd.f32 %v21383_v52, %v10538_v37  ;;  %15904 = vpow2.f32 %v12160_v34  ;;  %v12164_v49 = vmul.f32 -1.442695, %v21600_v56 }
 0xbff   :  { %23102 = vst [vmem:[#allocation61_spill] sm:$0xff] %v21624_v40  ;;  %v21635_v15 = vpop.eup %15886  ;;  %v10543_v2 = vmul.f32 %v21372_v48, %v21229_v63  ;;  %v21640_v20 = vadd.f32 %v21383_v52, %v10539_v17  ;;  %15906 = vpow2.f32 %v12161_v39  ;;  %v12165_v23 = vmul.f32 -1.442695, %v21608_v58 }
 0xc00   :  { %23103 = vst [vmem:[#allocation19_spill] sm:$0xff] %v21632_v36  ;;  %v21643_v11 = vpop.eup %15888  ;;  %v10544_v29 = vmul.f32 %v21372_v48, %v21235_v1  ;;  %v21648_v37 = vadd.f32 %v21383_v52, %v10540_v10  ;;  %15908 = vpow2.f32 %v12162_v45  ;;  %v12166_v34 = vmul.f32 -1.442695, %v21616_v42  ;;  %v23107_v1 = vld [vmem:[#allocation35_spill] sm:$0xff] }
 0xc01   :  { %23104 = vst [vmem:[#allocation3_spill] sm:$0xff] %v21640_v20  ;;  %v21651_v56 = vpop.eup %15890  ;;  %v10545_v63 = vmul.f32 %v21372_v48, %v21241_v5  ;;  %v21656_v17 = vadd.f32 %v21383_v52, %v10541_v18  ;;  %15910 = vpow2.f32 %v12163_v21  ;;  %v12167_v39 = vmul.f32 -1.442695, %v21624_v40  ;;  %v23109_v5 = vld [vmem:[#allocation36_spill] sm:$0xff] }
 0xc02   :  { %23105 = vst [vmem:[#allocation5_spill] sm:$0xff] %v21648_v37  ;;  %v21659_v58 = vpop.eup %15892  ;;  %v10546_v10 = vmul.f32 %v21372_v48, %v23107_v1  ;;  %v21664_v45 = vadd.f32 %v21383_v52, %v10542_v28  ;;  %15912 = vpow2.f32 %v12164_v49  ;;  %v12168_v42 = vmul.f32 -1.442695, %v21632_v36  ;;  %v23111_v1 = vld [vmem:[#allocation37_spill] sm:$0xff] }
 0xc03   :  { %23106 = vst [vmem:[#allocation8_spill] sm:$0xff] %v21656_v17  ;;  %v21667_v0 = vpop.eup %15894  ;;  %v10547_v18 = vmul.f32 %v21372_v48, %v23109_v5  ;;  %v21672_v21 = vadd.f32 %v21383_v52, %v10543_v2  ;;  %15914 = vpow2.f32 %v12165_v23  ;;  %v12169_v40 = vmul.f32 -1.442695, %v21640_v20  ;;  %v23114_v5 = vld [vmem:[#allocation38_spill] sm:$0xff] }
 0xc04   :  { %23108 = vst [vmem:[#allocation62_spill] sm:$0xff] %v21664_v45  ;;  %v21675_v38 = vpop.eup %15896  ;;  %v10548_v28 = vmul.f32 %v21372_v48, %v23111_v1  ;;  %v21680_v49 = vadd.f32 %v21383_v52, %v10544_v29  ;;  %15916 = vpow2.f32 %v12166_v34  ;;  %v12170_v36 = vmul.f32 -1.442695, %v21648_v37  ;;  %v23117_v1 = vld [vmem:[#allocation39_spill] sm:$0xff] }
 0xc05   :  { %23110 = vst [vmem:[#allocation13_spill] sm:$0xff] %v21672_v21  ;;  %v21683_v41 = vpop.eup %15898  ;;  %v10549_v2 = vmul.f32 %v21372_v48, %v23114_v5  ;;  %v21688_v23 = vadd.f32 %v21383_v52, %v10545_v63  ;;  %15918 = vpow2.f32 %v12167_v39  ;;  %v12171_v20 = vmul.f32 -1.442695, %v21656_v17  ;;  %v23120_v5 = vld [vmem:[#allocation40_spill] sm:$0xff] }
 0xc06   :  { %23112 = vst [vmem:[#allocation21_spill] sm:$0xff] %v21680_v49  ;;  %23113 = vst [vmem:[#allocation16_spill] sm:$0xff] %v21683_v41  ;;  %v21691_v53 = vpop.eup %15900  ;;  %v10550_v29 = vmul.f32 %v21372_v48, %v23117_v1  ;;  %v21696_v34 = vadd.f32 %v21383_v52, %v10546_v10  ;;  %15920 = vpow2.f32 %v12168_v42  ;;  %v12172_v37 = vmul.f32 -1.442695, %v21664_v45  ;;  %v23123_v1 = vld [vmem:[#allocation41_spill] sm:$0xff] }
 0xc07   :  { %23115 = vst [vmem:[#allocation18_spill] sm:$0xff] %v21688_v23  ;;  %23116 = vst [vmem:[#allocation63_spill] sm:$0xff] %v21691_v53  ;;  %v21699_v41 = vpop.eup %15902  ;;  %v10551_v63 = vmul.f32 %v21372_v48, %v23120_v5  ;;  %v21704_v39 = vadd.f32 %v21383_v52, %v10547_v18  ;;  %15922 = vpow2.f32 %v12169_v40  ;;  %v12173_v17 = vmul.f32 -1.442695, %v21672_v21  ;;  %v23125_v5 = vld [vmem:[#allocation42_spill] sm:$0xff] }
 0xc08   :  { %23118 = vst [vmem:[#allocation64_spill] sm:$0xff] %v21696_v34  ;;  %23119 = vst [vmem:[#allocation28_spill] sm:$0xff] %v21699_v41  ;;  %v21707_v53 = vpop.eup %15904  ;;  %v10552_v10 = vmul.f32 %v21372_v48, %v23123_v1  ;;  %v21712_v42 = vadd.f32 %v21383_v52, %v10548_v28  ;;  %15924 = vpow2.f32 %v12170_v36  ;;  %v12174_v45 = vmul.f32 -1.442695, %v21680_v49 }
 0xc09   :  { %23121 = vst [vmem:[#allocation32_spill] sm:$0xff] %v21704_v39  ;;  %23122 = vst [vmem:[#allocation30_spill] sm:$0xff] %v21707_v53  ;;  %v21715_v41 = vpop.eup %15906  ;;  %v10553_v18 = vmul.f32 %v21372_v48, %v23125_v5  ;;  %v21720_v40 = vadd.f32 %v21383_v52, %v10549_v2  ;;  %15926 = vpow2.f32 %v12171_v20  ;;  %v12175_v21 = vmul.f32 -1.442695, %v21688_v23  ;;  %v23129_v5 = vld [vmem:[#allocation43_spill] sm:$0xff] }
 0xc0a   :  { %23124 = vst [vmem:[#allocation65_spill] sm:$0xff] %v21712_v42  ;;  %v21723_v53 = vpop.eup %15908  ;;  %v10554_v28 = vmul.f32 %v21372_v48, %v21295_v47  ;;  %v21728_v36 = vadd.f32 %v21383_v52, %v10550_v29  ;;  %15928 = vpow2.f32 %v12172_v37  ;;  %v12176_v1 = vmul.f32 -1.442695, %v21696_v34 }
 0xc0b   :  { %23126 = vst [vmem:[#allocation33_spill] sm:$0xff] %v21720_v40  ;;  %23127 = vst [vmem:[#allocation34_spill] sm:$0xff] %v21723_v53  ;;  %v21731_v49 = vpop.eup %15910  ;;  %v10555_v2 = vmul.f32 %v21372_v48, %v23129_v5  ;;  %v21736_v20 = vadd.f32 %v21383_v52, %v10551_v63  ;;  %15930 = vpow2.f32 %v12173_v17  ;;  %v12177_v23 = vmul.f32 -1.442695, %v21704_v39 }
 0xc0c   :  { %23128 = vst [vmem:[#allocation23_spill] sm:$0xff] %v21728_v36  ;;  %v21739_v53 = vpop.eup %15912  ;;  %v10556_v47 = vmul.f32 %v21372_v48, %v21307_v32  ;;  %v21744_v37 = vadd.f32 %v21383_v52, %v10552_v10  ;;  %15932 = vpow2.f32 %v12174_v45  ;;  %v12178_v29 = vmul.f32 -1.442695, %v21712_v42 }
 0xc0d   :  { %23130 = vst [vmem:[#allocation10_spill] sm:$0xff] %v21736_v20  ;;  %v21747_v34 = vpop.eup %15914  ;;  %v10557_v63 = vmul.f32 %v21372_v48, %v21313_v26  ;;  %v21752_v17 = vadd.f32 %v21383_v52, %v10553_v18  ;;  %15934 = vpow2.f32 %v12175_v21  ;;  %v12179_v5 = vmul.f32 -1.442695, %v21720_v40 }
 0xc0e   :  { %23131 = vst [vmem:[#allocation4_spill] sm:$0xff] %v21744_v37  ;;  %v21755_v39 = vpop.eup %15916  ;;  %v10558_v32 = vmul.f32 %v21372_v48, %v21319_v4  ;;  %v21760_v45 = vadd.f32 %v21383_v52, %v10554_v28  ;;  %15936 = vpow2.f32 %v12176_v1  ;;  %v12180_v10 = vmul.f32 -1.442695, %v21728_v36 }
 0xc0f   :  { %23132 = vst [vmem:[#allocation25_spill] sm:$0xff] %v21752_v17  ;;  %v21763_v42 = vpop.eup %15918  ;;  %v10559_v26 = vmul.f32 %v21372_v48, %v21325_v30  ;;  %v21768_v21 = vadd.f32 %v21383_v52, %v10555_v2  ;;  %15938 = vpow2.f32 %v12177_v23  ;;  %v12181_v18 = vmul.f32 -1.442695, %v21736_v20 }
 0xc10   :  { %23133 = vst [vmem:[#allocation6_spill] sm:$0xff] %v21760_v45  ;;  %v21771_v40 = vpop.eup %15920  ;;  %v10560_v4 = vmul.f32 %v21372_v48, %v21331_v33  ;;  %v21776_v28 = vadd.f32 %v21383_v52, %v10556_v47  ;;  %15940 = vpow2.f32 %v12178_v29  ;;  %v12182_v1 = vmul.f32 -1.442695, %v21744_v37 }
 0xc11   :  { %23134 = vst [vmem:[#allocation24_spill] sm:$0xff] %v21768_v21  ;;  %v21779_v36 = vpop.eup %15922  ;;  %v10561_v30 = vmul.f32 %v21372_v48, %v21337_v22  ;;  %v21784_v23 = vadd.f32 %v21383_v52, %v10557_v63  ;;  %15942 = vpow2.f32 %v12179_v5  ;;  %v12183_v2 = vmul.f32 -1.442695, %v21752_v17 }
 0xc12   :  { %23135 = vst [vmem:[#allocation27_spill] sm:$0xff] %v21776_v28  ;;  %v21787_v20 = vpop.eup %15924  ;;  %v10562_v33 = vmul.f32 %v21372_v48, %v21343_v43  ;;  %v21792_v47 = vadd.f32 %v21383_v52, %v10558_v32  ;;  %15944 = vpow2.f32 %v12180_v10  ;;  %v12184_v29 = vmul.f32 -1.442695, %v21760_v45 }
 0xc13   :  { %23136 = vst [vmem:[#allocation29_spill] sm:$0xff] %v21784_v23  ;;  %v21795_v37 = vpop.eup %15926  ;;  %v10563_v22 = vmul.f32 %v21372_v48, %v21349_v24  ;;  %v21800_v63 = vadd.f32 %v21383_v52, %v10559_v26  ;;  %15946 = vpow2.f32 %v12181_v18  ;;  %v12185_v5 = vmul.f32 -1.442695, %v21768_v21 }
 0xc14   :  { %23137 = vst [vmem:[#allocation26_spill] sm:$0xff] %v21792_v47  ;;  %v21803_v17 = vpop.eup %15928  ;;  %v10564_v43 = vmul.f32 %v21372_v48, %v21355_v6  ;;  %v21808_v32 = vadd.f32 %v21383_v52, %v10560_v4  ;;  %15948 = vpow2.f32 %v12182_v1  ;;  %v12186_v10 = vmul.f32 -1.442695, %v21776_v28  ;;  %v23142_v6 = vld [vmem:[#allocation44_spill] sm:$0xff] }
 0xc15   :  { %23138 = vst [vmem:[#allocation31_spill] sm:$0xff] %v21800_v63  ;;  %v21811_v45 = vpop.eup %15930  ;;  %v10565_v24 = vmul.f32 %v21372_v48, %v21361_v57  ;;  %v21816_v26 = vadd.f32 %v21383_v52, %v10561_v30  ;;  %15950 = vpow2.f32 %v12183_v2  ;;  %v12187_v18 = vmul.f32 -1.442695, %v21784_v23 }
 0xc16   :  { %23139 = vst [vmem:[#allocation35_spill] sm:$0xff] %v21808_v32  ;;  %23140 = vst [vmem:[#allocation36_spill] sm:$0xff] %v21811_v45  ;;  %v21819_v21 = vpop.eup %15932  ;;  %v10566_v4 = vmul.f32 %v21372_v48, %v23142_v6  ;;  %v21824_v1 = vadd.f32 %v21383_v52, %v10562_v33  ;;  %15952 = vpow2.f32 %v12184_v29  ;;  %v12188_v28 = vmul.f32 -1.442695, %v21792_v47  ;;  %v12199_v47 = vld [vmem:[%s22404_s0 + $0x31] sm:$0xff] }
 0xc17   :  { %23141 = vst [vmem:[#allocation37_spill] sm:$0xff] %v21816_v26  ;;  %v21827_v45 = vpop.eup %15934  ;;  %v21830_v57 = vadd.f32 %v21383_v52, %v10563_v22  ;;  %15954 = vpow2.f32 %v12185_v5  ;;  %v12189_v30 = vmul.f32 -1.442695, %v21800_v63  ;;  %v21836_v23 = vadd.f32 %v21383_v52, %v10564_v43 }
 0xc18   :  { %23143 = vst [vmem:[#allocation38_spill] sm:$0xff] %v21824_v1  ;;  %v21833_v2 = vpop.eup %15936  ;;  %15956 = vpow2.f32 %v12186_v10  ;;  %v12190_v48 = vmul.f32 -1.442695, %v21808_v32  ;;  %v21842_v29 = vadd.f32 %v21383_v52, %v10565_v24  ;;  %v12191_v22 = vmul.f32 -1.442695, %v21816_v26 }
 0xc19   :  { %23144 = vst [vmem:[#allocation39_spill] sm:$0xff] %v21830_v57  ;;  %23145 = vst [vmem:[#allocation40_spill] sm:$0xff] %v21836_v23  ;;  %v21839_v33 = vpop.eup %15938  ;;  %15958 = vpow2.f32 %v12187_v18  ;;  %v21848_v5 = vadd.f32 %v21383_v52, %v10566_v4  ;;  %v12192_v43 = vmul.f32 -1.442695, %v21824_v1  ;;  %v12193_v10 = vmul.f32 -1.442695, %v21830_v57 }
 0xc1a   :  { %23146 = vst [vmem:[#allocation41_spill] sm:$0xff] %v21842_v29  ;;  %v21845_v6 = vpop.eup %15940  ;;  %15960 = vpow2.f32 %v12188_v28  ;;  %v12194_v24 = vmul.f32 -1.442695, %v21836_v23  ;;  %v12195_v26 = vmul.f32 -1.442695, %v21842_v29  ;;  %v10843_v1 = vadd.f32 1.0, %v21603_v31 }
 0xc1b   :  { %23147 = vst [vmem:[#allocation42_spill] sm:$0xff] %v21848_v5  ;;  %v21851_v63 = vpop.eup %15942  ;;  %15962 = vpow2.f32 %v12189_v30  ;;  %v12196_v28 = vmul.f32 -1.442695, %v21848_v5  ;;  %v10829_v30 = vadd.f32 1.0, %v21491_v19  ;;  %v23152_v31 = vld [vmem:[#allocation46_spill] sm:$0xff] }
 0xc1c   :  { %v21854_v32 = vpop.eup %15944  ;;  %15964 = vpow2.f32 %v12190_v48  ;;  %v10830_v48 = vadd.f32 1.0, %v21499_v35 }
 0xc1d   :  { %v21857_v18 = vpop.eup %15946  ;;  %15966 = vpow2.f32 %v12191_v22  ;;  %v10831_v22 = vadd.f32 1.0, %v21507_v59 }
 0xc1e   :  { %v21860_v52 = vpop.eup %15948  ;;  %15968 = vpow2.f32 %v12192_v43  ;;  %v10832_v43 = vadd.f32 1.0, %v21515_v44 }
 0xc1f   :  { %v21863_v4 = vpop.eup %15950  ;;  %15970 = vpow2.f32 %v12193_v10  ;;  %v10833_v10 = vadd.f32 1.0, %v21523_v50  ;;  %v10837_v50 = vadd.f32 1.0, %v21555_v3  ;;  %v10841_v3 = vadd.f32 1.0, %v21587_v62 }
 0xc20   :  { %v21866_v57 = vpop.eup %15952  ;;  %15972 = vpow2.f32 %v12194_v24  ;;  %v10834_v24 = vadd.f32 1.0, %v21531_v55  ;;  %v10838_v55 = vadd.f32 1.0, %v21563_v46  ;;  %v10842_v46 = vadd.f32 1.0, %v21595_v16 }
 0xc21   :  { %v21869_v23 = vpop.eup %15954  ;;  %15974 = vpow2.f32 %v12195_v26  ;;  %v10835_v26 = vadd.f32 1.0, %v21539_v13  ;;  %v10839_v13 = vadd.f32 1.0, %v21571_v25  ;;  %v12197_v25 = vld [vmem:[%s22404_s0 + $0x19] sm:$0xff] }
 0xc22   :  { %v21872_v29 = vpop.eup %15956  ;;  %15976 = vpow2.f32 %v12196_v28  ;;  %v10836_v28 = vadd.f32 1.0, %v21547_v51  ;;  %v10840_v51 = vadd.f32 1.0, %v21579_v7 }
 0xc23   :  { %v21875_v5 = vpop.eup %15958  ;;  %15978 = vrcp.f32 %v10829_v30 }
 0xc24   :  { %v21878_v19 = vpop.eup %15960  ;;  %15980 = vrcp.f32 %v10830_v48 }
 0xc25   :  { %v21881_v35 = vpop.eup %15962  ;;  %15982 = vrcp.f32 %v10831_v22 }
 0xc26   :  { %v21884_v59 = vpop.eup %15964  ;;  %15984 = vrcp.f32 %v10832_v43 }
 0xc27   :  { %v21887_v44 = vpop.eup %15966  ;;  %15986 = vrcp.f32 %v10833_v10 }
 0xc28   :  { %v21890_v30 = vpop.eup %15968  ;;  %15988 = vrcp.f32 %v10834_v24 }
 0xc29   :  { %v21893_v48 = vpop.eup %15970  ;;  %15990 = vrcp.f32 %v10835_v26  ;;  %v10844_v26 = vadd.f32 1.0, %v21611_v27  ;;  %v10846_v27 = vadd.f32 1.0, %v21627_v60 }
 0xc2a   :  { %v21896_v22 = vpop.eup %15972  ;;  %15992 = vrcp.f32 %v10836_v28  ;;  %v23151_v28 = vld [vmem:[#allocation45_spill] sm:$0xff] }
 0xc2b   :  { %23148 = vst [vmem:[#allocation43_spill] sm:$0xff] %v21896_v22  ;;  %v21899_v43 = vpop.eup %15974  ;;  %15994 = vrcp.f32 %v10837_v50  ;;  %v12198_v50 = vld [vmem:[%s22404_s0 + $0x21] sm:$0xff] }
 0xc2c   :  { %23149 = vst [vmem:[#allocation44_spill] sm:$0xff] %v21899_v43  ;;  %v21902_v10 = vpop.eup %15976  ;;  %15996 = vrcp.f32 %v10838_v55  ;;  %v10845_v55 = vadd.f32 1.0, %v21619_v9  ;;  %v10847_v9 = vadd.f32 1.0, %v21635_v15  ;;  %v10849_v15 = vadd.f32 1.0, %v21651_v56  ;;  %v12204_v56 = vld [vmem:[%s22404_s0 + $0x69] sm:$0xff] }
 0xc2d   :  { %23150 = vst [vmem:[#allocation70_spill] sm:$0xff] %v21902_v10  ;;  %v15979_v24 = vpop.eup %15978  ;;  %15998 = vrcp.f32 %v10839_v13 }
 0xc2e   :  { %v15981_v7 = vpop.eup %15980  ;;  %16000 = vrcp.f32 %v10840_v51  ;;  %v11021_v62 = vmul.f32 %v15979_v24, %v23151_v28  ;;  %v23153_v51 = vld [vmem:[#allocation47_spill] sm:$0xff] }
 0xc2f   :  { %v15983_v16 = vpop.eup %15982  ;;  %16002 = vrcp.f32 %v10841_v3  ;;  %v11022_v13 = vmul.f32 %v15981_v7, %v23152_v31  ;;  %v12200_v28 = vld [vmem:[%s22404_s0 + $0x39] sm:$0xff]  ;;  %v12201_v7 = vld [vmem:[%s22404_s0 + $0x49] sm:$0xff] }
 0xc30   :  { %v15985_v10 = vpop.eup %15984  ;;  %16004 = vrcp.f32 %v10842_v46  ;;  %v11023_v24 = vmul.f32 %v15983_v16, %v23153_v51  ;;  %v11149_v43 = vadd.f32 %v12197_v25, %v11021_v62  ;;  %v10848_v46 = vadd.f32 1.0, %v21643_v11  ;;  %v12202_v25 = vld [vmem:[%s22404_s0 + $0x51] sm:$0xff]  ;;  %v12203_v11 = vld [vmem:[%s22404_s0 + $0x61] sm:$0xff] }
 0xc31   :  { %v15987_v22 = vpop.eup %15986  ;;  %16006 = vrcp.f32 %v10843_v1  ;;  %v11024_v3 = vmul.f32 %v15985_v10, %v21405_v14  ;;  %v11150_v31 = vadd.f32 %v12198_v50, %v11022_v13  ;;  %v10852_v13 = vadd.f32 1.0, %v21675_v38  ;;  %v12207_v38 = vld [vmem:[%s22404_s0 + $0x91] sm:$0xff] }
 0xc32   :  { %v15989_v60 = vpop.eup %15988  ;;  %16008 = vrcp.f32 %v10844_v26  ;;  %v11025_v16 = vmul.f32 %v15987_v22, %v21410_v8  ;;  %v11151_v62 = vadd.f32 %v12199_v47, %v11023_v24  ;;  %11213 = vst [vmem:[%s22410_s7] sm:$0xff] %v11149_v43  ;;  %v10850_v22 = vadd.f32 1.0, %v21659_v58  ;;  %v12205_v58 = vld [vmem:[%s22404_s0 + $0x79] sm:$0xff] }
 0xc33   :  { %v15991_v14 = vpop.eup %15990  ;;  %16010 = vrcp.f32 %v10845_v55  ;;  %v11026_v1 = vmul.f32 %v15989_v60, %v21417_v12  ;;  %v11152_v8 = vadd.f32 %v12200_v28, %v11024_v3  ;;  %11214 = vst [vmem:[%s22410_s7 + $0x8] sm:$0xff] %v11150_v31  ;;  %v10851_v26 = vadd.f32 1.0, %v21667_v0  ;;  %v12206_v0 = vld [vmem:[%s22404_s0 + $0x81] sm:$0xff] }
 0xc34   :  { %v15993_v47 = vpop.eup %15992  ;;  %16012 = vrcp.f32 %v10846_v27  ;;  %v11027_v43 = vmul.f32 %v15991_v14, %v21420_v61  ;;  %v11153_v12 = vadd.f32 %v12201_v7, %v11025_v16  ;;  %11215 = vst [vmem:[%s22410_s7 + $0x10] sm:$0xff] %v11151_v62  ;;  %v23154_v27 = vld [vmem:[#allocation48_spill] sm:$0xff]  ;;  %v23156_v3 = vld [vmem:[#allocation7_spill] sm:$0xff] }
 0xc35   :  { %v15995_v10 = vpop.eup %15994  ;;  %16014 = vrcp.f32 %v10847_v9  ;;  %v11028_v50 = vmul.f32 %v15993_v47, %v21428_v54  ;;  %v11154_v61 = vadd.f32 %v12202_v25, %v11026_v1  ;;  %11216 = vst [vmem:[%s22410_s7 + $0x18] sm:$0xff] %v11152_v8  ;;  %v23155_v28 = vld [vmem:[#allocation16_spill] sm:$0xff]  ;;  %v23158_v25 = vld [vmem:[#allocation9_spill] sm:$0xff]  ;;  %v12208_v14 = vld [vmem:[%s22404_s0 + $0x99] sm:$0xff] }
 0xc36   :  { %v15997_v55 = vpop.eup %15996  ;;  %16016 = vrcp.f32 %v10848_v46  ;;  %v11029_v51 = vmul.f32 %v15995_v10, %v23154_v27  ;;  %v11155_v54 = vadd.f32 %v12203_v11, %v11027_v43  ;;  %11217 = vst [vmem:[%s22410_s7 + $0x20] sm:$0xff] %v11153_v12  ;;  %v10853_v9 = vadd.f32 1.0, %v23155_v28  ;;  %v23157_v46 = vld [vmem:[#allocation63_spill] sm:$0xff]  ;;  %v23159_v11 = vld [vmem:[#allocation28_spill] sm:$0xff]  ;;  %v23160_v47 = vld [vmem:[#allocation66_spill] sm:$0xff] }
 0xc37   :  { %v15999_v24 = vpop.eup %15998  ;;  %16018 = vrcp.f32 %v10849_v15  ;;  %v11030_v7 = vmul.f32 %v15997_v55, %v23156_v3  ;;  %v11156_v31 = vadd.f32 %v12204_v56, %v11028_v50  ;;  %11218 = vst [vmem:[%s22410_s7 + $0x28] sm:$0xff] %v11154_v61  ;;  %v10854_v16 = vadd.f32 1.0, %v23157_v46  ;;  %v23161_v10 = vld [vmem:[#allocation30_spill] sm:$0xff] }
 0xc38   :  { %v16001_v60 = vpop.eup %16000  ;;  %16020 = vrcp.f32 %v10850_v22  ;;  %v11031_v62 = vmul.f32 %v15999_v24, %v23158_v25  ;;  %v11157_v15 = vadd.f32 %v12205_v58, %v11029_v51  ;;  %11219 = vst [vmem:[%s22410_s7 + $0x30] sm:$0xff] %v11155_v54  ;;  %v10855_v8 = vadd.f32 1.0, %v23159_v11  ;;  %v12209_v22 = vld [vmem:[%s22404_s0 + $0xa9] sm:$0xff]  ;;  %v23164_v3 = vld [vmem:[#allocation34_spill] sm:$0xff]  ;;  %v23167_v11 = vld [vmem:[#allocation11_spill] sm:$0xff] }
 0xc39   :  { %v16003_v1 = vpop.eup %16002  ;;  %16022 = vrcp.f32 %v10851_v26  ;;  %v11032_v43 = vmul.f32 %v16001_v60, %v23160_v47  ;;  %v11158_v56 = vadd.f32 %v12206_v0, %v11030_v7  ;;  %11220 = vst [vmem:[%s22410_s7 + $0x38] sm:$0xff] %v11156_v31  ;;  %v10856_v50 = vadd.f32 1.0, %v23161_v10  ;;  %v23162_v58 = vld [vmem:[#allocation12_spill] sm:$0xff]  ;;  %v12210_v26 = vld [vmem:[%s22404_s0 + $0xb1] sm:$0xff]  ;;  %v23163_v0 = vld [vmem:[#allocation67_spill] sm:$0xff] }
 0xc3a   :  { %v16005_v12 = vpop.eup %16004  ;;  %16024 = vrcp.f32 %v10852_v13  ;;  %v11033_v61 = vmul.f32 %v16003_v1, %v23162_v58  ;;  %v11159_v55 = vadd.f32 %v12207_v38, %v11031_v62  ;;  %11221 = vst [vmem:[%s22410_s7 + $0x40] sm:$0xff] %v11157_v15  ;;  %v10857_v51 = vadd.f32 1.0, %v21715_v41  ;;  %v12211_v13 = vld [vmem:[%s22404_s0 + $0xc1] sm:$0xff]  ;;  %v23165_v38 = vld [vmem:[#allocation14_spill] sm:$0xff]  ;;  %v12212_v41 = vld [vmem:[%s22404_s0 + $0xc9] sm:$0xff] }
 0xc3b   :  { %v16007_v27 = vpop.eup %16006  ;;  %16026 = vrcp.f32 %v10853_v9  ;;  %v11034_v54 = vmul.f32 %v16005_v12, %v23163_v0  ;;  %v11160_v24 = vadd.f32 %v12208_v14, %v11032_v43  ;;  %11222 = vst [vmem:[%s22410_s7 + $0x48] sm:$0xff] %v11158_v56  ;;  %v10858_v7 = vadd.f32 1.0, %v23164_v3  ;;  %v23166_v25 = vld [vmem:[#allocation68_spill] sm:$0xff]  ;;  %v23168_v56 = vld [vmem:[#allocation69_spill] sm:$0xff] }
 0xc3c   :  { %v16009_v28 = vpop.eup %16008  ;;  %16028 = vrcp.f32 %v10854_v16  ;;  %v11035_v31 = vmul.f32 %v16007_v27, %v23165_v38  ;;  %v11161_v9 = vadd.f32 %v12209_v22, %v11033_v61  ;;  %11223 = vst [vmem:[%s22410_s7 + $0x50] sm:$0xff] %v11159_v55  ;;  %v10859_v46 = vadd.f32 1.0, %v21731_v49  ;;  %v12213_v16 = vld [vmem:[%s22404_s0 + $0xd9] sm:$0xff]  ;;  %v12214_v49 = vld [vmem:[%s22404_s0 + $0xe1] sm:$0xff]  ;;  %v23170_v0 = vld [vmem:[#allocation17_spill] sm:$0xff] }
 0xc3d   :  { %v16011_v60 = vpop.eup %16010  ;;  %16030 = vrcp.f32 %v10855_v8  ;;  %v11036_v62 = vmul.f32 %v16009_v28, %v23166_v25  ;;  %v11162_v14 = vadd.f32 %v12210_v26, %v11034_v54  ;;  %11224 = vst [vmem:[%s22410_s7 + $0x58] sm:$0xff] %v11160_v24  ;;  %v10860_v1 = vadd.f32 1.0, %v21739_v53  ;;  %v12215_v53 = vld [vmem:[%s22404_s0 + $0xf1] sm:$0xff]  ;;  %v23169_v61 = vld [vmem:[#allocation15_spill] sm:$0xff] }
 0xc3e   :  { %v16013_v15 = vpop.eup %16012  ;;  %16032 = vrcp.f32 %v10856_v50  ;;  %v11037_v47 = vmul.f32 %v16011_v60, %v23167_v11  ;;  %v11163_v8 = vadd.f32 %v12211_v13, %v11035_v31  ;;  %11225 = vst [vmem:[%s22410_s7 + $0x60] sm:$0xff] %v11161_v9  ;;  %v10861_v22 = vadd.f32 1.0, %v21747_v34  ;;  %v12216_v34 = vld [vmem:[%s22404_s0 + $0xf9] sm:$0xff]  ;;  %v23171_v3 = vld [vmem:[#allocation49_spill] sm:$0xff] }
 0xc3f   :  { %v16015_v43 = vpop.eup %16014  ;;  %16034 = vrcp.f32 %v10857_v51  ;;  %v11038_v12 = vmul.f32 %v16013_v15, %v23168_v56  ;;  %v11164_v10 = vadd.f32 %v12212_v41, %v11036_v62  ;;  %11226 = vst [vmem:[%s22410_s7 + $0x68] sm:$0xff] %v11162_v14  ;;  %v10862_v58 = vadd.f32 1.0, %v21755_v39  ;;  %v12217_v39 = vld [vmem:[%s22404_s0 + $0x109] sm:$0xff]  ;;  %v23172_v9 = vld [vmem:[#allocation50_spill] sm:$0xff]  ;;  %v23175_v56 = vld [vmem:[#allocation51_spill] sm:$0xff] }
 0xc40   :  { %v16017_v50 = vpop.eup %16016  ;;  %16036 = vrcp.f32 %v10858_v7  ;;  %v11039_v26 = vmul.f32 %v16015_v43, %v23169_v61  ;;  %v11165_v55 = vadd.f32 %v12213_v16, %v11037_v47  ;;  %11227 = vst [vmem:[%s22410_s7 + $0x70] sm:$0xff] %v11163_v8  ;;  %v10863_v51 = vadd.f32 1.0, %v21763_v42  ;;  %v12218_v42 = vld [vmem:[%s22404_s0 + $0x111] sm:$0xff]  ;;  %v23173_v16 = vld [vmem:[#allocation20_spill] sm:$0xff] }
 0xc41   :  { %v16019_v27 = vpop.eup %16018  ;;  %16038 = vrcp.f32 %v10859_v46  ;;  %v11040_v54 = vmul.f32 %v16017_v50, %v23170_v0  ;;  %v11166_v13 = vadd.f32 %v12214_v49, %v11038_v12  ;;  %11228 = vst [vmem:[%s22410_s7 + $0x78] sm:$0xff] %v11164_v10  ;;  %v10864_v28 = vadd.f32 1.0, %v21771_v40  ;;  %v12219_v40 = vld [vmem:[%s22404_s0 + $0x121] sm:$0xff]  ;;  %v23174_v47 = vld [vmem:[#allocation22_spill] sm:$0xff] }
 0xc42   :  { %v16021_v24 = vpop.eup %16020  ;;  %16040 = vrcp.f32 %v10860_v1  ;;  %v11041_v7 = vmul.f32 %v16019_v27, %v23171_v3  ;;  %v11167_v38 = vadd.f32 %v12215_v53, %v11039_v26  ;;  %11229 = vst [vmem:[%s22410_s7 + $0x80] sm:$0xff] %v11165_v55  ;;  %v10865_v41 = vadd.f32 1.0, %v21779_v36  ;;  %v12220_v36 = vld [vmem:[%s22404_s0 + $0x129] sm:$0xff] }
 0xc43   :  { %v16023_v31 = vpop.eup %16022  ;;  %16042 = vrcp.f32 %v10861_v22  ;;  %v11042_v60 = vmul.f32 %v16021_v24, %v23172_v9  ;;  %v11168_v46 = vadd.f32 %v12216_v34, %v11040_v54  ;;  %11230 = vst [vmem:[%s22410_s7 + $0x88] sm:$0xff] %v11166_v13  ;;  %v10866_v62 = vadd.f32 1.0, %v21787_v20  ;;  %v12221_v20 = vld [vmem:[%s22404_s0 + $0x139] sm:$0xff]  ;;  %v23176_v50 = vld [vmem:[#allocation36_spill] sm:$0xff] }
 0xc44   :  { %v16025_v25 = vpop.eup %16024  ;;  %16044 = vrcp.f32 %v10862_v58  ;;  %v11043_v14 = vmul.f32 %v16023_v31, %v23173_v16  ;;  %v11169_v15 = vadd.f32 %v12217_v39, %v11041_v7  ;;  %11231 = vst [vmem:[%s22410_s7 + $0x90] sm:$0xff] %v11167_v38  ;;  %v10867_v11 = vadd.f32 1.0, %v21795_v37  ;;  %v12222_v37 = vld [vmem:[%s22404_s0 + $0x141] sm:$0xff]  ;;  %v12224_v54 = vld [vmem:[%s22404_s0 + $0x159] sm:$0xff] }
 0xc45   :  { %v16027_v1 = vpop.eup %16026  ;;  %16046 = vrcp.f32 %v10863_v51  ;;  %v11044_v49 = vmul.f32 %v16025_v25, %v23174_v47  ;;  %v11170_v8 = vadd.f32 %v12218_v42, %v11042_v60  ;;  %11232 = vst [vmem:[%s22410_s7 + $0x98] sm:$0xff] %v11168_v46  ;;  %v10868_v22 = vadd.f32 1.0, %v21803_v17  ;;  %v23177_v61 = vld [vmem:[#allocation52_spill] sm:$0xff]  ;;  %v12223_v17 = vld [vmem:[%s22404_s0 + $0x151] sm:$0xff]  ;;  %v23180_v31 = vld [vmem:[#allocation55_spill] sm:$0xff] }
 0xc46   :  { %v16029_v43 = vpop.eup %16028  ;;  %16048 = vrcp.f32 %v10864_v28  ;;  %v11045_v12 = vmul.f32 %v16027_v1, %v23175_v56  ;;  %v11171_v53 = vadd.f32 %v12219_v40, %v11043_v14  ;;  %11233 = vst [vmem:[%s22410_s7 + $0xa0] sm:$0xff] %v11169_v15  ;;  %v10869_v58 = vadd.f32 1.0, %v23176_v50  ;;  %v23178_v51 = vld [vmem:[#allocation53_spill] sm:$0xff]  ;;  %v23179_v28 = vld [vmem:[#allocation54_spill] sm:$0xff]  ;;  %v23181_v46 = vld [vmem:[#allocation56_spill] sm:$0xff] }
 0xc47   :  { %v16031_v10 = vpop.eup %16030  ;;  %16050 = vrcp.f32 %v10865_v41  ;;  %v11046_v26 = vmul.f32 %v16029_v43, %v23177_v61  ;;  %v11172_v34 = vadd.f32 %v12220_v36, %v11044_v49  ;;  %11234 = vst [vmem:[%s22410_s7 + $0xa8] sm:$0xff] %v11170_v8  ;;  %v10870_v27 = vadd.f32 1.0, %v21819_v21  ;;  %v12225_v21 = vld [vmem:[%s22404_s0 + $0x169] sm:$0xff]  ;;  %v23183_v49 = vld [vmem:[#allocation58_spill] sm:$0xff]  ;;  %v23184_v56 = vld [vmem:[#allocation59_spill] sm:$0xff] }
 0xc48   :  { %v16033_v55 = vpop.eup %16032  ;;  %16052 = vrcp.f32 %v10866_v62  ;;  %v11047_v0 = vmul.f32 %v16031_v10, %v23178_v51  ;;  %v11173_v39 = vadd.f32 %v12221_v20, %v11045_v12  ;;  %11235 = vst [vmem:[%s22410_s7 + $0xb0] sm:$0xff] %v11171_v53  ;;  %v10871_v24 = vadd.f32 1.0, %v21827_v45  ;;  %v12226_v45 = vld [vmem:[%s22404_s0 + $0x171] sm:$0xff]  ;;  %v23185_v50 = vld [vmem:[#allocation60_spill] sm:$0xff] }
 0xc49   :  { %v16035_v13 = vpop.eup %16034  ;;  %16054 = vrcp.f32 %v10867_v11  ;;  %v11048_v3 = vmul.f32 %v16033_v55, %v23179_v28  ;;  %v11174_v7 = vadd.f32 %v12222_v37, %v11046_v26  ;;  %11236 = vst [vmem:[%s22410_s7 + $0xb8] sm:$0xff] %v11172_v34  ;;  %v10872_v38 = vadd.f32 1.0, %v21833_v2  ;;  %v12227_v2 = vld [vmem:[%s22404_s0 + $0x181] sm:$0xff]  ;;  %v23182_v36 = vld [vmem:[#allocation57_spill] sm:$0xff] }
 0xc4a   :  { %v16037_v42 = vpop.eup %16036  ;;  %16056 = vrcp.f32 %v10868_v22  ;;  %v11049_v41 = vmul.f32 %v16035_v13, %v23180_v31  ;;  %v11175_v9 = vadd.f32 %v12223_v17, %v11047_v0  ;;  %11237 = vst [vmem:[%s22410_s7 + $0xc0] sm:$0xff] %v11173_v39  ;;  %v10873_v40 = vadd.f32 1.0, %v21839_v33  ;;  %v12228_v33 = vld [vmem:[%s22404_s0 + $0x189] sm:$0xff] }
 0xc4b   :  { %v16039_v60 = vpop.eup %16038  ;;  %16058 = vrcp.f32 %v10869_v58  ;;  %v11050_v25 = vmul.f32 %v16037_v42, %v23181_v46  ;;  %v11176_v62 = vadd.f32 %v12224_v54, %v11048_v3  ;;  %11238 = vst [vmem:[%s22410_s7 + $0xc8] sm:$0xff] %v11174_v7  ;;  %v10874_v14 = vadd.f32 1.0, %v21845_v6  ;;  %v12229_v6 = vld [vmem:[%s22404_s0 + $0x1c9] sm:$0xff]  ;;  %v23187_v54 = vld [vmem:[#allocation19_spill] sm:$0xff] }
 0xc4c   :  { %v16041_v16 = vpop.eup %16040  ;;  %16060 = vrcp.f32 %v10870_v27  ;;  %v11051_v15 = vmul.f32 %v16039_v60, %v23182_v36  ;;  %v11177_v1 = vadd.f32 %v12225_v21, %v11049_v41  ;;  %11239 = vst [vmem:[%s22410_s7 + $0xd0] sm:$0xff] %v11175_v9  ;;  %v10875_v47 = vadd.f32 1.0, %v21851_v63  ;;  %v12230_v63 = vld [vmem:[%s22404_s0 + $0x1d1] sm:$0xff]  ;;  %v23188_v3 = vld [vmem:[#allocation3_spill] sm:$0xff] }
 0xc4d   :  { %v16043_v11 = vpop.eup %16042  ;;  %16062 = vrcp.f32 %v10871_v24  ;;  %v11052_v20 = vmul.f32 %v16041_v16, %v23183_v49  ;;  %v11178_v8 = vadd.f32 %v12226_v45, %v11050_v25  ;;  %11240 = vst [vmem:[%s22410_s7 + $0xd8] sm:$0xff] %v11176_v62  ;;  %v10876_v22 = vadd.f32 1.0, %v21854_v32  ;;  %v12231_v32 = vld [vmem:[%s22404_s0 + $0x1e1] sm:$0xff]  ;;  %v23186_v34 = vld [vmem:[#allocation61_spill] sm:$0xff]  ;;  %v23191_v16 = vld [vmem:[#allocation62_spill] sm:$0xff] }
 0xc4e   :  { %v16045_v43 = vpop.eup %16044  ;;  %16064 = vrcp.f32 %v10872_v38  ;;  %v11053_v12 = vmul.f32 %v16043_v11, %v23184_v56  ;;  %v11179_v37 = vadd.f32 %v12227_v2, %v11051_v15  ;;  %11241 = vst [vmem:[%s22410_s7 + $0xe0] sm:$0xff] %v11177_v1  ;;  %v10877_v10 = vadd.f32 1.0, %v21857_v18  ;;  %v12232_v18 = vld [vmem:[%s22404_s0 + $0x1e9] sm:$0xff] }
 0xc4f   :  { %v16047_v53 = vpop.eup %16046  ;;  %16066 = vrcp.f32 %v10873_v40  ;;  %v11054_v58 = vmul.f32 %v16045_v43, %v23185_v50  ;;  %v11180_v61 = vadd.f32 %v12228_v33, %v11052_v20  ;;  %11242 = vst [vmem:[%s22410_s7 + $0xe8] sm:$0xff] %v11178_v8  ;;  %v10878_v17 = vadd.f32 1.0, %v21860_v52  ;;  %v12233_v52 = vld [vmem:[%s22404_s0 + $0x1f9] sm:$0xff]  ;;  %v23189_v31 = vld [vmem:[#allocation5_spill] sm:$0xff]  ;;  %v23190_v40 = vld [vmem:[#allocation8_spill] sm:$0xff] }
 0xc50   :  { %v16049_v26 = vpop.eup %16048  ;;  %16068 = vrcp.f32 %v10874_v14  ;;  %v11055_v55 = vmul.f32 %v16047_v53, %v23186_v34  ;;  %v11181_v27 = vadd.f32 %v12229_v6, %v11053_v12  ;;  %11243 = vst [vmem:[%s22410_s7 + $0xf0] sm:$0xff] %v11179_v37  ;;  %v10879_v0 = vadd.f32 1.0, %v21863_v4  ;;  %v12234_v4 = vld [vmem:[%s22404_s0 + $0x201] sm:$0xff]  ;;  %v23192_v1 = vld [vmem:[#allocation13_spill] sm:$0xff]  ;;  %v23194_v12 = vld [vmem:[#allocation18_spill] sm:$0xff] }
 0xc51   :  { %v16051_v51 = vpop.eup %16050  ;;  %16070 = vrcp.f32 %v10875_v47  ;;  %v11056_v39 = vmul.f32 %v16049_v26, %v23187_v54  ;;  %v11182_v13 = vadd.f32 %v12230_v63, %v11054_v58  ;;  %11244 = vst [vmem:[%s22410_s7 + $0xf8] sm:$0xff] %v11180_v61  ;;  %v10880_v28 = vadd.f32 1.0, %v21866_v57  ;;  %v12235_v57 = vld [vmem:[%s22404_s0 + $0x211] sm:$0xff]  ;;  %v23195_v50 = vld [vmem:[#allocation64_spill] sm:$0xff] }
 0xc52   :  { %v16053_v24 = vpop.eup %16052  ;;  %16072 = vrcp.f32 %v10876_v22  ;;  %v11057_v21 = vmul.f32 %v16051_v51, %v23188_v3  ;;  %v11183_v7 = vadd.f32 %v12231_v32, %v11055_v55  ;;  %11245 = vst [vmem:[%s22410_s7 + $0x100] sm:$0xff] %v11181_v27  ;;  %v10881_v38 = vadd.f32 1.0, %v21869_v23  ;;  %v12236_v23 = vld [vmem:[%s22404_s0 + $0x219] sm:$0xff]  ;;  %v23193_v6 = vld [vmem:[#allocation21_spill] sm:$0xff] }
 0xc53   :  { %v16055_v42 = vpop.eup %16054  ;;  %16074 = vrcp.f32 %v10877_v10  ;;  %v11058_v41 = vmul.f32 %v16053_v24, %v23189_v31  ;;  %v11184_v45 = vadd.f32 %v12232_v18, %v11056_v39  ;;  %11246 = vst [vmem:[%s22410_s7 + $0x108] sm:$0xff] %v11182_v13  ;;  %v10882_v60 = vadd.f32 1.0, %v21872_v29  ;;  %v12237_v29 = vld [vmem:[%s22404_s0 + $0x229] sm:$0xff] }
 0xc54   :  { %v16057_v9 = vpop.eup %16056  ;;  %16076 = vrcp.f32 %v10878_v17  ;;  %v11059_v46 = vmul.f32 %v16055_v42, %v23190_v40  ;;  %v11185_v25 = vadd.f32 %v12233_v52, %v11057_v21  ;;  %11247 = vst [vmem:[%s22410_s7 + $0x110] sm:$0xff] %v11183_v7  ;;  %v10883_v62 = vadd.f32 1.0, %v21875_v5  ;;  %v12238_v5 = vld [vmem:[%s22404_s0 + $0x231] sm:$0xff]  ;;  %v23196_v17 = vld [vmem:[#allocation32_spill] sm:$0xff]  ;;  %v23198_v52 = vld [vmem:[#allocation43_spill] sm:$0xff] }
 0xc55   :  { %v16059_v2 = vpop.eup %16058  ;;  %16078 = vrcp.f32 %v10879_v0  ;;  %v11060_v14 = vmul.f32 %v16057_v9, %v23191_v16  ;;  %v11186_v36 = vadd.f32 %v12234_v4, %v11058_v41  ;;  %11248 = vst [vmem:[%s22410_s7 + $0x118] sm:$0xff] %v11184_v45  ;;  %v10884_v33 = vadd.f32 1.0, %v21878_v19  ;;  %v12239_v19 = vld [vmem:[%s22404_s0 + $0x241] sm:$0xff]  ;;  %v23197_v51 = vld [vmem:[#allocation65_spill] sm:$0xff]  ;;  %v23202_v45 = vld [vmem:[#allocation70_spill] sm:$0xff] }
 0xc56   :  { %v16061_v15 = vpop.eup %16060  ;;  %16080 = vrcp.f32 %v10880_v28  ;;  %v11061_v11 = vmul.f32 %v16059_v2, %v23192_v1  ;;  %v11187_v47 = vadd.f32 %v12235_v57, %v11059_v46  ;;  %11249 = vst [vmem:[%s22410_s7 + $0x120] sm:$0xff] %v11185_v25  ;;  %v10885_v20 = vadd.f32 1.0, %v21881_v35  ;;  %v12240_v35 = vld [vmem:[%s22404_s0 + $0x249] sm:$0xff]  ;;  %v23201_v42 = vld [vmem:[#allocation23_spill] sm:$0xff]  ;;  %v12246_v46 = vld [vmem:[%s22404_s0 + $0x291] sm:$0xff] }
 0xc57   :  { %v16063_v49 = vpop.eup %16062  ;;  %16082 = vrcp.f32 %v10881_v38  ;;  %v11062_v8 = vmul.f32 %v16061_v15, %v23193_v6  ;;  %v11188_v43 = vadd.f32 %v12236_v23, %v11060_v14  ;;  %11250 = vst [vmem:[%s22410_s7 + $0x128] sm:$0xff] %v11186_v36  ;;  %v10886_v56 = vadd.f32 1.0, %v21884_v59  ;;  %v12241_v59 = vld [vmem:[%s22404_s0 + $0x259] sm:$0xff]  ;;  %v23199_v24 = vld [vmem:[#allocation33_spill] sm:$0xff]  ;;  %v23200_v4 = vld [vmem:[#allocation44_spill] sm:$0xff] }
 0xc58   :  { %v16065_v22 = vpop.eup %16064  ;;  %16084 = vrcp.f32 %v10882_v60  ;;  %v11063_v63 = vmul.f32 %v16063_v49, %v23194_v12  ;;  %v11189_v37 = vadd.f32 %v12237_v29, %v11061_v11  ;;  %11251 = vst [vmem:[%s22410_s7 + $0x130] sm:$0xff] %v11187_v47  ;;  %v10887_v10 = vadd.f32 1.0, %v21887_v44  ;;  %v12242_v44 = vld [vmem:[%s22404_s0 + $0x261] sm:$0xff]  ;;  %v12245_v31 = vld [vmem:[%s22404_s0 + $0x289] sm:$0xff]  ;;  %v23203_v60 = vld [vmem:[#allocation10_spill] sm:$0xff] }
 0xc59   :  { %v16067_v53 = vpop.eup %16066  ;;  %16086 = vrcp.f32 %v10883_v62  ;;  %v11064_v58 = vmul.f32 %v16065_v22, %v23195_v50  ;;  %v11190_v32 = vadd.f32 %v12238_v5, %v11062_v8  ;;  %11252 = vst [vmem:[%s22410_s7 + $0x138] sm:$0xff] %v11188_v43  ;;  %v10888_v26 = vadd.f32 1.0, %v21890_v30  ;;  %v12243_v30 = vld [vmem:[%s22404_s0 + $0x271] sm:$0xff]  ;;  %v23204_v2 = vld [vmem:[#allocation4_spill] sm:$0xff]  ;;  %v12249_v49 = vld [vmem:[%s22404_s0 + $0x2b9] sm:$0xff] }
 0xc5a   :  { %v16069_v61 = vpop.eup %16068  ;;  %16088 = vrcp.f32 %v10884_v33  ;;  %v11065_v34 = vmul.f32 %v16067_v53, %v23196_v17  ;;  %v11191_v55 = vadd.f32 %v12239_v19, %v11063_v63  ;;  %11253 = vst [vmem:[%s22410_s7 + $0x140] sm:$0xff] %v11189_v37  ;;  %v10889_v27 = vadd.f32 1.0, %v21893_v48  ;;  %v12244_v48 = vld [vmem:[%s22404_s0 + $0x279] sm:$0xff]  ;;  %v12247_v16 = vld [vmem:[%s22404_s0 + $0x2a1] sm:$0xff]  ;;  %v23205_v36 = vld [vmem:[#allocation25_spill] sm:$0xff] }
 0xc5b   :  { %v16071_v18 = vpop.eup %16070  ;;  %16090 = vrcp.f32 %v10885_v20  ;;  %v11066_v0 = vmul.f32 %v16069_v61, %v23197_v51  ;;  %v11192_v54 = vadd.f32 %v12240_v35, %v11064_v58  ;;  %11254 = vst [vmem:[%s22410_s7 + $0x148] sm:$0xff] %v11190_v32  ;;  %v10890_v13 = vadd.f32 1.0, %v23198_v52  ;;  %v12248_v33 = vld [vmem:[%s22404_s0 + $0x2a9] sm:$0xff]  ;;  %v23206_v5 = vld [vmem:[#allocation6_spill] sm:$0xff]  ;;  %v12250_v43 = vld [vmem:[%s22404_s0 + $0x2c1] sm:$0xff] }
 0xc5c   :  { %v16073_v39 = vpop.eup %16072  ;;  %16092 = vrcp.f32 %v10886_v56  ;;  %v11067_v28 = vmul.f32 %v16071_v18, %v23199_v24  ;;  %v11193_v3 = vadd.f32 %v12241_v59, %v11065_v34  ;;  %11255 = vst [vmem:[%s22410_s7 + $0x150] sm:$0xff] %v11191_v55  ;;  %v10891_v7 = vadd.f32 1.0, %v23200_v4  ;;  %v23207_v8 = vld [vmem:[#allocation24_spill] sm:$0xff]  ;;  %v23208_v12 = vld [vmem:[#allocation27_spill] sm:$0xff]  ;;  %v12251_v35 = vld [vmem:[%s22404_s0 + $0x2d1] sm:$0xff] }
 0xc5d   :  { %v16075_v21 = vpop.eup %16074  ;;  %16094 = vrcp.f32 %v10887_v10  ;;  %v11068_v38 = vmul.f32 %v16073_v39, %v23201_v42  ;;  %v11194_v41 = vadd.f32 %v12242_v44, %v11066_v0  ;;  %11256 = vst [vmem:[%s22410_s7 + $0x158] sm:$0xff] %v11192_v54  ;;  %v10892_v9 = vadd.f32 1.0, %v23202_v45  ;;  %v23209_v10 = vld [vmem:[#allocation29_spill] sm:$0xff]  ;;  %v12252_v58 = vld [vmem:[%s22404_s0 + $0x2d9] sm:$0xff]  ;;  %v12255_v39 = vld [vmem:[%s22404_s0 + $0x301] sm:$0xff] }
 0xc5e   :  { %v16077_v57 = vpop.eup %16076  ;;  %16096 = vrcp.f32 %v10888_v26  ;;  %v11069_v40 = vmul.f32 %v16075_v21, %v23203_v60  ;;  %v11195_v23 = vadd.f32 %v12243_v30, %v11067_v28  ;;  %11257 = vst [vmem:[%s22410_s7 + $0x160] sm:$0xff] %v11193_v3  ;;  %v23210_v61 = vld [vmem:[#allocation26_spill] sm:$0xff]  ;;  %v12253_v17 = vld [vmem:[%s22404_s0 + $0x2e9] sm:$0xff]  ;;  %v23211_v55 = vld [vmem:[#allocation31_spill] sm:$0xff] }
 0xc5f   :  { %v16079_v25 = vpop.eup %16078  ;;  %16098 = vrcp.f32 %v10889_v27  ;;  %v11070_v62 = vmul.f32 %v16077_v57, %v23204_v2  ;;  %v11196_v14 = vadd.f32 %v12244_v48, %v11068_v38  ;;  %11258 = vst [vmem:[%s22410_s7 + $0x168] sm:$0xff] %v11194_v41  ;;  %v12254_v27 = vld [vmem:[%s22404_s0 + $0x2f1] sm:$0xff]  ;;  %v23212_v30 = vld [vmem:[#allocation35_spill] sm:$0xff]  ;;  %v12256_v48 = vld [vmem:[%s22404_s0 + $0x309] sm:$0xff] }
 0xc60   :  { %v16081_v29 = vpop.eup %16080  ;;  %16100 = vrcp.f32 %v10890_v13  ;;  %v11071_v15 = vmul.f32 %v16079_v25, %v23205_v36  ;;  %v11197_v1 = vadd.f32 %v12245_v31, %v11069_v40  ;;  %11259 = vst [vmem:[%s22410_s7 + $0x170] sm:$0xff] %v11195_v23  ;;  %v23213_v24 = vld [vmem:[#allocation37_spill] sm:$0xff]  ;;  %v23214_v4 = vld [vmem:[#allocation38_spill] sm:$0xff]  ;;  %v23215_v41 = vld [vmem:[#allocation39_spill] sm:$0xff] }
 0xc61   :  { %v16083_v11 = vpop.eup %16082  ;;  %16102 = vrcp.f32 %v10891_v7  ;;  %v11072_v47 = vmul.f32 %v16081_v29, %v23206_v5  ;;  %v11198_v20 = vadd.f32 %v12246_v46, %v11070_v62  ;;  %11260 = vst [vmem:[%s22410_s7 + $0x178] sm:$0xff] %v11196_v14  ;;  %v12257_v42 = vld [vmem:[%s22404_s0 + $0x319] sm:$0xff]  ;;  %v12258_v45 = vld [vmem:[%s22404_s0 + $0x321] sm:$0xff]  ;;  %v12259_v23 = vld [vmem:[%s22404_s0 + $0x331] sm:$0xff] }
 0xc62   :  { %v16085_v6 = vpop.eup %16084  ;;  %16104 = vrcp.f32 %v10892_v9  ;;  %v11073_v19 = vmul.f32 %v16083_v11, %v23207_v8  ;;  %v11199_v22 = vadd.f32 %v12247_v16, %v11071_v15  ;;  %11261 = vst [vmem:[%s22410_s7 + $0x180] sm:$0xff] %v11197_v1  ;;  %v23216_v40 = vld [vmem:[#allocation40_spill] sm:$0xff]  ;;  %v23217_v62 = vld [vmem:[#allocation41_spill] sm:$0xff]  ;;  %v12260_v14 = vld [vmem:[%s22404_s0 + $0x339] sm:$0xff] }
 0xc63   :  { %v16087_v56 = vpop.eup %16086  ;;  %v11074_v63 = vmul.f32 %v16085_v6, %v23208_v12  ;;  %v11200_v37 = vadd.f32 %v12248_v33, %v11072_v47  ;;  %11262 = vst [vmem:[%s22410_s7 + $0x188] sm:$0xff] %v11198_v20  ;;  %v23218_v36 = vld [vmem:[#allocation42_spill] sm:$0xff] }
 0xc64   :  { %v16089_v53 = vpop.eup %16088  ;;  %v11075_v50 = vmul.f32 %v16087_v56, %v23209_v10  ;;  %v11201_v59 = vadd.f32 %v12249_v49, %v11073_v19  ;;  %11263 = vst [vmem:[%s22410_s7 + $0x190] sm:$0xff] %v11199_v22 }
 0xc65   :  { %v16091_v32 = vpop.eup %16090  ;;  %v11076_v26 = vmul.f32 %v16089_v53, %v23210_v61  ;;  %v11202_v34 = vadd.f32 %v12250_v43, %v11074_v63  ;;  %11264 = vst [vmem:[%s22410_s7 + $0x198] sm:$0xff] %v11200_v37 }
 0xc66   :  { %v16093_v44 = vpop.eup %16092  ;;  %v11077_v18 = vmul.f32 %v16091_v32, %v23211_v55  ;;  %v11203_v51 = vadd.f32 %v12251_v35, %v11075_v50  ;;  %11265 = vst [vmem:[%s22410_s7 + $0x1a0] sm:$0xff] %v11201_v59 }
 0xc67   :  { %v16095_v0 = vpop.eup %16094  ;;  %v11078_v54 = vmul.f32 %v16093_v44, %v23212_v30  ;;  %v11204_v52 = vadd.f32 %v12252_v58, %v11076_v26  ;;  %11266 = vst [vmem:[%s22410_s7 + $0x1a8] sm:$0xff] %v11202_v34 }
 0xc68   :  { %v16097_v13 = vpop.eup %16096  ;;  %v11079_v28 = vmul.f32 %v16095_v0, %v23213_v24  ;;  %v11205_v3 = vadd.f32 %v12253_v17, %v11077_v18  ;;  %11267 = vst [vmem:[%s22410_s7 + $0x1b0] sm:$0xff] %v11203_v51 }
 0xc69   :  { %v16099_v21 = vpop.eup %16098  ;;  %v11080_v7 = vmul.f32 %v16097_v13, %v23214_v4  ;;  %v11206_v38 = vadd.f32 %v12254_v27, %v11078_v54  ;;  %11268 = vst [vmem:[%s22410_s7 + $0x1b8] sm:$0xff] %v11204_v52 }
 0xc6a   :  { %v16101_v31 = vpop.eup %16100  ;;  %v11081_v57 = vmul.f32 %v16099_v21, %v23215_v41  ;;  %v11207_v9 = vadd.f32 %v12255_v39, %v11079_v28  ;;  %11269 = vst [vmem:[%s22410_s7 + $0x1c0] sm:$0xff] %v11205_v3 }
 0xc6b   :  { %v16103_v60 = vpop.eup %16102  ;;  %v11082_v46 = vmul.f32 %v16101_v31, %v23216_v40  ;;  %v11208_v25 = vadd.f32 %v12256_v48, %v11080_v7  ;;  %11270 = vst [vmem:[%s22410_s7 + $0x1c8] sm:$0xff] %v11206_v38 }
 0xc6c   :  { %v16105_v2 = vpop.eup %16104  ;;  %v11083_v16 = vmul.f32 %v16103_v60, %v23217_v62  ;;  %v11209_v29 = vadd.f32 %v12257_v42, %v11081_v57  ;;  %11271 = vst [vmem:[%s22410_s7 + $0x1d0] sm:$0xff] %v11207_v9 }
 0xc6d   :  { %v11084_v15 = vmul.f32 %v16105_v2, %v23218_v36  ;;  %v11210_v33 = vadd.f32 %v12258_v45, %v11082_v46  ;;  %11272 = vst [vmem:[%s22410_s7 + $0x1d8] sm:$0xff] %v11208_v25 }
 0xc6e   :  { %v11211_v1 = vadd.f32 %v12259_v23, %v11083_v16  ;;  %11273 = vst [vmem:[%s22410_s7 + $0x1e0] sm:$0xff] %v11209_v29 }
 0xc6f   :  { %v11212_v11 = vadd.f32 %v12260_v14, %v11084_v15  ;;  %11274 = vst [vmem:[%s22410_s7 + $0x1e8] sm:$0xff] %v11210_v33 }
 0xc70   :  { %11275 = vst [vmem:[%s22410_s7 + $0x1f0] sm:$0xff] %v11211_v1 }
 0xc71   :  { %11276 = vst [vmem:[%s22410_s7 + $0x1f8] sm:$0xff] %v11212_v11 }

</bundles_post_ra>
